<compile_context>
chip_gen: v5e
topology: v5e:2x2
jax: 0.10.0
libtpu: 0.0.40
codegen_flags: <defaults>
</compile_context>

<pallas_src>
import jax
import jax.numpy as jnp
from jax.experimental import pallas as pl
from jax.experimental.pallas import tpu as pltpu

EPS = 1e-5                    # F.instance_norm default
MXU_DTYPE = jnp.bfloat16      # bf16 MXU operands, f32 accumulation
LANE = 128


def _round_up(x, m):
    return (x + m - 1) // m * m


def _round2(x):
    return x + (x % 2)         # even channel counts keep bf16 sublane packing clean


def plane_geometry(H, W):
    Wp = W + 2                           # padded row width
    Lc = (H + 2) * Wp                    # padded-image length
    L = _round_up(Lc, LANE)              # lane-dense stored row length
    c = Wp + 1                           # centre-tap offset of a 3x3 conv
    P = _round_up(c, LANE)               # aligned left margin of the staging buffer
    A = L + 2 * P                        # staging buffer width
    return Wp, Lc, L, c, P, A


# ------------------------- host-side plane helpers --------------------------


def to_plane(x):
    # (B, C, H, W) -> (B, C, L) with a zero ring and zero tail padding.
    B, C, H, W = x.shape
    _, Lc, L, _, _, _ = plane_geometry(H, W)
    xp = jnp.pad(x, ((0, 0), (0, 0), (1, 1), (1, 1))).reshape(B, C, Lc)
    return jnp.pad(xp, ((0, 0), (0, 0), (0, L - Lc)))


def from_plane(p, H, W):
    B, C, _ = p.shape
    _, Lc, _, _, _, _ = plane_geometry(H, W)
    return p[:, :, :Lc].reshape(B, C, H + 2, W + 2)[:, :, 1:H + 1, 1:W + 1]


def upsample_plane(p, H, W):
    # nearest-neighbour 2x on the valid region, re-padded to plane form.
    x = from_plane(p, H, W)
    x = jnp.repeat(jnp.repeat(x, 2, axis=2), 2, axis=3)
    return to_plane(x)


def make_plane_mask(H, W):
    # (1, L) f32: 1.0 on valid pixels, 0.0 on the padding ring / tail.
    Wp, Lc, L, _, _, _ = plane_geometry(H, W)
    q = jnp.arange(L)
    rr, cc = q // Wp, q % Wp
    valid = (q < Lc) & (rr >= 1) & (rr <= H) & (cc >= 1) & (cc <= W)
    return valid.astype(jnp.float32)[None, :]


# --------------------------- host-side weight packing -----------------------


def pack_conv3x3(w, cin_pad):
    # torch (Cout, Cin, 3, 3) -> (Cout, 9*cin_pad) bf16, tap-major channel-minor.
    cout, cin = w.shape[0], w.shape[1]
    wt = jnp.transpose(w, (0, 2, 3, 1))                  # (Cout, 3, 3, Cin)
    if cin_pad > cin:
        wt = jnp.pad(wt, ((0, 0), (0, 0), (0, 0), (0, cin_pad - cin)))
    return wt.reshape(cout, 9 * cin_pad).astype(MXU_DTYPE)


def pack_conv1x1(w, cin_pad):
    # torch (Cout, Cin, 1, 1) -> (Cout, cin_pad) bf16.
    cout, cin = w.shape[0], w.shape[1]
    wf = w.reshape(cout, cin)
    if cin_pad > cin:
        wf = jnp.pad(wf, ((0, 0), (0, cin_pad - cin)))
    return wf.astype(MXU_DTYPE)


# ------------------------------ Pallas kernels -------------------------------


def _make_stage_pack(H, W):
    """In-kernel helpers: bf16 staging with aligned margins + tap packing."""
    Wp, _, L, c, P, A = plane_geometry(H, W)
    taps = tuple((t // 3) * Wp + (t % 3) for t in range(9))

    def stage(val, ext_ref, c_real, c_pad):
        # one-shot f32 -> bf16 cast; all stores lane-aligned (offsets 0/P/P+L).
        ext_ref[:, 0:P] = jnp.zeros((c_pad, P), MXU_DTYPE)
        ext_ref[:, P + L:A] = jnp.zeros((c_pad, A - P - L), MXU_DTYPE)
        if c_pad == c_real:
            ext_ref[:, P:P + L] = val.astype(MXU_DTYPE)
        else:
            ext_ref[0:c_real, P:P + L] = val.astype(MXU_DTYPE)
            ext_ref[c_real:c_pad, P:P + L] = jnp.zeros((c_pad - c_real, L),
                                                       MXU_DTYPE)

    def pack(ext_ref, pk_ref, c_pad):
        # 9 shifted copies, sublane-stacked -> single (9*Cin, L) MXU operand.
        for t, off in enumerate(taps):
            s = P - c + off                                  # static offset
            pk_ref[t * c_pad:(t + 1) * c_pad, :] = ext_ref[:, s:s + L]

    return stage, pack


def _make_block_kernel(*, H, W, Cin, Cout, skip, act, act_scale):
    """Whole AdaIN residual block (2x conv3x3 + skip) in a single kernel."""
    _, _, L, _, _, A = plane_geometry(H, W)
    Cinp, Chp, Csp = _round2(Cin), _round2(Cout), _round2(Cin)
    inv_n = 1.0 / float(H * W)
    stage, pack = _make_stage_pack(H, W)

    def adain_relu(v, ada_ref, mask):
        # two-pass (mean-shifted) instance-norm stats, then affine + ReLU.
        mean = jnp.sum(v, axis=1, keepdims=True) * inv_n          # pads are zero
        d = (v - mean) * mask
        var = jnp.sum(d * d, axis=1, keepdims=True) * inv_n
        rstd = jax.lax.rsqrt(var + EPS)
        sig = ada_ref[:, 0:1]
        mu = ada_ref[:, 1:2]
        return jnp.maximum(d * (sig * rstd) + mu, 0.0) * mask

    def kernel(x_ref, m_ref, a1_ref, a2_ref, b_ref, w1_ref, w2_ref, y_ref,
               ae1, pk1, ae2, pk2):
        mask = m_ref[...]

        # ---- conv1: AdaIN-1 + ReLU -> pack taps -> one MXU dot --------------
        a1 = adain_relu(x_ref[0], a1_ref, mask)
        stage(a1, ae1, Cin, Cinp)
        pack(ae1, pk1, Cinp)
        h1 = jnp.dot(w1_ref[...], pk1[...], preferred_element_type=jnp.float32)
        h1 = (h1 + b_ref[:, 0:1]) * mask          # re-zero ring (stats & conv2)

        # ---- conv2 (+ fused 1x1 skip): AdaIN-2 stats computed in-kernel -----
        a2 = adain_relu(h1, a2_ref, mask)
        stage(a2, ae2, Cout, Chp)
        pack(ae2, pk2, Chp)
        if skip == "conv1x1":
            r0 = 9 * Chp
            pk2[r0:r0 + Cin, :] = x_ref[0].astype(MXU_DTYPE)
            if Csp > Cin:
                pk2[r0 + Cin:r0 + Csp, :] = jnp.zeros((Csp - Cin, L), MXU_DTYPE)
        y = jnp.dot(w2_ref[...], pk2[...], preferred_element_type=jnp.float32)
        y = y + b_ref[:, 1:2]
        if skip == "identity":
            y = y + x_ref[0]                       # exact f32 residual add
        if act == "sigmoid":
            y = jax.nn.sigmoid(y) * act_scale
        y_ref[0] = y * mask                        # single lane-dense full store

    k2 = 9 * Chp + (Csp if skip == "conv1x1" else 0)
    scratch = [pltpu.VMEM((Cinp, A), MXU_DTYPE),
               pltpu.VMEM((9 * Cinp, L), MXU_DTYPE),
               pltpu.VMEM((Chp, A), MXU_DTYPE),
               pltpu.VMEM((k2, L), MXU_DTYPE)]
    return kernel, scratch


def _make_conv_kernel(*, H, W, Cin, act, act_scale):
    """Plain conv3x3 (+ bias, optional fused sigmoid*scale)."""
    _, _, L, _, _, A = plane_geometry(H, W)
    Cinp = _round2(Cin)
    stage, pack = _make_stage_pack(H, W)

    def kernel(x_ref, m_ref, b_ref, w_ref, y_ref, ae, pk):
        stage(x_ref[0], ae, Cin, Cinp)             # no prologue: raw x, cast once
        pack(ae, pk, Cinp)
        y = jnp.dot(w_ref[...], pk[...], preferred_element_type=jnp.float32)
        y = y + b_ref[...]
        if act == "sigmoid":
            y = jax.nn.sigmoid(y) * act_scale
        y_ref[0] = y * m_ref[...]

    scratch = [pltpu.VMEM((Cinp, A), MXU_DTYPE),
               pltpu.VMEM((9 * Cinp, L), MXU_DTYPE)]
    return kernel, scratch


# ----------------------------- pallas_call wrappers ---------------------------


def fused_res_block(plane, spatial, p, sig1, mu1, sig2, mu2, *, upsample,
                    act, act_scale):
    H, W = spatial
    if upsample:
        plane = upsample_plane(plane, H, W)        # TODO(synk): fold into kernel
        H, W = 2 * H, 2 * W
    B, Cin, L = plane.shape
    Cout = p["w1"].shape[0]
    skip = "conv1x1" if "wr" in p else "identity"
    assert skip == "conv1x1" or Cin == Cout
    Cinp, Chp, Csp = _round2(Cin), _round2(Cout), _round2(Cin)

    kernel, scratch = _make_block_kernel(H=H, W=W, Cin=Cin, Cout=Cout,
                                         skip=skip, act=act,
                                         act_scale=act_scale)

    w1p = pack_conv3x3(p["w1"], Cinp)              # (Cout, 9*Cinp) bf16
    w2p = pack_conv3x3(p["w2"], Chp)               # (Cout, 9*Chp)  bf16
    b2 = p["b2"]
    if skip == "conv1x1":
        w2p = jnp.concatenate([w2p, pack_conv1x1(p["wr"], Csp)], axis=1)
        b2 = b2 + p["br"]                          # fold skip bias
    bb = jnp.stack([p["b1"], b2], axis=1)          # (Cout, 2)
    ada1 = jnp.stack([sig1, mu1], axis=1)          # (Cin, 2)
    ada2 = jnp.stack([sig2, mu2], axis=1)          # (Cout, 2)
    mask = make_plane_mask(H, W)

    out = pl.pallas_call(
        kernel,
        grid=(B,),
        in_specs=[
            pl.BlockSpec((1, Cin, L), lambda b: (b, 0, 0)),
            pl.BlockSpec((1, L), lambda b: (0, 0)),
            pl.BlockSpec((Cin, 2), lambda b: (0, 0)),
            pl.BlockSpec((Cout, 2), lambda b: (0, 0)),
            pl.BlockSpec((Cout, 2), lambda b: (0, 0)),
            pl.BlockSpec(w1p.shape, lambda b: (0, 0)),
            pl.BlockSpec(w2p.shape, lambda b: (0, 0)),
        ],
        out_specs=pl.BlockSpec((1, Cout, L), lambda b: (b, 0, 0)),
        out_shape=jax.ShapeDtypeStruct((B, Cout, L), jnp.float32),
        scratch_shapes=scratch,
        compiler_params=pltpu.CompilerParams(
            dimension_semantics=("parallel",)),
    )(plane, mask, ada1, ada2, bb, w1p, w2p)
    return out, (H, W)


def fused_plain_conv(plane, spatial, p, *, act, act_scale):
    H, W = spatial
    B, Cin, L = plane.shape
    Cout = p["w"].shape[0]
    Cinp = _round2(Cin)
    kernel, scratch = _make_conv_kernel(H=H, W=W, Cin=Cin, act=act,
                                        act_scale=act_scale)
    wp = pack_conv3x3(p["w"], Cinp)
    bias = p["b"].reshape(Cout, 1)
    mask = make_plane_mask(H, W)

    out = pl.pallas_call(
        kernel,
        grid=(B,),
        in_specs=[
            pl.BlockSpec((1, Cin, L), lambda b: (b, 0, 0)),
            pl.BlockSpec((1, L), lambda b: (0, 0)),
            pl.BlockSpec((Cout, 1), lambda b: (0, 0)),
            pl.BlockSpec(wp.shape, lambda b: (0, 0)),
        ],
        out_specs=pl.BlockSpec((1, Cout, L), lambda b: (b, 0, 0)),
        out_shape=jax.ShapeDtypeStruct((B, Cout, L), jnp.float32),
        scratch_shapes=scratch,
        compiler_params=pltpu.CompilerParams(
            dimension_semantics=("parallel",)),
    )(plane, mask, bias, wp)
    return out, spatial


# --------------------------------- Generator ---------------------------------


def init_generator_params(key, G_config, input_dim):
    def conv_w(k, cout, cin, ks):
        return jax.random.normal(k, (cout, cin, ks, ks), jnp.float32) * 0.1

    layers = []
    adain_slice = []
    in_ch = input_dim
    for kind, out_ch in G_config:
        key, k0, k1, k2, k3 = jax.random.split(key, 5)
        if kind in ("res_adaptive", "res_up"):
            p = {
                "kind": kind,
                "adain_dims": (in_ch, out_ch),
                "w1": conv_w(k0, out_ch, in_ch, 3),
                "b1": 0.01 * jax.random.normal(k3, (out_ch,), jnp.float32),
                "w2": conv_w(k1, out_ch, out_ch, 3),
                "b2": jnp.zeros((out_ch,), jnp.float32),
            }
            if kind == "res_up" or in_ch != out_ch:
                p["wr"] = conv_w(k2, out_ch, in_ch, 1)
                p["br"] = jnp.zeros((out_ch,), jnp.float32)
            adain_slice.append((in_ch, out_ch))
        else:  # plain conv layer (the `else` branch of forward)
            p = {
                "kind": "conv",
                "w": conv_w(k0, out_ch, in_ch, 3),
                "b": 0.01 * jax.random.normal(k1, (out_ch,), jnp.float32),
            }
        layers.append(p)
        in_ch = out_ch

    adain_param_count = sum(a + b for a, b in adain_slice)
    key, ks, km = jax.random.split(key, 3)
    sigma = 1.0 + 0.05 * jax.random.normal(ks, (1, adain_param_count),
                                           jnp.float32)
    mu = 0.05 * jax.random.normal(km, (1, adain_param_count), jnp.float32)
    adain = jnp.stack([sigma, mu], axis=-1)          # (1, P, 2) like nn.Parameter

    return {"layers": layers, "adain": adain,
            "adain_param_count": adain_param_count}


def generator_forward(params, x_nchw, normalize):
    # x_nchw: (B, C, H, W) float32 (the PyTorch module's input convention).
    x = x_nchw.astype(jnp.float32)
    B, C, H, W = x.shape
    plane = to_plane(x)
    spatial = (H, W)

    adain = params["adain"]
    layers = params["layers"]
    n_layers = len(layers)
    act_scale = 1.0 if normalize else 255.0
    pos = 0
    for li, layer in enumerate(layers):
        act = "sigmoid" if li == n_layers - 1 else "none"
        kind = layer["kind"]
        if kind in ("res_adaptive", "res_up"):
            d1, d2 = layer["adain_dims"]
            sig1 = adain[0, pos:pos + d1, 0]
            mu1 = adain[0, pos:pos + d1, 1]
            sig2 = adain[0, pos + d1:pos + d1 + d2, 0]
            mu2 = adain[0, pos + d1:pos + d1 + d2, 1]
            plane, spatial = fused_res_block(
                plane, spatial, layer, sig1, mu1, sig2, mu2,
                upsample=(kind == "res_up"), act=act, act_scale=act_scale)
            pos += d1 + d2
        else:
            plane, spatial = fused_plain_conv(plane, spatial, layer,
                                              act=act, act_scale=act_scale)
    assert pos == params["adain_param_count"]
    # final sigmoid (*255 if not normalize) is fused into the last kernel above.
    Hf, Wf = spatial
    return from_plane(plane, Hf, Wf)               # NCHW out, like PyTorch


# ------------------------------------ main ------------------------------------

if __name__ == "__main__":
    key = jax.random.PRNGKey(0)
    kp, kx = jax.random.split(key)

    input_dim = 4
    # synthetic G_config: adaptive (learned skip), adaptive (identity skip),
    # upsampling block, final RGB conv.
    G_config = [("res_adaptive", 8), ("res_adaptive", 8),
                ("res_up", 4), ("conv", 3)]
    params = init_generator_params(kp, G_config, input_dim)

    B, H, W = 2, 16, 16
    x = jax.random.normal(kx, (B, input_dim, H, W), jnp.float32)   # NCHW

    fwd = jax.jit(lambda inp, normalize: generator_forward(params, inp,
                                                           normalize),
                  static_argnums=1)

    out = jax.block_until_ready(fwd(x, True))
    assert out.shape == (B, 3, 2 * H, 2 * W), out.shape
    assert bool(jnp.all(jnp.isfinite(out)))
    assert bool(jnp.all((out >= 0.0) & (out <= 1.0)))

    out255 = jax.block_until_ready(fwd(x, False))
    assert bool(jnp.all((out255 >= 0.0) & (out255 <= 255.0)))

    print("KERNEL_OK")
</pallas_src>

<mosaic_0001>
module attributes {stable_mosaic.version = 11 : i64} {
  func.func @kernel(%arg0: i32, %arg1: memref<1x8x384xf32, #tpu.memory_space<vmem>>, %arg2: memref<1x384xf32, #tpu.memory_space<vmem>>, %arg3: memref<8x2xf32, #tpu.memory_space<vmem>>, %arg4: memref<8x2xf32, #tpu.memory_space<vmem>>, %arg5: memref<8x2xf32, #tpu.memory_space<vmem>>, %arg6: memref<8x72xbf16, #tpu.memory_space<vmem>>, %arg7: memref<8x72xbf16, #tpu.memory_space<vmem>>, %arg8: memref<1x8x384xf32, #tpu.memory_space<vmem>>, %arg9: memref<8x640xbf16, #tpu.memory_space<vmem>>, %arg10: memref<72x384xbf16, #tpu.memory_space<vmem>>, %arg11: memref<8x640xbf16, #tpu.memory_space<vmem>>, %arg12: memref<72x384xbf16, #tpu.memory_space<vmem>>) attributes {dimension_semantics = [#tpu.dimension_semantics<parallel>], iteration_bounds = array<i64: 2>, scalar_prefetch = 0 : i64, scratch_operands = 4 : i64, tpu.core_type = #tpu.core_type<tc>, window_params = [{transform_indices = @transform_0, window_bounds = array<i64: 1, 8, 384>}, {pipeline_mode = #tpu.pipeline_mode<synchronous>, transform_indices = @transform_1, window_bounds = array<i64: 1, 384>}, {pipeline_mode = #tpu.pipeline_mode<synchronous>, transform_indices = @transform_2, window_bounds = array<i64: 8, 2>}, {pipeline_mode = #tpu.pipeline_mode<synchronous>, transform_indices = @transform_3, window_bounds = array<i64: 8, 2>}, {pipeline_mode = #tpu.pipeline_mode<synchronous>, transform_indices = @transform_4, window_bounds = array<i64: 8, 2>}, {pipeline_mode = #tpu.pipeline_mode<synchronous>, transform_indices = @transform_5, window_bounds = array<i64: 8, 72>}, {pipeline_mode = #tpu.pipeline_mode<synchronous>, transform_indices = @transform_6, window_bounds = array<i64: 8, 72>}, {transform_indices = @transform_7, window_bounds = array<i64: 1, 8, 384>}]} {
    %c0 = arith.constant 0 : index
    %c0_0 = arith.constant 0 : index
    %0 = vector.load %arg2[%c0, %c0_0] : memref<1x384xf32, #tpu.memory_space<vmem>>, vector<1x384xf32>
    %c0_1 = arith.constant 0 : index
    %c0_2 = arith.constant 0 : index
    %c0_3 = arith.constant 0 : index
    %1 = vector.load %arg1[%c0_1, %c0_2, %c0_3] : memref<1x8x384xf32, #tpu.memory_space<vmem>>, vector<1x8x384xf32>
    %2 = vector.shape_cast %1 : vector<1x8x384xf32> to vector<8x384xf32>
    %cst = arith.constant dense<0.000000e+00> : vector<8xf32>
    %3 = vector.multi_reduction <add>, %2, %cst [1] : vector<8x384xf32> to vector<8xf32>
    %4 = vector.shape_cast %3 : vector<8xf32> to vector<8x1xf32>
    %cst_4 = arith.constant 3.906250e-03 : f32
    %5 = vector.broadcast %cst_4 : f32 to vector<8x1xf32>
    %6 = arith.mulf %4, %5 : vector<8x1xf32>
    %7 = vector.broadcast %6 : vector<8x1xf32> to vector<8x384xf32>
    %8 = arith.subf %2, %7 : vector<8x384xf32>
    %9 = vector.broadcast %0 : vector<1x384xf32> to vector<8x384xf32>
    %10 = arith.mulf %8, %9 : vector<8x384xf32>
    %11 = arith.mulf %10, %10 : vector<8x384xf32>
    %cst_5 = arith.constant dense<0.000000e+00> : vector<8xf32>
    %12 = vector.multi_reduction <add>, %11, %cst_5 [1] : vector<8x384xf32> to vector<8xf32>
    %13 = vector.shape_cast %12 : vector<8xf32> to vector<8x1xf32>
    %cst_6 = arith.constant 3.906250e-03 : f32
    %14 = vector.broadcast %cst_6 : f32 to vector<8x1xf32>
    %15 = arith.mulf %13, %14 : vector<8x1xf32>
    %cst_7 = arith.constant 9.99999974E-6 : f32
    %16 = vector.broadcast %cst_7 : f32 to vector<8x1xf32>
    %17 = arith.addf %15, %16 : vector<8x1xf32>
    %18 = math.rsqrt %17 : vector<8x1xf32>
    %c0_8 = arith.constant 0 : index
    %c0_9 = arith.constant 0 : index
    %19 = vector.load %arg3[%c0_8, %c0_9] : memref<8x2xf32, #tpu.memory_space<vmem>>, vector<8x1xf32>
    %c0_10 = arith.constant 0 : index
    %c1 = arith.constant 1 : index
    %20 = vector.load %arg3[%c0_10, %c1] : memref<8x2xf32, #tpu.memory_space<vmem>>, vector<8x1xf32>
    %21 = arith.mulf %19, %18 : vector<8x1xf32>
    %22 = vector.broadcast %21 : vector<8x1xf32> to vector<8x384xf32>
    %23 = arith.mulf %10, %22 : vector<8x384xf32>
    %24 = vector.broadcast %20 : vector<8x1xf32> to vector<8x384xf32>
    %25 = arith.addf %23, %24 : vector<8x384xf32>
    %cst_11 = arith.constant 0.000000e+00 : f32
    %26 = vector.broadcast %cst_11 : f32 to vector<8x384xf32>
    %27 = arith.maximumf %25, %26 : vector<8x384xf32>
    %28 = vector.broadcast %0 : vector<1x384xf32> to vector<8x384xf32>
    %29 = arith.mulf %27, %28 : vector<8x384xf32>
    %cst_12 = arith.constant 0.000000e+00 : bf16
    %30 = vector.broadcast %cst_12 : bf16 to vector<8x128xbf16>
    %c0_13 = arith.constant 0 : index
    %c0_14 = arith.constant 0 : index
    %31 = vector.load %arg9[%c0_13, %c0_14] : memref<8x640xbf16, #tpu.memory_space<vmem>>, vector<8x128xbf16>
    tpu.vector_store %arg9[%c0_13, %c0_14], %30 {strides = array<i32>} : memref<8x640xbf16, #tpu.memory_space<vmem>>, vector<8x128xbf16>,
    %cst_15 = arith.constant 0.000000e+00 : bf16
    %32 = vector.broadcast %cst_15 : bf16 to vector<8x128xbf16>
    %c0_16 = arith.constant 0 : index
    %c512 = arith.constant 512 : index
    %33 = vector.load %arg9[%c0_16, %c512] : memref<8x640xbf16, #tpu.memory_space<vmem>>, vector<8x128xbf16>
    tpu.vector_store %arg9[%c0_16, %c512], %32 {strides = array<i32>} : memref<8x640xbf16, #tpu.memory_space<vmem>>, vector<8x128xbf16>,
    %34 = arith.truncf %29 : vector<8x384xf32> to vector<8x384xbf16>
    %c0_17 = arith.constant 0 : index
    %c128 = arith.constant 128 : index
    %35 = vector.load %arg9[%c0_17, %c128] : memref<8x640xbf16, #tpu.memory_space<vmem>>, vector<8x384xbf16>
    tpu.vector_store %arg9[%c0_17, %c128], %34 {strides = array<i32>} : memref<8x640xbf16, #tpu.memory_space<vmem>>, vector<8x384xbf16>,
    %c0_18 = arith.constant 0 : index
    %c109 = arith.constant 109 : index
    %36 = vector.load %arg9[%c0_18, %c109] : memref<8x640xbf16, #tpu.memory_space<vmem>>, vector<8x384xbf16>
    %c0_19 = arith.constant 0 : index
    %c0_20 = arith.constant 0 : index
    %37 = vector.load %arg10[%c0_19, %c0_20] : memref<72x384xbf16, #tpu.memory_space<vmem>>, vector<8x384xbf16>
    tpu.vector_store %arg10[%c0_19, %c0_20], %36 {strides = array<i32>} : memref<72x384xbf16, #tpu.memory_space<vmem>>, vector<8x384xbf16>,
    %c0_21 = arith.constant 0 : index
    %c110 = arith.constant 110 : index
    %38 = vector.load %arg9[%c0_21, %c110] : memref<8x640xbf16, #tpu.memory_space<vmem>>, vector<8x384xbf16>
    %c8 = arith.constant 8 : index
    %c0_22 = arith.constant 0 : index
    %39 = vector.load %arg10[%c8, %c0_22] : memref<72x384xbf16, #tpu.memory_space<vmem>>, vector<8x384xbf16>
    tpu.vector_store %arg10[%c8, %c0_22], %38 {strides = array<i32>} : memref<72x384xbf16, #tpu.memory_space<vmem>>, vector<8x384xbf16>,
    %c0_23 = arith.constant 0 : index
    %c111 = arith.constant 111 : index
    %40 = vector.load %arg9[%c0_23, %c111] : memref<8x640xbf16, #tpu.memory_space<vmem>>, vector<8x384xbf16>
    %c16 = arith.constant 16 : index
    %c0_24 = arith.constant 0 : index
    %41 = vector.load %arg10[%c16, %c0_24] : memref<72x384xbf16, #tpu.memory_space<vmem>>, vector<8x384xbf16>
    tpu.vector_store %arg10[%c16, %c0_24], %40 {strides = array<i32>} : memref<72x384xbf16, #tpu.memory_space<vmem>>, vector<8x384xbf16>,
    %c0_25 = arith.constant 0 : index
    %c127 = arith.constant 127 : index
    %42 = vector.load %arg9[%c0_25, %c127] : memref<8x640xbf16, #tpu.memory_space<vmem>>, vector<8x384xbf16>
    %c24 = arith.constant 24 : index
    %c0_26 = arith.constant 0 : index
    %43 = vector.load %arg10[%c24, %c0_26] : memref<72x384xbf16, #tpu.memory_space<vmem>>, vector<8x384xbf16>
    tpu.vector_store %arg10[%c24, %c0_26], %42 {strides = array<i32>} : memref<72x384xbf16, #tpu.memory_space<vmem>>, vector<8x384xbf16>,
    %c0_27 = arith.constant 0 : index
    %c128_28 = arith.constant 128 : index
    %44 = vector.load %arg9[%c0_27, %c128_28] : memref<8x640xbf16, #tpu.memory_space<vmem>>, vector<8x384xbf16>
    %c32 = arith.constant 32 : index
    %c0_29 = arith.constant 0 : index
    %45 = vector.load %arg10[%c32, %c0_29] : memref<72x384xbf16, #tpu.memory_space<vmem>>, vector<8x384xbf16>
    tpu.vector_store %arg10[%c32, %c0_29], %44 {strides = array<i32>} : memref<72x384xbf16, #tpu.memory_space<vmem>>, vector<8x384xbf16>,
    %c0_30 = arith.constant 0 : index
    %c129 = arith.constant 129 : index
    %46 = vector.load %arg9[%c0_30, %c129] : memref<8x640xbf16, #tpu.memory_space<vmem>>, vector<8x384xbf16>
    %c40 = arith.constant 40 : index
    %c0_31 = arith.constant 0 : index
    %47 = vector.load %arg10[%c40, %c0_31] : memref<72x384xbf16, #tpu.memory_space<vmem>>, vector<8x384xbf16>
    tpu.vector_store %arg10[%c40, %c0_31], %46 {strides = array<i32>} : memref<72x384xbf16, #tpu.memory_space<vmem>>, vector<8x384xbf16>,
    %c0_32 = arith.constant 0 : index
    %c145 = arith.constant 145 : index
    %48 = vector.load %arg9[%c0_32, %c145] : memref<8x640xbf16, #tpu.memory_space<vmem>>, vector<8x384xbf16>
    %c48 = arith.constant 48 : index
    %c0_33 = arith.constant 0 : index
    %49 = vector.load %arg10[%c48, %c0_33] : memref<72x384xbf16, #tpu.memory_space<vmem>>, vector<8x384xbf16>
    tpu.vector_store %arg10[%c48, %c0_33], %48 {strides = array<i32>} : memref<72x384xbf16, #tpu.memory_space<vmem>>, vector<8x384xbf16>,
    %c0_34 = arith.constant 0 : index
    %c146 = arith.constant 146 : index
    %50 = vector.load %arg9[%c0_34, %c146] : memref<8x640xbf16, #tpu.memory_space<vmem>>, vector<8x384xbf16>
    %c56 = arith.constant 56 : index
    %c0_35 = arith.constant 0 : index
    %51 = vector.load %arg10[%c56, %c0_35] : memref<72x384xbf16, #tpu.memory_space<vmem>>, vector<8x384xbf16>
    tpu.vector_store %arg10[%c56, %c0_35], %50 {strides = array<i32>} : memref<72x384xbf16, #tpu.memory_space<vmem>>, vector<8x384xbf16>,
    %c0_36 = arith.constant 0 : index
    %c147 = arith.constant 147 : index
    %52 = vector.load %arg9[%c0_36, %c147] : memref<8x640xbf16, #tpu.memory_space<vmem>>, vector<8x384xbf16>
    %c64 = arith.constant 64 : index
    %c0_37 = arith.constant 0 : index
    %53 = vector.load %arg10[%c64, %c0_37] : memref<72x384xbf16, #tpu.memory_space<vmem>>, vector<8x384xbf16>
    tpu.vector_store %arg10[%c64, %c0_37], %52 {strides = array<i32>} : memref<72x384xbf16, #tpu.memory_space<vmem>>, vector<8x384xbf16>,
    %c0_38 = arith.constant 0 : index
    %c0_39 = arith.constant 0 : index
    %54 = vector.load %arg6[%c0_38, %c0_39] : memref<8x72xbf16, #tpu.memory_space<vmem>>, vector<8x72xbf16>
    %c0_40 = arith.constant 0 : index
    %c0_41 = arith.constant 0 : index
    %55 = vector.load %arg10[%c0_40, %c0_41] : memref<72x384xbf16, #tpu.memory_space<vmem>>, vector<72x384xbf16>
    %cst_42 = arith.constant dense<0.000000e+00> : vector<8x384xf32>
    %56 = tpu.matmul %54, %55, %cst_42 {dimension_numbers = #tpu.dot_dimension_numbers<[1], [0], [0], [1], [0, 0, 1, 1], [], []>} : vector<8x72xbf16>, vector<72x384xbf16>, vector<8x384xf32> -> vector<8x384xf32>
    %c0_43 = arith.constant 0 : index
    %c0_44 = arith.constant 0 : index
    %57 = vector.load %arg5[%c0_43, %c0_44] : memref<8x2xf32, #tpu.memory_space<vmem>>, vector<8x1xf32>
    %58 = vector.broadcast %57 : vector<8x1xf32> to vector<8x384xf32>
    %59 = arith.addf %56, %58 : vector<8x384xf32>
    %60 = vector.broadcast %0 : vector<1x384xf32> to vector<8x384xf32>
    %61 = arith.mulf %59, %60 : vector<8x384xf32>
    %cst_45 = arith.constant dense<0.000000e+00> : vector<8xf32>
    %62 = vector.multi_reduction <add>, %61, %cst_45 [1] : vector<8x384xf32> to vector<8xf32>
    %63 = vector.shape_cast %62 : vector<8xf32> to vector<8x1xf32>
    %cst_46 = arith.constant 3.906250e-03 : f32
    %64 = vector.broadcast %cst_46 : f32 to vector<8x1xf32>
    %65 = arith.mulf %63, %64 : vector<8x1xf32>
    %66 = vector.broadcast %65 : vector<8x1xf32> to vector<8x384xf32>
    %67 = arith.subf %61, %66 : vector<8x384xf32>
    %68 = vector.broadcast %0 : vector<1x384xf32> to vector<8x384xf32>
    %69 = arith.mulf %67, %68 : vector<8x384xf32>
    %70 = arith.mulf %69, %69 : vector<8x384xf32>
    %cst_47 = arith.constant dense<0.000000e+00> : vector<8xf32>
    %71 = vector.multi_reduction <add>, %70, %cst_47 [1] : vector<8x384xf32> to vector<8xf32>
    %72 = vector.shape_cast %71 : vector<8xf32> to vector<8x1xf32>
    %cst_48 = arith.constant 3.906250e-03 : f32
    %73 = vector.broadcast %cst_48 : f32 to vector<8x1xf32>
    %74 = arith.mulf %72, %73 : vector<8x1xf32>
    %cst_49 = arith.constant 9.99999974E-6 : f32
    %75 = vector.broadcast %cst_49 : f32 to vector<8x1xf32>
    %76 = arith.addf %74, %75 : vector<8x1xf32>
    %77 = math.rsqrt %76 : vector<8x1xf32>
    %c0_50 = arith.constant 0 : index
    %c0_51 = arith.constant 0 : index
    %78 = vector.load %arg4[%c0_50, %c0_51] : memref<8x2xf32, #tpu.memory_space<vmem>>, vector<8x1xf32>
    %c0_52 = arith.constant 0 : index
    %c1_53 = arith.constant 1 : index
    %79 = vector.load %arg4[%c0_52, %c1_53] : memref<8x2xf32, #tpu.memory_space<vmem>>, vector<8x1xf32>
    %80 = arith.mulf %78, %77 : vector<8x1xf32>
    %81 = vector.broadcast %80 : vector<8x1xf32> to vector<8x384xf32>
    %82 = arith.mulf %69, %81 : vector<8x384xf32>
    %83 = vector.broadcast %79 : vector<8x1xf32> to vector<8x384xf32>
    %84 = arith.addf %82, %83 : vector<8x384xf32>
    %cst_54 = arith.constant 0.000000e+00 : f32
    %85 = vector.broadcast %cst_54 : f32 to vector<8x384xf32>
    %86 = arith.maximumf %84, %85 : vector<8x384xf32>
    %87 = vector.broadcast %0 : vector<1x384xf32> to vector<8x384xf32>
    %88 = arith.mulf %86, %87 : vector<8x384xf32>
    %cst_55 = arith.constant 0.000000e+00 : bf16
    %89 = vector.broadcast %cst_55 : bf16 to vector<8x128xbf16>
    %c0_56 = arith.constant 0 : index
    %c0_57 = arith.constant 0 : index
    %90 = vector.load %arg11[%c0_56, %c0_57] : memref<8x640xbf16, #tpu.memory_space<vmem>>, vector<8x128xbf16>
    tpu.vector_store %arg11[%c0_56, %c0_57], %89 {strides = array<i32>} : memref<8x640xbf16, #tpu.memory_space<vmem>>, vector<8x128xbf16>,
    %cst_58 = arith.constant 0.000000e+00 : bf16
    %91 = vector.broadcast %cst_58 : bf16 to vector<8x128xbf16>
    %c0_59 = arith.constant 0 : index
    %c512_60 = arith.constant 512 : index
    %92 = vector.load %arg11[%c0_59, %c512_60] : memref<8x640xbf16, #tpu.memory_space<vmem>>, vector<8x128xbf16>
    tpu.vector_store %arg11[%c0_59, %c512_60], %91 {strides = array<i32>} : memref<8x640xbf16, #tpu.memory_space<vmem>>, vector<8x128xbf16>,
    %93 = arith.truncf %88 : vector<8x384xf32> to vector<8x384xbf16>
    %c0_61 = arith.constant 0 : index
    %c128_62 = arith.constant 128 : index
    %94 = vector.load %arg11[%c0_61, %c128_62] : memref<8x640xbf16, #tpu.memory_space<vmem>>, vector<8x384xbf16>
    tpu.vector_store %arg11[%c0_61, %c128_62], %93 {strides = array<i32>} : memref<8x640xbf16, #tpu.memory_space<vmem>>, vector<8x384xbf16>,
    %c0_63 = arith.constant 0 : index
    %c109_64 = arith.constant 109 : index
    %95 = vector.load %arg11[%c0_63, %c109_64] : memref<8x640xbf16, #tpu.memory_space<vmem>>, vector<8x384xbf16>
    %c0_65 = arith.constant 0 : index
    %c0_66 = arith.constant 0 : index
    %96 = vector.load %arg12[%c0_65, %c0_66] : memref<72x384xbf16, #tpu.memory_space<vmem>>, vector<8x384xbf16>
    tpu.vector_store %arg12[%c0_65, %c0_66], %95 {strides = array<i32>} : memref<72x384xbf16, #tpu.memory_space<vmem>>, vector<8x384xbf16>,
    %c0_67 = arith.constant 0 : index
    %c110_68 = arith.constant 110 : index
    %97 = vector.load %arg11[%c0_67, %c110_68] : memref<8x640xbf16, #tpu.memory_space<vmem>>, vector<8x384xbf16>
    %c8_69 = arith.constant 8 : index
    %c0_70 = arith.constant 0 : index
    %98 = vector.load %arg12[%c8_69, %c0_70] : memref<72x384xbf16, #tpu.memory_space<vmem>>, vector<8x384xbf16>
    tpu.vector_store %arg12[%c8_69, %c0_70], %97 {strides = array<i32>} : memref<72x384xbf16, #tpu.memory_space<vmem>>, vector<8x384xbf16>,
    %c0_71 = arith.constant 0 : index
    %c111_72 = arith.constant 111 : index
    %99 = vector.load %arg11[%c0_71, %c111_72] : memref<8x640xbf16, #tpu.memory_space<vmem>>, vector<8x384xbf16>
    %c16_73 = arith.constant 16 : index
    %c0_74 = arith.constant 0 : index
    %100 = vector.load %arg12[%c16_73, %c0_74] : memref<72x384xbf16, #tpu.memory_space<vmem>>, vector<8x384xbf16>
    tpu.vector_store %arg12[%c16_73, %c0_74], %99 {strides = array<i32>} : memref<72x384xbf16, #tpu.memory_space<vmem>>, vector<8x384xbf16>,
    %c0_75 = arith.constant 0 : index
    %c127_76 = arith.constant 127 : index
    %101 = vector.load %arg11[%c0_75, %c127_76] : memref<8x640xbf16, #tpu.memory_space<vmem>>, vector<8x384xbf16>
    %c24_77 = arith.constant 24 : index
    %c0_78 = arith.constant 0 : index
    %102 = vector.load %arg12[%c24_77, %c0_78] : memref<72x384xbf16, #tpu.memory_space<vmem>>, vector<8x384xbf16>
    tpu.vector_store %arg12[%c24_77, %c0_78], %101 {strides = array<i32>} : memref<72x384xbf16, #tpu.memory_space<vmem>>, vector<8x384xbf16>,
    %c0_79 = arith.constant 0 : index
    %c128_80 = arith.constant 128 : index
    %103 = vector.load %arg11[%c0_79, %c128_80] : memref<8x640xbf16, #tpu.memory_space<vmem>>, vector<8x384xbf16>
    %c32_81 = arith.constant 32 : index
    %c0_82 = arith.constant 0 : index
    %104 = vector.load %arg12[%c32_81, %c0_82] : memref<72x384xbf16, #tpu.memory_space<vmem>>, vector<8x384xbf16>
    tpu.vector_store %arg12[%c32_81, %c0_82], %103 {strides = array<i32>} : memref<72x384xbf16, #tpu.memory_space<vmem>>, vector<8x384xbf16>,
    %c0_83 = arith.constant 0 : index
    %c129_84 = arith.constant 129 : index
    %105 = vector.load %arg11[%c0_83, %c129_84] : memref<8x640xbf16, #tpu.memory_space<vmem>>, vector<8x384xbf16>
    %c40_85 = arith.constant 40 : index
    %c0_86 = arith.constant 0 : index
    %106 = vector.load %arg12[%c40_85, %c0_86] : memref<72x384xbf16, #tpu.memory_space<vmem>>, vector<8x384xbf16>
    tpu.vector_store %arg12[%c40_85, %c0_86], %105 {strides = array<i32>} : memref<72x384xbf16, #tpu.memory_space<vmem>>, vector<8x384xbf16>,
    %c0_87 = arith.constant 0 : index
    %c145_88 = arith.constant 145 : index
    %107 = vector.load %arg11[%c0_87, %c145_88] : memref<8x640xbf16, #tpu.memory_space<vmem>>, vector<8x384xbf16>
    %c48_89 = arith.constant 48 : index
    %c0_90 = arith.constant 0 : index
    %108 = vector.load %arg12[%c48_89, %c0_90] : memref<72x384xbf16, #tpu.memory_space<vmem>>, vector<8x384xbf16>
    tpu.vector_store %arg12[%c48_89, %c0_90], %107 {strides = array<i32>} : memref<72x384xbf16, #tpu.memory_space<vmem>>, vector<8x384xbf16>,
    %c0_91 = arith.constant 0 : index
    %c146_92 = arith.constant 146 : index
    %109 = vector.load %arg11[%c0_91, %c146_92] : memref<8x640xbf16, #tpu.memory_space<vmem>>, vector<8x384xbf16>
    %c56_93 = arith.constant 56 : index
    %c0_94 = arith.constant 0 : index
    %110 = vector.load %arg12[%c56_93, %c0_94] : memref<72x384xbf16, #tpu.memory_space<vmem>>, vector<8x384xbf16>
    tpu.vector_store %arg12[%c56_93, %c0_94], %109 {strides = array<i32>} : memref<72x384xbf16, #tpu.memory_space<vmem>>, vector<8x384xbf16>,
    %c0_95 = arith.constant 0 : index
    %c147_96 = arith.constant 147 : index
    %111 = vector.load %arg11[%c0_95, %c147_96] : memref<8x640xbf16, #tpu.memory_space<vmem>>, vector<8x384xbf16>
    %c64_97 = arith.constant 64 : index
    %c0_98 = arith.constant 0 : index
    %112 = vector.load %arg12[%c64_97, %c0_98] : memref<72x384xbf16, #tpu.memory_space<vmem>>, vector<8x384xbf16>
    tpu.vector_store %arg12[%c64_97, %c0_98], %111 {strides = array<i32>} : memref<72x384xbf16, #tpu.memory_space<vmem>>, vector<8x384xbf16>,
    %c0_99 = arith.constant 0 : index
    %c0_100 = arith.constant 0 : index
    %113 = vector.load %arg7[%c0_99, %c0_100] : memref<8x72xbf16, #tpu.memory_space<vmem>>, vector<8x72xbf16>
    %c0_101 = arith.constant 0 : index
    %c0_102 = arith.constant 0 : index
    %114 = vector.load %arg12[%c0_101, %c0_102] : memref<72x384xbf16, #tpu.memory_space<vmem>>, vector<72x384xbf16>
    %cst_103 = arith.constant dense<0.000000e+00> : vector<8x384xf32>
    %115 = tpu.matmul %113, %114, %cst_103 {dimension_numbers = #tpu.dot_dimension_numbers<[1], [0], [0], [1], [0, 0, 1, 1], [], []>} : vector<8x72xbf16>, vector<72x384xbf16>, vector<8x384xf32> -> vector<8x384xf32>
    %c0_104 = arith.constant 0 : index
    %c1_105 = arith.constant 1 : index
    %116 = vector.load %arg5[%c0_104, %c1_105] : memref<8x2xf32, #tpu.memory_space<vmem>>, vector<8x1xf32>
    %117 = vector.broadcast %116 : vector<8x1xf32> to vector<8x384xf32>
    %118 = arith.addf %115, %117 : vector<8x384xf32>
    %c0_106 = arith.constant 0 : index
    %c0_107 = arith.constant 0 : index
    %c0_108 = arith.constant 0 : index
    %119 = vector.load %arg1[%c0_106, %c0_107, %c0_108] : memref<1x8x384xf32, #tpu.memory_space<vmem>>, vector<1x8x384xf32>
    %120 = vector.shape_cast %119 : vector<1x8x384xf32> to vector<8x384xf32>
    %121 = arith.addf %118, %120 : vector<8x384xf32>
    %122 = vector.broadcast %0 : vector<1x384xf32> to vector<8x384xf32>
    %123 = arith.mulf %121, %122 : vector<8x384xf32>
    %c0_109 = arith.constant 0 : index
    %c0_110 = arith.constant 0 : index
    %c0_111 = arith.constant 0 : index
    %124 = vector.load %arg8[%c0_109, %c0_110, %c0_111] : memref<1x8x384xf32, #tpu.memory_space<vmem>>, vector<1x8x384xf32>
    %125 = vector.shape_cast %124 : vector<1x8x384xf32> to vector<8x384xf32>
    %126 = vector.shape_cast %123 : vector<8x384xf32> to vector<1x8x384xf32>
    tpu.vector_store %arg8[%c0_109, %c0_110, %c0_111], %126 {strides = array<i32>} : memref<1x8x384xf32, #tpu.memory_space<vmem>>, vector<1x8x384xf32>,
    return
  }
  func.func @transform_0(%arg0: i32) -> (i32, i32, i32) {
    %c0_i32 = arith.constant 0 : i32
    %c0_i32_0 = arith.constant 0 : i32
    %c0_i32_1 = arith.constant 0 : i32
    return %arg0, %c0_i32, %c0_i32_0 : i32, i32, i32
  }
  func.func @transform_1(%arg0: i32) -> (i32, i32) {
    %c0_i32 = arith.constant 0 : i32
    %c0_i32_0 = arith.constant 0 : i32
    %c0_i32_1 = arith.constant 0 : i32
    return %c0_i32, %c0_i32_0 : i32, i32
  }
  func.func @transform_2(%arg0: i32) -> (i32, i32) {
    %c0_i32 = arith.constant 0 : i32
    %c0_i32_0 = arith.constant 0 : i32
    %c0_i32_1 = arith.constant 0 : i32
    return %c0_i32, %c0_i32_0 : i32, i32
  }
  func.func @transform_3(%arg0: i32) -> (i32, i32) {
    %c0_i32 = arith.constant 0 : i32
    %c0_i32_0 = arith.constant 0 : i32
    %c0_i32_1 = arith.constant 0 : i32
    return %c0_i32, %c0_i32_0 : i32, i32
  }
  func.func @transform_4(%arg0: i32) -> (i32, i32) {
    %c0_i32 = arith.constant 0 : i32
    %c0_i32_0 = arith.constant 0 : i32
    %c0_i32_1 = arith.constant 0 : i32
    return %c0_i32, %c0_i32_0 : i32, i32
  }
  func.func @transform_5(%arg0: i32) -> (i32, i32) {
    %c0_i32 = arith.constant 0 : i32
    %c0_i32_0 = arith.constant 0 : i32
    %c0_i32_1 = arith.constant 0 : i32
    return %c0_i32, %c0_i32_0 : i32, i32
  }
  func.func @transform_6(%arg0: i32) -> (i32, i32) {
    %c0_i32 = arith.constant 0 : i32
    %c0_i32_0 = arith.constant 0 : i32
    %c0_i32_1 = arith.constant 0 : i32
    return %c0_i32, %c0_i32_0 : i32, i32
  }
  func.func @transform_7(%arg0: i32) -> (i32, i32, i32) {
    %c0_i32 = arith.constant 0 : i32
    %c0_i32_0 = arith.constant 0 : i32
    %c0_i32_1 = arith.constant 0 : i32
    return %arg0, %c0_i32, %c0_i32_0 : i32, i32, i32
  }
}

module attributes {stable_mosaic.version = 11 : i64} {
  func.func @kernel(%arg0: i32, %arg1: memref<1x4x384xf32, #tpu.memory_space<vmem>>, %arg2: memref<1x384xf32, #tpu.memory_space<vmem>>, %arg3: memref<4x2xf32, #tpu.memory_space<vmem>>, %arg4: memref<8x2xf32, #tpu.memory_space<vmem>>, %arg5: memref<8x2xf32, #tpu.memory_space<vmem>>, %arg6: memref<8x36xbf16, #tpu.memory_space<vmem>>, %arg7: memref<8x76xbf16, #tpu.memory_space<vmem>>, %arg8: memref<1x8x384xf32, #tpu.memory_space<vmem>>, %arg9: memref<4x640xbf16, #tpu.memory_space<vmem>>, %arg10: memref<36x384xbf16, #tpu.memory_space<vmem>>, %arg11: memref<8x640xbf16, #tpu.memory_space<vmem>>, %arg12: memref<76x384xbf16, #tpu.memory_space<vmem>>) attributes {dimension_semantics = [#tpu.dimension_semantics<parallel>], iteration_bounds = array<i64: 2>, scalar_prefetch = 0 : i64, scratch_operands = 4 : i64, tpu.core_type = #tpu.core_type<tc>, window_params = [{transform_indices = @transform_0, window_bounds = array<i64: 1, 4, 384>}, {pipeline_mode = #tpu.pipeline_mode<synchronous>, transform_indices = @transform_1, window_bounds = array<i64: 1, 384>}, {pipeline_mode = #tpu.pipeline_mode<synchronous>, transform_indices = @transform_2, window_bounds = array<i64: 4, 2>}, {pipeline_mode = #tpu.pipeline_mode<synchronous>, transform_indices = @transform_3, window_bounds = array<i64: 8, 2>}, {pipeline_mode = #tpu.pipeline_mode<synchronous>, transform_indices = @transform_4, window_bounds = array<i64: 8, 2>}, {pipeline_mode = #tpu.pipeline_mode<synchronous>, transform_indices = @transform_5, window_bounds = array<i64: 8, 36>}, {pipeline_mode = #tpu.pipeline_mode<synchronous>, transform_indices = @transform_6, window_bounds = array<i64: 8, 76>}, {transform_indices = @transform_7, window_bounds = array<i64: 1, 8, 384>}]} {
    %c0 = arith.constant 0 : index
    %c0_0 = arith.constant 0 : index
    %0 = vector.load %arg2[%c0, %c0_0] : memref<1x384xf32, #tpu.memory_space<vmem>>, vector<1x384xf32>
    %c0_1 = arith.constant 0 : index
    %c0_2 = arith.constant 0 : index
    %c0_3 = arith.constant 0 : index
    %1 = vector.load %arg1[%c0_1, %c0_2, %c0_3] : memref<1x4x384xf32, #tpu.memory_space<vmem>>, vector<1x4x384xf32>
    %2 = vector.shape_cast %1 : vector<1x4x384xf32> to vector<4x384xf32>
    %cst = arith.constant dense<0.000000e+00> : vector<4xf32>
    %3 = vector.multi_reduction <add>, %2, %cst [1] : vector<4x384xf32> to vector<4xf32>
    %4 = vector.shape_cast %3 : vector<4xf32> to vector<4x1xf32>
    %cst_4 = arith.constant 3.906250e-03 : f32
    %5 = vector.broadcast %cst_4 : f32 to vector<4x1xf32>
    %6 = arith.mulf %4, %5 : vector<4x1xf32>
    %7 = vector.broadcast %6 : vector<4x1xf32> to vector<4x384xf32>
    %8 = arith.subf %2, %7 : vector<4x384xf32>
    %9 = vector.broadcast %0 : vector<1x384xf32> to vector<4x384xf32>
    %10 = arith.mulf %8, %9 : vector<4x384xf32>
    %11 = arith.mulf %10, %10 : vector<4x384xf32>
    %cst_5 = arith.constant dense<0.000000e+00> : vector<4xf32>
    %12 = vector.multi_reduction <add>, %11, %cst_5 [1] : vector<4x384xf32> to vector<4xf32>
    %13 = vector.shape_cast %12 : vector<4xf32> to vector<4x1xf32>
    %cst_6 = arith.constant 3.906250e-03 : f32
    %14 = vector.broadcast %cst_6 : f32 to vector<4x1xf32>
    %15 = arith.mulf %13, %14 : vector<4x1xf32>
    %cst_7 = arith.constant 9.99999974E-6 : f32
    %16 = vector.broadcast %cst_7 : f32 to vector<4x1xf32>
    %17 = arith.addf %15, %16 : vector<4x1xf32>
    %18 = math.rsqrt %17 : vector<4x1xf32>
    %c0_8 = arith.constant 0 : index
    %c0_9 = arith.constant 0 : index
    %19 = vector.load %arg3[%c0_8, %c0_9] : memref<4x2xf32, #tpu.memory_space<vmem>>, vector<4x1xf32>
    %c0_10 = arith.constant 0 : index
    %c1 = arith.constant 1 : index
    %20 = vector.load %arg3[%c0_10, %c1] : memref<4x2xf32, #tpu.memory_space<vmem>>, vector<4x1xf32>
    %21 = arith.mulf %19, %18 : vector<4x1xf32>
    %22 = vector.broadcast %21 : vector<4x1xf32> to vector<4x384xf32>
    %23 = arith.mulf %10, %22 : vector<4x384xf32>
    %24 = vector.broadcast %20 : vector<4x1xf32> to vector<4x384xf32>
    %25 = arith.addf %23, %24 : vector<4x384xf32>
    %cst_11 = arith.constant 0.000000e+00 : f32
    %26 = vector.broadcast %cst_11 : f32 to vector<4x384xf32>
    %27 = arith.maximumf %25, %26 : vector<4x384xf32>
    %28 = vector.broadcast %0 : vector<1x384xf32> to vector<4x384xf32>
    %29 = arith.mulf %27, %28 : vector<4x384xf32>
    %cst_12 = arith.constant 0.000000e+00 : bf16
    %30 = vector.broadcast %cst_12 : bf16 to vector<4x128xbf16>
    %c0_13 = arith.constant 0 : index
    %c0_14 = arith.constant 0 : index
    %31 = vector.load %arg9[%c0_13, %c0_14] : memref<4x640xbf16, #tpu.memory_space<vmem>>, vector<4x128xbf16>
    tpu.vector_store %arg9[%c0_13, %c0_14], %30 {strides = array<i32>} : memref<4x640xbf16, #tpu.memory_space<vmem>>, vector<4x128xbf16>,
    %cst_15 = arith.constant 0.000000e+00 : bf16
    %32 = vector.broadcast %cst_15 : bf16 to vector<4x128xbf16>
    %c0_16 = arith.constant 0 : index
    %c512 = arith.constant 512 : index
    %33 = vector.load %arg9[%c0_16, %c512] : memref<4x640xbf16, #tpu.memory_space<vmem>>, vector<4x128xbf16>
    tpu.vector_store %arg9[%c0_16, %c512], %32 {strides = array<i32>} : memref<4x640xbf16, #tpu.memory_space<vmem>>, vector<4x128xbf16>,
    %34 = arith.truncf %29 : vector<4x384xf32> to vector<4x384xbf16>
    %c0_17 = arith.constant 0 : index
    %c128 = arith.constant 128 : index
    %35 = vector.load %arg9[%c0_17, %c128] : memref<4x640xbf16, #tpu.memory_space<vmem>>, vector<4x384xbf16>
    tpu.vector_store %arg9[%c0_17, %c128], %34 {strides = array<i32>} : memref<4x640xbf16, #tpu.memory_space<vmem>>, vector<4x384xbf16>,
    %c0_18 = arith.constant 0 : index
    %c109 = arith.constant 109 : index
    %36 = vector.load %arg9[%c0_18, %c109] : memref<4x640xbf16, #tpu.memory_space<vmem>>, vector<4x384xbf16>
    %c0_19 = arith.constant 0 : index
    %c0_20 = arith.constant 0 : index
    %37 = vector.load %arg10[%c0_19, %c0_20] : memref<36x384xbf16, #tpu.memory_space<vmem>>, vector<4x384xbf16>
    tpu.vector_store %arg10[%c0_19, %c0_20], %36 {strides = array<i32>} : memref<36x384xbf16, #tpu.memory_space<vmem>>, vector<4x384xbf16>,
    %c0_21 = arith.constant 0 : index
    %c110 = arith.constant 110 : index
    %38 = vector.load %arg9[%c0_21, %c110] : memref<4x640xbf16, #tpu.memory_space<vmem>>, vector<4x384xbf16>
    %c4 = arith.constant 4 : index
    %c0_22 = arith.constant 0 : index
    %39 = vector.load %arg10[%c4, %c0_22] : memref<36x384xbf16, #tpu.memory_space<vmem>>, vector<4x384xbf16>
    tpu.vector_store %arg10[%c4, %c0_22], %38 {strides = array<i32>} : memref<36x384xbf16, #tpu.memory_space<vmem>>, vector<4x384xbf16>,
    %c0_23 = arith.constant 0 : index
    %c111 = arith.constant 111 : index
    %40 = vector.load %arg9[%c0_23, %c111] : memref<4x640xbf16, #tpu.memory_space<vmem>>, vector<4x384xbf16>
    %c8 = arith.constant 8 : index
    %c0_24 = arith.constant 0 : index
    %41 = vector.load %arg10[%c8, %c0_24] : memref<36x384xbf16, #tpu.memory_space<vmem>>, vector<4x384xbf16>
    tpu.vector_store %arg10[%c8, %c0_24], %40 {strides = array<i32>} : memref<36x384xbf16, #tpu.memory_space<vmem>>, vector<4x384xbf16>,
    %c0_25 = arith.constant 0 : index
    %c127 = arith.constant 127 : index
    %42 = vector.load %arg9[%c0_25, %c127] : memref<4x640xbf16, #tpu.memory_space<vmem>>, vector<4x384xbf16>
    %c12 = arith.constant 12 : index
    %c0_26 = arith.constant 0 : index
    %43 = vector.load %arg10[%c12, %c0_26] : memref<36x384xbf16, #tpu.memory_space<vmem>>, vector<4x384xbf16>
    tpu.vector_store %arg10[%c12, %c0_26], %42 {strides = array<i32>} : memref<36x384xbf16, #tpu.memory_space<vmem>>, vector<4x384xbf16>,
    %c0_27 = arith.constant 0 : index
    %c128_28 = arith.constant 128 : index
    %44 = vector.load %arg9[%c0_27, %c128_28] : memref<4x640xbf16, #tpu.memory_space<vmem>>, vector<4x384xbf16>
    %c16 = arith.constant 16 : index
    %c0_29 = arith.constant 0 : index
    %45 = vector.load %arg10[%c16, %c0_29] : memref<36x384xbf16, #tpu.memory_space<vmem>>, vector<4x384xbf16>
    tpu.vector_store %arg10[%c16, %c0_29], %44 {strides = array<i32>} : memref<36x384xbf16, #tpu.memory_space<vmem>>, vector<4x384xbf16>,
    %c0_30 = arith.constant 0 : index
    %c129 = arith.constant 129 : index
    %46 = vector.load %arg9[%c0_30, %c129] : memref<4x640xbf16, #tpu.memory_space<vmem>>, vector<4x384xbf16>
    %c20 = arith.constant 20 : index
    %c0_31 = arith.constant 0 : index
    %47 = vector.load %arg10[%c20, %c0_31] : memref<36x384xbf16, #tpu.memory_space<vmem>>, vector<4x384xbf16>
    tpu.vector_store %arg10[%c20, %c0_31], %46 {strides = array<i32>} : memref<36x384xbf16, #tpu.memory_space<vmem>>, vector<4x384xbf16>,
    %c0_32 = arith.constant 0 : index
    %c145 = arith.constant 145 : index
    %48 = vector.load %arg9[%c0_32, %c145] : memref<4x640xbf16, #tpu.memory_space<vmem>>, vector<4x384xbf16>
    %c24 = arith.constant 24 : index
    %c0_33 = arith.constant 0 : index
    %49 = vector.load %arg10[%c24, %c0_33] : memref<36x384xbf16, #tpu.memory_space<vmem>>, vector<4x384xbf16>
    tpu.vector_store %arg10[%c24, %c0_33], %48 {strides = array<i32>} : memref<36x384xbf16, #tpu.memory_space<vmem>>, vector<4x384xbf16>,
    %c0_34 = arith.constant 0 : index
    %c146 = arith.constant 146 : index
    %50 = vector.load %arg9[%c0_34, %c146] : memref<4x640xbf16, #tpu.memory_space<vmem>>, vector<4x384xbf16>
    %c28 = arith.constant 28 : index
    %c0_35 = arith.constant 0 : index
    %51 = vector.load %arg10[%c28, %c0_35] : memref<36x384xbf16, #tpu.memory_space<vmem>>, vector<4x384xbf16>
    tpu.vector_store %arg10[%c28, %c0_35], %50 {strides = array<i32>} : memref<36x384xbf16, #tpu.memory_space<vmem>>, vector<4x384xbf16>,
    %c0_36 = arith.constant 0 : index
    %c147 = arith.constant 147 : index
    %52 = vector.load %arg9[%c0_36, %c147] : memref<4x640xbf16, #tpu.memory_space<vmem>>, vector<4x384xbf16>
    %c32 = arith.constant 32 : index
    %c0_37 = arith.constant 0 : index
    %53 = vector.load %arg10[%c32, %c0_37] : memref<36x384xbf16, #tpu.memory_space<vmem>>, vector<4x384xbf16>
    tpu.vector_store %arg10[%c32, %c0_37], %52 {strides = array<i32>} : memref<36x384xbf16, #tpu.memory_space<vmem>>, vector<4x384xbf16>,
    %c0_38 = arith.constant 0 : index
    %c0_39 = arith.constant 0 : index
    %54 = vector.load %arg6[%c0_38, %c0_39] : memref<8x36xbf16, #tpu.memory_space<vmem>>, vector<8x36xbf16>
    %c0_40 = arith.constant 0 : index
    %c0_41 = arith.constant 0 : index
    %55 = vector.load %arg10[%c0_40, %c0_41] : memref<36x384xbf16, #tpu.memory_space<vmem>>, vector<36x384xbf16>
    %cst_42 = arith.constant dense<0.000000e+00> : vector<8x384xf32>
    %56 = tpu.matmul %54, %55, %cst_42 {dimension_numbers = #tpu.dot_dimension_numbers<[1], [0], [0], [1], [0, 0, 1, 1], [], []>} : vector<8x36xbf16>, vector<36x384xbf16>, vector<8x384xf32> -> vector<8x384xf32>
    %c0_43 = arith.constant 0 : index
    %c0_44 = arith.constant 0 : index
    %57 = vector.load %arg5[%c0_43, %c0_44] : memref<8x2xf32, #tpu.memory_space<vmem>>, vector<8x1xf32>
    %58 = vector.broadcast %57 : vector<8x1xf32> to vector<8x384xf32>
    %59 = arith.addf %56, %58 : vector<8x384xf32>
    %60 = vector.broadcast %0 : vector<1x384xf32> to vector<8x384xf32>
    %61 = arith.mulf %59, %60 : vector<8x384xf32>
    %cst_45 = arith.constant dense<0.000000e+00> : vector<8xf32>
    %62 = vector.multi_reduction <add>, %61, %cst_45 [1] : vector<8x384xf32> to vector<8xf32>
    %63 = vector.shape_cast %62 : vector<8xf32> to vector<8x1xf32>
    %cst_46 = arith.constant 3.906250e-03 : f32
    %64 = vector.broadcast %cst_46 : f32 to vector<8x1xf32>
    %65 = arith.mulf %63, %64 : vector<8x1xf32>
    %66 = vector.broadcast %65 : vector<8x1xf32> to vector<8x384xf32>
    %67 = arith.subf %61, %66 : vector<8x384xf32>
    %68 = vector.broadcast %0 : vector<1x384xf32> to vector<8x384xf32>
    %69 = arith.mulf %67, %68 : vector<8x384xf32>
    %70 = arith.mulf %69, %69 : vector<8x384xf32>
    %cst_47 = arith.constant dense<0.000000e+00> : vector<8xf32>
    %71 = vector.multi_reduction <add>, %70, %cst_47 [1] : vector<8x384xf32> to vector<8xf32>
    %72 = vector.shape_cast %71 : vector<8xf32> to vector<8x1xf32>
    %cst_48 = arith.constant 3.906250e-03 : f32
    %73 = vector.broadcast %cst_48 : f32 to vector<8x1xf32>
    %74 = arith.mulf %72, %73 : vector<8x1xf32>
    %cst_49 = arith.constant 9.99999974E-6 : f32
    %75 = vector.broadcast %cst_49 : f32 to vector<8x1xf32>
    %76 = arith.addf %74, %75 : vector<8x1xf32>
    %77 = math.rsqrt %76 : vector<8x1xf32>
    %c0_50 = arith.constant 0 : index
    %c0_51 = arith.constant 0 : index
    %78 = vector.load %arg4[%c0_50, %c0_51] : memref<8x2xf32, #tpu.memory_space<vmem>>, vector<8x1xf32>
    %c0_52 = arith.constant 0 : index
    %c1_53 = arith.constant 1 : index
    %79 = vector.load %arg4[%c0_52, %c1_53] : memref<8x2xf32, #tpu.memory_space<vmem>>, vector<8x1xf32>
    %80 = arith.mulf %78, %77 : vector<8x1xf32>
    %81 = vector.broadcast %80 : vector<8x1xf32> to vector<8x384xf32>
    %82 = arith.mulf %69, %81 : vector<8x384xf32>
    %83 = vector.broadcast %79 : vector<8x1xf32> to vector<8x384xf32>
    %84 = arith.addf %82, %83 : vector<8x384xf32>
    %cst_54 = arith.constant 0.000000e+00 : f32
    %85 = vector.broadcast %cst_54 : f32 to vector<8x384xf32>
    %86 = arith.maximumf %84, %85 : vector<8x384xf32>
    %87 = vector.broadcast %0 : vector<1x384xf32> to vector<8x384xf32>
    %88 = arith.mulf %86, %87 : vector<8x384xf32>
    %cst_55 = arith.constant 0.000000e+00 : bf16
    %89 = vector.broadcast %cst_55 : bf16 to vector<8x128xbf16>
    %c0_56 = arith.constant 0 : index
    %c0_57 = arith.constant 0 : index
    %90 = vector.load %arg11[%c0_56, %c0_57] : memref<8x640xbf16, #tpu.memory_space<vmem>>, vector<8x128xbf16>
    tpu.vector_store %arg11[%c0_56, %c0_57], %89 {strides = array<i32>} : memref<8x640xbf16, #tpu.memory_space<vmem>>, vector<8x128xbf16>,
    %cst_58 = arith.constant 0.000000e+00 : bf16
    %91 = vector.broadcast %cst_58 : bf16 to vector<8x128xbf16>
    %c0_59 = arith.constant 0 : index
    %c512_60 = arith.constant 512 : index
    %92 = vector.load %arg11[%c0_59, %c512_60] : memref<8x640xbf16, #tpu.memory_space<vmem>>, vector<8x128xbf16>
    tpu.vector_store %arg11[%c0_59, %c512_60], %91 {strides = array<i32>} : memref<8x640xbf16, #tpu.memory_space<vmem>>, vector<8x128xbf16>,
    %93 = arith.truncf %88 : vector<8x384xf32> to vector<8x384xbf16>
    %c0_61 = arith.constant 0 : index
    %c128_62 = arith.constant 128 : index
    %94 = vector.load %arg11[%c0_61, %c128_62] : memref<8x640xbf16, #tpu.memory_space<vmem>>, vector<8x384xbf16>
    tpu.vector_store %arg11[%c0_61, %c128_62], %93 {strides = array<i32>} : memref<8x640xbf16, #tpu.memory_space<vmem>>, vector<8x384xbf16>,
    %c0_63 = arith.constant 0 : index
    %c109_64 = arith.constant 109 : index
    %95 = vector.load %arg11[%c0_63, %c109_64] : memref<8x640xbf16, #tpu.memory_space<vmem>>, vector<8x384xbf16>
    %c0_65 = arith.constant 0 : index
    %c0_66 = arith.constant 0 : index
    %96 = vector.load %arg12[%c0_65, %c0_66] : memref<76x384xbf16, #tpu.memory_space<vmem>>, vector<8x384xbf16>
    tpu.vector_store %arg12[%c0_65, %c0_66], %95 {strides = array<i32>} : memref<76x384xbf16, #tpu.memory_space<vmem>>, vector<8x384xbf16>,
    %c0_67 = arith.constant 0 : index
    %c110_68 = arith.constant 110 : index
    %97 = vector.load %arg11[%c0_67, %c110_68] : memref<8x640xbf16, #tpu.memory_space<vmem>>, vector<8x384xbf16>
    %c8_69 = arith.constant 8 : index
    %c0_70 = arith.constant 0 : index
    %98 = vector.load %arg12[%c8_69, %c0_70] : memref<76x384xbf16, #tpu.memory_space<vmem>>, vector<8x384xbf16>
    tpu.vector_store %arg12[%c8_69, %c0_70], %97 {strides = array<i32>} : memref<76x384xbf16, #tpu.memory_space<vmem>>, vector<8x384xbf16>,
    %c0_71 = arith.constant 0 : index
    %c111_72 = arith.constant 111 : index
    %99 = vector.load %arg11[%c0_71, %c111_72] : memref<8x640xbf16, #tpu.memory_space<vmem>>, vector<8x384xbf16>
    %c16_73 = arith.constant 16 : index
    %c0_74 = arith.constant 0 : index
    %100 = vector.load %arg12[%c16_73, %c0_74] : memref<76x384xbf16, #tpu.memory_space<vmem>>, vector<8x384xbf16>
    tpu.vector_store %arg12[%c16_73, %c0_74], %99 {strides = array<i32>} : memref<76x384xbf16, #tpu.memory_space<vmem>>, vector<8x384xbf16>,
    %c0_75 = arith.constant 0 : index
    %c127_76 = arith.constant 127 : index
    %101 = vector.load %arg11[%c0_75, %c127_76] : memref<8x640xbf16, #tpu.memory_space<vmem>>, vector<8x384xbf16>
    %c24_77 = arith.constant 24 : index
    %c0_78 = arith.constant 0 : index
    %102 = vector.load %arg12[%c24_77, %c0_78] : memref<76x384xbf16, #tpu.memory_space<vmem>>, vector<8x384xbf16>
    tpu.vector_store %arg12[%c24_77, %c0_78], %101 {strides = array<i32>} : memref<76x384xbf16, #tpu.memory_space<vmem>>, vector<8x384xbf16>,
    %c0_79 = arith.constant 0 : index
    %c128_80 = arith.constant 128 : index
    %103 = vector.load %arg11[%c0_79, %c128_80] : memref<8x640xbf16, #tpu.memory_space<vmem>>, vector<8x384xbf16>
    %c32_81 = arith.constant 32 : index
    %c0_82 = arith.constant 0 : index
    %104 = vector.load %arg12[%c32_81, %c0_82] : memref<76x384xbf16, #tpu.memory_space<vmem>>, vector<8x384xbf16>
    tpu.vector_store %arg12[%c32_81, %c0_82], %103 {strides = array<i32>} : memref<76x384xbf16, #tpu.memory_space<vmem>>, vector<8x384xbf16>,
    %c0_83 = arith.constant 0 : index
    %c129_84 = arith.constant 129 : index
    %105 = vector.load %arg11[%c0_83, %c129_84] : memref<8x640xbf16, #tpu.memory_space<vmem>>, vector<8x384xbf16>
    %c40 = arith.constant 40 : index
    %c0_85 = arith.constant 0 : index
    %106 = vector.load %arg12[%c40, %c0_85] : memref<76x384xbf16, #tpu.memory_space<vmem>>, vector<8x384xbf16>
    tpu.vector_store %arg12[%c40, %c0_85], %105 {strides = array<i32>} : memref<76x384xbf16, #tpu.memory_space<vmem>>, vector<8x384xbf16>,
    %c0_86 = arith.constant 0 : index
    %c145_87 = arith.constant 145 : index
    %107 = vector.load %arg11[%c0_86, %c145_87] : memref<8x640xbf16, #tpu.memory_space<vmem>>, vector<8x384xbf16>
    %c48 = arith.constant 48 : index
    %c0_88 = arith.constant 0 : index
    %108 = vector.load %arg12[%c48, %c0_88] : memref<76x384xbf16, #tpu.memory_space<vmem>>, vector<8x384xbf16>
    tpu.vector_store %arg12[%c48, %c0_88], %107 {strides = array<i32>} : memref<76x384xbf16, #tpu.memory_space<vmem>>, vector<8x384xbf16>,
    %c0_89 = arith.constant 0 : index
    %c146_90 = arith.constant 146 : index
    %109 = vector.load %arg11[%c0_89, %c146_90] : memref<8x640xbf16, #tpu.memory_space<vmem>>, vector<8x384xbf16>
    %c56 = arith.constant 56 : index
    %c0_91 = arith.constant 0 : index
    %110 = vector.load %arg12[%c56, %c0_91] : memref<76x384xbf16, #tpu.memory_space<vmem>>, vector<8x384xbf16>
    tpu.vector_store %arg12[%c56, %c0_91], %109 {strides = array<i32>} : memref<76x384xbf16, #tpu.memory_space<vmem>>, vector<8x384xbf16>,
    %c0_92 = arith.constant 0 : index
    %c147_93 = arith.constant 147 : index
    %111 = vector.load %arg11[%c0_92, %c147_93] : memref<8x640xbf16, #tpu.memory_space<vmem>>, vector<8x384xbf16>
    %c64 = arith.constant 64 : index
    %c0_94 = arith.constant 0 : index
    %112 = vector.load %arg12[%c64, %c0_94] : memref<76x384xbf16, #tpu.memory_space<vmem>>, vector<8x384xbf16>
    tpu.vector_store %arg12[%c64, %c0_94], %111 {strides = array<i32>} : memref<76x384xbf16, #tpu.memory_space<vmem>>, vector<8x384xbf16>,
    %c0_95 = arith.constant 0 : index
    %c0_96 = arith.constant 0 : index
    %c0_97 = arith.constant 0 : index
    %113 = vector.load %arg1[%c0_95, %c0_96, %c0_97] : memref<1x4x384xf32, #tpu.memory_space<vmem>>, vector<1x4x384xf32>
    %114 = vector.shape_cast %113 : vector<1x4x384xf32> to vector<4x384xf32>
    %115 = arith.truncf %114 : vector<4x384xf32> to vector<4x384xbf16>
    %c72 = arith.constant 72 : index
    %c0_98 = arith.constant 0 : index
    %116 = vector.load %arg12[%c72, %c0_98] : memref<76x384xbf16, #tpu.memory_space<vmem>>, vector<4x384xbf16>
    tpu.vector_store %arg12[%c72, %c0_98], %115 {strides = array<i32>} : memref<76x384xbf16, #tpu.memory_space<vmem>>, vector<4x384xbf16>,
    %c0_99 = arith.constant 0 : index
    %c0_100 = arith.constant 0 : index
    %117 = vector.load %arg7[%c0_99, %c0_100] : memref<8x76xbf16, #tpu.memory_space<vmem>>, vector<8x76xbf16>
    %c0_101 = arith.constant 0 : index
    %c0_102 = arith.constant 0 : index
    %118 = vector.load %arg12[%c0_101, %c0_102] : memref<76x384xbf16, #tpu.memory_space<vmem>>, vector<76x384xbf16>
    %cst_103 = arith.constant dense<0.000000e+00> : vector<8x384xf32>
    %119 = tpu.matmul %117, %118, %cst_103 {dimension_numbers = #tpu.dot_dimension_numbers<[1], [0], [0], [1], [0, 0, 1, 1], [], []>} : vector<8x76xbf16>, vector<76x384xbf16>, vector<8x384xf32> -> vector<8x384xf32>
    %c0_104 = arith.constant 0 : index
    %c1_105 = arith.constant 1 : index
    %120 = vector.load %arg5[%c0_104, %c1_105] : memref<8x2xf32, #tpu.memory_space<vmem>>, vector<8x1xf32>
    %121 = vector.broadcast %120 : vector<8x1xf32> to vector<8x384xf32>
    %122 = arith.addf %119, %121 : vector<8x384xf32>
    %123 = vector.broadcast %0 : vector<1x384xf32> to vector<8x384xf32>
    %124 = arith.mulf %122, %123 : vector<8x384xf32>
    %c0_106 = arith.constant 0 : index
    %c0_107 = arith.constant 0 : index
    %c0_108 = arith.constant 0 : index
    %125 = vector.load %arg8[%c0_106, %c0_107, %c0_108] : memref<1x8x384xf32, #tpu.memory_space<vmem>>, vector<1x8x384xf32>
    %126 = vector.shape_cast %125 : vector<1x8x384xf32> to vector<8x384xf32>
    %127 = vector.shape_cast %124 : vector<8x384xf32> to vector<1x8x384xf32>
    tpu.vector_store %arg8[%c0_106, %c0_107, %c0_108], %127 {strides = array<i32>} : memref<1x8x384xf32, #tpu.memory_space<vmem>>, vector<1x8x384xf32>,
    return
  }
  func.func @transform_0(%arg0: i32) -> (i32, i32, i32) {
    %c0_i32 = arith.constant 0 : i32
    %c0_i32_0 = arith.constant 0 : i32
    %c0_i32_1 = arith.constant 0 : i32
    return %arg0, %c0_i32, %c0_i32_0 : i32, i32, i32
  }
  func.func @transform_1(%arg0: i32) -> (i32, i32) {
    %c0_i32 = arith.constant 0 : i32
    %c0_i32_0 = arith.constant 0 : i32
    %c0_i32_1 = arith.constant 0 : i32
    return %c0_i32, %c0_i32_0 : i32, i32
  }
  func.func @transform_2(%arg0: i32) -> (i32, i32) {
    %c0_i32 = arith.constant 0 : i32
    %c0_i32_0 = arith.constant 0 : i32
    %c0_i32_1 = arith.constant 0 : i32
    return %c0_i32, %c0_i32_0 : i32, i32
  }
  func.func @transform_3(%arg0: i32) -> (i32, i32) {
    %c0_i32 = arith.constant 0 : i32
    %c0_i32_0 = arith.constant 0 : i32
    %c0_i32_1 = arith.constant 0 : i32
    return %c0_i32, %c0_i32_0 : i32, i32
  }
  func.func @transform_4(%arg0: i32) -> (i32, i32) {
    %c0_i32 = arith.constant 0 : i32
    %c0_i32_0 = arith.constant 0 : i32
    %c0_i32_1 = arith.constant 0 : i32
    return %c0_i32, %c0_i32_0 : i32, i32
  }
  func.func @transform_5(%arg0: i32) -> (i32, i32) {
    %c0_i32 = arith.constant 0 : i32
    %c0_i32_0 = arith.constant 0 : i32
    %c0_i32_1 = arith.constant 0 : i32
    return %c0_i32, %c0_i32_0 : i32, i32
  }
  func.func @transform_6(%arg0: i32) -> (i32, i32) {
    %c0_i32 = arith.constant 0 : i32
    %c0_i32_0 = arith.constant 0 : i32
    %c0_i32_1 = arith.constant 0 : i32
    return %c0_i32, %c0_i32_0 : i32, i32
  }
  func.func @transform_7(%arg0: i32) -> (i32, i32, i32) {
    %c0_i32 = arith.constant 0 : i32
    %c0_i32_0 = arith.constant 0 : i32
    %c0_i32_1 = arith.constant 0 : i32
    return %arg0, %c0_i32, %c0_i32_0 : i32, i32, i32
  }
}

module attributes {stable_mosaic.version = 11 : i64} {
  func.func @kernel(%arg0: i32, %arg1: memref<1x4x1280xf32, #tpu.memory_space<vmem>>, %arg2: memref<1x1280xf32, #tpu.memory_space<vmem>>, %arg3: memref<3x1xf32, #tpu.memory_space<vmem>>, %arg4: memref<3x36xbf16, #tpu.memory_space<vmem>>, %arg5: memref<1x3x1280xf32, #tpu.memory_space<vmem>>, %arg6: memref<4x1536xbf16, #tpu.memory_space<vmem>>, %arg7: memref<36x1280xbf16, #tpu.memory_space<vmem>>) attributes {dimension_semantics = [#tpu.dimension_semantics<parallel>], iteration_bounds = array<i64: 2>, scalar_prefetch = 0 : i64, scratch_operands = 2 : i64, tpu.core_type = #tpu.core_type<tc>, window_params = [{transform_indices = @transform_0, window_bounds = array<i64: 1, 4, 1280>}, {pipeline_mode = #tpu.pipeline_mode<synchronous>, transform_indices = @transform_1, window_bounds = array<i64: 1, 1280>}, {pipeline_mode = #tpu.pipeline_mode<synchronous>, transform_indices = @transform_2, window_bounds = array<i64: 3, 1>}, {pipeline_mode = #tpu.pipeline_mode<synchronous>, transform_indices = @transform_3, window_bounds = array<i64: 3, 36>}, {transform_indices = @transform_4, window_bounds = array<i64: 1, 3, 1280>}]} {
    %c0 = arith.constant 0 : index
    %c0_0 = arith.constant 0 : index
    %c0_1 = arith.constant 0 : index
    %0 = vector.load %arg1[%c0, %c0_0, %c0_1] : memref<1x4x1280xf32, #tpu.memory_space<vmem>>, vector<1x4x1280xf32>
    %1 = vector.shape_cast %0 : vector<1x4x1280xf32> to vector<4x1280xf32>
    %cst = arith.constant 0.000000e+00 : bf16
    %2 = vector.broadcast %cst : bf16 to vector<4x128xbf16>
    %c0_2 = arith.constant 0 : index
    %c0_3 = arith.constant 0 : index
    %3 = vector.load %arg6[%c0_2, %c0_3] : memref<4x1536xbf16, #tpu.memory_space<vmem>>, vector<4x128xbf16>
    tpu.vector_store %arg6[%c0_2, %c0_3], %2 {strides = array<i32>} : memref<4x1536xbf16, #tpu.memory_space<vmem>>, vector<4x128xbf16>,
    %cst_4 = arith.constant 0.000000e+00 : bf16
    %4 = vector.broadcast %cst_4 : bf16 to vector<4x128xbf16>
    %c0_5 = arith.constant 0 : index
    %c1408 = arith.constant 1408 : index
    %5 = vector.load %arg6[%c0_5, %c1408] : memref<4x1536xbf16, #tpu.memory_space<vmem>>, vector<4x128xbf16>
    tpu.vector_store %arg6[%c0_5, %c1408], %4 {strides = array<i32>} : memref<4x1536xbf16, #tpu.memory_space<vmem>>, vector<4x128xbf16>,
    %6 = arith.truncf %1 : vector<4x1280xf32> to vector<4x1280xbf16>
    %c0_6 = arith.constant 0 : index
    %c128 = arith.constant 128 : index
    %7 = vector.load %arg6[%c0_6, %c128] : memref<4x1536xbf16, #tpu.memory_space<vmem>>, vector<4x1280xbf16>
    tpu.vector_store %arg6[%c0_6, %c128], %6 {strides = array<i32>} : memref<4x1536xbf16, #tpu.memory_space<vmem>>, vector<4x1280xbf16>,
    %c0_7 = arith.constant 0 : index
    %c93 = arith.constant 93 : index
    %8 = vector.load %arg6[%c0_7, %c93] : memref<4x1536xbf16, #tpu.memory_space<vmem>>, vector<4x1280xbf16>
    %c0_8 = arith.constant 0 : index
    %c0_9 = arith.constant 0 : index
    %9 = vector.load %arg7[%c0_8, %c0_9] : memref<36x1280xbf16, #tpu.memory_space<vmem>>, vector<4x1280xbf16>
    tpu.vector_store %arg7[%c0_8, %c0_9], %8 {strides = array<i32>} : memref<36x1280xbf16, #tpu.memory_space<vmem>>, vector<4x1280xbf16>,
    %c0_10 = arith.constant 0 : index
    %c94 = arith.constant 94 : index
    %10 = vector.load %arg6[%c0_10, %c94] : memref<4x1536xbf16, #tpu.memory_space<vmem>>, vector<4x1280xbf16>
    %c4 = arith.constant 4 : index
    %c0_11 = arith.constant 0 : index
    %11 = vector.load %arg7[%c4, %c0_11] : memref<36x1280xbf16, #tpu.memory_space<vmem>>, vector<4x1280xbf16>
    tpu.vector_store %arg7[%c4, %c0_11], %10 {strides = array<i32>} : memref<36x1280xbf16, #tpu.memory_space<vmem>>, vector<4x1280xbf16>,
    %c0_12 = arith.constant 0 : index
    %c95 = arith.constant 95 : index
    %12 = vector.load %arg6[%c0_12, %c95] : memref<4x1536xbf16, #tpu.memory_space<vmem>>, vector<4x1280xbf16>
    %c8 = arith.constant 8 : index
    %c0_13 = arith.constant 0 : index
    %13 = vector.load %arg7[%c8, %c0_13] : memref<36x1280xbf16, #tpu.memory_space<vmem>>, vector<4x1280xbf16>
    tpu.vector_store %arg7[%c8, %c0_13], %12 {strides = array<i32>} : memref<36x1280xbf16, #tpu.memory_space<vmem>>, vector<4x1280xbf16>,
    %c0_14 = arith.constant 0 : index
    %c127 = arith.constant 127 : index
    %14 = vector.load %arg6[%c0_14, %c127] : memref<4x1536xbf16, #tpu.memory_space<vmem>>, vector<4x1280xbf16>
    %c12 = arith.constant 12 : index
    %c0_15 = arith.constant 0 : index
    %15 = vector.load %arg7[%c12, %c0_15] : memref<36x1280xbf16, #tpu.memory_space<vmem>>, vector<4x1280xbf16>
    tpu.vector_store %arg7[%c12, %c0_15], %14 {strides = array<i32>} : memref<36x1280xbf16, #tpu.memory_space<vmem>>, vector<4x1280xbf16>,
    %c0_16 = arith.constant 0 : index
    %c128_17 = arith.constant 128 : index
    %16 = vector.load %arg6[%c0_16, %c128_17] : memref<4x1536xbf16, #tpu.memory_space<vmem>>, vector<4x1280xbf16>
    %c16 = arith.constant 16 : index
    %c0_18 = arith.constant 0 : index
    %17 = vector.load %arg7[%c16, %c0_18] : memref<36x1280xbf16, #tpu.memory_space<vmem>>, vector<4x1280xbf16>
    tpu.vector_store %arg7[%c16, %c0_18], %16 {strides = array<i32>} : memref<36x1280xbf16, #tpu.memory_space<vmem>>, vector<4x1280xbf16>,
    %c0_19 = arith.constant 0 : index
    %c129 = arith.constant 129 : index
    %18 = vector.load %arg6[%c0_19, %c129] : memref<4x1536xbf16, #tpu.memory_space<vmem>>, vector<4x1280xbf16>
    %c20 = arith.constant 20 : index
    %c0_20 = arith.constant 0 : index
    %19 = vector.load %arg7[%c20, %c0_20] : memref<36x1280xbf16, #tpu.memory_space<vmem>>, vector<4x1280xbf16>
    tpu.vector_store %arg7[%c20, %c0_20], %18 {strides = array<i32>} : memref<36x1280xbf16, #tpu.memory_space<vmem>>, vector<4x1280xbf16>,
    %c0_21 = arith.constant 0 : index
    %c161 = arith.constant 161 : index
    %20 = vector.load %arg6[%c0_21, %c161] : memref<4x1536xbf16, #tpu.memory_space<vmem>>, vector<4x1280xbf16>
    %c24 = arith.constant 24 : index
    %c0_22 = arith.constant 0 : index
    %21 = vector.load %arg7[%c24, %c0_22] : memref<36x1280xbf16, #tpu.memory_space<vmem>>, vector<4x1280xbf16>
    tpu.vector_store %arg7[%c24, %c0_22], %20 {strides = array<i32>} : memref<36x1280xbf16, #tpu.memory_space<vmem>>, vector<4x1280xbf16>,
    %c0_23 = arith.constant 0 : index
    %c162 = arith.constant 162 : index
    %22 = vector.load %arg6[%c0_23, %c162] : memref<4x1536xbf16, #tpu.memory_space<vmem>>, vector<4x1280xbf16>
    %c28 = arith.constant 28 : index
    %c0_24 = arith.constant 0 : index
    %23 = vector.load %arg7[%c28, %c0_24] : memref<36x1280xbf16, #tpu.memory_space<vmem>>, vector<4x1280xbf16>
    tpu.vector_store %arg7[%c28, %c0_24], %22 {strides = array<i32>} : memref<36x1280xbf16, #tpu.memory_space<vmem>>, vector<4x1280xbf16>,
    %c0_25 = arith.constant 0 : index
    %c163 = arith.constant 163 : index
    %24 = vector.load %arg6[%c0_25, %c163] : memref<4x1536xbf16, #tpu.memory_space<vmem>>, vector<4x1280xbf16>
    %c32 = arith.constant 32 : index
    %c0_26 = arith.constant 0 : index
    %25 = vector.load %arg7[%c32, %c0_26] : memref<36x1280xbf16, #tpu.memory_space<vmem>>, vector<4x1280xbf16>
    tpu.vector_store %arg7[%c32, %c0_26], %24 {strides = array<i32>} : memref<36x1280xbf16, #tpu.memory_space<vmem>>, vector<4x1280xbf16>,
    %c0_27 = arith.constant 0 : index
    %c0_28 = arith.constant 0 : index
    %26 = vector.load %arg4[%c0_27, %c0_28] : memref<3x36xbf16, #tpu.memory_space<vmem>>, vector<3x36xbf16>
    %c0_29 = arith.constant 0 : index
    %c0_30 = arith.constant 0 : index
    %27 = vector.load %arg7[%c0_29, %c0_30] : memref<36x1280xbf16, #tpu.memory_space<vmem>>, vector<36x1280xbf16>
    %cst_31 = arith.constant dense<0.000000e+00> : vector<3x1280xf32>
    %28 = tpu.matmul %26, %27, %cst_31 {dimension_numbers = #tpu.dot_dimension_numbers<[1], [0], [0], [1], [0, 0, 1, 1], [], []>} : vector<3x36xbf16>, vector<36x1280xbf16>, vector<3x1280xf32> -> vector<3x1280xf32>
    %c0_32 = arith.constant 0 : index
    %c0_33 = arith.constant 0 : index
    %29 = vector.load %arg3[%c0_32, %c0_33] : memref<3x1xf32, #tpu.memory_space<vmem>>, vector<3x1xf32>
    %30 = vector.broadcast %29 : vector<3x1xf32> to vector<3x1280xf32>
    %31 = arith.addf %28, %30 : vector<3x1280xf32>
    %32 = arith.negf %31 : vector<3x1280xf32>
    %33 = math.exp %32 : vector<3x1280xf32>
    %cst_34 = arith.constant 1.000000e+00 : f32
    %34 = vector.broadcast %cst_34 : f32 to vector<3x1280xf32>
    %35 = arith.addf %34, %33 : vector<3x1280xf32>
    %36 = arith.divf %34, %35 : vector<3x1280xf32>
    %cst_35 = arith.constant 1.000000e+00 : f32
    %37 = vector.broadcast %cst_35 : f32 to vector<3x1280xf32>
    %38 = arith.mulf %36, %37 : vector<3x1280xf32>
    %c0_36 = arith.constant 0 : index
    %c0_37 = arith.constant 0 : index
    %39 = vector.load %arg2[%c0_36, %c0_37] : memref<1x1280xf32, #tpu.memory_space<vmem>>, vector<1x1280xf32>
    %40 = vector.broadcast %39 : vector<1x1280xf32> to vector<3x1280xf32>
    %41 = arith.mulf %38, %40 : vector<3x1280xf32>
    %c0_38 = arith.constant 0 : index
    %c0_39 = arith.constant 0 : index
    %c0_40 = arith.constant 0 : index
    %42 = vector.load %arg5[%c0_38, %c0_39, %c0_40] : memref<1x3x1280xf32, #tpu.memory_space<vmem>>, vector<1x3x1280xf32>
    %43 = vector.shape_cast %42 : vector<1x3x1280xf32> to vector<3x1280xf32>
    %44 = vector.shape_cast %41 : vector<3x1280xf32> to vector<1x3x1280xf32>
    tpu.vector_store %arg5[%c0_38, %c0_39, %c0_40], %44 {strides = array<i32>} : memref<1x3x1280xf32, #tpu.memory_space<vmem>>, vector<1x3x1280xf32>,
    return
  }
  func.func @transform_0(%arg0: i32) -> (i32, i32, i32) {
    %c0_i32 = arith.constant 0 : i32
    %c0_i32_0 = arith.constant 0 : i32
    %c0_i32_1 = arith.constant 0 : i32
    return %arg0, %c0_i32, %c0_i32_0 : i32, i32, i32
  }
  func.func @transform_1(%arg0: i32) -> (i32, i32) {
    %c0_i32 = arith.constant 0 : i32
    %c0_i32_0 = arith.constant 0 : i32
    %c0_i32_1 = arith.constant 0 : i32
    return %c0_i32, %c0_i32_0 : i32, i32
  }
  func.func @transform_2(%arg0: i32) -> (i32, i32) {
    %c0_i32 = arith.constant 0 : i32
    %c0_i32_0 = arith.constant 0 : i32
    %c0_i32_1 = arith.constant 0 : i32
    return %c0_i32, %c0_i32_0 : i32, i32
  }
  func.func @transform_3(%arg0: i32) -> (i32, i32) {
    %c0_i32 = arith.constant 0 : i32
    %c0_i32_0 = arith.constant 0 : i32
    %c0_i32_1 = arith.constant 0 : i32
    return %c0_i32, %c0_i32_0 : i32, i32
  }
  func.func @transform_4(%arg0: i32) -> (i32, i32, i32) {
    %c0_i32 = arith.constant 0 : i32
    %c0_i32_0 = arith.constant 0 : i32
    %c0_i32_1 = arith.constant 0 : i32
    return %arg0, %c0_i32, %c0_i32_0 : i32, i32, i32
  }
}

module attributes {stable_mosaic.version = 11 : i64} {
  func.func @kernel(%arg0: i32, %arg1: memref<1x8x1280xf32, #tpu.memory_space<vmem>>, %arg2: memref<1x1280xf32, #tpu.memory_space<vmem>>, %arg3: memref<8x2xf32, #tpu.memory_space<vmem>>, %arg4: memref<4x2xf32, #tpu.memory_space<vmem>>, %arg5: memref<4x2xf32, #tpu.memory_space<vmem>>, %arg6: memref<4x72xbf16, #tpu.memory_space<vmem>>, %arg7: memref<4x44xbf16, #tpu.memory_space<vmem>>, %arg8: memref<1x4x1280xf32, #tpu.memory_space<vmem>>, %arg9: memref<8x1536xbf16, #tpu.memory_space<vmem>>, %arg10: memref<72x1280xbf16, #tpu.memory_space<vmem>>, %arg11: memref<4x1536xbf16, #tpu.memory_space<vmem>>, %arg12: memref<44x1280xbf16, #tpu.memory_space<vmem>>) attributes {dimension_semantics = [#tpu.dimension_semantics<parallel>], iteration_bounds = array<i64: 2>, scalar_prefetch = 0 : i64, scratch_operands = 4 : i64, tpu.core_type = #tpu.core_type<tc>, window_params = [{transform_indices = @transform_0, window_bounds = array<i64: 1, 8, 1280>}, {pipeline_mode = #tpu.pipeline_mode<synchronous>, transform_indices = @transform_1, window_bounds = array<i64: 1, 1280>}, {pipeline_mode = #tpu.pipeline_mode<synchronous>, transform_indices = @transform_2, window_bounds = array<i64: 8, 2>}, {pipeline_mode = #tpu.pipeline_mode<synchronous>, transform_indices = @transform_3, window_bounds = array<i64: 4, 2>}, {pipeline_mode = #tpu.pipeline_mode<synchronous>, transform_indices = @transform_4, window_bounds = array<i64: 4, 2>}, {pipeline_mode = #tpu.pipeline_mode<synchronous>, transform_indices = @transform_5, window_bounds = array<i64: 4, 72>}, {pipeline_mode = #tpu.pipeline_mode<synchronous>, transform_indices = @transform_6, window_bounds = array<i64: 4, 44>}, {transform_indices = @transform_7, window_bounds = array<i64: 1, 4, 1280>}]} {
    %c0 = arith.constant 0 : index
    %c0_0 = arith.constant 0 : index
    %0 = vector.load %arg2[%c0, %c0_0] : memref<1x1280xf32, #tpu.memory_space<vmem>>, vector<1x1280xf32>
    %c0_1 = arith.constant 0 : index
    %c0_2 = arith.constant 0 : index
    %c0_3 = arith.constant 0 : index
    %1 = vector.load %arg1[%c0_1, %c0_2, %c0_3] : memref<1x8x1280xf32, #tpu.memory_space<vmem>>, vector<1x8x1280xf32>
    %2 = vector.shape_cast %1 : vector<1x8x1280xf32> to vector<8x1280xf32>
    %cst = arith.constant dense<0.000000e+00> : vector<8xf32>
    %3 = vector.multi_reduction <add>, %2, %cst [1] : vector<8x1280xf32> to vector<8xf32>
    %4 = vector.shape_cast %3 : vector<8xf32> to vector<8x1xf32>
    %cst_4 = arith.constant 9.765625E-4 : f32
    %5 = vector.broadcast %cst_4 : f32 to vector<8x1xf32>
    %6 = arith.mulf %4, %5 : vector<8x1xf32>
    %7 = vector.broadcast %6 : vector<8x1xf32> to vector<8x1280xf32>
    %8 = arith.subf %2, %7 : vector<8x1280xf32>
    %9 = vector.broadcast %0 : vector<1x1280xf32> to vector<8x1280xf32>
    %10 = arith.mulf %8, %9 : vector<8x1280xf32>
    %11 = arith.mulf %10, %10 : vector<8x1280xf32>
    %cst_5 = arith.constant dense<0.000000e+00> : vector<8xf32>
    %12 = vector.multi_reduction <add>, %11, %cst_5 [1] : vector<8x1280xf32> to vector<8xf32>
    %13 = vector.shape_cast %12 : vector<8xf32> to vector<8x1xf32>
    %cst_6 = arith.constant 9.765625E-4 : f32
    %14 = vector.broadcast %cst_6 : f32 to vector<8x1xf32>
    %15 = arith.mulf %13, %14 : vector<8x1xf32>
    %cst_7 = arith.constant 9.99999974E-6 : f32
    %16 = vector.broadcast %cst_7 : f32 to vector<8x1xf32>
    %17 = arith.addf %15, %16 : vector<8x1xf32>
    %18 = math.rsqrt %17 : vector<8x1xf32>
    %c0_8 = arith.constant 0 : index
    %c0_9 = arith.constant 0 : index
    %19 = vector.load %arg3[%c0_8, %c0_9] : memref<8x2xf32, #tpu.memory_space<vmem>>, vector<8x1xf32>
    %c0_10 = arith.constant 0 : index
    %c1 = arith.constant 1 : index
    %20 = vector.load %arg3[%c0_10, %c1] : memref<8x2xf32, #tpu.memory_space<vmem>>, vector<8x1xf32>
    %21 = arith.mulf %19, %18 : vector<8x1xf32>
    %22 = vector.broadcast %21 : vector<8x1xf32> to vector<8x1280xf32>
    %23 = arith.mulf %10, %22 : vector<8x1280xf32>
    %24 = vector.broadcast %20 : vector<8x1xf32> to vector<8x1280xf32>
    %25 = arith.addf %23, %24 : vector<8x1280xf32>
    %cst_11 = arith.constant 0.000000e+00 : f32
    %26 = vector.broadcast %cst_11 : f32 to vector<8x1280xf32>
    %27 = arith.maximumf %25, %26 : vector<8x1280xf32>
    %28 = vector.broadcast %0 : vector<1x1280xf32> to vector<8x1280xf32>
    %29 = arith.mulf %27, %28 : vector<8x1280xf32>
    %cst_12 = arith.constant 0.000000e+00 : bf16
    %30 = vector.broadcast %cst_12 : bf16 to vector<8x128xbf16>
    %c0_13 = arith.constant 0 : index
    %c0_14 = arith.constant 0 : index
    %31 = vector.load %arg9[%c0_13, %c0_14] : memref<8x1536xbf16, #tpu.memory_space<vmem>>, vector<8x128xbf16>
    tpu.vector_store %arg9[%c0_13, %c0_14], %30 {strides = array<i32>} : memref<8x1536xbf16, #tpu.memory_space<vmem>>, vector<8x128xbf16>,
    %cst_15 = arith.constant 0.000000e+00 : bf16
    %32 = vector.broadcast %cst_15 : bf16 to vector<8x128xbf16>
    %c0_16 = arith.constant 0 : index
    %c1408 = arith.constant 1408 : index
    %33 = vector.load %arg9[%c0_16, %c1408] : memref<8x1536xbf16, #tpu.memory_space<vmem>>, vector<8x128xbf16>
    tpu.vector_store %arg9[%c0_16, %c1408], %32 {strides = array<i32>} : memref<8x1536xbf16, #tpu.memory_space<vmem>>, vector<8x128xbf16>,
    %34 = arith.truncf %29 : vector<8x1280xf32> to vector<8x1280xbf16>
    %c0_17 = arith.constant 0 : index
    %c128 = arith.constant 128 : index
    %35 = vector.load %arg9[%c0_17, %c128] : memref<8x1536xbf16, #tpu.memory_space<vmem>>, vector<8x1280xbf16>
    tpu.vector_store %arg9[%c0_17, %c128], %34 {strides = array<i32>} : memref<8x1536xbf16, #tpu.memory_space<vmem>>, vector<8x1280xbf16>,
    %c0_18 = arith.constant 0 : index
    %c93 = arith.constant 93 : index
    %36 = vector.load %arg9[%c0_18, %c93] : memref<8x1536xbf16, #tpu.memory_space<vmem>>, vector<8x1280xbf16>
    %c0_19 = arith.constant 0 : index
    %c0_20 = arith.constant 0 : index
    %37 = vector.load %arg10[%c0_19, %c0_20] : memref<72x1280xbf16, #tpu.memory_space<vmem>>, vector<8x1280xbf16>
    tpu.vector_store %arg10[%c0_19, %c0_20], %36 {strides = array<i32>} : memref<72x1280xbf16, #tpu.memory_space<vmem>>, vector<8x1280xbf16>,
    %c0_21 = arith.constant 0 : index
    %c94 = arith.constant 94 : index
    %38 = vector.load %arg9[%c0_21, %c94] : memref<8x1536xbf16, #tpu.memory_space<vmem>>, vector<8x1280xbf16>
    %c8 = arith.constant 8 : index
    %c0_22 = arith.constant 0 : index
    %39 = vector.load %arg10[%c8, %c0_22] : memref<72x1280xbf16, #tpu.memory_space<vmem>>, vector<8x1280xbf16>
    tpu.vector_store %arg10[%c8, %c0_22], %38 {strides = array<i32>} : memref<72x1280xbf16, #tpu.memory_space<vmem>>, vector<8x1280xbf16>,
    %c0_23 = arith.constant 0 : index
    %c95 = arith.constant 95 : index
    %40 = vector.load %arg9[%c0_23, %c95] : memref<8x1536xbf16, #tpu.memory_space<vmem>>, vector<8x1280xbf16>
    %c16 = arith.constant 16 : index
    %c0_24 = arith.constant 0 : index
    %41 = vector.load %arg10[%c16, %c0_24] : memref<72x1280xbf16, #tpu.memory_space<vmem>>, vector<8x1280xbf16>
    tpu.vector_store %arg10[%c16, %c0_24], %40 {strides = array<i32>} : memref<72x1280xbf16, #tpu.memory_space<vmem>>, vector<8x1280xbf16>,
    %c0_25 = arith.constant 0 : index
    %c127 = arith.constant 127 : index
    %42 = vector.load %arg9[%c0_25, %c127] : memref<8x1536xbf16, #tpu.memory_space<vmem>>, vector<8x1280xbf16>
    %c24 = arith.constant 24 : index
    %c0_26 = arith.constant 0 : index
    %43 = vector.load %arg10[%c24, %c0_26] : memref<72x1280xbf16, #tpu.memory_space<vmem>>, vector<8x1280xbf16>
    tpu.vector_store %arg10[%c24, %c0_26], %42 {strides = array<i32>} : memref<72x1280xbf16, #tpu.memory_space<vmem>>, vector<8x1280xbf16>,
    %c0_27 = arith.constant 0 : index
    %c128_28 = arith.constant 128 : index
    %44 = vector.load %arg9[%c0_27, %c128_28] : memref<8x1536xbf16, #tpu.memory_space<vmem>>, vector<8x1280xbf16>
    %c32 = arith.constant 32 : index
    %c0_29 = arith.constant 0 : index
    %45 = vector.load %arg10[%c32, %c0_29] : memref<72x1280xbf16, #tpu.memory_space<vmem>>, vector<8x1280xbf16>
    tpu.vector_store %arg10[%c32, %c0_29], %44 {strides = array<i32>} : memref<72x1280xbf16, #tpu.memory_space<vmem>>, vector<8x1280xbf16>,
    %c0_30 = arith.constant 0 : index
    %c129 = arith.constant 129 : index
    %46 = vector.load %arg9[%c0_30, %c129] : memref<8x1536xbf16, #tpu.memory_space<vmem>>, vector<8x1280xbf16>
    %c40 = arith.constant 40 : index
    %c0_31 = arith.constant 0 : index
    %47 = vector.load %arg10[%c40, %c0_31] : memref<72x1280xbf16, #tpu.memory_space<vmem>>, vector<8x1280xbf16>
    tpu.vector_store %arg10[%c40, %c0_31], %46 {strides = array<i32>} : memref<72x1280xbf16, #tpu.memory_space<vmem>>, vector<8x1280xbf16>,
    %c0_32 = arith.constant 0 : index
    %c161 = arith.constant 161 : index
    %48 = vector.load %arg9[%c0_32, %c161] : memref<8x1536xbf16, #tpu.memory_space<vmem>>, vector<8x1280xbf16>
    %c48 = arith.constant 48 : index
    %c0_33 = arith.constant 0 : index
    %49 = vector.load %arg10[%c48, %c0_33] : memref<72x1280xbf16, #tpu.memory_space<vmem>>, vector<8x1280xbf16>
    tpu.vector_store %arg10[%c48, %c0_33], %48 {strides = array<i32>} : memref<72x1280xbf16, #tpu.memory_space<vmem>>, vector<8x1280xbf16>,
    %c0_34 = arith.constant 0 : index
    %c162 = arith.constant 162 : index
    %50 = vector.load %arg9[%c0_34, %c162] : memref<8x1536xbf16, #tpu.memory_space<vmem>>, vector<8x1280xbf16>
    %c56 = arith.constant 56 : index
    %c0_35 = arith.constant 0 : index
    %51 = vector.load %arg10[%c56, %c0_35] : memref<72x1280xbf16, #tpu.memory_space<vmem>>, vector<8x1280xbf16>
    tpu.vector_store %arg10[%c56, %c0_35], %50 {strides = array<i32>} : memref<72x1280xbf16, #tpu.memory_space<vmem>>, vector<8x1280xbf16>,
    %c0_36 = arith.constant 0 : index
    %c163 = arith.constant 163 : index
    %52 = vector.load %arg9[%c0_36, %c163] : memref<8x1536xbf16, #tpu.memory_space<vmem>>, vector<8x1280xbf16>
    %c64 = arith.constant 64 : index
    %c0_37 = arith.constant 0 : index
    %53 = vector.load %arg10[%c64, %c0_37] : memref<72x1280xbf16, #tpu.memory_space<vmem>>, vector<8x1280xbf16>
    tpu.vector_store %arg10[%c64, %c0_37], %52 {strides = array<i32>} : memref<72x1280xbf16, #tpu.memory_space<vmem>>, vector<8x1280xbf16>,
    %c0_38 = arith.constant 0 : index
    %c0_39 = arith.constant 0 : index
    %54 = vector.load %arg6[%c0_38, %c0_39] : memref<4x72xbf16, #tpu.memory_space<vmem>>, vector<4x72xbf16>
    %c0_40 = arith.constant 0 : index
    %c0_41 = arith.constant 0 : index
    %55 = vector.load %arg10[%c0_40, %c0_41] : memref<72x1280xbf16, #tpu.memory_space<vmem>>, vector<72x1280xbf16>
    %cst_42 = arith.constant dense<0.000000e+00> : vector<4x1280xf32>
    %56 = tpu.matmul %54, %55, %cst_42 {dimension_numbers = #tpu.dot_dimension_numbers<[1], [0], [0], [1], [0, 0, 1, 1], [], []>} : vector<4x72xbf16>, vector<72x1280xbf16>, vector<4x1280xf32> -> vector<4x1280xf32>
    %c0_43 = arith.constant 0 : index
    %c0_44 = arith.constant 0 : index
    %57 = vector.load %arg5[%c0_43, %c0_44] : memref<4x2xf32, #tpu.memory_space<vmem>>, vector<4x1xf32>
    %58 = vector.broadcast %57 : vector<4x1xf32> to vector<4x1280xf32>
    %59 = arith.addf %56, %58 : vector<4x1280xf32>
    %60 = vector.broadcast %0 : vector<1x1280xf32> to vector<4x1280xf32>
    %61 = arith.mulf %59, %60 : vector<4x1280xf32>
    %cst_45 = arith.constant dense<0.000000e+00> : vector<4xf32>
    %62 = vector.multi_reduction <add>, %61, %cst_45 [1] : vector<4x1280xf32> to vector<4xf32>
    %63 = vector.shape_cast %62 : vector<4xf32> to vector<4x1xf32>
    %cst_46 = arith.constant 9.765625E-4 : f32
    %64 = vector.broadcast %cst_46 : f32 to vector<4x1xf32>
    %65 = arith.mulf %63, %64 : vector<4x1xf32>
    %66 = vector.broadcast %65 : vector<4x1xf32> to vector<4x1280xf32>
    %67 = arith.subf %61, %66 : vector<4x1280xf32>
    %68 = vector.broadcast %0 : vector<1x1280xf32> to vector<4x1280xf32>
    %69 = arith.mulf %67, %68 : vector<4x1280xf32>
    %70 = arith.mulf %69, %69 : vector<4x1280xf32>
    %cst_47 = arith.constant dense<0.000000e+00> : vector<4xf32>
    %71 = vector.multi_reduction <add>, %70, %cst_47 [1] : vector<4x1280xf32> to vector<4xf32>
    %72 = vector.shape_cast %71 : vector<4xf32> to vector<4x1xf32>
    %cst_48 = arith.constant 9.765625E-4 : f32
    %73 = vector.broadcast %cst_48 : f32 to vector<4x1xf32>
    %74 = arith.mulf %72, %73 : vector<4x1xf32>
    %cst_49 = arith.constant 9.99999974E-6 : f32
    %75 = vector.broadcast %cst_49 : f32 to vector<4x1xf32>
    %76 = arith.addf %74, %75 : vector<4x1xf32>
    %77 = math.rsqrt %76 : vector<4x1xf32>
    %c0_50 = arith.constant 0 : index
    %c0_51 = arith.constant 0 : index
    %78 = vector.load %arg4[%c0_50, %c0_51] : memref<4x2xf32, #tpu.memory_space<vmem>>, vector<4x1xf32>
    %c0_52 = arith.constant 0 : index
    %c1_53 = arith.constant 1 : index
    %79 = vector.load %arg4[%c0_52, %c1_53] : memref<4x2xf32, #tpu.memory_space<vmem>>, vector<4x1xf32>
    %80 = arith.mulf %78, %77 : vector<4x1xf32>
    %81 = vector.broadcast %80 : vector<4x1xf32> to vector<4x1280xf32>
    %82 = arith.mulf %69, %81 : vector<4x1280xf32>
    %83 = vector.broadcast %79 : vector<4x1xf32> to vector<4x1280xf32>
    %84 = arith.addf %82, %83 : vector<4x1280xf32>
    %cst_54 = arith.constant 0.000000e+00 : f32
    %85 = vector.broadcast %cst_54 : f32 to vector<4x1280xf32>
    %86 = arith.maximumf %84, %85 : vector<4x1280xf32>
    %87 = vector.broadcast %0 : vector<1x1280xf32> to vector<4x1280xf32>
    %88 = arith.mulf %86, %87 : vector<4x1280xf32>
    %cst_55 = arith.constant 0.000000e+00 : bf16
    %89 = vector.broadcast %cst_55 : bf16 to vector<4x128xbf16>
    %c0_56 = arith.constant 0 : index
    %c0_57 = arith.constant 0 : index
    %90 = vector.load %arg11[%c0_56, %c0_57] : memref<4x1536xbf16, #tpu.memory_space<vmem>>, vector<4x128xbf16>
    tpu.vector_store %arg11[%c0_56, %c0_57], %89 {strides = array<i32>} : memref<4x1536xbf16, #tpu.memory_space<vmem>>, vector<4x128xbf16>,
    %cst_58 = arith.constant 0.000000e+00 : bf16
    %91 = vector.broadcast %cst_58 : bf16 to vector<4x128xbf16>
    %c0_59 = arith.constant 0 : index
    %c1408_60 = arith.constant 1408 : index
    %92 = vector.load %arg11[%c0_59, %c1408_60] : memref<4x1536xbf16, #tpu.memory_space<vmem>>, vector<4x128xbf16>
    tpu.vector_store %arg11[%c0_59, %c1408_60], %91 {strides = array<i32>} : memref<4x1536xbf16, #tpu.memory_space<vmem>>, vector<4x128xbf16>,
    %93 = arith.truncf %88 : vector<4x1280xf32> to vector<4x1280xbf16>
    %c0_61 = arith.constant 0 : index
    %c128_62 = arith.constant 128 : index
    %94 = vector.load %arg11[%c0_61, %c128_62] : memref<4x1536xbf16, #tpu.memory_space<vmem>>, vector<4x1280xbf16>
    tpu.vector_store %arg11[%c0_61, %c128_62], %93 {strides = array<i32>} : memref<4x1536xbf16, #tpu.memory_space<vmem>>, vector<4x1280xbf16>,
    %c0_63 = arith.constant 0 : index
    %c93_64 = arith.constant 93 : index
    %95 = vector.load %arg11[%c0_63, %c93_64] : memref<4x1536xbf16, #tpu.memory_space<vmem>>, vector<4x1280xbf16>
    %c0_65 = arith.constant 0 : index
    %c0_66 = arith.constant 0 : index
    %96 = vector.load %arg12[%c0_65, %c0_66] : memref<44x1280xbf16, #tpu.memory_space<vmem>>, vector<4x1280xbf16>
    tpu.vector_store %arg12[%c0_65, %c0_66], %95 {strides = array<i32>} : memref<44x1280xbf16, #tpu.memory_space<vmem>>, vector<4x1280xbf16>,
    %c0_67 = arith.constant 0 : index
    %c94_68 = arith.constant 94 : index
    %97 = vector.load %arg11[%c0_67, %c94_68] : memref<4x1536xbf16, #tpu.memory_space<vmem>>, vector<4x1280xbf16>
    %c4 = arith.constant 4 : index
    %c0_69 = arith.constant 0 : index
    %98 = vector.load %arg12[%c4, %c0_69] : memref<44x1280xbf16, #tpu.memory_space<vmem>>, vector<4x1280xbf16>
    tpu.vector_store %arg12[%c4, %c0_69], %97 {strides = array<i32>} : memref<44x1280xbf16, #tpu.memory_space<vmem>>, vector<4x1280xbf16>,
    %c0_70 = arith.constant 0 : index
    %c95_71 = arith.constant 95 : index
    %99 = vector.load %arg11[%c0_70, %c95_71] : memref<4x1536xbf16, #tpu.memory_space<vmem>>, vector<4x1280xbf16>
    %c8_72 = arith.constant 8 : index
    %c0_73 = arith.constant 0 : index
    %100 = vector.load %arg12[%c8_72, %c0_73] : memref<44x1280xbf16, #tpu.memory_space<vmem>>, vector<4x1280xbf16>
    tpu.vector_store %arg12[%c8_72, %c0_73], %99 {strides = array<i32>} : memref<44x1280xbf16, #tpu.memory_space<vmem>>, vector<4x1280xbf16>,
    %c0_74 = arith.constant 0 : index
    %c127_75 = arith.constant 127 : index
    %101 = vector.load %arg11[%c0_74, %c127_75] : memref<4x1536xbf16, #tpu.memory_space<vmem>>, vector<4x1280xbf16>
    %c12 = arith.constant 12 : index
    %c0_76 = arith.constant 0 : index
    %102 = vector.load %arg12[%c12, %c0_76] : memref<44x1280xbf16, #tpu.memory_space<vmem>>, vector<4x1280xbf16>
    tpu.vector_store %arg12[%c12, %c0_76], %101 {strides = array<i32>} : memref<44x1280xbf16, #tpu.memory_space<vmem>>, vector<4x1280xbf16>,
    %c0_77 = arith.constant 0 : index
    %c128_78 = arith.constant 128 : index
    %103 = vector.load %arg11[%c0_77, %c128_78] : memref<4x1536xbf16, #tpu.memory_space<vmem>>, vector<4x1280xbf16>
    %c16_79 = arith.constant 16 : index
    %c0_80 = arith.constant 0 : index
    %104 = vector.load %arg12[%c16_79, %c0_80] : memref<44x1280xbf16, #tpu.memory_space<vmem>>, vector<4x1280xbf16>
    tpu.vector_store %arg12[%c16_79, %c0_80], %103 {strides = array<i32>} : memref<44x1280xbf16, #tpu.memory_space<vmem>>, vector<4x1280xbf16>,
    %c0_81 = arith.constant 0 : index
    %c129_82 = arith.constant 129 : index
    %105 = vector.load %arg11[%c0_81, %c129_82] : memref<4x1536xbf16, #tpu.memory_space<vmem>>, vector<4x1280xbf16>
    %c20 = arith.constant 20 : index
    %c0_83 = arith.constant 0 : index
    %106 = vector.load %arg12[%c20, %c0_83] : memref<44x1280xbf16, #tpu.memory_space<vmem>>, vector<4x1280xbf16>
    tpu.vector_store %arg12[%c20, %c0_83], %105 {strides = array<i32>} : memref<44x1280xbf16, #tpu.memory_space<vmem>>, vector<4x1280xbf16>,
    %c0_84 = arith.constant 0 : index
    %c161_85 = arith.constant 161 : index
    %107 = vector.load %arg11[%c0_84, %c161_85] : memref<4x1536xbf16, #tpu.memory_space<vmem>>, vector<4x1280xbf16>
    %c24_86 = arith.constant 24 : index
    %c0_87 = arith.constant 0 : index
    %108 = vector.load %arg12[%c24_86, %c0_87] : memref<44x1280xbf16, #tpu.memory_space<vmem>>, vector<4x1280xbf16>
    tpu.vector_store %arg12[%c24_86, %c0_87], %107 {strides = array<i32>} : memref<44x1280xbf16, #tpu.memory_space<vmem>>, vector<4x1280xbf16>,
    %c0_88 = arith.constant 0 : index
    %c162_89 = arith.constant 162 : index
    %109 = vector.load %arg11[%c0_88, %c162_89] : memref<4x1536xbf16, #tpu.memory_space<vmem>>, vector<4x1280xbf16>
    %c28 = arith.constant 28 : index
    %c0_90 = arith.constant 0 : index
    %110 = vector.load %arg12[%c28, %c0_90] : memref<44x1280xbf16, #tpu.memory_space<vmem>>, vector<4x1280xbf16>
    tpu.vector_store %arg12[%c28, %c0_90], %109 {strides = array<i32>} : memref<44x1280xbf16, #tpu.memory_space<vmem>>, vector<4x1280xbf16>,
    %c0_91 = arith.constant 0 : index
    %c163_92 = arith.constant 163 : index
    %111 = vector.load %arg11[%c0_91, %c163_92] : memref<4x1536xbf16, #tpu.memory_space<vmem>>, vector<4x1280xbf16>
    %c32_93 = arith.constant 32 : index
    %c0_94 = arith.constant 0 : index
    %112 = vector.load %arg12[%c32_93, %c0_94] : memref<44x1280xbf16, #tpu.memory_space<vmem>>, vector<4x1280xbf16>
    tpu.vector_store %arg12[%c32_93, %c0_94], %111 {strides = array<i32>} : memref<44x1280xbf16, #tpu.memory_space<vmem>>, vector<4x1280xbf16>,
    %c0_95 = arith.constant 0 : index
    %c0_96 = arith.constant 0 : index
    %c0_97 = arith.constant 0 : index
    %113 = vector.load %arg1[%c0_95, %c0_96, %c0_97] : memref<1x8x1280xf32, #tpu.memory_space<vmem>>, vector<1x8x1280xf32>
    %114 = vector.shape_cast %113 : vector<1x8x1280xf32> to vector<8x1280xf32>
    %115 = arith.truncf %114 : vector<8x1280xf32> to vector<8x1280xbf16>
    %c36 = arith.constant 36 : index
    %c0_98 = arith.constant 0 : index
    %116 = vector.load %arg12[%c36, %c0_98] : memref<44x1280xbf16, #tpu.memory_space<vmem>>, vector<8x1280xbf16>
    tpu.vector_store %arg12[%c36, %c0_98], %115 {strides = array<i32>} : memref<44x1280xbf16, #tpu.memory_space<vmem>>, vector<8x1280xbf16>,
    %c0_99 = arith.constant 0 : index
    %c0_100 = arith.constant 0 : index
    %117 = vector.load %arg7[%c0_99, %c0_100] : memref<4x44xbf16, #tpu.memory_space<vmem>>, vector<4x44xbf16>
    %c0_101 = arith.constant 0 : index
    %c0_102 = arith.constant 0 : index
    %118 = vector.load %arg12[%c0_101, %c0_102] : memref<44x1280xbf16, #tpu.memory_space<vmem>>, vector<44x1280xbf16>
    %cst_103 = arith.constant dense<0.000000e+00> : vector<4x1280xf32>
    %119 = tpu.matmul %117, %118, %cst_103 {dimension_numbers = #tpu.dot_dimension_numbers<[1], [0], [0], [1], [0, 0, 1, 1], [], []>} : vector<4x44xbf16>, vector<44x1280xbf16>, vector<4x1280xf32> -> vector<4x1280xf32>
    %c0_104 = arith.constant 0 : index
    %c1_105 = arith.constant 1 : index
    %120 = vector.load %arg5[%c0_104, %c1_105] : memref<4x2xf32, #tpu.memory_space<vmem>>, vector<4x1xf32>
    %121 = vector.broadcast %120 : vector<4x1xf32> to vector<4x1280xf32>
    %122 = arith.addf %119, %121 : vector<4x1280xf32>
    %123 = vector.broadcast %0 : vector<1x1280xf32> to vector<4x1280xf32>
    %124 = arith.mulf %122, %123 : vector<4x1280xf32>
    %c0_106 = arith.constant 0 : index
    %c0_107 = arith.constant 0 : index
    %c0_108 = arith.constant 0 : index
    %125 = vector.load %arg8[%c0_106, %c0_107, %c0_108] : memref<1x4x1280xf32, #tpu.memory_space<vmem>>, vector<1x4x1280xf32>
    %126 = vector.shape_cast %125 : vector<1x4x1280xf32> to vector<4x1280xf32>
    %127 = vector.shape_cast %124 : vector<4x1280xf32> to vector<1x4x1280xf32>
    tpu.vector_store %arg8[%c0_106, %c0_107, %c0_108], %127 {strides = array<i32>} : memref<1x4x1280xf32, #tpu.memory_space<vmem>>, vector<1x4x1280xf32>,
    return
  }
  func.func @transform_0(%arg0: i32) -> (i32, i32, i32) {
    %c0_i32 = arith.constant 0 : i32
    %c0_i32_0 = arith.constant 0 : i32
    %c0_i32_1 = arith.constant 0 : i32
    return %arg0, %c0_i32, %c0_i32_0 : i32, i32, i32
  }
  func.func @transform_1(%arg0: i32) -> (i32, i32) {
    %c0_i32 = arith.constant 0 : i32
    %c0_i32_0 = arith.constant 0 : i32
    %c0_i32_1 = arith.constant 0 : i32
    return %c0_i32, %c0_i32_0 : i32, i32
  }
  func.func @transform_2(%arg0: i32) -> (i32, i32) {
    %c0_i32 = arith.constant 0 : i32
    %c0_i32_0 = arith.constant 0 : i32
    %c0_i32_1 = arith.constant 0 : i32
    return %c0_i32, %c0_i32_0 : i32, i32
  }
  func.func @transform_3(%arg0: i32) -> (i32, i32) {
    %c0_i32 = arith.constant 0 : i32
    %c0_i32_0 = arith.constant 0 : i32
    %c0_i32_1 = arith.constant 0 : i32
    return %c0_i32, %c0_i32_0 : i32, i32
  }
  func.func @transform_4(%arg0: i32) -> (i32, i32) {
    %c0_i32 = arith.constant 0 : i32
    %c0_i32_0 = arith.constant 0 : i32
    %c0_i32_1 = arith.constant 0 : i32
    return %c0_i32, %c0_i32_0 : i32, i32
  }
  func.func @transform_5(%arg0: i32) -> (i32, i32) {
    %c0_i32 = arith.constant 0 : i32
    %c0_i32_0 = arith.constant 0 : i32
    %c0_i32_1 = arith.constant 0 : i32
    return %c0_i32, %c0_i32_0 : i32, i32
  }
  func.func @transform_6(%arg0: i32) -> (i32, i32) {
    %c0_i32 = arith.constant 0 : i32
    %c0_i32_0 = arith.constant 0 : i32
    %c0_i32_1 = arith.constant 0 : i32
    return %c0_i32, %c0_i32_0 : i32, i32
  }
  func.func @transform_7(%arg0: i32) -> (i32, i32, i32) {
    %c0_i32 = arith.constant 0 : i32
    %c0_i32_0 = arith.constant 0 : i32
    %c0_i32_1 = arith.constant 0 : i32
    return %arg0, %c0_i32, %c0_i32_0 : i32, i32, i32
  }
}

</mosaic_0001>

<bundles_post_ra>
// kernel: _lambda_.5
= control target key start
LH: loop header
LB: loop body
LE: loop exit
PB: predicated region body
PF: predicated region fallthrough
CT: control target
= control target key end

     0   :  { %s1289_s24 = smov 0   ;;  %s1478_s0 = inlined_call_operand.vmem [shape: f32[2,8,384], index: 0, kind: input, shape index: {}]   ;;  %s1479_s1 = inlined_call_operand.vmem [shape: f32[1,384], index: 1, kind: input, shape index: {}]   ;;  %s1480_s2 = inlined_call_operand.vmem [shape: f32[8,2], index: 2, kind: input, shape index: {}]   ;;  %s1481_s3 = inlined_call_operand.vmem [shape: f32[8,2], index: 3, kind: input, shape index: {}]   ;;  %s1482_s4 = inlined_call_operand.vmem [shape: f32[8,2], index: 4, kind: input, shape index: {}]   ;;  %s1483_s5 = inlined_call_operand.vmem [shape: bf16[8,72], index: 5, kind: input, shape index: {}]   ;;  %s1484_s6 = inlined_call_operand.vmem [shape: bf16[8,72], index: 6, kind: input, shape index: {}]   ;;  %s1485_s7 = inlined_call_operand.vmem [shape: f32[2,8,384], index: 7, kind: output, shape index: {}]  }
   0x1 LB: > { %s1068_s25 = sadd.s32 4294967295, %s1237_s24   ;;  %p1072_p0 = scmp.ge.s32.totalorder %s1237_s24, 1  ;;  %s1237_s24 = sphi %s1289_s24, %s17_s24  }
   0x2   : > { %p237_p1 = scmp.lt.s32.totalorder %s1237_s24, 3 }
   0x4   : > { %p238_p2 = pnand %p1072_p0, %p237_p1 }
   0x5   : > { %p269_p3 = scmp.lt.s32.totalorder (!%p238_p2), %s1068_s25, 1  ;;  %s1241_s11 = smov (!%p238_p2), 109  }
   0x6   : > { %241 = sbr.rel (%p238_p2) target bundleno = 1459 (0x5b3), region = 48  ;;  %s1242_s12 = smov (!%p238_p2), 110  }
   0x7   : > { %s1243_s13 = smov (!%p238_p2), 111   ;;  %s1244_s14 = smov (!%p238_p2), 1  }
   0x8   : > { %s1245_s15 = smov (!%p238_p2), 127   ;;  %s1246_s16 = smov (!%p238_p2), 19  }
   0x9   : > { %s1247_s17 = smov (!%p238_p2), 17   ;;  %s1248_s18 = smov (!%p238_p2), 18  }
   0xb   : > { %s1487_s25 = smov (!%p269_p3, %s1068_s25), 1  ;;  %v280_v5 = vld [vmem:[%s1479_s1] sm:$0x7]  ;;  %v1239_v22 = vmov 0   ;;  %v1240_v23 = vmov 1   ;;  %vm493_vm3 = vcmask 891904  }
   0xc   : > { %s1203_s26 = smul.u32 24, %s1487_s25  ;;  %v1316_v7 = vperm.slane %v280_v5, 0  ;;  %v1318_v8 = vperm.slane %v280_v5, 1  ;;  %v1320_v10 = vperm.slane %v280_v5, 2  ;;  %1222 = vset.pattern.permute.xlu1 %v1239_v22  ;;  %345 = vst [vmem:[#allocation2] sm:$0xf] %v1239_v22  ;;  %1226 = vset.pattern.permute.xlu0 %v1240_v23 }
   0xd   : > { %346 = vst [vmem:[#allocation2 + $0x10] sm:$0xf] %v1239_v22  ;;  %v321_v33 = vld [vmem:[%s1480_s2] sm:$0xff]  ;;  %vm361_vm4 = vcmask 1043456   ;;  %vm475_vm5 = vcmask 900096   ;;  %vm457_vm6 = vcmask 908288  }
   0xe   : > { %s1305_s29 = scalar_lea.vmem %s1478_s0, %s1203_s26  ;;  %707 = vst [vmem:[#allocation4] sm:$0xf] %v1239_v22  ;;  %vm439_vm7 = vcmask 1039360   ;;  %vm399_vm8 = vcmask 138240   ;;  %vm417_vm9 = vcmask 7168   ;;  %vm363_vm10 = vcmask 154624   ;;  %s278_s10 = scalar_lea.vmem %s1485_s7, %s1203_s26 }
   0xf   : > { %v281_v0 = vld [vmem:[%s1305_s29] sm:$0xff]  ;;  %v282_v1 = vld [vmem:[%s1305_s29 + $0x8] sm:$0xff]  ;;  %v1310_v2 = vld [vmem:[%s1305_s29 + $0x10] sm:$0xff]  ;;  %708 = vst [vmem:[#allocation4 + $0x10] sm:$0xf] %v1239_v22  ;;  %vm381_vm11 = vcmask 146432  }
  0x10   : > { %v284_v3 = vadd.f32 %v282_v1, %v281_v0  ;;  %vm597_vm12 = vcmask 588800  }
  0x12   : > { %v285_v4 = vadd.f32 %v284_v3, %v1310_v2 }
  0x14   : > { %286 = vadd.xlane.f32.xlu0 %v285_v4 }
  0x87   : > { %v287_v6 = vpop.xlane.xlu0 %286 }
  0x88   : > { %v288_v9 = vmul.f32 0.00390625, %v287_v6 }
  0x8a   : > { %v289_v11 = vsub.f32 %v281_v0, %v288_v9  ;;  %v290_v12 = vsub.f32 %v282_v1, %v288_v9  ;;  %v291_v13 = vsub.f32 %v1310_v2, %v288_v9 }
  0x8c   : > { %v299_v14 = vmul.f32 %v1316_v7, %v289_v11  ;;  %v300_v15 = vmul.f32 %v1318_v8, %v290_v12  ;;  %v301_v16 = vmul.f32 %v1320_v10, %v291_v13 }
  0x8e   : > { %v302_v17 = vmul.f32 %v299_v14, %v299_v14  ;;  %v303_v18 = vmul.f32 %v300_v15, %v300_v15  ;;  %v304_v19 = vmul.f32 %v301_v16, %v301_v16 }
  0x90   : > { %v305_v20 = vadd.f32 %v303_v18, %v302_v17 }
  0x92   : > { %v306_v21 = vadd.f32 %v305_v20, %v304_v19 }
  0x94   : > { %307 = vadd.xlane.f32.xlu0 %v306_v21 }
 0x107   : > { %v308_v24 = vpop.xlane.xlu0 %307 }
 0x108   : > { %v309_v25 = vmul.f32 0.00390625, %v308_v24 }
 0x10a   : > { %v310_v26 = vadd.f32 1e-05, %v309_v25 }
 0x10c   : > { %1227 = vrsqrt.f32 %v310_v26  ;;  %vm317_vm1 = vweird.f32 %v310_v26 }
 0x112   : > { %v1228_v27 = vpop.eup %1227 }
 0x113   : > { %v312_v28 = vmul.f32 %v1228_v27, %v310_v26  ;;  %vm318_vm0 = vweird.f32 %v1228_v27 }
 0x114   : > { %vm319_vm2 = vmor %vm317_vm1, %vm318_vm0 }
 0x115   : > { %v313_v29 = vmul.f32 %v1228_v27, %v312_v28 }
 0x117   : > { %v314_v30 = vmul.f32 0.5, %v313_v29 }
 0x119   : > { %v315_v31 = vsub.f32 1.5, %v314_v30 }
 0x11b   : > { %v316_v32 = vmul.f32 %v1228_v27, %v315_v31 }
 0x11d   : > { %v320_v34 = vsel %vm319_vm2, %v1228_v27, %v316_v32 }
 0x11e   : > { %v322_v35 = vmul.f32 %v321_v33, %v320_v34 }
 0x120   : > { %325 = vperm.xlu1 %1222, %v322_v35  }
 0x128   : > { %1223 = vset.pattern.permute.xlu1 %v1240_v23 }
 0x129   : > { %333 = vperm.xlu1 %1223, %v321_v33  }
 0x131   : > { %1224 = vset.pattern.permute.xlu1 %v1239_v22 }
 0x192   : > { %v326_v36 = vpop.permute.xlu1 %325 }
 0x193   : > { %v328_v37 = vmul.f32 %v326_v36, %v299_v14  ;;  %v329_v38 = vmul.f32 %v326_v36, %v300_v15  ;;  %v330_v39 = vmul.f32 %v326_v36, %v301_v16 }
 0x19b   : > { %v334_v40 = vpop.permute.xlu1 %333 }
 0x19c   : > { %v336_v41 = vadd.f32 %v334_v40, %v328_v37  ;;  %v337_v42 = vadd.f32 %v334_v40, %v329_v38  ;;  %v338_v43 = vadd.f32 %v334_v40, %v330_v39 }
 0x19e   : > { %v339_v44 = vmax.f32 %v336_v41, 0.0  ;;  %v340_v45 = vmax.f32 %v337_v42, 0.0  ;;  %v341_v46 = vmax.f32 %v338_v43, 0.0 }
 0x1a0   : > { %v342_v47 = vmul.f32 %v339_v44, %v1316_v7  ;;  %v343_v48 = vmul.f32 %v340_v45, %v1318_v8  ;;  %v344_v49 = vmul.f32 %v341_v46, %v1320_v10 }
 0x1a2   : > { %v347_v50 = vpack.c.bf16 %v343_v48, %v342_v47  ;;  %v348_v51 = vpack.c.bf16 %v344_v49, %v344_v49  ;;  %v1368_v49 = vld [vmem:[%s1482_s4] sm:$0xff] }
 0x1a4   : > { %349 = vst [vmem:[#allocation2 + $0x4] sm:$0xff] %v347_v50 }
 0x1a5   : > { %350 = vst [vmem:[#allocation2 + $0xc] sm:$0xf] %v348_v51 }
 0x1a6   : > { %426 = vst [vmem:[#allocation3 + $0x30] sm:$0xff] %v347_v50 }
 0x1ab   : > { %v388_v55 = vld [vmem:[#allocation2] sm:$0xff] }
 0x1ac   : > { %v483_v52 = vld [vmem:[#allocation2 + $0xc] sm:$0xff] }
 0x1ad   : > { %v425_v53 = vld [vmem:[#allocation2 + $0xc] sm:$0xf]  ;;  %488 = vrot.lane.b32.xlu2 %v483_v52, %s1241_s11  ;;  %470 = vrot.lane.b32.xlu1 %v483_v52, %s1242_s12 }
 0x1ae   : > { %427 = vst [vmem:[#allocation3 + $0x38] sm:$0xf] %v425_v53  ;;  %452 = vrot.lane.b32.xlu0 %v483_v52, %s1243_s13  ;;  %v407_v54 = vld [vmem:[#allocation2 + $0x8] sm:$0xff] }
 0x1b5   : > { %486 = vrot.lane.b32.xlu2 %v347_v50, %s1241_s11  ;;  %468 = vrot.lane.b32.xlu1 %v347_v50, %s1242_s12  ;;  %v1109_v43 = vld [vmem:[#allocation3 + $0x38] sm:$0xf] }
 0x1b6   : > { %412 = vrot.lane.b32.xlu0 %v407_v54, %s1244_s14 }
 0x1bd   : > { %450 = vrot.lane.b32.xlu2 %v347_v50, %s1243_s13  ;;  %432 = vrot.lane.b32.xlu1 %v347_v50, %s1245_s15 }
 0x1be   : > { %357 = vrot.lane.b32.xlu0 %v407_v54, %s1246_s16 }
 0x1c5   : > { %434 = vrot.lane.b32.xlu2 %v483_v52, %s1245_s15  ;;  %392 = vrot.lane.b32.xlu1 %v388_v55, %s1247_s17 }
 0x1c6   : > { %374 = vrot.lane.b32.xlu0 %v388_v55, %s1248_s18 }
 0x1cd   : > { %394 = vrot.lane.b32.xlu2 %v407_v54, %s1247_s17  ;;  %376 = vrot.lane.b32.xlu1 %v407_v54, %s1248_s18 }
 0x1d5   : > { %410 = vrot.lane.b32.xlu2 %v388_v55, %s1244_s14  ;;  %522 = vperm.xlu1 %1224, %v1368_v49  }
 0x1dd   : > { %355 = vrot.lane.b32.xlu2 %v388_v55, %s1246_s16 }
 0x207   : > { %v489_v56 = vpop.permute.xlu2 %488 }
 0x208   : > { %v491_v57 = vrot.slane %v489_v56, 4 }
 0x20a   : > { %v495_v58 = vsel %vm493_vm3, %v489_v56, %v491_v57 }
 0x20b   : > { %499 = vst [vmem:[#allocation3 + $0x68] sm:$0xf] %v495_v58 }
 0x20f   : > { %v487_v59 = vpop.permute.xlu2 %486 }
 0x210   : > { %v490_v60 = vrot.slane %v487_v59, 4 }
 0x212   : > { %v492_v61 = vsel %vm361_vm4, %v490_v60, %v491_v57  ;;  %v518_v62 = vld [vmem:[#allocation3 + $0x68] sm:$0xf] }
 0x213   : > { %v494_v63 = vsel %vm493_vm3, %v487_v59, %v492_v61  ;;  %v569_v0 = vunpack.c.l.b16 %v518_v62 }
 0x214   : > { %v567_v1 = vunpack.c.l.b16 %v494_v63  ;;  %v568_v3 = vunpack.c.h.b16 %v494_v63 }
 0x215   : > { %v584_v4 = vpack.c.b16 %v569_v0, %v569_v0 }
 0x216   : > { %v582_v5 = vpack.c.b16 %v567_v1, %v567_v1  ;;  %v583_v6 = vpack.c.b16 %v568_v3, %v568_v3 }
 0x217   : > { %v451_v9 = vpop.permute.xlu2 %450  ;;  %v609_v11 = vsel %vm361_vm4, %v584_v4, 0 }
 0x218   : > { %640 = vmatpush.bf16.msra.mxu2 %v609_v11  ;;  %v603_v12 = vsel %vm361_vm4, %v582_v5, 0  ;;  %v606_v13 = vsel %vm361_vm4, %v583_v6, 0  ;;  %v454_v19 = vrot.slane %v451_v9, 4 }
 0x219   : > { %614 = vmatpush.bf16.msra.mxu0 %v603_v12  ;;  %627 = vmatpush.bf16.msra.mxu1 %v606_v13 }
 0x21f   : > { %v471_v14 = vpop.permute.xlu1 %470  ;;  %v435_v15 = vpop.permute.xlu2 %434 }
 0x220   : > { %v473_v16 = vrot.slane %v471_v14, 4  ;;  %v453_v17 = vpop.permute.xlu0 %452  ;;  %v437_v18 = vrot.slane %v435_v15, 4 }
 0x221   : > { %v455_v20 = vrot.slane %v453_v17, 4 }
 0x222   : > { %v477_v21 = vsel %vm475_vm5, %v471_v14, %v473_v16  ;;  %v441_v25 = vsel %vm439_vm7, %v435_v15, %v437_v18  ;;  %v1185_v14 = vld [vmem:[#allocation3 + $0x34] sm:$0xf] }
 0x223   : > { %481 = vst [vmem:[#allocation3 + $0x5c] sm:$0xf] %v477_v21  ;;  %v456_v22 = vsel %vm361_vm4, %v454_v19, %v455_v20  ;;  %v459_v24 = vsel %vm457_vm6, %v453_v17, %v455_v20 }
 0x224   : > { %v458_v26 = vsel %vm457_vm6, %v451_v9, %v456_v22  ;;  %463 = vst [vmem:[#allocation3 + $0x50] sm:$0xf] %v459_v24  ;;  %v1101_v9 = vld [vmem:[#allocation3 + $0x30] sm:$0xf] }
 0x225   : > { %462 = vst [vmem:[#allocation3 + $0x48] sm:$0xff] %v458_v26 }
 0x226   : > { %445 = vst [vmem:[#allocation3 + $0x44] sm:$0xf] %v441_v25 }
 0x227   : > { %v469_v27 = vpop.permute.xlu1 %468  ;;  %v395_v28 = vpop.permute.xlu2 %394 }
 0x228   : > { %v472_v29 = vrot.slane %v469_v27, 4  ;;  %v413_v30 = vpop.permute.xlu0 %412  ;;  %v397_v31 = vrot.slane %v395_v28, 4 }
 0x229   : > { %v415_v32 = vrot.slane %v413_v30, 4 }
 0x22a   : > { %v474_v33 = vsel %vm361_vm4, %v472_v29, %v473_v16  ;;  %v401_v34 = vsel %vm399_vm8, %v395_v28, %v397_v31  ;;  %v1190_v35 = vld [vmem:[#allocation3 + $0x58] sm:$0xf0] }
 0x22b   : > { %v476_v36 = vsel %vm475_vm5, %v469_v27, %v474_v33  ;;  %v419_v37 = vsel %vm417_vm9, %v413_v30, %v415_v32  ;;  %405 = vst [vmem:[#allocation3 + $0x20] sm:$0xf] %v401_v34  ;;  %v1121_v38 = vld [vmem:[#allocation3 + $0x50] sm:$0xf] }
 0x22c   : > { %480 = vst [vmem:[#allocation3 + $0x54] sm:$0xff] %v476_v36  ;;  %v1122_v39 = vor.u32 %v1190_v35, %v1121_v38  ;;  %v1113_v53 = vld [vmem:[#allocation3 + $0x48] sm:$0xf]  ;;  %v1188_v58 = vld [vmem:[#allocation3 + $0x4c] sm:$0xf] }
 0x22d   : > { %423 = vst [vmem:[#allocation3 + $0x2c] sm:$0xf] %v419_v37  ;;  %v1187_v40 = vld [vmem:[#allocation3 + $0x40] sm:$0xf0] }
 0x22e   : > { %641 = vmatpush.bf16.msra.mxu2 %v1122_v39  ;;  %v1110_v47 = vor.u32 %v1187_v40, %v1109_v43 }
 0x22f   : > { %v433_v41 = vpop.permute.xlu1 %432  ;;  %v411_v42 = vpop.permute.xlu2 %410 }
 0x230   : > { %v436_v44 = vrot.slane %v433_v41, 4  ;;  %v414_v45 = vrot.slane %v411_v42, 4  ;;  %v358_v46 = vpop.permute.xlu0 %357 }
 0x231   : > { %v360_v48 = vrot.slane %v358_v46, 4 }
 0x232   : > { %v438_v50 = vsel %vm361_vm4, %v436_v44, %v437_v18  ;;  %v416_v51 = vsel %vm361_vm4, %v414_v45, %v415_v32  ;;  %642 = vmatpush.bf16.msra.mxu2 %v1110_v47  ;;  %v1097_v52 = vld [vmem:[#allocation3 + $0x20] sm:$0xf] }
 0x233   : > { %v440_v54 = vsel %vm439_vm7, %v433_v41, %v438_v50  ;;  %v418_v55 = vsel %vm417_vm9, %v411_v42, %v416_v51  ;;  %v365_v56 = vsel %vm363_vm10, %v358_v46, %v360_v48  ;;  %v1189_v57 = vld [vmem:[#allocation3 + $0x50] sm:$0xf0]  ;;  %v1115_v59 = vld [vmem:[#allocation3 + $0x54] sm:$0xf0]  ;;  %v500_v41 = vld [vmem:[%s1483_s5] sm:$0xf] }
 0x234   : > { %444 = vst [vmem:[#allocation3 + $0x3c] sm:$0xff] %v440_v54  ;;  %v1184_v60 = vld [vmem:[#allocation3 + $0x28] sm:$0xf0]  ;;  %v1114_v61 = vor.u32 %v1189_v57, %v1113_v53  ;;  %v1118_v62 = vor.u32 %v1188_v58, %v1115_v59 }
 0x235   : > { %422 = vst [vmem:[#allocation3 + $0x24] sm:$0xff] %v418_v55  ;;  %v1098_v63 = vor.u32 %v1184_v60, %v1097_v52 }
 0x236   : > { %369 = vst [vmem:[#allocation3 + $0x8] sm:$0xf] %v365_v56  ;;  %615 = vmatpush.bf16.msra.mxu0 %v1114_v61  ;;  %628 = vmatpush.bf16.msra.mxu1 %v1118_v62 }
 0x237   : > { %643 = vmatpush.bf16.msra.mxu2 %v1098_v63  ;;  %v393_v0 = vpop.permute.xlu1 %392  ;;  %v356_v1 = vpop.permute.xlu2 %355 }
 0x238   : > { %v396_v3 = vrot.slane %v393_v0, 4  ;;  %v359_v4 = vrot.slane %v356_v1, 4  ;;  %v375_v18 = vpop.permute.xlu0 %374 }
 0x239   : > { %v378_v20 = vrot.slane %v375_v18, 4 }
 0x23a   : > { %v398_v5 = vsel %vm361_vm4, %v396_v3, %v397_v31  ;;  %v362_v6 = vsel %vm361_vm4, %v359_v4, %v360_v48 }
 0x23b   : > { %v400_v11 = vsel %vm399_vm8, %v393_v0, %v398_v5  ;;  %v364_v12 = vsel %vm363_vm10, %v356_v1, %v362_v6  ;;  %v1186_v13 = vld [vmem:[#allocation3 + $0x38] sm:$0xf0]  ;;  %v1103_v15 = vld [vmem:[#allocation3 + $0x3c] sm:$0xf0] }
 0x23c   : > { %404 = vst [vmem:[#allocation3 + $0x18] sm:$0xff] %v400_v11  ;;  %v1102_v16 = vor.u32 %v1186_v13, %v1101_v9  ;;  %v1106_v17 = vor.u32 %v1185_v14, %v1103_v15  ;;  %v1183_v25 = vld [vmem:[#allocation3 + $0x20] sm:$0xf0]  ;;  %v1091_v26 = vld [vmem:[#allocation3 + $0x24] sm:$0xf0] }
 0x23d   : > { %368 = vst [vmem:[#allocation3] sm:$0xff] %v364_v12  ;;  %v1085_v32 = vld [vmem:[#allocation3 + $0x8] sm:$0xf] }
 0x23e   : > { %616 = vmatpush.bf16.msra.mxu0 %v1102_v16  ;;  %629 = vmatpush.bf16.msra.mxu1 %v1106_v17 }
 0x23f   : > { %v377_v19 = vpop.permute.xlu1 %376 }
 0x240   : > { %v379_v21 = vrot.slane %v377_v19, 4 }
 0x242   : > { %v380_v22 = vsel %vm361_vm4, %v378_v20, %v379_v21  ;;  %v383_v24 = vsel %vm381_vm11, %v377_v19, %v379_v21  ;;  %v683_v20 = vld [vmem:[%s1481_s3] sm:$0xff] }
 0x243   : > { %v382_v27 = vsel %vm381_vm11, %v375_v18, %v380_v22  ;;  %387 = vst [vmem:[#allocation3 + $0x14] sm:$0xf] %v383_v24  ;;  %v1089_v28 = vld [vmem:[#allocation3 + $0x18] sm:$0xf]  ;;  %v1182_v29 = vld [vmem:[#allocation3 + $0x1c] sm:$0xf] }
 0x244   : > { %386 = vst [vmem:[#allocation3 + $0xc] sm:$0xff] %v382_v27  ;;  %v1090_v30 = vor.u32 %v1183_v25, %v1089_v28  ;;  %v1094_v31 = vor.u32 %v1182_v29, %v1091_v26  ;;  %v1077_v34 = vld [vmem:[#allocation3] sm:$0xf]  ;;  %v1179_v37 = vld [vmem:[#allocation3 + $0x4] sm:$0xf] }
 0x246   : > { %617 = vmatpush.bf16.msra.mxu0 %v1090_v30  ;;  %630 = vmatpush.bf16.msra.mxu1 %v1094_v31 }
 0x247   : > { %v523_v42 = vpop.permute.xlu1 %522 }
 0x24a   : > { %v1181_v33 = vld [vmem:[#allocation3 + $0x10] sm:$0xf0] }
 0x24b   : > { %v1086_v35 = vor.u32 %v1181_v33, %v1085_v32  ;;  %v1180_v36 = vld [vmem:[#allocation3 + $0x8] sm:$0xf0]  ;;  %v1079_v38 = vld [vmem:[#allocation3 + $0xc] sm:$0xf0] }
 0x24c   : > { %v1078_v39 = vor.u32 %v1180_v36, %v1077_v34  ;;  %v1082_v40 = vor.u32 %v1179_v37, %v1079_v38 }
 0x24d   : > { %644 = vmatpush.bf16.msra.mxu2 %v1086_v35 }
 0x24e   : > { %618 = vmatpush.bf16.msra.mxu0 %v1078_v39  ;;  %631 = vmatpush.bf16.msra.mxu1 %v1082_v40 }
 0x250   : > { %1125 = vmatmul.msk.bf16.vlgmr.msra.gmra.mxu2 %vm597_vm12, %v500_v41 }
 0x251   : > { %1123 = vmatmul.msk.bf16.vlgmr.msra.gmra.mxu0 %vm597_vm12, %v500_v41  ;;  %1124 = vmatmul.msk.bf16.vlgmr.msra.gmra.mxu1 %vm597_vm12, %v500_v41 }
 0x2ce   : > { %v620_v43 = vpop.f32.mrf.mxu0  ;;  %v633_v44 = vpop.f32.mrf.mxu1 }
 0x2cf   : > { %v621_v45 = vadd.f32 %v620_v43, %v523_v42  ;;  %v634_v46 = vadd.f32 %v633_v44, %v523_v42 }
 0x2d1   : > { %v650_v47 = vmul.f32 %v621_v45, %v1316_v7  ;;  %v651_v48 = vmul.f32 %v634_v46, %v1318_v8 }
 0x2d3   : > { %v646_v50 = vpop.f32.mrf.mxu2  ;;  %v653_v52 = vadd.f32 %v651_v48, %v650_v47 }
 0x2d4   : > { %v647_v51 = vadd.f32 %v646_v50, %v523_v42 }
 0x2d6   : > { %v652_v53 = vmul.f32 %v647_v51, %v1320_v10  ;;  %v622_v54 = vpop.f32.mrf.mxu0  ;;  %v635_v55 = vpop.f32.mrf.mxu1 }
 0x2d8   : > { %v654_v56 = vadd.f32 %v653_v52, %v652_v53 }
 0x2da   : > { %655 = vadd.xlane.f32.xlu2 %v654_v56 }
 0x2db   : > { %v648_v57 = vpop.f32.mrf.mxu2 }
 0x34d   : > { %v656_v58 = vpop.xlane.xlu2 %655 }
 0x34e   : > { %v657_v59 = vmul.f32 0.00390625, %v656_v58 }
 0x350   : > { %v658_v60 = vsub.f32 %v650_v47, %v657_v59  ;;  %v659_v61 = vsub.f32 %v651_v48, %v657_v59  ;;  %v660_v62 = vsub.f32 %v652_v53, %v657_v59 }
 0x352   : > { %v661_v63 = vmul.f32 %v658_v60, %v1316_v7  ;;  %v662_v0 = vmul.f32 %v659_v61, %v1318_v8  ;;  %v663_v1 = vmul.f32 %v660_v62, %v1320_v10 }
 0x354   : > { %v664_v3 = vmul.f32 %v661_v63, %v661_v63  ;;  %v665_v4 = vmul.f32 %v662_v0, %v662_v0  ;;  %v666_v5 = vmul.f32 %v663_v1, %v663_v1 }
 0x356   : > { %v667_v6 = vadd.f32 %v665_v4, %v664_v3 }
 0x358   : > { %v668_v9 = vadd.f32 %v667_v6, %v666_v5 }
 0x35a   : > { %669 = vadd.xlane.f32.xlu0 %v668_v9 }
 0x3cd   : > { %v670_v11 = vpop.xlane.xlu0 %669 }
 0x3ce   : > { %v671_v12 = vmul.f32 0.00390625, %v670_v11 }
 0x3d0   : > { %v672_v13 = vadd.f32 1e-05, %v671_v12 }
 0x3d2   : > { %1229 = vrsqrt.f32 %v672_v13  ;;  %vm679_vm14 = vweird.f32 %v672_v13 }
 0x3d8   : > { %v1230_v14 = vpop.eup %1229 }
 0x3d9   : > { %v674_v15 = vmul.f32 %v1230_v14, %v672_v13  ;;  %vm680_vm13 = vweird.f32 %v1230_v14 }
 0x3da   : > { %vm681_vm15 = vmor %vm679_vm14, %vm680_vm13 }
 0x3db   : > { %v675_v16 = vmul.f32 %v1230_v14, %v674_v15 }
 0x3dd   : > { %v676_v17 = vmul.f32 0.5, %v675_v16 }
 0x3df   : > { %v677_v18 = vsub.f32 1.5, %v676_v17 }
 0x3e1   : > { %v678_v19 = vmul.f32 %v1230_v14, %v677_v18 }
 0x3e3   : > { %v682_v21 = vsel %vm681_vm15, %v1230_v14, %v678_v19 }
 0x3e4   : > { %v684_v22 = vmul.f32 %v683_v20, %v682_v21 }
 0x3e6   : > { %687 = vperm.xlu1 %1224, %v684_v22  }
 0x3ee   : > { %1225 = vset.pattern.permute.xlu1 %v1240_v23 }
 0x3ef   : > { %695 = vperm.xlu1 %1225, %v683_v20  }
 0x458   : > { %v688_v24 = vpop.permute.xlu1 %687 }
 0x459   : > { %v690_v25 = vmul.f32 %v688_v24, %v661_v63  ;;  %v691_v26 = vmul.f32 %v688_v24, %v662_v0  ;;  %v692_v27 = vmul.f32 %v688_v24, %v663_v1 }
 0x461   : > { %v696_v28 = vpop.permute.xlu1 %695 }
 0x462   : > { %v698_v29 = vadd.f32 %v696_v28, %v690_v25  ;;  %v699_v30 = vadd.f32 %v696_v28, %v691_v26  ;;  %v700_v31 = vadd.f32 %v696_v28, %v692_v27 }
 0x464   : > { %v701_v32 = vmax.f32 %v698_v29, 0.0  ;;  %v702_v33 = vmax.f32 %v699_v30, 0.0  ;;  %v703_v34 = vmax.f32 %v700_v31, 0.0 }
 0x466   : > { %v704_v35 = vmul.f32 %v701_v32, %v1316_v7  ;;  %v705_v36 = vmul.f32 %v702_v33, %v1318_v8  ;;  %v706_v37 = vmul.f32 %v703_v34, %v1320_v10 }
 0x468   : > { %v709_v38 = vpack.c.bf16 %v705_v36, %v704_v35  ;;  %v710_v23 = vpack.c.bf16 %v706_v37, %v706_v37 }
 0x46a   : > { %711 = vst [vmem:[#allocation4 + $0x4] sm:$0xff] %v709_v38  ;;  %840 = vrot.lane.b32.xlu1 %v709_v38, %s1241_s11  ;;  %823 = vrot.lane.b32.xlu0 %v709_v38, %s1242_s12 }
 0x46b   : > { %712 = vst [vmem:[#allocation4 + $0xc] sm:$0xf] %v710_v23 }
 0x46c   : > { %783 = vst [vmem:[#allocation5 + $0x30] sm:$0xff] %v709_v38 }
 0x471   : > { %v747_v42 = vld [vmem:[#allocation4] sm:$0xff] }
 0x472   : > { %v803_v39 = vld [vmem:[#allocation4 + $0xc] sm:$0xff] }
 0x473   : > { %v748_v40 = vld [vmem:[#allocation4 + $0x8] sm:$0xff]  ;;  %808 = vrot.lane.b32.xlu2 %v803_v39, %s1243_s13  ;;  %842 = vrot.lane.b32.xlu1 %v803_v39, %s1241_s11 }
 0x474   : > { %v782_v41 = vld [vmem:[#allocation4 + $0xc] sm:$0xf]  ;;  %753 = vrot.lane.b32.xlu0 %v748_v40, %s1247_s17 }
 0x475   : > { %784 = vst [vmem:[#allocation5 + $0x38] sm:$0xf] %v782_v41 }
 0x47b   : > { %751 = vrot.lane.b32.xlu2 %v747_v42, %s1247_s17  ;;  %806 = vrot.lane.b32.xlu1 %v709_v38, %s1243_s13 }
 0x47c   : > { %717 = vrot.lane.b32.xlu0 %v747_v42, %s1246_s16 }
 0x483   : > { %770 = vrot.lane.b32.xlu2 %v748_v40, %s1244_s14  ;;  %825 = vrot.lane.b32.xlu1 %v803_v39, %s1242_s12 }
 0x484   : > { %736 = vrot.lane.b32.xlu0 %v748_v40, %s1248_s18 }
 0x48b   : > { %734 = vrot.lane.b32.xlu2 %v747_v42, %s1248_s18  ;;  %789 = vrot.lane.b32.xlu1 %v709_v38, %s1245_s15 }
 0x493   : > { %791 = vrot.lane.b32.xlu1 %v803_v39, %s1245_s15 }
 0x49b   : > { %768 = vrot.lane.b32.xlu1 %v747_v42, %s1244_s14 }
 0x4a3   : > { %719 = vrot.lane.b32.xlu1 %v748_v40, %s1246_s16 }
 0x4ab   : > { %875 = vperm.xlu1 %1225, %v1368_v49  }
 0x4cd   : > { %v809_v43 = vpop.permute.xlu2 %808 }
 0x4ce   : > { %v811_v44 = vrot.slane %v809_v43, 4 }
 0x4d0   : > { %v814_v45 = vsel %vm457_vm6, %v809_v43, %v811_v44 }
 0x4d1   : > { %818 = vst [vmem:[#allocation5 + $0x50] sm:$0xf] %v814_v45 }
 0x4d5   : > { %v752_v46 = vpop.permute.xlu2 %751 }
 0x4d6   : > { %v755_v56 = vrot.slane %v752_v46, 4 }
 0x4d8   : > { %v1172_v34 = vld [vmem:[#allocation5 + $0x50] sm:$0xf] }
 0x4dc   : > { %v841_v47 = vpop.permute.xlu1 %840  ;;  %v824_v48 = vpop.permute.xlu0 %823 }
 0x4dd   : > { %v1420_v50 = vpop.permute.xlu2 %770  ;;  %v844_v49 = vrot.slane %v841_v47, 4  ;;  %v827_v21 = vrot.slane %v824_v48, 4 }
 0x4de   : > { %v773_v51 = vrot.slane %v1420_v50, 4 }
 0x4e0   : > { %v776_v52 = vsel %vm417_vm9, %v1420_v50, %v773_v51 }
 0x4e1   : > { %780 = vst [vmem:[#allocation5 + $0x2c] sm:$0xf] %v776_v52 }
 0x4e5   : > { %v843_v53 = vpop.permute.xlu1 %842  ;;  %v735_v18 = vpop.permute.xlu2 %734 }
 0x4e6   : > { %v845_v54 = vrot.slane %v843_v53, 4  ;;  %v754_v55 = vpop.permute.xlu0 %753  ;;  %v738_v25 = vrot.slane %v735_v18, 4 }
 0x4e7   : > { %v756_v57 = vrot.slane %v754_v55, 4 }
 0x4e8   : > { %v846_v58 = vsel %vm361_vm4, %v844_v49, %v845_v54  ;;  %v848_v59 = vsel %vm493_vm3, %v843_v53, %v845_v54  ;;  %v1160_v49 = vld [vmem:[#allocation5 + $0x38] sm:$0xf] }
 0x4e9   : > { %v847_v60 = vsel %vm493_vm3, %v841_v47, %v846_v58  ;;  %852 = vst [vmem:[#allocation5 + $0x68] sm:$0xf] %v848_v59  ;;  %v757_v61 = vsel %vm361_vm4, %v755_v56, %v756_v57  ;;  %v759_v62 = vsel %vm399_vm8, %v754_v55, %v756_v57  ;;  %v1152_v55 = vld [vmem:[#allocation5 + $0x30] sm:$0xf]  ;;  %v1197_v59 = vld [vmem:[#allocation5 + $0x34] sm:$0xf] }
 0x4ea   : > { %v758_v63 = vsel %vm399_vm8, %v752_v46, %v757_v61  ;;  %v920_v0 = vunpack.c.l.b16 %v847_v60  ;;  %v921_v1 = vunpack.c.h.b16 %v847_v60  ;;  %763 = vst [vmem:[#allocation5 + $0x20] sm:$0xf] %v759_v62 }
 0x4eb   : > { %762 = vst [vmem:[#allocation5 + $0x18] sm:$0xff] %v758_v63 }
 0x4ec   : > { %v935_v3 = vpack.c.b16 %v920_v0, %v920_v0  ;;  %v936_v4 = vpack.c.b16 %v921_v1, %v921_v1  ;;  %v1196_v0 = vld [vmem:[#allocation5 + $0x28] sm:$0xf0] }
 0x4ed   : > { %v807_v5 = vpop.permute.xlu1 %806 }
 0x4ee   : > { %v810_v6 = vrot.slane %v807_v5, 4  ;;  %v1433_v9 = vpop.permute.xlu0 %717  ;;  %v954_v11 = vsel %vm361_vm4, %v935_v3, 0  ;;  %v957_v12 = vsel %vm361_vm4, %v936_v4, 0 }
 0x4ef   : > { %965 = vmatpush.bf16.msra.mxu3 %v954_v11  ;;  %978 = vmatpush.bf16.msrb.mxu0 %v957_v12 }
 0x4f0   : > { %v812_v13 = vsel %vm361_vm4, %v810_v6, %v811_v44  ;;  %v871_v14 = vld [vmem:[#allocation5 + $0x68] sm:$0xf] }
 0x4f1   : > { %v813_v15 = vsel %vm457_vm6, %v807_v5, %v812_v13  ;;  %v922_v16 = vunpack.c.l.b16 %v871_v14  ;;  %v1148_v63 = vld [vmem:[#allocation5 + $0x20] sm:$0xf] }
 0x4f2   : > { %817 = vst [vmem:[#allocation5 + $0x48] sm:$0xff] %v813_v15  ;;  %v1149_v1 = vor.u32 %v1196_v0, %v1148_v63  ;;  %v1140_v6 = vld [vmem:[#allocation5 + $0x18] sm:$0xf]  ;;  %v1194_v11 = vld [vmem:[#allocation5 + $0x1c] sm:$0xf] }
 0x4f3   : > { %v937_v17 = vpack.c.b16 %v922_v16, %v922_v16 }
 0x4f5   : > { %v826_v19 = vpop.permute.xlu1 %825  ;;  %v960_v20 = vsel %vm361_vm4, %v937_v17, 0 }
 0x4f6   : > { %v828_v22 = vrot.slane %v826_v19, 4  ;;  %v737_v24 = vpop.permute.xlu0 %736  ;;  %991 = vmatpush.bf16.msrb.mxu1 %v960_v20 }
 0x4f7   : > { %v739_v26 = vrot.slane %v737_v24, 4 }
 0x4f8   : > { %v829_v27 = vsel %vm361_vm4, %v827_v21, %v828_v22  ;;  %v831_v28 = vsel %vm475_vm5, %v826_v19, %v828_v22 }
 0x4f9   : > { %v830_v29 = vsel %vm475_vm5, %v824_v48, %v829_v27  ;;  %835 = vst [vmem:[#allocation5 + $0x5c] sm:$0xf] %v831_v28  ;;  %v740_v30 = vsel %vm361_vm4, %v738_v25, %v739_v26  ;;  %v742_v31 = vsel %vm381_vm11, %v737_v24, %v739_v26  ;;  %v1164_v36 = vld [vmem:[#allocation5 + $0x48] sm:$0xf]  ;;  %v1200_v23 = vld [vmem:[#allocation5 + $0x4c] sm:$0xf] }
 0x4fa   : > { %834 = vst [vmem:[#allocation5 + $0x54] sm:$0xff] %v830_v29  ;;  %v741_v32 = vsel %vm381_vm11, %v735_v18, %v740_v30 }
 0x4fb   : > { %745 = vst [vmem:[#allocation5 + $0xc] sm:$0xff] %v741_v32 }
 0x4fc   : > { %746 = vst [vmem:[#allocation5 + $0x14] sm:$0xf] %v742_v31  ;;  %v1002_v31 = vld [vmem:[%s1305_s29 + $0x8] sm:$0xff] }
 0x4fd   : > { %v790_v33 = vpop.permute.xlu1 %789 }
 0x4fe   : > { %v793_v43 = vrot.slane %v790_v33, 4 }
 0x500   : > { %v1202_v35 = vld [vmem:[#allocation5 + $0x58] sm:$0xf0] }
 0x501   : > { %v1173_v37 = vor.u32 %v1202_v35, %v1172_v34  ;;  %v1201_v38 = vld [vmem:[#allocation5 + $0x50] sm:$0xf0]  ;;  %v1166_v39 = vld [vmem:[#allocation5 + $0x54] sm:$0xf0] }
 0x502   : > { %v1165_v40 = vor.u32 %v1201_v38, %v1164_v36  ;;  %v1169_v41 = vor.u32 %v1200_v23, %v1166_v39  ;;  %v1192_v19 = vld [vmem:[#allocation5 + $0x8] sm:$0xf0]  ;;  %v1130_v24 = vld [vmem:[#allocation5 + $0xc] sm:$0xf0] }
 0x503   : > { %992 = vmatpush.bf16.msrb.mxu1 %v1173_v37  ;;  %v1193_v18 = vld [vmem:[#allocation5 + $0x10] sm:$0xf0]  ;;  %v1001_v38 = vld [vmem:[%s1305_s29] sm:$0xff] }
 0x504   : > { %966 = vmatpush.bf16.msra.mxu3 %v1165_v40  ;;  %979 = vmatpush.bf16.msrb.mxu0 %v1169_v41 }
 0x505   : > { %v792_v42 = vpop.permute.xlu1 %791 }
 0x506   : > { %v794_v44 = vrot.slane %v792_v42, 4 }
 0x508   : > { %v795_v45 = vsel %vm361_vm4, %v793_v43, %v794_v44  ;;  %v797_v46 = vsel %vm439_vm7, %v792_v42, %v794_v44 }
 0x509   : > { %v796_v47 = vsel %vm439_vm7, %v790_v33, %v795_v45  ;;  %801 = vst [vmem:[#allocation5 + $0x44] sm:$0xf] %v797_v46 }
 0x50a   : > { %800 = vst [vmem:[#allocation5 + $0x3c] sm:$0xff] %v796_v47 }
 0x50d   : > { %v769_v48 = vpop.permute.xlu1 %768 }
 0x50e   : > { %v772_v52 = vrot.slane %v769_v48, 4 }
 0x510   : > { %v774_v53 = vsel %vm361_vm4, %v772_v52, %v773_v51  ;;  %v1199_v54 = vld [vmem:[#allocation5 + $0x40] sm:$0xf0]  ;;  %v721_v51 = vrot.slane %v1433_v9, 4 }
 0x511   : > { %v775_v56 = vsel %vm417_vm9, %v769_v48, %v774_v53  ;;  %v1161_v57 = vor.u32 %v1199_v54, %v1160_v49  ;;  %v1198_v58 = vld [vmem:[#allocation5 + $0x38] sm:$0xf0]  ;;  %v1154_v60 = vld [vmem:[#allocation5 + $0x3c] sm:$0xf0] }
 0x512   : > { %779 = vst [vmem:[#allocation5 + $0x24] sm:$0xff] %v775_v56  ;;  %v1153_v61 = vor.u32 %v1198_v58, %v1152_v55  ;;  %v1157_v62 = vor.u32 %v1197_v59, %v1154_v60 }
 0x513   : > { %993 = vmatpush.bf16.msrb.mxu1 %v1161_v57 }
 0x514   : > { %967 = vmatpush.bf16.msra.mxu3 %v1153_v61  ;;  %980 = vmatpush.bf16.msrb.mxu0 %v1157_v62 }
 0x515   : > { %v720_v50 = vpop.permute.xlu1 %719 }
 0x516   : > { %v722_v3 = vrot.slane %v720_v50, 4 }
 0x517   : > { %994 = vmatpush.bf16.msrb.mxu1 %v1149_v1 }
 0x518   : > { %v723_v4 = vsel %vm361_vm4, %v721_v51, %v722_v3  ;;  %v725_v5 = vsel %vm363_vm10, %v720_v50, %v722_v3 }
 0x519   : > { %v724_v12 = vsel %vm363_vm10, %v1433_v9, %v723_v4  ;;  %729 = vst [vmem:[#allocation5 + $0x8] sm:$0xf] %v725_v5  ;;  %v1195_v13 = vld [vmem:[#allocation5 + $0x20] sm:$0xf0]  ;;  %v1142_v14 = vld [vmem:[#allocation5 + $0x24] sm:$0xf0] }
 0x51a   : > { %728 = vst [vmem:[#allocation5] sm:$0xff] %v724_v12  ;;  %v1141_v15 = vor.u32 %v1195_v13, %v1140_v6  ;;  %v1145_v16 = vor.u32 %v1194_v11, %v1142_v14  ;;  %v853_v9 = vld [vmem:[%s1484_s6] sm:$0xf] }
 0x51c   : > { %968 = vmatpush.bf16.msra.mxu3 %v1141_v15  ;;  %981 = vmatpush.bf16.msrb.mxu0 %v1145_v16 }
 0x51d   : > { %v876_v27 = vpop.permute.xlu1 %875 }
 0x520   : > { %v1136_v17 = vld [vmem:[#allocation5 + $0x8] sm:$0xf] }
 0x521   : > { %v1137_v20 = vor.u32 %v1193_v18, %v1136_v17  ;;  %v1128_v21 = vld [vmem:[#allocation5] sm:$0xf]  ;;  %v1191_v22 = vld [vmem:[#allocation5 + $0x4] sm:$0xf] }
 0x522   : > { %v1129_v25 = vor.u32 %v1192_v19, %v1128_v21  ;;  %v1133_v26 = vor.u32 %v1191_v22, %v1130_v24 }
 0x523   : > { %995 = vmatpush.bf16.msrb.mxu1 %v1137_v20 }
 0x524   : > { %969 = vmatpush.bf16.msra.mxu3 %v1129_v25  ;;  %982 = vmatpush.bf16.msrb.mxu0 %v1133_v26 }
 0x526   : > { %1176 = vmatmul.msk.bf16.vlgmr.msrb.gmra.mxu1 %vm597_vm12, %v853_v9 }
 0x527   : > { %1174 = vmatmul.msk.bf16.vlgmr.msra.gmra.mxu3 %vm597_vm12, %v853_v9  ;;  %1175 = vmatmul.msk.bf16.vlgmr.msrb.gmra.mxu0 %vm597_vm12, %v853_v9 }
 0x5a3   : > { %v997_v28 = vpop.f32.mrf.mxu1 }
 0x5a4   : > { %v998_v29 = vadd.f32 %v997_v28, %v876_v27  ;;  %v984_v30 = vpop.f32.mrf.mxu0 }
 0x5a5   : > { %v985_v32 = vadd.f32 %v984_v30, %v876_v27 }
 0x5a6   : > { %v1006_v33 = vadd.f32 %v998_v29, %v1310_v2 }
 0x5a7   : > { %v1005_v34 = vadd.f32 %v1002_v31, %v985_v32 }
 0x5a8   : > { %v1009_v35 = vmul.f32 %v1006_v33, %v1320_v10 }
 0x5a9   : > { %v1008_v36 = vmul.f32 %v1005_v34, %v1318_v8 }
 0x5aa   : > { %1012 = vst [vmem:[%s278_s10 + $0x10] sm:$0xff] %v1009_v35  ;;  %v971_v37 = vpop.f32.mrf.mxu3 }
 0x5ab   : > { %1011 = vst [vmem:[%s278_s10 + $0x8] sm:$0xff] %v1008_v36  ;;  %v972_v23 = vadd.f32 %v971_v37, %v876_v27  ;;  %v999_v39 = vpop.f32.mrf.mxu1 }
 0x5ac   : > { %v986_v40 = vpop.f32.mrf.mxu0 }
 0x5ad   : > { %v1004_v41 = vadd.f32 %v1001_v38, %v972_v23 }
 0x5af   : > { %v1007_v2 = vmul.f32 %v1004_v41, %v1316_v7 }
 0x5b1   : > { %1010 = vst [vmem:[%s278_s10] sm:$0xff] %v1007_v2 }
 0x5b2   : > { %v973_v42 = vpop.f32.mrf.mxu3 }
 0x5b3 PF: > { %s17_s24 = sadd.s32 1, %s1237_s24  }
 0x5b4   : > { %p14_p4 = scmp.ge.s32.totalorder %s17_s24, 4  }
 0x5b6   :  { %16 = sbr.rel (!%p14_p4) target bundleno = 1 (0x1), region = 78 }

// kernel: _lambda_.4
= control target key start
LH: loop header
LB: loop body
LE: loop exit
PB: predicated region body
PF: predicated region fallthrough
CT: control target
= control target key end

     0   :  { %s1352_s24 = smov 0   ;;  %s1538_s0 = inlined_call_operand.vmem [shape: f32[2,4,384], index: 0, kind: input, shape index: {}]   ;;  %s1539_s1 = inlined_call_operand.vmem [shape: f32[1,384], index: 1, kind: input, shape index: {}]   ;;  %s1540_s2 = inlined_call_operand.vmem [shape: f32[4,2], index: 2, kind: input, shape index: {}]   ;;  %s1541_s3 = inlined_call_operand.vmem [shape: f32[8,2], index: 3, kind: input, shape index: {}]   ;;  %s1542_s4 = inlined_call_operand.vmem [shape: f32[8,2], index: 4, kind: input, shape index: {}]   ;;  %s1543_s5 = inlined_call_operand.vmem [shape: bf16[8,36], index: 5, kind: input, shape index: {}]   ;;  %s1544_s6 = inlined_call_operand.vmem [shape: bf16[8,76], index: 6, kind: input, shape index: {}]   ;;  %s1545_s7 = inlined_call_operand.vmem [shape: f32[2,8,384], index: 7, kind: output, shape index: {}]  }
   0x1 LB: > { %s1143_s25 = sadd.s32 4294967295, %s1299_s24   ;;  %p1147_p0 = scmp.ge.s32.totalorder %s1299_s24, 1  ;;  %s1299_s24 = sphi %s1352_s24, %s17_s24  }
   0x2   : > { %p237_p1 = scmp.lt.s32.totalorder %s1299_s24, 3 }
   0x4   : > { %p238_p2 = pnand %p1147_p0, %p237_p1 }
   0x5   : > { %p269_p3 = scmp.lt.s32.totalorder (!%p238_p2), %s1143_s25, 1  ;;  %s1304_s11 = smov (!%p238_p2), 19  }
   0x6   : > { %241 = sbr.rel (%p238_p2) target bundleno = 1551 (0x60f), region = 48  ;;  %s1305_s12 = smov (!%p238_p2), 18  }
   0x7   : > { %s1306_s13 = smov (!%p238_p2), 127   ;;  %s1307_s14 = smov (!%p238_p2), 17  }
   0x8   : > { %s1308_s15 = smov (!%p238_p2), 111   ;;  %s1309_s16 = smov (!%p238_p2), 1  }
   0x9   : > { %s1310_s17 = smov (!%p238_p2), 110   ;;  %s1311_s18 = smov (!%p238_p2), 109  }
   0xb   : > { %s1547_s25 = smov (!%p269_p3, %s1143_s25), 1  ;;  %vm294_vm0 = vcmask 1043456   ;;  %v280_v10 = vld [vmem:[%s1539_s1] sm:$0x7]  ;;  %v1301_v11 = vmov 839922192  }
   0xc   : > { %s1263_s26 = smul.u32 12, %s1547_s25  ;;  %v305_v12 = vunpack.c.l.s4 %v1301_v11  ;;  %v1379_v13 = vperm.slane %v280_v10, 1  ;;  %v1381_v15 = vperm.slane %v280_v10, 0  ;;  %v1384_v19 = vperm.slane %v280_v10, 2  ;;  %v353_v47 = vld [vmem:[%s1540_s2] sm:$0xf] }
   0xd   : > { %v1302_v36 = vmov 0   ;;  %v1303_v37 = vmov 1   ;;  %vm401_vm4 = vcmask 1041408   ;;  %vm405_vm5 = vcmask 1045508  }
   0xe   : > { %s1366_s29 = scalar_lea.vmem %s1538_s0, %s1263_s26  ;;  %v306_v14 = vunpack.c.0.s8 %v305_v12  ;;  %v316_v16 = vrot.slane %v1379_v13, 4  ;;  %1284 = vset.pattern.permute.xlu1 %v1302_v36  ;;  %381 = vst [vmem:[#allocation2] sm:$0x3] %v1302_v36  ;;  %1288 = vset.pattern.permute.xlu0 %v1303_v37  ;;  %vm427_vm6 = vcmask 154624   ;;  %vm523_vm7 = vcmask 1039360  }
   0xf   : > { %v1369_v0 = vld [vmem:[%s1366_s29] sm:$0xff]  ;;  %v282_v1 = vld [vmem:[%s1366_s29 + $0x8] sm:$0xf]  ;;  %382 = vst [vmem:[#allocation2 + $0x8] sm:$0x3] %v1302_v36  ;;  %vm544_vm8 = vcmask 908288  }
  0x10   : > { %285 = vst [vmem:[#allocation1] ss:$2 sm:$0xff] %v1369_v0  ;;  %v317_v21 = vsel %vm294_vm0, %v1381_v15, %v316_v16  ;;  %v909_v62 = vld [vmem:[%s1366_s29 + $0x8] sm:$0xf]  ;;  %vm587_vm9 = vcmask 891904   ;;  %vm492_vm10 = vcmask 7168  }
  0x11   : > { %287 = vst [vmem:[#allocation1 + $0x10] ss:$2 sm:$0xff] %v282_v1  ;;  %vm566_vm11 = vcmask 900096   ;;  %vm449_vm12 = vcmask 146432   ;;  %vm470_vm13 = vcmask 138240   ;;  %vm651_vm14 = vcmask 293888  }
  0x12   : > { %762 = vst [vmem:[#allocation4] sm:$0xf] %v1302_v36  ;;  %s1264_s29 = smul.u32 24, %s1547_s25 }
  0x13   : > { %763 = vst [vmem:[#allocation4 + $0x10] sm:$0xf] %v1302_v36 }
  0x14   : > { %s278_s9 = scalar_lea.vmem %s1545_s7, %s1264_s29 }
  0x17   : > { %v288_v2 = vld.sshfl [vmem:[#allocation1] sm:$0xff pattern:$0x75316420]  ;;  %v289_v3 = vld.sshfl [vmem:[#allocation1 + $0x8] sm:$0xff pattern:$0x75316420] }
  0x18   : > { %v290_v4 = vld.sshfl [vmem:[#allocation1 + $0x10] sm:$0xff pattern:$0x75316420]  ;;  %v295_v5 = vsel %vm294_vm0, %v288_v2, 0.0  ;;  %v296_v6 = vsel %vm294_vm0, %v289_v3, 0.0 }
  0x19   : > { %v297_v7 = vadd.f32 %v296_v6, %v295_v5  ;;  %v298_v8 = vsel %vm294_vm0, %v290_v4, 0.0 }
  0x1b   : > { %v299_v9 = vadd.f32 %v298_v8, %v297_v7 }
  0x1d   : > { %300 = vadd.xlane.f32.xlu0 %v299_v9 }
  0x90   : > { %v301_v17 = vpop.xlane.xlu0 %300 }
  0x91   : > { %v302_v18 = vmul.f32 0.00390625, %v301_v17 }
  0x93   : > { %v307_v20 = vperm.slane %v302_v18, %v306_v14 }
  0x95   : > { %v309_v22 = vsub.f32 %v1369_v0, %v307_v20  ;;  %v310_v23 = vsub.f32 %v282_v1, %v307_v20 }
  0x97   : > { %v319_v24 = vmul.f32 %v317_v21, %v309_v22  ;;  %v320_v25 = vmul.f32 %v1384_v19, %v310_v23 }
  0x99   : > { %v321_v26 = vmul.f32 %v319_v24, %v319_v24  ;;  %v322_v27 = vmul.f32 %v320_v25, %v320_v25 }
  0x9b   : > { %325 = vst [vmem:[#allocation1] ss:$2 sm:$0xff] %v321_v26 }
  0x9c   : > { %327 = vst [vmem:[#allocation1 + $0x10] ss:$2 sm:$0xff] %v322_v27 }
  0xa2   : > { %v328_v28 = vld.sshfl [vmem:[#allocation1] sm:$0xff pattern:$0x75316420]  ;;  %v329_v29 = vld.sshfl [vmem:[#allocation1 + $0x8] sm:$0xff pattern:$0x75316420] }
  0xa3   : > { %v330_v30 = vld.sshfl [vmem:[#allocation1 + $0x10] sm:$0xff pattern:$0x75316420]  ;;  %v334_v31 = vsel %vm294_vm0, %v328_v28, 0.0  ;;  %v335_v32 = vsel %vm294_vm0, %v329_v29, 0.0 }
  0xa4   : > { %v336_v33 = vadd.f32 %v335_v32, %v334_v31  ;;  %v337_v34 = vsel %vm294_vm0, %v330_v30, 0.0 }
  0xa6   : > { %v338_v35 = vadd.f32 %v337_v34, %v336_v33 }
  0xa8   : > { %339 = vadd.xlane.f32.xlu0 %v338_v35 }
 0x11b   : > { %v340_v38 = vpop.xlane.xlu0 %339 }
 0x11c   : > { %v341_v39 = vmul.f32 0.00390625, %v340_v38 }
 0x11e   : > { %v342_v40 = vadd.f32 1e-05, %v341_v39 }
 0x120   : > { %1289 = vrsqrt.f32 %v342_v40  ;;  %vm349_vm2 = vweird.f32 %v342_v40 }
 0x126   : > { %v1290_v41 = vpop.eup %1289 }
 0x127   : > { %v344_v42 = vmul.f32 %v1290_v41, %v342_v40  ;;  %vm350_vm1 = vweird.f32 %v1290_v41 }
 0x128   : > { %vm351_vm3 = vmor %vm349_vm2, %vm350_vm1 }
 0x129   : > { %v345_v43 = vmul.f32 %v1290_v41, %v344_v42 }
 0x12b   : > { %v346_v44 = vmul.f32 0.5, %v345_v43 }
 0x12d   : > { %v347_v45 = vsub.f32 1.5, %v346_v44 }
 0x12f   : > { %v348_v46 = vmul.f32 %v1290_v41, %v347_v45 }
 0x131   : > { %v352_v48 = vsel %vm351_vm3, %v1290_v41, %v348_v46  ;;  %vm1033_vm3 = vcmask 1045504  }
 0x132   : > { %v354_v49 = vmul.f32 %v353_v47, %v352_v48 }
 0x134   : > { %357 = vperm.xlu1 %1284, %v354_v49  }
 0x13c   : > { %1285 = vset.pattern.permute.xlu1 %v1303_v37 }
 0x13d   : > { %368 = vperm.xlu1 %1285, %v353_v47  }
 0x145   : > { %1286 = vset.pattern.permute.xlu1 %v1302_v36 }
 0x1a6   : > { %v358_v50 = vpop.permute.xlu1 %357 }
 0x1a7   : > { %v362_v51 = vperm.slane %v358_v50, %v306_v14 }
 0x1a9   : > { %v364_v53 = vmul.f32 %v362_v51, %v319_v24  ;;  %v365_v54 = vmul.f32 %v362_v51, %v320_v25 }
 0x1af   : > { %v369_v52 = vpop.permute.xlu1 %368 }
 0x1b0   : > { %v373_v55 = vperm.slane %v369_v52, %v306_v14 }
 0x1b2   : > { %v375_v56 = vadd.f32 %v373_v55, %v364_v53  ;;  %v376_v57 = vadd.f32 %v373_v55, %v365_v54 }
 0x1b4   : > { %v377_v58 = vmax.f32 %v375_v56, 0.0  ;;  %v378_v59 = vmax.f32 %v376_v57, 0.0 }
 0x1b6   : > { %v379_v60 = vmul.f32 %v377_v58, %v317_v21  ;;  %v380_v61 = vmul.f32 %v378_v59, %v1384_v19 }
 0x1b8   : > { %385 = vst [vmem:[#allocation1] ss:$2 sm:$0xff] %v379_v60 }
 0x1b9   : > { %387 = vst [vmem:[#allocation1 + $0x10] ss:$2 sm:$0xff] %v380_v61 }
 0x1bf   : > { %v388_v63 = vld.sshfl [vmem:[#allocation1] sm:$0xff pattern:$0x75316420]  ;;  %v389_v1 = vld.sshfl [vmem:[#allocation1 + $0x8] sm:$0xff pattern:$0x75316420] }
 0x1c0   : > { %v390_v2 = vld.sshfl [vmem:[#allocation1 + $0x10] sm:$0xff pattern:$0x75316420]  ;;  %v394_v3 = vpack.c.bf16 %v389_v1, %v388_v63 }
 0x1c1   : > { %v395_v4 = vpack.c.bf16 %v390_v2, %v390_v2  ;;  %914 = vst [vmem:[#allocation1 + $0x10] ss:$2 sm:$0xff] %v909_v62 }
 0x1c2   : > { %v398_v5 = vrot.slane %v394_v3, 2 }
 0x1c3   : > { %v399_v6 = vrot.slane %v395_v4, 4  ;;  %v400_v7 = vrot.slane %v395_v4, 6 }
 0x1c4   : > { %v404_v8 = vsel %vm401_vm4, %v394_v3, %v398_v5 }
 0x1c5   : > { %v408_v9 = vsel %vm405_vm5, %v399_v6, %v400_v7 }
 0x1c6   : > { %v409_v10 = vsel %vm294_vm0, %v404_v8, %v408_v9 }
 0x1c7   : > { %411 = vst [vmem:[#allocation2 + $0x2] sm:$0x3f] %v409_v10 }
 0x1ce   : > { %v412_v11 = vld [vmem:[#allocation2] sm:$0xff] }
 0x1cf   : > { %414 = vst [vmem:[#allocation1] ss:$2 sm:$0xff] %v412_v11  ;;  %v499_v21 = vld [vmem:[#allocation2 + $0x2] sm:$0x3f] }
 0x1d0   : > { %v508_v24 = vld [vmem:[#allocation2 + $0x2] sm:$0xff] }
 0x1d6   : > { %v417_v12 = vld.sshfl [vmem:[#allocation1 + $0x8] sm:$0xff pattern:$0x75643120]  ;;  %v415_v14 = vld.sshfl [vmem:[#allocation1] sm:$0xff pattern:$0x75643120] }
 0x1d7   : > { %421 = vrot.lane.b32.xlu0 %v417_v12, %s1304_s11  ;;  %419 = vrot.lane.b32.xlu2 %v415_v14, %s1304_s11  ;;  %437 = vst [vmem:[#allocation1 + $0x1] ss:$2 sm:$0xff] %v412_v11 }
 0x1de   : > { %v440_v16 = vld.sshfl [vmem:[#allocation1 + $0x8] sm:$0xff pattern:$0x75643120]  ;;  %v438_v17 = vld.sshfl [vmem:[#allocation1] sm:$0xff pattern:$0x75643120] }
 0x1df   : > { %442 = vrot.lane.b32.xlu1 %v438_v17, %s1305_s12  ;;  %458 = vst [vmem:[#allocation1] ss:$2 sm:$0xff] %v412_v11 }
 0x1e6   : > { %v459_v18 = vld.sshfl [vmem:[#allocation1] sm:$0xff pattern:$0x75643120]  ;;  %v461_v20 = vld.sshfl [vmem:[#allocation1 + $0x8] sm:$0xff pattern:$0x75643120] }
 0x1e7   : > { %480 = vst [vmem:[#allocation1 + $0x1] ss:$2 sm:$0xff] %v412_v11 }
 0x1ee   : > { %v481_v22 = vld.sshfl [vmem:[#allocation1] sm:$0xff pattern:$0x75643120]  ;;  %v483_v23 = vld.sshfl [vmem:[#allocation1 + $0x8] sm:$0xff pattern:$0x75643120] }
 0x1ef   : > { %501 = vst [vmem:[#allocation1] ss:$2 sm:$0xff] %v499_v21 }
 0x1f6   : > { %v502_v25 = vld.sshfl [vmem:[#allocation1] sm:$0xff pattern:$0x75643120]  ;;  %v503_v26 = vld.sshfl [vmem:[#allocation1 + $0x8] sm:$0xff pattern:$0x75643120] }
 0x1f7   : > { %511 = vst [vmem:[#allocation1 + $0x1] ss:$2 sm:$0xff] %v508_v24 }
 0x1f8   : > { %506 = vst [vmem:[#allocation3 + $0x18] sm:$0x33] %v502_v25 }
 0x1f9   : > { %507 = vst [vmem:[#allocation3 + $0x20] sm:$0x3] %v503_v26 }
 0x1fe   : > { %v514_v27 = vld.sshfl [vmem:[#allocation1 + $0x8] sm:$0xff pattern:$0x75643120]  ;;  %v512_v28 = vld.sshfl [vmem:[#allocation1] sm:$0xff pattern:$0x75643120] }
 0x1ff   : > { %518 = vrot.lane.b32.xlu1 %v514_v27, %s1306_s13  ;;  %516 = vrot.lane.b32.xlu0 %v512_v28, %s1306_s13  ;;  %532 = vst [vmem:[#allocation1] ss:$2 sm:$0xff] %v508_v24 }
 0x206   : > { %v535_v29 = vld.sshfl [vmem:[#allocation1 + $0x8] sm:$0xff pattern:$0x75643120]  ;;  %v533_v30 = vld.sshfl [vmem:[#allocation1] sm:$0xff pattern:$0x75643120] }
 0x207   : > { %463 = vrot.lane.b32.xlu0 %v459_v18, %s1307_s14  ;;  %539 = vrot.lane.b32.xlu1 %v535_v29, %s1308_s15  ;;  %554 = vst [vmem:[#allocation1 + $0x1] ss:$2 sm:$0xff] %v508_v24 }
 0x208   : > { %537 = vrot.lane.b32.xlu2 %v533_v30, %s1308_s15 }
 0x20e   : > { %v557_v31 = vld.sshfl [vmem:[#allocation1 + $0x8] sm:$0xff pattern:$0x75643120]  ;;  %v555_v32 = vld.sshfl [vmem:[#allocation1] sm:$0xff pattern:$0x75643120] }
 0x20f   : > { %487 = vrot.lane.b32.xlu0 %v483_v23, %s1309_s16  ;;  %561 = vrot.lane.b32.xlu1 %v557_v31, %s1310_s17  ;;  %575 = vst [vmem:[#allocation1] ss:$2 sm:$0xff] %v508_v24 }
 0x210   : > { %559 = vrot.lane.b32.xlu2 %v555_v32, %s1310_s17 }
 0x216   : > { %v576_v33 = vld.sshfl [vmem:[#allocation1] sm:$0xff pattern:$0x75643120]  ;;  %v578_v34 = vld.sshfl [vmem:[#allocation1 + $0x8] sm:$0xff pattern:$0x75643120] }
 0x217   : > { %465 = vrot.lane.b32.xlu1 %v461_v20, %s1307_s14  ;;  %912 = vst [vmem:[#allocation1] ss:$2 sm:$0xff] %v1369_v0 }
 0x218   : > { %580 = vrot.lane.b32.xlu2 %v576_v33, %s1311_s18 }
 0x21e   : > { %v915_v35 = vld.sshfl [vmem:[#allocation1] sm:$0xff pattern:$0x75316420]  ;;  %v916_v36 = vld.sshfl [vmem:[#allocation1 + $0x8] sm:$0xff pattern:$0x75316420] }
 0x21f   : > { %v921_v38 = vpack.c.bf16 %v916_v36, %v915_v35 }
 0x220   : > { %582 = vrot.lane.b32.xlu2 %v578_v34, %s1311_s18 }
 0x221   : > { %923 = vst [vmem:[#allocation5 + $0x6c] sm:$0x33] %v921_v38 }
 0x228   : > { %444 = vrot.lane.b32.xlu2 %v440_v16, %s1305_s12 }
 0x230   : > { %485 = vrot.lane.b32.xlu2 %v481_v22, %s1309_s16 }
 0x231   : > { %v420_v39 = vpop.permute.xlu2 %419 }
 0x232   : > { %v423_v41 = vrot.slane %v420_v39, 4 }
 0x249   : > { %v422_v40 = vpop.permute.xlu0 %421 }
 0x24a   : > { %v424_v42 = vrot.slane %v422_v40, 4 }
 0x24c   : > { %v426_v0 = vsel %vm294_vm0, %v423_v41, %v424_v42  ;;  %v429_v43 = vsel %vm427_vm6, %v422_v40, %v424_v42  ;;  %v1448_v41 = vld [vmem:[%s1542_s4] sm:$0xff] }
 0x24d   : > { %v428_v44 = vsel %vm427_vm6, %v420_v39, %v426_v0  ;;  %433 = vst [vmem:[#allocation3 + $0x8] sm:$0x3] %v429_v43  ;;  %608 = vperm.xlu1 %1286, %v1448_v41  }
 0x24e   : > { %432 = vst [vmem:[#allocation3] sm:$0x33] %v428_v44 }
 0x251   : > { %v443_v46 = vpop.permute.xlu1 %442 }
 0x252   : > { %v446_v12 = vrot.slane %v443_v46, 4 }
 0x262   : > { %v538_v45 = vpop.permute.xlu2 %537 }
 0x263   : > { %v541_v58 = vrot.slane %v538_v45, 4 }
 0x26a   : > { %v560_v47 = vpop.permute.xlu2 %559 }
 0x26b   : > { %v563_v8 = vrot.slane %v560_v47, 4 }
 0x271   : > { %v519_v48 = vpop.permute.xlu1 %518  ;;  %v517_v49 = vpop.permute.xlu0 %516 }
 0x272   : > { %v521_v50 = vrot.slane %v519_v48, 4  ;;  %v520_v51 = vrot.slane %v517_v49, 4  ;;  %v581_v52 = vpop.permute.xlu2 %580 }
 0x273   : > { %v584_v61 = vrot.slane %v581_v52, 4 }
 0x274   : > { %v525_v53 = vsel %vm523_vm7, %v519_v48, %v521_v50  ;;  %v522_v54 = vsel %vm294_vm0, %v520_v51, %v521_v50 }
 0x275   : > { %529 = vst [vmem:[#allocation3 + $0x20] sm:$0xc] %v525_v53  ;;  %v524_v55 = vsel %vm523_vm7, %v517_v49, %v522_v54 }
 0x276   : > { %528 = vst [vmem:[#allocation3 + $0x18] sm:$0xcc] %v524_v55 }
 0x279   : > { %v1425_v56 = vpop.permute.xlu0 %463  ;;  %v540_v57 = vpop.permute.xlu1 %539 }
 0x27a   : > { %v542_v59 = vrot.slane %v540_v57, 4  ;;  %v583_v60 = vpop.permute.xlu2 %582  ;;  %v467_v30 = vrot.slane %v1425_v56, 4 }
 0x27b   : > { %v585_v62 = vrot.slane %v583_v60, 4 }
 0x27c   : > { %v543_v63 = vsel %vm294_vm0, %v541_v58, %v542_v59  ;;  %v546_v1 = vsel %vm544_vm8, %v540_v57, %v542_v59  ;;  %v594_v58 = vld [vmem:[%s1543_s5] sm:$0xf] }
 0x27d   : > { %v545_v2 = vsel %vm544_vm8, %v538_v45, %v543_v63  ;;  %550 = vst [vmem:[#allocation3 + $0x2c] sm:$0x3] %v546_v1  ;;  %v586_v3 = vsel %vm294_vm0, %v584_v61, %v585_v62  ;;  %v589_v4 = vsel %vm587_vm9, %v583_v60, %v585_v62  ;;  %v1164_v39 = vld [vmem:[#allocation3 + $0x18] sm:$0xf]  ;;  %v1245_v40 = vld [vmem:[#allocation3 + $0x1c] sm:$0xf] }
 0x27e   : > { %549 = vst [vmem:[#allocation3 + $0x24] sm:$0x33] %v545_v2  ;;  %v588_v5 = vsel %vm587_vm9, %v581_v52, %v586_v3  ;;  %v1172_v60 = vld [vmem:[#allocation3 + $0x20] sm:$0xf] }
 0x27f   : > { %592 = vst [vmem:[#allocation3 + $0x30] sm:$0x33] %v588_v5 }
 0x280   : > { %593 = vst [vmem:[#allocation3 + $0x38] sm:$0x3] %v589_v4 }
 0x281   : > { %v488_v6 = vpop.permute.xlu0 %487  ;;  %v562_v7 = vpop.permute.xlu1 %561 }
 0x282   : > { %v490_v9 = vrot.slane %v488_v6, 4  ;;  %v564_v10 = vrot.slane %v562_v7, 4  ;;  %v445_v11 = vpop.permute.xlu2 %444 }
 0x283   : > { %v447_v14 = vrot.slane %v445_v11, 4 }
 0x284   : > { %v494_v16 = vsel %vm492_vm10, %v488_v6, %v490_v9  ;;  %v565_v17 = vsel %vm294_vm0, %v563_v8, %v564_v10  ;;  %v568_v18 = vsel %vm566_vm11, %v562_v7, %v564_v10 }
 0x285   : > { %498 = vst [vmem:[#allocation3 + $0x14] sm:$0xc] %v494_v16  ;;  %v567_v20 = vsel %vm566_vm11, %v560_v47, %v565_v17  ;;  %v448_v21 = vsel %vm294_vm0, %v446_v12, %v447_v14  ;;  %v451_v23 = vsel %vm449_vm12, %v445_v11, %v447_v14 }
 0x286   : > { %571 = vst [vmem:[#allocation3 + $0x24] sm:$0xcc] %v567_v20  ;;  %v450_v22 = vsel %vm449_vm12, %v443_v46, %v448_v21  ;;  %v603_v24 = vld [vmem:[#allocation3 + $0x30] sm:$0x33] }
 0x287   : > { %572 = vst [vmem:[#allocation3 + $0x2c] sm:$0xc] %v568_v18  ;;  %v633_v25 = vunpack.c.l.b16 %v603_v24  ;;  %v634_v26 = vunpack.c.h.b16 %v603_v24  ;;  %v604_v48 = vld [vmem:[#allocation3 + $0x38] sm:$0x3] }
 0x288   : > { %454 = vst [vmem:[#allocation3] sm:$0xcc] %v450_v22  ;;  %v635_v49 = vunpack.c.l.b16 %v604_v48 }
 0x289   : > { %455 = vst [vmem:[#allocation3 + $0x8] sm:$0xc] %v451_v23  ;;  %v466_v27 = vpop.permute.xlu1 %465  ;;  %v642_v28 = vpack.c.b16 %v633_v25, %v633_v25  ;;  %v643_v29 = vpack.c.b16 %v634_v26, %v634_v26 }
 0x28a   : > { %v468_v31 = vrot.slane %v466_v27, 4  ;;  %v486_v32 = vpop.permute.xlu2 %485  ;;  %v644_v51 = vpack.c.b16 %v635_v49, %v635_v49 }
 0x28b   : > { %v489_v33 = vrot.slane %v486_v32, 4  ;;  %v656_v34 = vsel %vm401_vm4, %v642_v28, 0  ;;  %v659_v35 = vsel %vm401_vm4, %v643_v29, 0 }
 0x28c   : > { %v469_v36 = vsel %vm294_vm0, %v467_v30, %v468_v31  ;;  %v472_v38 = vsel %vm470_vm13, %v466_v27, %v468_v31  ;;  %669 = vmatpush.bf16.msra.mxu2 %v656_v34  ;;  %682 = vmatpush.bf16.msra.mxu1 %v659_v35  ;;  %v662_v57 = vsel %vm401_vm4, %v644_v51, 0 }
 0x28d   : > { %v471_v42 = vsel %vm470_vm13, %v1425_v56, %v469_v36  ;;  %476 = vst [vmem:[#allocation3 + $0x14] sm:$0x3] %v472_v38  ;;  %v491_v0 = vsel %vm294_vm0, %v489_v33, %v490_v9  ;;  %v1246_v43 = vld [vmem:[#allocation3 + $0x20] sm:$0xf0]  ;;  %v1166_v44 = vld [vmem:[#allocation3 + $0x24] sm:$0xf0] }
 0x28e   : > { %475 = vst [vmem:[#allocation3 + $0xc] sm:$0x33] %v471_v42  ;;  %v493_v45 = vsel %vm492_vm10, %v486_v32, %v491_v0  ;;  %v1165_v46 = vor.u32 %v1246_v43, %v1164_v39  ;;  %v1169_v47 = vor.u32 %v1245_v40, %v1166_v44  ;;  %v1247_v59 = vld [vmem:[#allocation3 + $0x28] sm:$0xf0] }
 0x28f   : > { %497 = vst [vmem:[#allocation3 + $0xc] sm:$0xcc] %v493_v45  ;;  %v1152_v50 = vld [vmem:[#allocation3] sm:$0xf]  ;;  %v1242_v53 = vld [vmem:[#allocation3 + $0x4] sm:$0xf]  ;;  %v1173_v61 = vor.u32 %v1247_v59, %v1172_v60 }
 0x290   : > { %670 = vmatpush.bf16.msra.mxu2 %v1165_v46  ;;  %683 = vmatpush.bf16.msra.mxu1 %v1169_v47  ;;  %v1160_v63 = vld [vmem:[#allocation3 + $0x8] sm:$0xf]  ;;  %v738_v43 = vld [vmem:[%s1541_s3] sm:$0xff] }
 0x294   : > { %v1244_v62 = vld [vmem:[#allocation3 + $0x10] sm:$0xf0] }
 0x295   : > { %v1161_v1 = vor.u32 %v1244_v62, %v1160_v63 }
 0x296   : > { %v1243_v52 = vld [vmem:[#allocation3 + $0x8] sm:$0xf0]  ;;  %v1154_v54 = vld [vmem:[#allocation3 + $0xc] sm:$0xf0] }
 0x297   : > { %v1153_v55 = vor.u32 %v1243_v52, %v1152_v50  ;;  %v1157_v56 = vor.u32 %v1242_v53, %v1154_v54 }
 0x299   : > { %671 = vmatpush.bf16.msra.mxu2 %v1153_v55  ;;  %684 = vmatpush.bf16.msra.mxu1 %v1157_v56 }
 0x29c   : > { %1174 = vmatmul.msk.bf16.vlgmr.msra.gmra.mxu2 %vm651_vm14, %v594_v58  ;;  %1175 = vmatmul.msk.bf16.vlgmr.msra.gmra.mxu1 %vm651_vm14, %v594_v58 }
 0x29d   : > { %695 = vmatpush.bf16.msrb.mxu2 %v662_v57 }
 0x2a1   : > { %696 = vmatpush.bf16.msrb.mxu2 %v1173_v61 }
 0x2a5   : > { %697 = vmatpush.bf16.msrb.mxu2 %v1161_v1 }
 0x2ac   : > { %1176 = vmatmul.msk.bf16.vlgmr.msrb.gmra.mxu2 %vm651_vm14, %v594_v58 }
 0x2bf   : > { %v609_v5 = vpop.permute.xlu1 %608 }
 0x319   : > { %v686_v2 = vpop.f32.mrf.mxu1 }
 0x31a   : > { %v687_v8 = vadd.f32 %v686_v2, %v609_v5  ;;  %v917_v2 = vld.sshfl [vmem:[#allocation1 + $0x10] sm:$0xff pattern:$0x75316420] }
 0x31c   : > { %v706_v10 = vmul.f32 %v687_v8, %v1379_v13 }
 0x31f   : > { %v673_v3 = vpop.f32.mrf.mxu2 }
 0x320   : > { %v674_v7 = vadd.f32 %v673_v3, %v609_v5  ;;  %v922_v3 = vpack.c.bf16 %v917_v2, %v917_v2 }
 0x321   : > { %v688_v4 = vpop.f32.mrf.mxu1 }
 0x322   : > { %v705_v9 = vmul.f32 %v674_v7, %v1381_v15  ;;  %924 = vst [vmem:[#allocation5 + $0x74] sm:$0x3] %v922_v3 }
 0x324   : > { %v708_v16 = vadd.f32 %v706_v10, %v705_v9 }
 0x327   : > { %v675_v6 = vpop.f32.mrf.mxu2 }
 0x32f   : > { %v699_v11 = vpop.f32.mrf.mxu2 }
 0x330   : > { %v700_v12 = vadd.f32 %v699_v11, %v609_v5 }
 0x332   : > { %v707_v14 = vmul.f32 %v700_v12, %v1384_v19 }
 0x334   : > { %v709_v17 = vadd.f32 %v708_v16, %v707_v14 }
 0x336   : > { %710 = vadd.xlane.f32.xlu2 %v709_v17 }
 0x337   : > { %v701_v18 = vpop.f32.mrf.mxu2 }
 0x3a9   : > { %v711_v20 = vpop.xlane.xlu2 %710 }
 0x3aa   : > { %v712_v21 = vmul.f32 0.00390625, %v711_v20 }
 0x3ac   : > { %v713_v22 = vsub.f32 %v705_v9, %v712_v21  ;;  %v714_v23 = vsub.f32 %v706_v10, %v712_v21  ;;  %v715_v24 = vsub.f32 %v707_v14, %v712_v21 }
 0x3ae   : > { %v716_v25 = vmul.f32 %v713_v22, %v1381_v15  ;;  %v717_v26 = vmul.f32 %v714_v23, %v1379_v13  ;;  %v718_v27 = vmul.f32 %v715_v24, %v1384_v19 }
 0x3b0   : > { %v719_v28 = vmul.f32 %v716_v25, %v716_v25  ;;  %v720_v29 = vmul.f32 %v717_v26, %v717_v26  ;;  %v721_v30 = vmul.f32 %v718_v27, %v718_v27 }
 0x3b2   : > { %v722_v31 = vadd.f32 %v720_v29, %v719_v28 }
 0x3b4   : > { %v723_v32 = vadd.f32 %v722_v31, %v721_v30  ;;  %v1262_v30 = vld [vmem:[#allocation5 + $0x70] sm:$0x30] }
 0x3b6   : > { %724 = vadd.xlane.f32.xlu0 %v723_v32 }
 0x429   : > { %v725_v33 = vpop.xlane.xlu0 %724 }
 0x42a   : > { %v726_v34 = vmul.f32 0.00390625, %v725_v33  ;;  %v1261_v33 = vld [vmem:[#allocation5 + $0x68] sm:$0x30] }
 0x42c   : > { %v727_v35 = vadd.f32 1e-05, %v726_v34 }
 0x42e   : > { %1291 = vrsqrt.f32 %v727_v35  ;;  %vm734_vm1 = vweird.f32 %v727_v35 }
 0x434   : > { %v1292_v36 = vpop.eup %1291 }
 0x435   : > { %v729_v38 = vmul.f32 %v1292_v36, %v727_v35  ;;  %vm735_vm15 = vweird.f32 %v1292_v36 }
 0x436   : > { %vm736_vm2 = vmor %vm734_vm1, %vm735_vm15 }
 0x437   : > { %v730_v39 = vmul.f32 %v1292_v36, %v729_v38 }
 0x439   : > { %v731_v40 = vmul.f32 0.5, %v730_v39  ;;  %v1229_v39 = vld [vmem:[#allocation5 + $0x6c] sm:$0x30] }
 0x43b   : > { %v732_v42 = vsub.f32 1.5, %v731_v40 }
 0x43d   : > { %v733_v0 = vmul.f32 %v1292_v36, %v732_v42 }
 0x43f   : > { %v737_v44 = vsel %vm736_vm2, %v1292_v36, %v733_v0 }
 0x440   : > { %v739_v45 = vmul.f32 %v738_v43, %v737_v44 }
 0x442   : > { %742 = vperm.xlu1 %1286, %v739_v45  }
 0x44a   : > { %1287 = vset.pattern.permute.xlu1 %v1303_v37 }
 0x44b   : > { %750 = vperm.xlu1 %1287, %v738_v43  }
 0x4b4   : > { %v743_v46 = vpop.permute.xlu1 %742 }
 0x4b5   : > { %v745_v47 = vmul.f32 %v743_v46, %v716_v25  ;;  %v746_v48 = vmul.f32 %v743_v46, %v717_v26  ;;  %v747_v49 = vmul.f32 %v743_v46, %v718_v27 }
 0x4bd   : > { %v751_v50 = vpop.permute.xlu1 %750 }
 0x4be   : > { %v753_v51 = vadd.f32 %v751_v50, %v745_v47  ;;  %v754_v52 = vadd.f32 %v751_v50, %v746_v48  ;;  %v755_v53 = vadd.f32 %v751_v50, %v747_v49 }
 0x4c0   : > { %v756_v54 = vmax.f32 %v753_v51, 0.0  ;;  %v757_v55 = vmax.f32 %v754_v52, 0.0  ;;  %v758_v56 = vmax.f32 %v755_v53, 0.0 }
 0x4c2   : > { %v759_v57 = vmul.f32 %v756_v54, %v1381_v15  ;;  %v760_v58 = vmul.f32 %v757_v55, %v1379_v13  ;;  %v761_v59 = vmul.f32 %v758_v56, %v1384_v19 }
 0x4c4   : > { %v764_v60 = vpack.c.bf16 %v760_v58, %v759_v57  ;;  %v765_v37 = vpack.c.bf16 %v761_v59, %v761_v59 }
 0x4c6   : > { %766 = vst [vmem:[#allocation4 + $0x4] sm:$0xff] %v764_v60  ;;  %895 = vrot.lane.b32.xlu1 %v764_v60, %s1311_s18  ;;  %878 = vrot.lane.b32.xlu0 %v764_v60, %s1310_s17 }
 0x4c7   : > { %767 = vst [vmem:[#allocation4 + $0xc] sm:$0xf] %v765_v37 }
 0x4c8   : > { %838 = vst [vmem:[#allocation5 + $0x30] sm:$0xff] %v764_v60 }
 0x4cd   : > { %v802_v1 = vld [vmem:[#allocation4] sm:$0xff] }
 0x4ce   : > { %v858_v61 = vld [vmem:[#allocation4 + $0xc] sm:$0xff] }
 0x4cf   : > { %v803_v62 = vld [vmem:[#allocation4 + $0x8] sm:$0xff]  ;;  %863 = vrot.lane.b32.xlu2 %v858_v61, %s1308_s15  ;;  %897 = vrot.lane.b32.xlu1 %v858_v61, %s1311_s18 }
 0x4d0   : > { %v837_v63 = vld [vmem:[#allocation4 + $0xc] sm:$0xf]  ;;  %808 = vrot.lane.b32.xlu0 %v803_v62, %s1307_s14 }
 0x4d1   : > { %839 = vst [vmem:[#allocation5 + $0x38] sm:$0xf] %v837_v63 }
 0x4d7   : > { %806 = vrot.lane.b32.xlu2 %v802_v1, %s1307_s14  ;;  %861 = vrot.lane.b32.xlu1 %v764_v60, %s1308_s15 }
 0x4d8   : > { %772 = vrot.lane.b32.xlu0 %v802_v1, %s1304_s11 }
 0x4df   : > { %825 = vrot.lane.b32.xlu2 %v803_v62, %s1309_s16  ;;  %880 = vrot.lane.b32.xlu1 %v858_v61, %s1310_s17 }
 0x4e0   : > { %791 = vrot.lane.b32.xlu0 %v803_v62, %s1305_s12 }
 0x4e7   : > { %789 = vrot.lane.b32.xlu2 %v802_v1, %s1305_s12  ;;  %844 = vrot.lane.b32.xlu1 %v764_v60, %s1306_s13 }
 0x4ef   : > { %846 = vrot.lane.b32.xlu1 %v858_v61, %s1306_s13 }
 0x4f7   : > { %823 = vrot.lane.b32.xlu1 %v802_v1, %s1309_s16 }
 0x4ff   : > { %774 = vrot.lane.b32.xlu1 %v803_v62, %s1304_s11 }
 0x507   : > { %949 = vperm.xlu1 %1287, %v1448_v41  }
 0x529   : > { %v864_v4 = vpop.permute.xlu2 %863 }
 0x52a   : > { %v866_v5 = vrot.slane %v864_v4, 4 }
 0x52c   : > { %v869_v6 = vsel %vm544_vm8, %v864_v4, %v866_v5 }
 0x52d   : > { %873 = vst [vmem:[#allocation5 + $0x50] sm:$0xf] %v869_v6 }
 0x531   : > { %v807_v7 = vpop.permute.xlu2 %806 }
 0x532   : > { %v810_v18 = vrot.slane %v807_v7, 4 }
 0x534   : > { %v1223_v59 = vld [vmem:[#allocation5 + $0x50] sm:$0xf] }
 0x538   : > { %v896_v8 = vpop.permute.xlu1 %895  ;;  %v879_v9 = vpop.permute.xlu0 %878 }
 0x539   : > { %v1490_v10 = vpop.permute.xlu2 %825  ;;  %v899_v14 = vrot.slane %v896_v8, 4  ;;  %v882_v47 = vrot.slane %v879_v9, 4 }
 0x53a   : > { %v828_v11 = vrot.slane %v1490_v10, 4 }
 0x53c   : > { %v831_v41 = vsel %vm492_vm10, %v1490_v10, %v828_v11 }
 0x53d   : > { %835 = vst [vmem:[#allocation5 + $0x2c] sm:$0xf] %v831_v41 }
 0x541   : > { %v898_v12 = vpop.permute.xlu1 %897  ;;  %v790_v43 = vpop.permute.xlu2 %789 }
 0x542   : > { %v900_v16 = vrot.slane %v898_v12, 4  ;;  %v809_v17 = vpop.permute.xlu0 %808  ;;  %v793_v50 = vrot.slane %v790_v43, 4 }
 0x543   : > { %v811_v20 = vrot.slane %v809_v17, 4 }
 0x544   : > { %v901_v21 = vsel %vm294_vm0, %v899_v14, %v900_v16  ;;  %v903_v22 = vsel %vm587_vm9, %v898_v12, %v900_v16  ;;  %v1211_v16 = vld [vmem:[#allocation5 + $0x38] sm:$0xf] }
 0x545   : > { %v902_v23 = vsel %vm587_vm9, %v896_v8, %v901_v21  ;;  %907 = vst [vmem:[#allocation5 + $0x68] sm:$0xf] %v903_v22  ;;  %v812_v24 = vsel %vm294_vm0, %v810_v18, %v811_v20  ;;  %v814_v25 = vsel %vm470_vm13, %v809_v17, %v811_v20  ;;  %v1203_v18 = vld [vmem:[#allocation5 + $0x30] sm:$0xf] }
 0x546   : > { %906 = vst [vmem:[#allocation5 + $0x60] sm:$0xff] %v902_v23  ;;  %v813_v26 = vsel %vm470_vm13, %v807_v7, %v812_v24  ;;  %v1254_v23 = vld [vmem:[#allocation5 + $0x34] sm:$0xf] }
 0x547   : > { %817 = vst [vmem:[#allocation5 + $0x18] sm:$0xff] %v813_v26 }
 0x548   : > { %818 = vst [vmem:[#allocation5 + $0x20] sm:$0xf] %v814_v25 }
 0x549   : > { %v862_v27 = vpop.permute.xlu1 %861 }
 0x54a   : > { %v865_v28 = vrot.slane %v862_v27, 4  ;;  %v1503_v29 = vpop.permute.xlu0 %772 }
 0x54c   : > { %v867_v31 = vsel %vm294_vm0, %v865_v28, %v866_v5  ;;  %v1235_v32 = vld [vmem:[#allocation5 + $0x68] sm:$0xf]  ;;  %v1253_v28 = vld [vmem:[#allocation5 + $0x28] sm:$0xf0] }
 0x54d   : > { %v868_v34 = vsel %vm544_vm8, %v862_v27, %v867_v31  ;;  %v1236_v35 = vor.u32 %v1262_v30, %v1235_v32  ;;  %v1227_v36 = vld [vmem:[#allocation5 + $0x60] sm:$0xf]  ;;  %v1260_v38 = vld [vmem:[#allocation5 + $0x64] sm:$0xf] }
 0x54e   : > { %872 = vst [vmem:[#allocation5 + $0x48] sm:$0xff] %v868_v34  ;;  %v1228_v40 = vor.u32 %v1261_v33, %v1227_v36  ;;  %v1232_v42 = vor.u32 %v1260_v38, %v1229_v39  ;;  %v1191_v34 = vld [vmem:[#allocation5 + $0x18] sm:$0xf] }
 0x54f   : > { %v1041_v0 = vsel %vm1033_vm3, %v1236_v35, 0  ;;  %v1199_v27 = vld [vmem:[#allocation5 + $0x20] sm:$0xf]  ;;  %v1251_v35 = vld [vmem:[#allocation5 + $0x1c] sm:$0xf] }
 0x550   : > { %1072 = vmatpush.bf16.msrb.mxu1 %v1041_v0  ;;  %v1035_v44 = vsel %vm1033_vm3, %v1228_v40, 0  ;;  %v1038_v45 = vsel %vm1033_vm3, %v1232_v42, 0  ;;  %v1200_v30 = vor.u32 %v1253_v28, %v1199_v27 }
 0x551   : > { %1046 = vmatpush.bf16.msra.mxu3 %v1035_v44  ;;  %1059 = vmatpush.bf16.msra.mxu0 %v1038_v45  ;;  %v881_v46 = vpop.permute.xlu1 %880 }
 0x552   : > { %v883_v48 = vrot.slane %v881_v46, 4  ;;  %v792_v49 = vpop.permute.xlu0 %791 }
 0x553   : > { %v794_v51 = vrot.slane %v792_v49, 4 }
 0x554   : > { %v884_v52 = vsel %vm294_vm0, %v882_v47, %v883_v48  ;;  %v886_v53 = vsel %vm566_vm11, %v881_v46, %v883_v48 }
 0x555   : > { %v885_v54 = vsel %vm566_vm11, %v879_v9, %v884_v52  ;;  %890 = vst [vmem:[#allocation5 + $0x5c] sm:$0xf] %v886_v53  ;;  %v795_v55 = vsel %vm294_vm0, %v793_v50, %v794_v51  ;;  %v797_v56 = vsel %vm449_vm12, %v792_v49, %v794_v51  ;;  %v1215_v37 = vld [vmem:[#allocation5 + $0x48] sm:$0xf]  ;;  %v1257_v63 = vld [vmem:[#allocation5 + $0x4c] sm:$0xf] }
 0x556   : > { %889 = vst [vmem:[#allocation5 + $0x54] sm:$0xff] %v885_v54  ;;  %v796_v57 = vsel %vm449_vm12, %v790_v43, %v795_v55 }
 0x557   : > { %800 = vst [vmem:[#allocation5 + $0xc] sm:$0xff] %v796_v57 }
 0x558   : > { %801 = vst [vmem:[#allocation5 + $0x14] sm:$0xf] %v797_v56 }
 0x559   : > { %v845_v58 = vpop.permute.xlu1 %844 }
 0x55a   : > { %v848_v5 = vrot.slane %v845_v58, 4 }
 0x55c   : > { %v1259_v60 = vld [vmem:[#allocation5 + $0x58] sm:$0xf0] }
 0x55d   : > { %v1224_v61 = vor.u32 %v1259_v60, %v1223_v59  ;;  %v1258_v62 = vld [vmem:[#allocation5 + $0x50] sm:$0xf0]  ;;  %v1217_v1 = vld [vmem:[#allocation5 + $0x54] sm:$0xf0] }
 0x55e   : > { %v1216_v2 = vor.u32 %v1258_v62, %v1215_v37  ;;  %v1220_v3 = vor.u32 %v1257_v63, %v1217_v1  ;;  %v1249_v44 = vld [vmem:[#allocation5 + $0x8] sm:$0xf0]  ;;  %v1181_v48 = vld [vmem:[#allocation5 + $0xc] sm:$0xf0] }
 0x55f   : > { %1073 = vmatpush.bf16.msrb.mxu1 %v1224_v61  ;;  %v1250_v43 = vld [vmem:[#allocation5 + $0x10] sm:$0xf0] }
 0x560   : > { %1047 = vmatpush.bf16.msra.mxu3 %v1216_v2  ;;  %1060 = vmatpush.bf16.msra.mxu0 %v1220_v3 }
 0x561   : > { %v847_v4 = vpop.permute.xlu1 %846 }
 0x562   : > { %v849_v6 = vrot.slane %v847_v4, 4 }
 0x564   : > { %v850_v7 = vsel %vm294_vm0, %v848_v5, %v849_v6  ;;  %v852_v8 = vsel %vm523_vm7, %v847_v4, %v849_v6 }
 0x565   : > { %v851_v9 = vsel %vm523_vm7, %v845_v58, %v850_v7  ;;  %856 = vst [vmem:[#allocation5 + $0x44] sm:$0xf] %v852_v8 }
 0x566   : > { %855 = vst [vmem:[#allocation5 + $0x3c] sm:$0xff] %v851_v9 }
 0x569   : > { %v824_v41 = vpop.permute.xlu1 %823 }
 0x56a   : > { %v827_v12 = vrot.slane %v824_v41, 4 }
 0x56c   : > { %v829_v14 = vsel %vm294_vm0, %v827_v12, %v828_v11  ;;  %v1256_v17 = vld [vmem:[#allocation5 + $0x40] sm:$0xf0]  ;;  %v776_v11 = vrot.slane %v1503_v29, 4 }
 0x56d   : > { %v830_v20 = vsel %vm492_vm10, %v824_v41, %v829_v14  ;;  %v1212_v21 = vor.u32 %v1256_v17, %v1211_v16  ;;  %v1255_v22 = vld [vmem:[#allocation5 + $0x38] sm:$0xf0]  ;;  %v1205_v24 = vld [vmem:[#allocation5 + $0x3c] sm:$0xf0] }
 0x56e   : > { %834 = vst [vmem:[#allocation5 + $0x24] sm:$0xff] %v830_v20  ;;  %v1204_v25 = vor.u32 %v1255_v22, %v1203_v18  ;;  %v1208_v26 = vor.u32 %v1254_v23, %v1205_v24 }
 0x56f   : > { %1074 = vmatpush.bf16.msrb.mxu1 %v1212_v21 }
 0x570   : > { %1048 = vmatpush.bf16.msra.mxu3 %v1204_v25  ;;  %1061 = vmatpush.bf16.msra.mxu0 %v1208_v26 }
 0x571   : > { %v775_v10 = vpop.permute.xlu1 %774 }
 0x572   : > { %v777_v31 = vrot.slane %v775_v10, 4 }
 0x573   : > { %1075 = vmatpush.bf16.msrb.mxu1 %v1200_v30 }
 0x574   : > { %v778_v32 = vsel %vm294_vm0, %v776_v11, %v777_v31  ;;  %v780_v33 = vsel %vm427_vm6, %v775_v10, %v777_v31  ;;  %vm1029_vm0 = vcmask 621568  }
 0x575   : > { %v779_v36 = vsel %vm427_vm6, %v1503_v29, %v778_v32  ;;  %784 = vst [vmem:[#allocation5 + $0x8] sm:$0xf] %v780_v33  ;;  %v1252_v38 = vld [vmem:[#allocation5 + $0x20] sm:$0xf0]  ;;  %v1193_v39 = vld [vmem:[#allocation5 + $0x24] sm:$0xf0] }
 0x576   : > { %783 = vst [vmem:[#allocation5] sm:$0xff] %v779_v36  ;;  %v1192_v40 = vor.u32 %v1252_v38, %v1191_v34  ;;  %v1196_v42 = vor.u32 %v1251_v35, %v1193_v39  ;;  %v925_v29 = vld [vmem:[%s1544_s6] sm:$0xf] }
 0x578   : > { %1049 = vmatpush.bf16.msra.mxu3 %v1192_v40  ;;  %1062 = vmatpush.bf16.msra.mxu0 %v1196_v42 }
 0x579   : > { %v950_v51 = vpop.permute.xlu1 %949 }
 0x57c   : > { %v1187_v0 = vld [vmem:[#allocation5 + $0x8] sm:$0xf] }
 0x57d   : > { %v1188_v45 = vor.u32 %v1250_v43, %v1187_v0  ;;  %v1179_v46 = vld [vmem:[#allocation5] sm:$0xf]  ;;  %v1248_v47 = vld [vmem:[#allocation5 + $0x4] sm:$0xf] }
 0x57e   : > { %v1180_v49 = vor.u32 %v1249_v44, %v1179_v46  ;;  %v1184_v50 = vor.u32 %v1248_v47, %v1181_v48 }
 0x57f   : > { %1076 = vmatpush.bf16.msrb.mxu1 %v1188_v45 }
 0x580   : > { %1050 = vmatpush.bf16.msra.mxu3 %v1180_v49  ;;  %1063 = vmatpush.bf16.msra.mxu0 %v1184_v50 }
 0x582   : > { %1239 = vmatmul.msk.bf16.vlgmr.msrb.gmra.mxu1 %vm1029_vm0, %v925_v29 }
 0x583   : > { %1237 = vmatmul.msk.bf16.vlgmr.msra.gmra.mxu3 %vm1029_vm0, %v925_v29  ;;  %1238 = vmatmul.msk.bf16.vlgmr.msra.gmra.mxu0 %vm1029_vm0, %v925_v29 }
 0x5ff   : > { %v1078_v52 = vpop.f32.mrf.mxu1 }
 0x600   : > { %v1079_v53 = vadd.f32 %v1078_v52, %v950_v51  ;;  %v1065_v54 = vpop.f32.mrf.mxu0 }
 0x601   : > { %v1066_v55 = vadd.f32 %v1065_v54, %v950_v51 }
 0x602   : > { %v1084_v56 = vmul.f32 %v1079_v53, %v1384_v19 }
 0x603   : > { %v1083_v57 = vmul.f32 %v1066_v55, %v1379_v13 }
 0x604   : > { %1087 = vst [vmem:[%s278_s9 + $0x10] sm:$0xff] %v1084_v56 }
 0x605   : > { %1086 = vst [vmem:[%s278_s9 + $0x8] sm:$0xff] %v1083_v57 }
 0x606   : > { %v1052_v58 = vpop.f32.mrf.mxu3 }
 0x607   : > { %v1053_v59 = vadd.f32 %v1052_v58, %v950_v51  ;;  %v1080_v60 = vpop.f32.mrf.mxu1 }
 0x608   : > { %v1067_v37 = vpop.f32.mrf.mxu0 }
 0x609   : > { %v1082_v61 = vmul.f32 %v1053_v59, %v1381_v15 }
 0x60b   : > { %1085 = vst [vmem:[%s278_s9] sm:$0xff] %v1082_v61 }
 0x60e   : > { %v1054_v62 = vpop.f32.mrf.mxu3 }
 0x60f PF: > { %s17_s24 = sadd.s32 1, %s1299_s24  }
 0x610   : > { %p14_p4 = scmp.ge.s32.totalorder %s17_s24, 4  }
 0x612   :  { %16 = sbr.rel (!%p14_p4) target bundleno = 1 (0x1), region = 86 }

// kernel: _lambda_.7
= control target key start
LH: loop header
LB: loop body
LE: loop exit
PB: predicated region body
PF: predicated region fallthrough
CT: control target
= control target key end

     0   :  { %s1669_s15 = smov 0   ;;  %s2156_s0 = inlined_call_operand.vmem [shape: f32[2,4,1280], index: 0, kind: input, shape index: {}]   ;;  %s2157_s1 = inlined_call_operand.vmem [shape: f32[1,1280], index: 1, kind: input, shape index: {}]   ;;  %s2158_s2 = inlined_call_operand.vmem [shape: f32[3,1], index: 2, kind: input, shape index: {}]   ;;  %s2159_s3 = inlined_call_operand.vmem [shape: bf16[3,36], index: 3, kind: input, shape index: {}]   ;;  %s2160_s4 = inlined_call_operand.vmem [shape: f32[2,3,1280], index: 4, kind: output, shape index: {}]  }
   0x1 LB: > { %s1439_s16 = sadd.s32 4294967295, %s1633_s15   ;;  %p1443_p0 = scmp.ge.s32.totalorder %s1633_s15, 1  ;;  %s1633_s15 = sphi %s1669_s15, %s14_s15  }
   0x2   : > { %p162_p1 = scmp.lt.s32.totalorder %s1633_s15, 3 }
   0x4   : > { %p163_p2 = pnand %p1443_p0, %p162_p1 }
   0x5   : > { %p188_p3 = scmp.lt.s32.totalorder (!%p163_p2), %s1439_s16, 1  ;;  %s1636_s21 = smov (!%p163_p2), 35  }
   0x6   : > { %166 = sbr.rel (%p163_p2) target bundleno = 471 (0x1d7), region = 36  ;;  %s1637_s22 = smov (!%p163_p2), 34  }
   0x7   : > { %s1638_s23 = smov (!%p163_p2), 33   ;;  %s1639_s24 = smov (!%p163_p2), 1  }
   0x8   : > { %s1640_s25 = smov (!%p163_p2), 127   ;;  %s1641_s26 = smov (!%p163_p2), 95  }
   0x9   : > { %s1642_s27 = smov (!%p163_p2), 94   ;;  %s1643_s28 = smov (!%p163_p2), 93  }
   0xb   : > { %v1635_v0 = vmov 0   ;;  %s2178_s16 = smov (!%p188_p3, %s1439_s16), 1  ;;  %vm256_vm0 = vcmask 1041408   ;;  %vm260_vm1 = vcmask 1045508   ;;  %vm264_vm2 = vcmask 1043456  }
   0xc   : > { %204 = vst [vmem:[#allocation2] sm:$0x3] %v1635_v0  ;;  %1586 = vset.pattern.permute.xlu0 %v1635_v0  ;;  %s1568_s17 = smul.u32 40, %s2178_s16  ;;  %vm325_vm3 = vcmask 285696   ;;  %vm450_vm4 = vcmask 269312   ;;  %vm388_vm5 = vcmask 277504  }
   0xd   : > { %205 = vst [vmem:[#allocation2 + $0x16] sm:$0x3] %v1635_v0  ;;  %vm513_vm6 = vcmask 7168   ;;  %vm664_vm7 = vcmask 777216   ;;  %vm602_vm8 = vcmask 1039360   ;;  %vm727_vm9 = vcmask 769024  }
   0xe   : > { %s192_s20 = scalar_lea.vmem %s2156_s0, %s1568_s17  ;;  %vm789_vm10 = vcmask 760832   ;;  %vm966_vm11 = vcmask 293888   ;;  %s2070_s11 = scalar_lea.vmem %s2160_s4, %s1568_s17 }
   0xf   : > { %v199_v1 = vld [vmem:[%s192_s20] sm:$0xff]  ;;  %v200_v2 = vld [vmem:[%s192_s20 + $0x8] sm:$0xff]  ;;  %v201_v3 = vld [vmem:[%s192_s20 + $0x10] sm:$0xff] }
  0x10   : > { %v202_v4 = vld [vmem:[%s192_s20 + $0x18] sm:$0xff]  ;;  %211 = vst [vmem:[#allocation1] ss:$2 sm:$0xff] %v199_v1  ;;  %v203_v5 = vld [vmem:[%s192_s20 + $0x20] sm:$0xff] }
  0x11   : > { %213 = vst [vmem:[#allocation1 + $0x10] ss:$2 sm:$0xff] %v200_v2 }
  0x12   : > { %215 = vst [vmem:[#allocation1 + $0x20] ss:$2 sm:$0xff] %v201_v3 }
  0x13   : > { %217 = vst [vmem:[#allocation1 + $0x30] ss:$2 sm:$0xff] %v202_v4 }
  0x17   : > { %v218_v6 = vld.sshfl [vmem:[#allocation1] sm:$0xff pattern:$0x75316420]  ;;  %v219_v7 = vld.sshfl [vmem:[#allocation1 + $0x8] sm:$0xff pattern:$0x75316420] }
  0x18   : > { %v220_v8 = vld.sshfl [vmem:[#allocation1 + $0x10] sm:$0xff pattern:$0x75316420]  ;;  %v221_v9 = vld.sshfl [vmem:[#allocation1 + $0x18] sm:$0xff pattern:$0x75316420]  ;;  %v239_v10 = vpack.c.bf16 %v219_v7, %v218_v6 }
  0x19   : > { %v222_v11 = vld.sshfl [vmem:[#allocation1 + $0x20] sm:$0xff pattern:$0x75316420]  ;;  %v223_v12 = vld.sshfl [vmem:[#allocation1 + $0x28] sm:$0xff pattern:$0x75316420]  ;;  %v240_v13 = vpack.c.bf16 %v221_v9, %v220_v8 }
  0x1a   : > { %226 = vst [vmem:[#allocation1] ss:$2 sm:$0xff] %v203_v5  ;;  %v249_v14 = vrot.slane %v239_v10, 2  ;;  %v224_v15 = vld.sshfl [vmem:[#allocation1 + $0x30] sm:$0xff pattern:$0x75316420]  ;;  %v241_v16 = vpack.c.bf16 %v223_v12, %v222_v11 }
  0x1b   : > { %v250_v17 = vrot.slane %v240_v13, 4  ;;  %v251_v18 = vrot.slane %v240_v13, 6  ;;  %v225_v19 = vld.sshfl [vmem:[#allocation1 + $0x38] sm:$0xff pattern:$0x75316420] }
  0x1c   : > { %v259_v20 = vsel %vm256_vm0, %v239_v10, %v249_v14  ;;  %v242_v21 = vpack.c.bf16 %v225_v19, %v224_v15  ;;  %v252_v22 = vrot.slane %v241_v16, 2 }
  0x1d   : > { %v263_v23 = vsel %vm260_vm1, %v250_v17, %v251_v18 }
  0x1e   : > { %v1688_v24 = vsel %vm264_vm2, %v259_v20, %v263_v23  ;;  %v253_v25 = vrot.slane %v242_v21, 4  ;;  %v254_v26 = vrot.slane %v242_v21, 6  ;;  %v268_v27 = vsel %vm256_vm0, %v241_v16, %v252_v22 }
  0x1f   : > { %279 = vst [vmem:[#allocation2 + $0x2] sm:$0xff] %v1688_v24 }
  0x20   : > { %v271_v28 = vsel %vm260_vm1, %v253_v25, %v254_v26 }
  0x21   : > { %v227_v29 = vld.sshfl [vmem:[#allocation1] sm:$0xff pattern:$0x75316420]  ;;  %v228_v30 = vld.sshfl [vmem:[#allocation1 + $0x8] sm:$0xff pattern:$0x75316420]  ;;  %v1694_v31 = vsel %vm264_vm2, %v268_v27, %v271_v28 }
  0x22   : > { %v243_v32 = vpack.c.bf16 %v228_v30, %v227_v29  ;;  %280 = vst [vmem:[#allocation2 + $0xa] sm:$0xff] %v1694_v31 }
  0x24   : > { %v255_v33 = vrot.slane %v243_v32, 2 }
  0x26   : > { %v282_v34 = vld [vmem:[#allocation2] sm:$0xff]  ;;  %v275_v36 = vsel %vm256_vm0, %v243_v32, %v255_v33 }
  0x27   : > { %286 = vst [vmem:[#allocation1] ss:$2 sm:$0xff] %v282_v34 }
  0x28   : > { %281 = vst [vmem:[#allocation2 + $0x12] sm:$0xf] %v275_v36 }
  0x29   : > { %v283_v35 = vld [vmem:[#allocation2 + $0x8] sm:$0xff] }
  0x2a   : > { %289 = vst [vmem:[#allocation1 + $0x10] ss:$2 sm:$0xff] %v283_v35 }
  0x2e   : > { %v295_v37 = vld.sshfl [vmem:[#allocation1 + $0x8] sm:$0xff pattern:$0x75643120]  ;;  %v293_v38 = vld.sshfl [vmem:[#allocation1] sm:$0xff pattern:$0x75643120] }
  0x2f   : > { %307 = vrot.lane.b32.xlu1 %v295_v37, %s1636_s21  ;;  %305 = vrot.lane.b32.xlu0 %v293_v38, %s1636_s21  ;;  %350 = vst [vmem:[#allocation1 + $0x1] ss:$2 sm:$0xff] %v282_v34  ;;  %v284_v41 = vld [vmem:[#allocation2 + $0x10] sm:$0x3f] }
  0x30   : > { %292 = vst [vmem:[#allocation1 + $0x20] ss:$2 sm:$0xff] %v284_v41  ;;  %v347_v48 = vld [vmem:[#allocation2 + $0x10] sm:$0x3f] }
  0x31   : > { %v297_v39 = vld.sshfl [vmem:[#allocation1 + $0x10] sm:$0xff pattern:$0x75643120]  ;;  %v299_v40 = vld.sshfl [vmem:[#allocation1 + $0x18] sm:$0xff pattern:$0x75643120] }
  0x32   : > { %353 = vst [vmem:[#allocation1 + $0x11] ss:$2 sm:$0xff] %v283_v35  ;;  %311 = vrot.lane.b32.xlu2 %v299_v40, %s1636_s21  ;;  %v410_v53 = vld [vmem:[#allocation2 + $0x10] sm:$0x3f] }
  0x33   : > { %v472_v60 = vld [vmem:[#allocation2 + $0x10] sm:$0x3f] }
  0x34   : > { %v535_v5 = vld [vmem:[#allocation2 + $0x12] sm:$0xf] }
  0x35   : > { %v561_v10 = vld [vmem:[#allocation2 + $0x12] sm:$0x3f] }
  0x36   : > { %v359_v42 = vld.sshfl [vmem:[#allocation1 + $0x8] sm:$0xff pattern:$0x75643120]  ;;  %v357_v43 = vld.sshfl [vmem:[#allocation1] sm:$0xff pattern:$0x75643120] }
  0x37   : > { %309 = vrot.lane.b32.xlu0 %v297_v39, %s1636_s21  ;;  %412 = vst [vmem:[#allocation1] ss:$2 sm:$0xff] %v282_v34  ;;  %v1706_v46 = vld.sshfl [vmem:[#allocation1 + $0x20] sm:$0xff pattern:$0x75643120] }
  0x38   : > { %v1708_v47 = vld.sshfl [vmem:[#allocation1 + $0x28] sm:$0xff pattern:$0x75643120]  ;;  %v624_v16 = vld [vmem:[#allocation2 + $0x12] sm:$0x3f] }
  0x39   : > { %v361_v44 = vld.sshfl [vmem:[#allocation1 + $0x10] sm:$0xff pattern:$0x75643120]  ;;  %v1702_v45 = vld.sshfl [vmem:[#allocation1 + $0x18] sm:$0xff pattern:$0x75643120] }
  0x3a   : > { %415 = vst [vmem:[#allocation1 + $0x10] ss:$2 sm:$0xff] %v283_v35  ;;  %373 = vrot.lane.b32.xlu1 %v361_v44, %s1637_s22  ;;  %369 = vrot.lane.b32.xlu2 %v357_v43, %s1637_s22  ;;  %v686_v23 = vld [vmem:[#allocation2 + $0x12] sm:$0x3f] }
  0x3b   : > { %356 = vst [vmem:[#allocation1 + $0x21] ss:$2 sm:$0xff] %v347_v48  ;;  %v749_v27 = vld [vmem:[#allocation2 + $0x12] sm:$0x3f] }
  0x3e   : > { %v421_v49 = vld.sshfl [vmem:[#allocation1 + $0x8] sm:$0xff pattern:$0x75643120]  ;;  %v419_v50 = vld.sshfl [vmem:[#allocation1] sm:$0xff pattern:$0x75643120] }
  0x3f   : > { %371 = vrot.lane.b32.xlu0 %v359_v42, %s1637_s22  ;;  %475 = vst [vmem:[#allocation1 + $0x1] ss:$2 sm:$0xff] %v282_v34 }
  0x41   : > { %v423_v51 = vld.sshfl [vmem:[#allocation1 + $0x10] sm:$0xff pattern:$0x75643120]  ;;  %v1711_v52 = vld.sshfl [vmem:[#allocation1 + $0x18] sm:$0xff pattern:$0x75643120] }
  0x42   : > { %431 = vrot.lane.b32.xlu1 %v419_v50, %s1638_s23  ;;  %433 = vrot.lane.b32.xlu2 %v421_v49, %s1638_s23  ;;  %478 = vst [vmem:[#allocation1 + $0x11] ss:$2 sm:$0xff] %v283_v35  ;;  %v1715_v54 = vld.sshfl [vmem:[#allocation1 + $0x20] sm:$0xff pattern:$0x75643120] }
  0x43   : > { %v1717_v55 = vld.sshfl [vmem:[#allocation1 + $0x28] sm:$0xff pattern:$0x75643120] }
  0x44   : > { %418 = vst [vmem:[#allocation1 + $0x20] ss:$2 sm:$0xff] %v410_v53 }
  0x46   : > { %v484_v56 = vld.sshfl [vmem:[#allocation1 + $0x8] sm:$0xff pattern:$0x75643120]  ;;  %v482_v57 = vld.sshfl [vmem:[#allocation1] sm:$0xff pattern:$0x75643120] }
  0x47   : > { %494 = vrot.lane.b32.xlu0 %v482_v57, %s1639_s24  ;;  %537 = vst [vmem:[#allocation1] ss:$2 sm:$0xff] %v1688_v24 }
  0x49   : > { %v486_v58 = vld.sshfl [vmem:[#allocation1 + $0x10] sm:$0xff pattern:$0x75643120]  ;;  %v1721_v59 = vld.sshfl [vmem:[#allocation1 + $0x18] sm:$0xff pattern:$0x75643120] }
  0x4a   : > { %496 = vrot.lane.b32.xlu1 %v484_v56, %s1639_s24  ;;  %435 = vrot.lane.b32.xlu2 %v423_v51, %s1638_s23  ;;  %540 = vst [vmem:[#allocation1 + $0x10] ss:$2 sm:$0xff] %v1694_v31 }
  0x4b   : > { %v1726_v61 = vld.sshfl [vmem:[#allocation1 + $0x20] sm:$0xff pattern:$0x75643120]  ;;  %v1728_v62 = vld.sshfl [vmem:[#allocation1 + $0x28] sm:$0xff pattern:$0x75643120] }
  0x4c   : > { %481 = vst [vmem:[#allocation1 + $0x21] ss:$2 sm:$0xff] %v472_v60 }
  0x4e   : > { %v544_v63 = vld.sshfl [vmem:[#allocation1] sm:$0xff pattern:$0x75643120]  ;;  %v545_v0 = vld.sshfl [vmem:[#allocation1 + $0x8] sm:$0xff pattern:$0x75643120] }
  0x4f   : > { %498 = vrot.lane.b32.xlu0 %v486_v58, %s1639_s24  ;;  %564 = vst [vmem:[#allocation1 + $0x1] ss:$2 sm:$0xff] %v1688_v24 }
  0x50   : > { %554 = vst [vmem:[#allocation3 + $0x50] sm:$0x33] %v544_v63 }
  0x51   : > { %555 = vst [vmem:[#allocation3 + $0x58] sm:$0x33] %v545_v0  ;;  %v546_v1 = vld.sshfl [vmem:[#allocation1 + $0x10] sm:$0xff pattern:$0x75643120] }
  0x52   : > { %v547_v2 = vld.sshfl [vmem:[#allocation1 + $0x18] sm:$0xff pattern:$0x75643120]  ;;  %556 = vst [vmem:[#allocation3 + $0x60] sm:$0x33] %v546_v1 }
  0x53   : > { %567 = vst [vmem:[#allocation1 + $0x11] ss:$2 sm:$0xff] %v1694_v31  ;;  %v1733_v3 = vld.sshfl [vmem:[#allocation1 + $0x20] sm:$0xff pattern:$0x75643120] }
  0x54   : > { %557 = vst [vmem:[#allocation3 + $0x68] sm:$0x33] %v547_v2  ;;  %v1735_v4 = vld.sshfl [vmem:[#allocation1 + $0x28] sm:$0xff pattern:$0x75643120] }
  0x55   : > { %543 = vst [vmem:[#allocation1 + $0x20] ss:$2 sm:$0xff] %v535_v5 }
  0x56   : > { %v571_v6 = vld.sshfl [vmem:[#allocation1] sm:$0xff pattern:$0x75643120]  ;;  %v573_v7 = vld.sshfl [vmem:[#allocation1 + $0x8] sm:$0xff pattern:$0x75643120] }
  0x57   : > { %583 = vrot.lane.b32.xlu1 %v571_v6, %s1640_s25  ;;  %626 = vst [vmem:[#allocation1] ss:$2 sm:$0xff] %v1688_v24 }
  0x5a   : > { %v575_v8 = vld.sshfl [vmem:[#allocation1 + $0x10] sm:$0xff pattern:$0x75643120]  ;;  %v577_v9 = vld.sshfl [vmem:[#allocation1 + $0x18] sm:$0xff pattern:$0x75643120] }
  0x5b   : > { %587 = vrot.lane.b32.xlu0 %v575_v8, %s1640_s25  ;;  %629 = vst [vmem:[#allocation1 + $0x10] ss:$2 sm:$0xff] %v1694_v31 }
  0x5c   : > { %v548_v13 = vld.sshfl [vmem:[#allocation1 + $0x20] sm:$0xff pattern:$0x75643120] }
  0x5d   : > { %570 = vst [vmem:[#allocation1 + $0x21] ss:$2 sm:$0xff] %v561_v10 }
  0x5e   : > { %v633_v11 = vld.sshfl [vmem:[#allocation1] sm:$0xff pattern:$0x75643120]  ;;  %v635_v12 = vld.sshfl [vmem:[#allocation1 + $0x8] sm:$0xff pattern:$0x75643120] }
  0x5f   : > { %585 = vrot.lane.b32.xlu1 %v573_v7, %s1640_s25  ;;  %645 = vrot.lane.b32.xlu2 %v633_v11, %s1641_s26  ;;  %689 = vst [vmem:[#allocation1 + $0x1] ss:$2 sm:$0xff] %v1688_v24 }
  0x60   : > { %558 = vst [vmem:[#allocation3 + $0x70] sm:$0x33] %v548_v13 }
  0x62   : > { %v637_v14 = vld.sshfl [vmem:[#allocation1 + $0x10] sm:$0xff pattern:$0x75643120]  ;;  %v639_v15 = vld.sshfl [vmem:[#allocation1 + $0x18] sm:$0xff pattern:$0x75643120] }
  0x63   : > { %692 = vst [vmem:[#allocation1 + $0x11] ss:$2 sm:$0xff] %v1694_v31 }
  0x64   : > { %v579_v19 = vld.sshfl [vmem:[#allocation1 + $0x20] sm:$0xff pattern:$0x75643120]  ;;  %v581_v20 = vld.sshfl [vmem:[#allocation1 + $0x28] sm:$0xff pattern:$0x75643120] }
  0x65   : > { %632 = vst [vmem:[#allocation1 + $0x20] ss:$2 sm:$0xff] %v624_v16 }
  0x66   : > { %v696_v17 = vld.sshfl [vmem:[#allocation1] sm:$0xff pattern:$0x75643120]  ;;  %v698_v18 = vld.sshfl [vmem:[#allocation1 + $0x8] sm:$0xff pattern:$0x75643120] }
  0x67   : > { %589 = vrot.lane.b32.xlu1 %v577_v9, %s1640_s25  ;;  %647 = vrot.lane.b32.xlu2 %v635_v12, %s1641_s26  ;;  %751 = vst [vmem:[#allocation1] ss:$2 sm:$0xff] %v1688_v24 }
  0x68   : > { %708 = vrot.lane.b32.xlu0 %v696_v17, %s1642_s27 }
  0x6a   : > { %v702_v21 = vld.sshfl [vmem:[#allocation1 + $0x18] sm:$0xff pattern:$0x75643120]  ;;  %v700_v22 = vld.sshfl [vmem:[#allocation1 + $0x10] sm:$0xff pattern:$0x75643120] }
  0x6b   : > { %754 = vst [vmem:[#allocation1 + $0x10] ss:$2 sm:$0xff] %v1694_v31 }
  0x6c   : > { %v641_v25 = vld.sshfl [vmem:[#allocation1 + $0x20] sm:$0xff pattern:$0x75643120]  ;;  %v643_v26 = vld.sshfl [vmem:[#allocation1 + $0x28] sm:$0xff pattern:$0x75643120] }
  0x6d   : > { %695 = vst [vmem:[#allocation1 + $0x21] ss:$2 sm:$0xff] %v686_v23 }
  0x6e   : > { %v758_v24 = vld.sshfl [vmem:[#allocation1] sm:$0xff pattern:$0x75643120]  ;;  %v760_v30 = vld.sshfl [vmem:[#allocation1 + $0x8] sm:$0xff pattern:$0x75643120] }
  0x6f   : > { %649 = vrot.lane.b32.xlu1 %v637_v14, %s1641_s26  ;;  %651 = vrot.lane.b32.xlu2 %v639_v15, %s1641_s26 }
  0x70   : > { %714 = vrot.lane.b32.xlu0 %v702_v21, %s1642_s27 }
  0x72   : > { %v762_v31 = vld.sshfl [vmem:[#allocation1 + $0x10] sm:$0xff pattern:$0x75643120]  ;;  %v764_v33 = vld.sshfl [vmem:[#allocation1 + $0x18] sm:$0xff pattern:$0x75643120] }
  0x74   : > { %v704_v28 = vld.sshfl [vmem:[#allocation1 + $0x20] sm:$0xff pattern:$0x75643120]  ;;  %v706_v29 = vld.sshfl [vmem:[#allocation1 + $0x28] sm:$0xff pattern:$0x75643120] }
  0x75   : > { %757 = vst [vmem:[#allocation1 + $0x20] ss:$2 sm:$0xff] %v749_v27 }
  0x77   : > { %712 = vrot.lane.b32.xlu2 %v700_v22, %s1642_s27  ;;  %710 = vrot.lane.b32.xlu1 %v698_v18, %s1642_s27 }
  0x78   : > { %770 = vrot.lane.b32.xlu0 %v758_v24, %s1643_s28 }
  0x7c   : > { %v766_v34 = vld.sshfl [vmem:[#allocation1 + $0x20] sm:$0xff pattern:$0x75643120]  ;;  %v768_v37 = vld.sshfl [vmem:[#allocation1 + $0x28] sm:$0xff pattern:$0x75643120] }
  0x7f   : > { %500 = vrot.lane.b32.xlu2 %v1721_v59, %s1639_s24  ;;  %437 = vrot.lane.b32.xlu1 %v1711_v52, %s1638_s23 }
  0x80   : > { %772 = vrot.lane.b32.xlu0 %v760_v30, %s1643_s28 }
  0x87   : > { %591 = vrot.lane.b32.xlu1 %v579_v19, %s1640_s25  ;;  %653 = vrot.lane.b32.xlu2 %v641_v25, %s1641_s26 }
  0x88   : > { %375 = vrot.lane.b32.xlu0 %v1702_v45, %s1637_s22 }
  0x8c   : > { %v1763_v32 = vpop.permute.xlu2 %311 }
  0x8d   : > { %v320_v49 = vrot.slane %v1763_v32, 4 }
  0x8f   : > { %313 = vrot.lane.b32.xlu1 %v1706_v46, %s1636_s21  ;;  %774 = vrot.lane.b32.xlu2 %v762_v31, %s1643_s28 }
  0x90   : > { %716 = vrot.lane.b32.xlu0 %v704_v28, %s1642_s27 }
  0x94   : > { %v370_v35 = vpop.permute.xlu2 %369 }
  0x95   : > { %v381_v59 = vrot.slane %v370_v35, 4 }
  0x97   : > { %776 = vrot.lane.b32.xlu2 %v764_v33, %s1643_s28  ;;  %778 = vrot.lane.b32.xlu1 %v766_v34, %s1643_s28 }
  0x98   : > { %439 = vrot.lane.b32.xlu0 %v1726_v61, %s1638_s23 }
  0x9c   : > { %v434_v36 = vpop.permute.xlu2 %433 }
  0x9d   : > { %v444_v42 = vrot.slane %v434_v36, 4 }
  0x9f   : > { %377 = vrot.lane.b32.xlu2 %v1715_v54, %s1637_s22  ;;  %502 = vrot.lane.b32.xlu1 %v1733_v3, %s1639_s24 }
  0xa0   : > { %780 = vrot.lane.b32.xlu0 %v768_v37, %s1643_s28 }
  0xa1   : > { %v308_v38 = vpop.permute.xlu1 %307  ;;  %v306_v39 = vpop.permute.xlu0 %305 }
  0xa2   : > { %v318_v40 = vrot.slane %v308_v38, 4  ;;  %v317_v41 = vrot.slane %v306_v39, 4 }
  0xa4   : > { %v324_v43 = vsel %vm264_vm2, %v317_v41, %v318_v40  ;;  %v1775_v44 = vpop.permute.xlu2 %435 }
  0xa5   : > { %v326_v45 = vsel %vm325_vm3, %v306_v39, %v324_v43  ;;  %v445_v46 = vrot.slane %v1775_v44, 4 }
  0xa6   : > { %340 = vst [vmem:[#allocation3] sm:$0x33] %v326_v45 }
  0xa7   : > { %593 = vrot.lane.b32.xlu2 %v581_v20, %s1640_s25  ;;  %718 = vrot.lane.b32.xlu1 %v706_v29, %s1642_s27  ;;  %v452_v48 = vsel %vm264_vm2, %v444_v42, %v445_v46 }
  0xa8   : > { %655 = vrot.lane.b32.xlu0 %v643_v26, %s1641_s26  ;;  %v453_v50 = vsel %vm450_vm4, %v434_v36, %v452_v48 }
  0xa9   : > { %v310_v51 = vpop.permute.xlu0 %309  ;;  %466 = vst [vmem:[#allocation3 + $0x30] sm:$0x33] %v453_v50 }
  0xaa   : > { %v319_v52 = vrot.slane %v310_v51, 4 }
  0xac   : > { %v1787_v53 = vpop.permute.xlu1 %373  ;;  %v327_v54 = vsel %vm264_vm2, %v318_v40, %v319_v52  ;;  %v329_v56 = vsel %vm264_vm2, %v319_v52, %v320_v49 }
  0xad   : > { %v328_v57 = vsel %vm325_vm3, %v308_v38, %v327_v54  ;;  %v330_v58 = vsel %vm325_vm3, %v310_v51, %v329_v56  ;;  %v383_v60 = vrot.slane %v1787_v53, 4 }
  0xae   : > { %341 = vst [vmem:[#allocation3 + $0x8] sm:$0x33] %v328_v57 }
  0xaf   : > { %342 = vst [vmem:[#allocation3 + $0x10] sm:$0x33] %v330_v58  ;;  %315 = vrot.lane.b32.xlu2 %v1708_v47, %s1636_s21  ;;  %441 = vrot.lane.b32.xlu1 %v1728_v62, %s1638_s23 }
  0xb0   : > { %379 = vrot.lane.b32.xlu0 %v1717_v55, %s1637_s22 }
  0xb1   : > { %v372_v61 = vpop.permute.xlu0 %371 }
  0xb2   : > { %v382_v63 = vrot.slane %v372_v61, 4 }
  0xb4   : > { %v387_v0 = vsel %vm264_vm2, %v381_v59, %v382_v63  ;;  %v390_v1 = vsel %vm264_vm2, %v382_v63, %v383_v60  ;;  %v432_v2 = vpop.permute.xlu1 %431 }
  0xb5   : > { %v389_v47 = vsel %vm388_vm5, %v370_v35, %v387_v0  ;;  %v391_v62 = vsel %vm388_vm5, %v372_v61, %v390_v1  ;;  %v443_v3 = vrot.slane %v432_v2, 4 }
  0xb6   : > { %403 = vst [vmem:[#allocation3] sm:$0xcc] %v389_v47 }
  0xb7   : > { %404 = vst [vmem:[#allocation3 + $0x8] sm:$0xcc] %v391_v62  ;;  %v449_v5 = vsel %vm264_vm2, %v443_v3, %v444_v42  ;;  %504 = vrot.lane.b32.xlu2 %v1735_v4, %s1639_s24 }
  0xb8   : > { %v451_v55 = vsel %vm450_vm4, %v432_v2, %v449_v5 }
  0xb9   : > { %465 = vst [vmem:[#allocation3 + $0x28] sm:$0x33] %v451_v55  ;;  %v495_v6 = vpop.permute.xlu0 %494  ;;  %v646_v7 = vpop.permute.xlu2 %645 }
  0xba   : > { %v506_v8 = vrot.slane %v495_v6, 4  ;;  %v657_v13 = vrot.slane %v646_v7, 4 }
  0xbc   : > { %v497_v9 = vpop.permute.xlu1 %496 }
  0xbd   : > { %v507_v10 = vrot.slane %v497_v9, 4 }
  0xbf   : > { %v512_v11 = vsel %vm264_vm2, %v506_v8, %v507_v10 }
  0xc0   : > { %v514_v12 = vsel %vm513_vm6, %v495_v6, %v512_v11 }
  0xc1   : > { %528 = vst [vmem:[#allocation3 + $0x28] sm:$0xcc] %v514_v12  ;;  %v499_v14 = vpop.permute.xlu0 %498  ;;  %v648_v15 = vpop.permute.xlu2 %647 }
  0xc2   : > { %v508_v16 = vrot.slane %v499_v14, 4  ;;  %v658_v17 = vrot.slane %v648_v15, 4 }
  0xc4   : > { %v515_v4 = vsel %vm264_vm2, %v507_v10, %v508_v16  ;;  %v663_v18 = vsel %vm264_vm2, %v657_v13, %v658_v17 }
  0xc5   : > { %v516_v19 = vsel %vm513_vm6, %v497_v9, %v515_v4  ;;  %v665_v20 = vsel %vm664_vm7, %v646_v7, %v663_v18 }
  0xc6   : > { %529 = vst [vmem:[#allocation3 + $0x30] sm:$0xcc] %v516_v19 }
  0xc7   : > { %679 = vst [vmem:[#allocation3 + $0x78] sm:$0x33] %v665_v20 }
  0xc9   : > { %v584_v21 = vpop.permute.xlu1 %583  ;;  %v652_v22 = vpop.permute.xlu2 %651 }
  0xca   : > { %v595_v27 = vrot.slane %v584_v21, 4  ;;  %v660_v50 = vrot.slane %v652_v22, 4 }
  0xcd   : > { %v588_v23 = vpop.permute.xlu0 %587 }
  0xce   : > { %v597_v25 = vrot.slane %v588_v23, 4 }
  0xd1   : > { %v586_v26 = vpop.permute.xlu1 %585  ;;  %v713_v24 = vpop.permute.xlu2 %712 }
  0xd2   : > { %v596_v28 = vrot.slane %v586_v26, 4  ;;  %v722_v43 = vrot.slane %v713_v24, 4 }
  0xd4   : > { %v601_v29 = vsel %vm264_vm2, %v595_v27, %v596_v28  ;;  %v604_v30 = vsel %vm264_vm2, %v596_v28, %v597_v25 }
  0xd5   : > { %v603_v31 = vsel %vm602_vm8, %v584_v21, %v601_v29  ;;  %v605_v33 = vsel %vm602_vm8, %v586_v26, %v604_v30 }
  0xd6   : > { %617 = vst [vmem:[#allocation3 + $0x50] sm:$0xcc] %v603_v31 }
  0xd7   : > { %618 = vst [vmem:[#allocation3 + $0x58] sm:$0xcc] %v605_v33 }
  0xd9   : > { %v1822_v34 = vpop.permute.xlu1 %589  ;;  %v1824_v35 = vpop.permute.xlu2 %500 }
  0xda   : > { %v598_v36 = vrot.slane %v1822_v34, 4  ;;  %v509_v37 = vrot.slane %v1824_v35, 4  ;;  %v709_v38 = vpop.permute.xlu0 %708 }
  0xdb   : > { %v720_v3 = vrot.slane %v709_v38, 4 }
  0xdc   : > { %v606_v39 = vsel %vm264_vm2, %v597_v25, %v598_v36  ;;  %v517_v40 = vsel %vm264_vm2, %v508_v16, %v509_v37 }
  0xdd   : > { %v607_v41 = vsel %vm602_vm8, %v588_v23, %v606_v39  ;;  %v518_v42 = vsel %vm513_vm6, %v499_v14, %v517_v40 }
  0xde   : > { %619 = vst [vmem:[#allocation3 + $0x60] sm:$0xcc] %v607_v41 }
  0xdf   : > { %530 = vst [vmem:[#allocation3 + $0x38] sm:$0xcc] %v518_v42 }
  0xe1   : > { %v650_v45 = vpop.permute.xlu1 %649  ;;  %v1836_v48 = vpop.permute.xlu2 %653 }
  0xe2   : > { %v659_v51 = vrot.slane %v650_v45, 4  ;;  %v1838_v52 = vpop.permute.xlu0 %714  ;;  %v661_v54 = vrot.slane %v1836_v48, 4 }
  0xe3   : > { %v723_v56 = vrot.slane %v1838_v52, 4 }
  0xe4   : > { %v666_v57 = vsel %vm264_vm2, %v658_v17, %v659_v51  ;;  %v668_v58 = vsel %vm264_vm2, %v659_v51, %v660_v50  ;;  %v670_v59 = vsel %vm264_vm2, %v660_v50, %v661_v54 }
  0xe5   : > { %v667_v61 = vsel %vm664_vm7, %v648_v15, %v666_v57  ;;  %v669_v63 = vsel %vm664_vm7, %v650_v45, %v668_v58  ;;  %v731_v0 = vsel %vm264_vm2, %v722_v43, %v723_v56  ;;  %v671_v1 = vsel %vm664_vm7, %v652_v22, %v670_v59 }
  0xe6   : > { %680 = vst [vmem:[#allocation3 + $0x80] sm:$0x33] %v667_v61  ;;  %v732_v2 = vsel %vm727_vm9, %v713_v24, %v731_v0 }
  0xe7   : > { %681 = vst [vmem:[#allocation3 + $0x88] sm:$0x33] %v669_v63 }
  0xe8   : > { %682 = vst [vmem:[#allocation3 + $0x90] sm:$0x33] %v671_v1 }
  0xe9   : > { %v711_v47 = vpop.permute.xlu1 %710  ;;  %744 = vst [vmem:[#allocation3 + $0x88] sm:$0xcc] %v732_v2  ;;  %v775_v62 = vpop.permute.xlu2 %774 }
  0xea   : > { %v721_v5 = vrot.slane %v711_v47, 4  ;;  %v771_v55 = vpop.permute.xlu0 %770  ;;  %v784_v10 = vrot.slane %v775_v62, 4 }
  0xeb   : > { %v782_v16 = vrot.slane %v771_v55, 4 }
  0xec   : > { %v726_v6 = vsel %vm264_vm2, %v720_v3, %v721_v5  ;;  %v729_v7 = vsel %vm264_vm2, %v721_v5, %v722_v43 }
  0xed   : > { %v728_v8 = vsel %vm727_vm9, %v709_v38, %v726_v6  ;;  %v730_v9 = vsel %vm727_vm9, %v711_v47, %v729_v7 }
  0xee   : > { %742 = vst [vmem:[#allocation3 + $0x78] sm:$0xcc] %v728_v8 }
  0xef   : > { %743 = vst [vmem:[#allocation3 + $0x80] sm:$0xcc] %v730_v9 }
  0xf1   : > { %v1858_v11 = vpop.permute.xlu1 %437  ;;  %v1860_v12 = vpop.permute.xlu2 %776 }
  0xf2   : > { %v446_v13 = vrot.slane %v1858_v11, 4  ;;  %v773_v14 = vpop.permute.xlu0 %772  ;;  %v785_v15 = vrot.slane %v1860_v12, 4 }
  0xf3   : > { %v783_v17 = vrot.slane %v773_v14, 4 }
  0xf4   : > { %v454_v4 = vsel %vm264_vm2, %v445_v46, %v446_v13  ;;  %v793_v18 = vsel %vm264_vm2, %v784_v10, %v785_v15  ;;  %v835_v46 = vld [vmem:[%s2158_s2] sm:$0x7] }
  0xf5   : > { %v455_v19 = vsel %vm450_vm4, %v1775_v44, %v454_v4  ;;  %v788_v20 = vsel %vm264_vm2, %v782_v16, %v783_v17  ;;  %v791_v21 = vsel %vm264_vm2, %v783_v17, %v784_v10  ;;  %v794_v25 = vsel %vm789_vm10, %v775_v62, %v793_v18  ;;  %838 = vperm.xlu0 %1586, %v835_v46   ;;  %v1563_v1 = vld [vmem:[#allocation3 + $0x74] sm:$0xf0]  ;;  %v1490_v3 = vld [vmem:[#allocation3 + $0x78] sm:$0xf0]  ;;  %v1488_v17 = vld [vmem:[#allocation3 + $0x50] sm:$0xf] }
  0xf6   : > { %467 = vst [vmem:[#allocation3 + $0x38] sm:$0x33] %v455_v19  ;;  %v790_v22 = vsel %vm789_vm10, %v771_v55, %v788_v20  ;;  %v792_v23 = vsel %vm789_vm10, %v773_v14, %v791_v21  ;;  %v1564_v9 = vld [vmem:[#allocation3 + $0x7c] sm:$0xf0]  ;;  %v1498_v10 = vld [vmem:[#allocation3 + $0x80] sm:$0xf0]  ;;  %v1489_v20 = vor.u32 %v1563_v1, %v1488_v17 }
  0xf7   : > { %804 = vst [vmem:[#allocation3 + $0xa0] sm:$0x33] %v790_v22  ;;  %v1558_v4 = vld [vmem:[#allocation3 + $0x54] sm:$0xf]  ;;  %v1559_v22 = vld [vmem:[#allocation3 + $0x5c] sm:$0xf] }
  0xf8   : > { %805 = vst [vmem:[#allocation3 + $0xa8] sm:$0x33] %v792_v23  ;;  %v1493_v21 = vor.u32 %v1558_v4, %v1490_v3  ;;  %v1553_v46 = vld [vmem:[#allocation3 + $0x24] sm:$0xf0] }
  0xf9   : > { %806 = vst [vmem:[#allocation3 + $0xb0] sm:$0x33] %v794_v25  ;;  %v592_v26 = vpop.permute.xlu1 %591  ;;  %v1882_v44 = vpop.permute.xlu2 %377  ;;  %v1501_v25 = vor.u32 %v1559_v22, %v1498_v10  ;;  %v1565_v1 = vld [vmem:[#allocation3 + $0x84] sm:$0xf0] }
  0xfa   : > { %v376_v24 = vpop.permute.xlu0 %375  ;;  %v599_v27 = vrot.slane %v592_v26, 4  ;;  %v385_v28 = vrot.slane %v1882_v44, 4 }
  0xfb   : > { %v384_v29 = vrot.slane %v376_v24, 4 }
  0xfc   : > { %v608_v30 = vsel %vm264_vm2, %v598_v36, %v599_v27 }
  0xfd   : > { %v392_v31 = vsel %vm264_vm2, %v383_v60, %v384_v29  ;;  %v609_v33 = vsel %vm602_vm8, %v1822_v34, %v608_v30  ;;  %v394_v38 = vsel %vm264_vm2, %v384_v29, %v385_v28 }
  0xfe   : > { %v393_v39 = vsel %vm388_vm5, %v1787_v53, %v392_v31  ;;  %620 = vst [vmem:[#allocation3 + $0x68] sm:$0xcc] %v609_v33  ;;  %v395_v40 = vsel %vm388_vm5, %v376_v24, %v394_v38  ;;  %v830_v41 = vld [vmem:[#allocation3 + $0xa0] sm:$0x33]  ;;  %v1458_v24 = vld [vmem:[#allocation3 + $0x30] sm:$0xf0] }
  0xff   : > { %405 = vst [vmem:[#allocation3 + $0x10] sm:$0xcc] %v393_v39  ;;  %v906_v36 = vunpack.c.l.b16 %v830_v41  ;;  %v907_v42 = vunpack.c.h.b16 %v830_v41  ;;  %v831_v43 = vld [vmem:[#allocation3 + $0xa8] sm:$0x33]  ;;  %v1548_v31 = vld [vmem:[#allocation3 + $0x4] sm:$0xf] }
 0x100   : > { %406 = vst [vmem:[#allocation3 + $0x18] sm:$0xcc] %v395_v40  ;;  %v908_v60 = vunpack.c.l.b16 %v831_v43  ;;  %v909_v45 = vunpack.c.h.b16 %v831_v43  ;;  %v832_v50 = vld [vmem:[#allocation3 + $0xb0] sm:$0x33]  ;;  %v1549_v43 = vld [vmem:[#allocation3 + $0xc] sm:$0xf] }
 0x101   : > { %v1899_v34 = vpop.permute.xlu1 %313  ;;  %v594_v51 = vpop.permute.xlu2 %593  ;;  %v936_v57 = vpack.c.b16 %v906_v36, %v906_v36  ;;  %v937_v58 = vpack.c.b16 %v907_v42, %v907_v42  ;;  %v910_v5 = vunpack.c.l.b16 %v832_v50  ;;  %v911_v18 = vunpack.c.h.b16 %v832_v50  ;;  %v1456_v42 = vld [vmem:[#allocation3 + $0x8] sm:$0xf] }
 0x102   : > { %v321_v59 = vrot.slane %v1899_v34, 4  ;;  %v600_v53 = vrot.slane %v594_v51, 4  ;;  %v1902_v61 = vpop.permute.xlu0 %716  ;;  %v938_v63 = vpack.c.b16 %v908_v60, %v908_v60  ;;  %v939_v0 = vpack.c.b16 %v909_v45, %v909_v45 }
 0x103   : > { %v724_v2 = vrot.slane %v1902_v61, 4  ;;  %v971_v47 = vsel %vm256_vm0, %v936_v57, 0  ;;  %v974_v62 = vsel %vm256_vm0, %v937_v58, 0  ;;  %v941_v33 = vpack.c.b16 %v911_v18, %v911_v18 }
 0x104   : > { %v331_v55 = vsel %vm264_vm2, %v320_v49, %v321_v59  ;;  %v610_v6 = vsel %vm264_vm2, %v599_v27, %v600_v53  ;;  %1005 = vmatpush.bf16.msra.mxu0 %v971_v47  ;;  %1018 = vmatpush.bf16.msra.mxu1 %v974_v62  ;;  %v977_v7 = vsel %vm256_vm0, %v938_v63, 0  ;;  %v980_v8 = vsel %vm256_vm0, %v939_v0, 0  ;;  %v1937_v53 = vld [vmem:[%s2159_s3] sm:$0x3]  ;;  %v1506_v47 = vld [vmem:[#allocation3 + $0x88] sm:$0xf0] }
 0x105   : > { %v332_v14 = vsel %vm325_vm3, %v1763_v32, %v331_v55  ;;  %v611_v16 = vsel %vm602_vm8, %v592_v26, %v610_v6  ;;  %v733_v49 = vsel %vm264_vm2, %v723_v56, %v724_v2  ;;  %1031 = vmatpush.bf16.msra.mxu2 %v977_v7  ;;  %1044 = vmatpush.bf16.msra.mxu3 %v980_v8  ;;  %v1496_v32 = vld [vmem:[#allocation3 + $0x58] sm:$0xf]  ;;  %v1450_v26 = vld [vmem:[#allocation3 + $0x28] sm:$0xf0]  ;;  %v1554_v56 = vld [vmem:[#allocation3 + $0x2c] sm:$0xf0] }
 0x106   : > { %343 = vst [vmem:[#allocation3 + $0x18] sm:$0x33] %v332_v14  ;;  %v734_v19 = vsel %vm727_vm9, %v1838_v52, %v733_v49  ;;  %v1497_v23 = vor.u32 %v1564_v9, %v1496_v32  ;;  %v940_v27 = vpack.c.b16 %v910_v5, %v910_v5  ;;  %v1448_v52 = vld [vmem:[#allocation3] sm:$0xf]  ;;  %v1453_v36 = vor.u32 %v1548_v31, %v1450_v26  ;;  %v1464_v55 = vld [vmem:[#allocation3 + $0x10] sm:$0xf] }
 0x107   : > { %621 = vst [vmem:[#allocation3 + $0x70] sm:$0xcc] %v611_v16  ;;  %v1449_v41 = vor.u32 %v1553_v46, %v1448_v52  ;;  %v1457_v45 = vor.u32 %v1554_v56, %v1456_v42  ;;  %v1461_v50 = vor.u32 %v1549_v43, %v1458_v24  ;;  %v986_v0 = vsel %vm256_vm0, %v941_v33, 0  ;;  %v1550_v6 = vld [vmem:[#allocation3 + $0x14] sm:$0xf] }
 0x108   : > { %745 = vst [vmem:[#allocation3 + $0x90] sm:$0xcc] %v734_v19  ;;  %1006 = vmatpush.bf16.msra.mxu0 %v1489_v20  ;;  %1019 = vmatpush.bf16.msra.mxu1 %v1493_v21  ;;  %v983_v58 = vsel %vm256_vm0, %v940_v27, 0  ;;  %v1555_v14 = vld [vmem:[#allocation3 + $0x34] sm:$0xf0] }
 0x109   : > { %1032 = vmatpush.bf16.msra.mxu2 %v1497_v23  ;;  %1045 = vmatpush.bf16.msra.mxu3 %v1501_v25  ;;  %v316_v29 = vpop.permute.xlu2 %315  ;;  %v1923_v30 = vpop.permute.xlu1 %778  ;;  %v1466_v16 = vld [vmem:[#allocation3 + $0x38] sm:$0xf0]  ;;  %v1465_v4 = vor.u32 %v1555_v14, %v1464_v55 }
 0x10a   : > { %v322_v38 = vrot.slane %v316_v29, 4  ;;  %v1925_v39 = vpop.permute.xlu0 %439  ;;  %v786_v40 = vrot.slane %v1923_v30, 4  ;;  %v1469_v18 = vor.u32 %v1550_v6, %v1466_v16 }
 0x10b   : > { %v447_v60 = vrot.slane %v1925_v39, 4 }
 0x10c   : > { %v333_v51 = vsel %vm264_vm2, %v321_v59, %v322_v38  ;;  %v795_v57 = vsel %vm264_vm2, %v785_v15, %v786_v40  ;;  %1007 = vmatpush.bf16.msra.mxu0 %v1449_v41  ;;  %1020 = vmatpush.bf16.msra.mxu1 %v1453_v36 }
 0x10d   : > { %v334_v63 = vsel %vm325_vm3, %v1899_v34, %v333_v51  ;;  %v456_v59 = vsel %vm264_vm2, %v446_v13, %v447_v60  ;;  %v796_v15 = vsel %vm789_vm10, %v1860_v12, %v795_v57  ;;  %1033 = vmatpush.bf16.msra.mxu2 %v1457_v45  ;;  %1046 = vmatpush.bf16.msra.mxu3 %v1461_v50  ;;  %v1504_v12 = vld [vmem:[#allocation3 + $0x60] sm:$0xf]  ;;  %v1560_v13 = vld [vmem:[#allocation3 + $0x64] sm:$0xf] }
 0x10e   : > { %344 = vst [vmem:[#allocation3 + $0x20] sm:$0x33] %v334_v63  ;;  %v457_v62 = vsel %vm450_vm4, %v1858_v11, %v456_v59  ;;  %v1505_v34 = vor.u32 %v1565_v1, %v1504_v12  ;;  %v1509_v3 = vor.u32 %v1560_v13, %v1506_v47 }
 0x10f   : > { %468 = vst [vmem:[#allocation3 + $0x40] sm:$0x33] %v457_v62  ;;  %1526 = vmatmul.msk.bf16.vlgmr.msra.gmra.mxu0 %vm966_vm11, %v1937_v53  ;;  %1527 = vmatmul.msk.bf16.vlgmr.msra.gmra.mxu1 %vm966_vm11, %v1937_v53  ;;  %v1566_v52 = vld [vmem:[#allocation3 + $0x8c] sm:$0xf0]  ;;  %v1514_v31 = vld [vmem:[#allocation3 + $0x90] sm:$0xf0] }
 0x110   : > { %1057 = vmatpush.bf16.msrb.mxu0 %v983_v58  ;;  %1070 = vmatpush.bf16.msrb.mxu1 %v986_v0  ;;  %807 = vst [vmem:[#allocation3 + $0xb8] sm:$0x33] %v796_v15  ;;  %v1551_v0 = vld [vmem:[#allocation3 + $0x1c] sm:$0xf] }
 0x111   : > { %1529 = vmatmul.msk.bf16.vlgmr.msra.gmra.mxu3 %vm966_vm11, %v1937_v53  ;;  %1528 = vmatmul.msk.bf16.vlgmr.msra.gmra.mxu2 %vm966_vm11, %v1937_v53  ;;  %v505_v11 = vpop.permute.xlu2 %504  ;;  %v503_v5 = vpop.permute.xlu1 %502 }
 0x112   : > { %v511_v7 = vrot.slane %v505_v11, 4  ;;  %v781_v8 = vpop.permute.xlu0 %780  ;;  %v510_v9 = vrot.slane %v503_v5, 4  ;;  %v1520_v11 = vld [vmem:[#allocation3 + $0x70] sm:$0xf] }
 0x113   : > { %v787_v10 = vrot.slane %v781_v8, 4 }
 0x114   : > { %1058 = vmatpush.bf16.msrb.mxu0 %v1505_v34  ;;  %1071 = vmatpush.bf16.msrb.mxu1 %v1509_v3  ;;  %v519_v49 = vsel %vm264_vm2, %v509_v37, %v510_v9  ;;  %v521_v17 = vsel %vm264_vm2, %v510_v9, %v511_v7 }
 0x115   : > { %v797_v19 = vsel %vm264_vm2, %v786_v40, %v787_v10  ;;  %v520_v20 = vsel %vm513_vm6, %v1824_v35, %v519_v49  ;;  %v522_v21 = vsel %vm513_vm6, %v503_v5, %v521_v17  ;;  %v1512_v40 = vld [vmem:[#allocation3 + $0x68] sm:$0xf]  ;;  %v1562_v5 = vld [vmem:[#allocation3 + $0x74] sm:$0xf] }
 0x116   : > { %v798_v32 = vsel %vm789_vm10, %v1923_v30, %v797_v19  ;;  %531 = vst [vmem:[#allocation3 + $0x40] sm:$0xcc] %v520_v20 }
 0x117   : > { %808 = vst [vmem:[#allocation3 + $0xc0] sm:$0x33] %v798_v32  ;;  %v833_v22 = vld [vmem:[#allocation3 + $0xb8] sm:$0x33] }
 0x118   : > { %1059 = vmatpush.bf16.msrb.mxu0 %v1465_v4  ;;  %1072 = vmatpush.bf16.msrb.mxu1 %v1469_v18  ;;  %532 = vst [vmem:[#allocation3 + $0x48] sm:$0xcc] %v522_v21  ;;  %v912_v37 = vunpack.c.l.b16 %v833_v22  ;;  %v913_v23 = vunpack.c.h.b16 %v833_v22 }
 0x119   : > { %v719_v25 = vpop.permute.xlu1 %718 }
 0x11a   : > { %v656_v46 = vpop.permute.xlu0 %655  ;;  %v725_v26 = vrot.slane %v719_v25, 4  ;;  %v942_v56 = vpack.c.b16 %v912_v37, %v912_v37  ;;  %v943_v24 = vpack.c.b16 %v913_v23, %v913_v23 }
 0x11b   : > { %v662_v27 = vrot.slane %v656_v46, 4 }
 0x11c   : > { %v735_v35 = vsel %vm264_vm2, %v724_v2, %v725_v26  ;;  %v989_v29 = vsel %vm256_vm0, %v942_v56, 0  ;;  %v992_v30 = vsel %vm256_vm0, %v943_v24, 0  ;;  %v1561_v2 = vld [vmem:[#allocation3 + $0x6c] sm:$0xf] }
 0x11d   : > { %v672_v33 = vsel %vm264_vm2, %v661_v54, %v662_v27  ;;  %v736_v38 = vsel %vm727_vm9, %v1902_v61, %v735_v35  ;;  %1083 = vmatpush.bf16.msrb.mxu2 %v989_v29  ;;  %1096 = vmatpush.bf16.msrb.mxu3 %v992_v30  ;;  %v1513_v54 = vor.u32 %v1566_v52, %v1512_v40  ;;  %v1556_v43 = vld [vmem:[#allocation3 + $0x3c] sm:$0xf0]  ;;  %v1474_v50 = vld [vmem:[#allocation3 + $0x40] sm:$0xf0] }
 0x11e   : > { %v673_v41 = vsel %vm664_vm7, %v1836_v48, %v672_v33  ;;  %746 = vst [vmem:[#allocation3 + $0x98] sm:$0xcc] %v736_v38  ;;  %v834_v36 = vld [vmem:[#allocation3 + $0xc0] sm:$0x33]  ;;  %v1517_v42 = vor.u32 %v1561_v2, %v1514_v31  ;;  %v1472_v48 = vld [vmem:[#allocation3 + $0x18] sm:$0xf]  ;;  %v1477_v47 = vor.u32 %v1551_v0, %v1474_v50 }
 0x11f   : > { %683 = vst [vmem:[#allocation3 + $0x98] sm:$0x33] %v673_v41  ;;  %1530 = vmatmul.msk.bf16.vlgmr.msrb.gmra.mxu0 %vm966_vm11, %v1937_v53  ;;  %1531 = vmatmul.msk.bf16.vlgmr.msrb.gmra.mxu1 %vm966_vm11, %v1937_v53  ;;  %v914_v61 = vunpack.c.l.b16 %v834_v36  ;;  %v915_v45 = vunpack.c.h.b16 %v834_v36  ;;  %v1473_v15 = vor.u32 %v1556_v43, %v1472_v48  ;;  %v2014_v31 = vld [vmem:[%s2157_s1] sm:$0xff] }
 0x121   : > { %1084 = vmatpush.bf16.msrb.mxu2 %v1513_v54  ;;  %1097 = vmatpush.bf16.msrb.mxu3 %v1517_v42  ;;  %v442_v51 = vpop.permute.xlu1 %441  ;;  %v944_v57 = vpack.c.b16 %v914_v61, %v914_v61  ;;  %v945_v58 = vpack.c.b16 %v915_v45, %v915_v45  ;;  %v1324_v42 = vperm.slane %v2014_v31, 0 }
 0x122   : > { %v380_v63 = vpop.permute.xlu0 %379  ;;  %v448_v59 = vrot.slane %v442_v51, 4 }
 0x123   : > { %v386_v1 = vrot.slane %v380_v63, 4  ;;  %v995_v62 = vsel %vm256_vm0, %v944_v57, 0  ;;  %v998_v12 = vsel %vm256_vm0, %v945_v58, 0  ;;  %v1325_v57 = vperm.slane %v2014_v31, 1 }
 0x124   : > { %v458_v13 = vsel %vm264_vm2, %v447_v60, %v448_v59  ;;  %1109 = vmatpush.bf16.msra.mxu0 %v995_v62  ;;  %1122 = vmatpush.bf16.msra.mxu1 %v998_v12 }
 0x125   : > { %v396_v34 = vsel %vm264_vm2, %v385_v28, %v386_v1  ;;  %v459_v3 = vsel %vm450_vm4, %v1925_v39, %v458_v13  ;;  %1085 = vmatpush.bf16.msrb.mxu2 %v1473_v15  ;;  %1098 = vmatpush.bf16.msrb.mxu3 %v1477_v47  ;;  %v1327_v1 = vperm.slane %v2014_v31, 3 }
 0x126   : > { %v397_v55 = vsel %vm388_vm5, %v1882_v44, %v396_v34  ;;  %469 = vst [vmem:[#allocation3 + $0x48] sm:$0x33] %v459_v3  ;;  %v1567_v6 = vld [vmem:[#allocation3 + $0x94] sm:$0xf0]  ;;  %v1522_v7 = vld [vmem:[#allocation3 + $0x98] sm:$0xf0] }
 0x127   : > { %407 = vst [vmem:[#allocation3 + $0x20] sm:$0xcc] %v397_v55  ;;  %v1521_v60 = vor.u32 %v1567_v6, %v1520_v11  ;;  %v1525_v8 = vor.u32 %v1562_v5, %v1522_v7 }
 0x128   : > { %1532 = vmatmul.msk.bf16.vlgmr.msrb.gmra.mxu2 %vm966_vm11, %v1937_v53  ;;  %1533 = vmatmul.msk.bf16.vlgmr.msrb.gmra.mxu3 %vm966_vm11, %v1937_v53 }
 0x129   : > { %1110 = vmatpush.bf16.msra.mxu0 %v1521_v60  ;;  %1123 = vmatpush.bf16.msra.mxu1 %v1525_v8 }
 0x12d   : > { %v1557_v28 = vld [vmem:[#allocation3 + $0x44] sm:$0xf0]  ;;  %v1482_v39 = vld [vmem:[#allocation3 + $0x48] sm:$0xf0] }
 0x12e   : > { %v1480_v9 = vld [vmem:[#allocation3 + $0x20] sm:$0xf]  ;;  %v1552_v10 = vld [vmem:[#allocation3 + $0x24] sm:$0xf] }
 0x12f   : > { %v1481_v14 = vor.u32 %v1557_v28, %v1480_v9  ;;  %v1485_v44 = vor.u32 %v1552_v10, %v1482_v39 }
 0x131   : > { %1111 = vmatpush.bf16.msra.mxu0 %v1481_v14  ;;  %1124 = vmatpush.bf16.msra.mxu1 %v1485_v44 }
 0x134   : > { %1534 = vmatmul.msk.bf16.vlgmr.msra.gmra.mxu0 %vm966_vm11, %v1937_v53  ;;  %1535 = vmatmul.msk.bf16.vlgmr.msra.gmra.mxu1 %vm966_vm11, %v1937_v53 }
 0x167   : > { %v2005_v16 = vpop.permute.xlu0 %838 }
 0x18c   : > { %v1009_v49 = vpop.f32.mrf.mxu0  ;;  %v1022_v17 = vpop.f32.mrf.mxu1 }
 0x18d   : > { %v1010_v4 = vadd.f32 %v1009_v49, %v2005_v16  ;;  %v1023_v18 = vadd.f32 %v1022_v17, %v2005_v16 }
 0x18f   : > { %v1536_v19 = vmul.f32 -1.442695, %v1010_v4  ;;  %v1537_v20 = vmul.f32 -1.442695, %v1023_v18 }
 0x191   : > { %1587 = vpow2.f32 %v1536_v19 }
 0x192   : > { %1589 = vpow2.f32 %v1537_v20 }
 0x194   : > { %v1048_v21 = vpop.f32.mrf.mxu3  ;;  %v1035_v32 = vpop.f32.mrf.mxu2 }
 0x195   : > { %v1011_v22 = vpop.f32.mrf.mxu0  ;;  %v1024_v37 = vpop.f32.mrf.mxu1  ;;  %v1049_v23 = vadd.f32 %v1048_v21, %v2005_v16  ;;  %v1036_v53 = vadd.f32 %v1035_v32, %v2005_v16 }
 0x197   : > { %v1539_v25 = vmul.f32 -1.442695, %v1049_v23  ;;  %v1538_v46 = vmul.f32 -1.442695, %v1036_v53  ;;  %v1588_v26 = vpop.eup %1587 }
 0x198   : > { %v1590_v56 = vpop.eup %1589  ;;  %v1160_v24 = vadd.f32 1.0, %v1588_v26 }
 0x199   : > { %1591 = vpow2.f32 %v1539_v25  ;;  %v1161_v27 = vadd.f32 1.0, %v1590_v56 }
 0x19a   : > { %1593 = vpow2.f32 %v1538_v46  ;;  %v1179_v45 = vand.u32 2147483647, %v1160_v24  ;;  %v1181_v51 = vand.u32 2147483648, %v1160_v24  ;;  %vm1175_vm12 = vweird.f32 %v1160_v24 }
 0x19b   : > { %1595 = vrcp.f32 %v1160_v24  ;;  %v1194_v59 = vand.u32 2147483647, %v1161_v27  ;;  %v1196_v15 = vand.u32 2147483648, %v1161_v27  ;;  %vm1190_vm13 = vweird.f32 %v1161_v27 }
 0x19c   : > { %1597 = vrcp.f32 %v1161_v27  ;;  %v1037_v35 = vpop.f32.mrf.mxu2  ;;  %v1050_v29 = vpop.f32.mrf.mxu3  ;;  %vm2027_vm15 = vcmp.eq.f32.partialorder %v1179_v45, 8.507059e+37  ;;  %v1182_v34 = vor.u32 1.1754944e-38, %v1181_v51 }
 0x19d   : > { %v1061_v30 = vpop.f32.mrf.mxu0  ;;  %v1074_v52 = vpop.f32.mrf.mxu1  ;;  %vm2031_vm1 = vcmp.eq.f32.partialorder %v1194_v59, 8.507059e+37  ;;  %v1197_v6 = vor.u32 1.1754944e-38, %v1196_v15 }
 0x19e   : > { %v1062_v33 = vadd.f32 %v1061_v30, %v2005_v16  ;;  %v1075_v40 = vadd.f32 %v1074_v52, %v2005_v16 }
 0x19f   : > { %v1592_v38 = vpop.eup %1591 }
 0x1a0   : > { %v1594_v41 = vpop.eup %1593  ;;  %v2018_v2 = vadd.f32 1.0, %v1592_v38  ;;  %v1540_v50 = vmul.f32 -1.442695, %v1062_v33  ;;  %v1541_v58 = vmul.f32 -1.442695, %v1075_v40  ;;  %v1326_v38 = vperm.slane %v2014_v31, 2 }
 0x1a1   : > { %v1596_v36 = vpop.eup %1595  ;;  %v2020_v54 = vadd.f32 1.0, %v1594_v41 }
 0x1a2   : > { %v1598_v43 = vpop.eup %1597  ;;  %v1171_v61 = vmul.f32 %v1596_v36, %v1160_v24  ;;  %1599 = vrcp.f32 %v2018_v2  ;;  %vm1176_vm14 = vweird.f32 %v1596_v36  ;;  %v1224_v7 = vand.u32 2147483647, %v2018_v2 }
 0x1a3   : > { %v1186_v48 = vmul.f32 %v1598_v43, %v1161_v27  ;;  %1601 = vrcp.f32 %v2020_v54  ;;  %vm1191_vm0 = vweird.f32 %v1598_v43  ;;  %vm1177_vm3 = vmor %vm1175_vm12, %vm1176_vm14  ;;  %vm1220_vm4 = vweird.f32 %v2018_v2 }
 0x1a4   : > { %v1172_v63 = vsub.f32 1.0, %v1171_v61  ;;  %1603 = vpow2.f32 %v1540_v50  ;;  %v1226_v28 = vand.u32 2147483648, %v2018_v2  ;;  %vm1192_vm5 = vmor %vm1190_vm13, %vm1191_vm0  ;;  %vm1205_vm7 = vweird.f32 %v2020_v54 }
 0x1a5   : > { %v1187_v0 = vsub.f32 1.0, %v1186_v48  ;;  %v1076_v47 = vpop.f32.mrf.mxu1  ;;  %v1063_v62 = vpop.f32.mrf.mxu0  ;;  %1605 = vpow2.f32 %v1541_v58  ;;  %v1209_v10 = vand.u32 2147483647, %v2020_v54  ;;  %vm2048_vm8 = vcmp.eq.f32.partialorder %v1224_v7, 8.507059e+37 }
 0x1a6   : > { %v1173_v12 = vmul.f32 %v1596_v36, %v1172_v63  ;;  %v1211_v20 = vand.u32 2147483648, %v2020_v54  ;;  %v1227_v26 = vor.u32 1.1754944e-38, %v1226_v28 }
 0x1a7   : > { %v1188_v3 = vmul.f32 %v1598_v43, %v1187_v0  ;;  %vm1210_vm12 = vcmp.eq.f32.partialorder %v1209_v10, 8.507059e+37 }
 0x1a8   : > { %v1600_v11 = vpop.eup %1599  ;;  %v1174_v5 = vadd.f32 %v1596_v36, %v1173_v12  ;;  %v1212_v33 = vor.u32 1.1754944e-38, %v1211_v20 }
 0x1a9   : > { %v1189_v60 = vadd.f32 %v1598_v43, %v1188_v3  ;;  %v1216_v8 = vmul.f32 %v1600_v11, %v2018_v2  ;;  %v1602_v39 = vpop.eup %1601  ;;  %vm1221_vm6 = vweird.f32 %v1600_v11 }
 0x1aa   : > { %v1178_v9 = vsel %vm1177_vm3, %v1596_v36, %v1174_v5  ;;  %v1201_v17 = vmul.f32 %v1602_v39, %v2020_v54  ;;  %v1604_v4 = vpop.eup %1603  ;;  %vm1206_vm9 = vweird.f32 %v1602_v39  ;;  %vm2058_vm10 = vmor %vm1220_vm4, %vm1221_vm6 }
 0x1ab   : > { %v1183_v14 = vsel %vm2027_vm15, %v1182_v34, %v1178_v9  ;;  %v1193_v44 = vsel %vm1192_vm5, %v1598_v43, %v1189_v60  ;;  %v1217_v49 = vsub.f32 1.0, %v1216_v8  ;;  %v1087_v21 = vpop.f32.mrf.mxu2  ;;  %v1100_v32 = vpop.f32.mrf.mxu3  ;;  %v2053_v25 = vadd.f32 1.0, %v1604_v4  ;;  %vm2076_vm11 = vmor %vm1205_vm7, %vm1206_vm9 }
 0x1ac   : > { %v1198_v18 = vsel %vm2031_vm1, %v1197_v6, %v1193_v44  ;;  %v1606_v22 = vpop.eup %1605  ;;  %v1202_v23 = vsub.f32 1.0, %v1201_v17  ;;  %v1344_v56 = vmul.f32 %v1324_v42, %v1183_v14  ;;  %v1088_v27 = vadd.f32 %v1087_v21, %v2005_v16 }
 0x1ad   : > { %v1218_v37 = vmul.f32 %v1600_v11, %v1217_v49  ;;  %v1345_v53 = vmul.f32 %v1325_v57, %v1198_v18  ;;  %v2062_v24 = vadd.f32 1.0, %v1606_v22  ;;  %1607 = vrcp.f32 %v2053_v25 }
 0x1ae   : > { %v1203_v29 = vmul.f32 %v1602_v39, %v1202_v23  ;;  %v1101_v40 = vadd.f32 %v1100_v32, %v2005_v16  ;;  %v1542_v50 = vmul.f32 -1.442695, %v1088_v27  ;;  %vm1235_vm13 = vweird.f32 %v2053_v25 }
 0x1af   : > { %v1219_v35 = vadd.f32 %v1600_v11, %v1218_v37  ;;  %v1364_v30 = vrot.slane %v1345_v53, 4  ;;  %1609 = vrcp.f32 %v2062_v24  ;;  %v1256_v55 = vand.u32 2147483648, %v2062_v24 }
 0x1b0   : > { %v1204_v2 = vadd.f32 %v1602_v39, %v1203_v29  ;;  %v1543_v48 = vmul.f32 -1.442695, %v1101_v40  ;;  %1611 = vpow2.f32 %v1542_v50  ;;  %v1328_v44 = vperm.slane %v2014_v31, 4 }
 0x1b1   : > { %v1223_v41 = vsel %vm2058_vm10, %v1600_v11, %v1219_v35  ;;  %v1369_v36 = vsel %vm264_vm2, %v1344_v56, %v1364_v30  ;;  %v1113_v42 = vpop.f32.mrf.mxu0  ;;  %v1126_v43 = vpop.f32.mrf.mxu1  ;;  %v1241_v11 = vand.u32 2147483648, %v2053_v25  ;;  %vm1250_vm1 = vweird.f32 %v2062_v24 }
 0x1b2   : > { %v1228_v54 = vsel %vm2048_vm8, %v1227_v26, %v1223_v41  ;;  %1379 = vst [vmem:[%s2070_s11] sm:$0x77] %v1369_v36  ;;  %v1208_v45 = vsel %vm2076_vm11, %v1602_v39, %v1204_v2  ;;  %1613 = vpow2.f32 %v1543_v48  ;;  %v1114_v62 = vadd.f32 %v1113_v42, %v2005_v16 }
 0x1b3   : > { %v1347_v61 = vmul.f32 %v1327_v1, %v1228_v54  ;;  %v1213_v51 = vsel %vm1210_vm12, %v1212_v33, %v1208_v45  ;;  %v1102_v57 = vpop.f32.mrf.mxu3  ;;  %v1089_v58 = vpop.f32.mrf.mxu2  ;;  %v1127_v3 = vadd.f32 %v1126_v43, %v2005_v16  ;;  %v1239_v39 = vand.u32 2147483647, %v2053_v25 }
 0x1b4   : > { %v1608_v63 = vpop.eup %1607  ;;  %v1346_v15 = vmul.f32 %v1326_v38, %v1213_v51  ;;  %v1544_v34 = vmul.f32 -1.442695, %v1114_v62  ;;  %v1254_v16 = vand.u32 2147483647, %v2062_v24  ;;  %v1329_v18 = vperm.slane %v2014_v31, 5 }
 0x1b5   : > { %v1365_v59 = vrot.slane %v1347_v61, 4  ;;  %v1610_v0 = vpop.eup %1609  ;;  %v1231_v47 = vmul.f32 %v1608_v63, %v2053_v25  ;;  %vm1236_vm14 = vweird.f32 %v1608_v63  ;;  %v1545_v7 = vmul.f32 -1.442695, %v1127_v3 }
 0x1b6   : > { %v1246_v12 = vmul.f32 %v1610_v0, %v2062_v24  ;;  %1615 = vpow2.f32 %v1544_v34  ;;  %v1612_v28 = vpop.eup %1611  ;;  %vm1251_vm15 = vweird.f32 %v1610_v0  ;;  %vm2108_vm0 = vmor %vm1235_vm13, %vm1236_vm14  ;;  %v1242_v21 = vor.u32 1.1754944e-38, %v1241_v11  ;;  %v1321_v34 = vld [vmem:[%s2157_s1 + $0x8] sm:$0x3] }
 0x1b7   : > { %v1370_v1 = vsel %vm264_vm2, %v1346_v15, %v1365_v59  ;;  %v1232_v13 = vsub.f32 1.0, %v1231_v47  ;;  %v1166_v49 = vadd.f32 1.0, %v1612_v28  ;;  %1617 = vpow2.f32 %v1545_v7  ;;  %vm1252_vm3 = vmor %vm1250_vm1, %vm1251_vm15 }
 0x1b8   : > { %1380 = vst [vmem:[%s2070_s11 + $0x8] sm:$0x77] %v1370_v1  ;;  %v1247_v5 = vsub.f32 1.0, %v1246_v12  ;;  %v1614_v10 = vpop.eup %1613  ;;  %v1257_v32 = vor.u32 1.1754944e-38, %v1256_v55  ;;  %vm1240_vm4 = vcmp.eq.f32.partialorder %v1239_v39, 8.507059e+37  ;;  %vm1255_vm5 = vcmp.eq.f32.partialorder %v1254_v16, 8.507059e+37 }
 0x1b9   : > { %v1233_v6 = vmul.f32 %v1608_v63, %v1232_v13  ;;  %v1115_v60 = vpop.f32.mrf.mxu0  ;;  %v1128_v8 = vpop.f32.mrf.mxu1  ;;  %v1167_v19 = vadd.f32 1.0, %v1614_v10  ;;  %1619 = vrcp.f32 %v1166_v49  ;;  %v1269_v40 = vand.u32 2147483647, %v1166_v49 }
 0x1ba   : > { %v1248_v9 = vmul.f32 %v1610_v0, %v1247_v5  ;;  %v1271_v41 = vand.u32 2147483648, %v1166_v49  ;;  %vm1265_vm6 = vweird.f32 %v1166_v49  ;;  %v1330_v61 = vperm.slane %v2014_v31, 6 }
 0x1bb   : > { %v1234_v14 = vadd.f32 %v1608_v63, %v1233_v6  ;;  %1621 = vrcp.f32 %v1167_v19  ;;  %v1284_v36 = vand.u32 2147483647, %v1167_v19  ;;  %v1286_v42 = vand.u32 2147483648, %v1167_v19 }
 0x1bc   : > { %v1249_v4 = vadd.f32 %v1610_v0, %v1248_v9  ;;  %v1616_v37 = vpop.eup %1615  ;;  %vm1280_vm8 = vweird.f32 %v1167_v19  ;;  %vm2125_vm10 = vcmp.eq.f32.partialorder %v1269_v40, 8.507059e+37  ;;  %v1331_v57 = vperm.slane %v2014_v31, 7 }
 0x1bd   : > { %v1238_v20 = vsel %vm2108_vm0, %v1608_v63, %v1234_v14  ;;  %v1618_v46 = vpop.eup %1617  ;;  %v2116_v26 = vadd.f32 1.0, %v1616_v37  ;;  %v1272_v59 = vor.u32 1.1754944e-38, %v1271_v41  ;;  %vm1285_vm12 = vcmp.eq.f32.partialorder %v1284_v36, 8.507059e+37 }
 0x1be   : > { %v1253_v22 = vsel %vm1252_vm3, %v1610_v0, %v1249_v4  ;;  %v1243_v23 = vsel %vm1240_vm4, %v1242_v21, %v1238_v20  ;;  %v2118_v27 = vadd.f32 1.0, %v1618_v46  ;;  %v1287_v62 = vor.u32 1.1754944e-38, %v1286_v42 }
 0x1bf   : > { %v1258_v53 = vsel %vm1255_vm5, %v1257_v32, %v1253_v22  ;;  %v1348_v56 = vmul.f32 %v1328_v44, %v1243_v23  ;;  %v1620_v35 = vpop.eup %1619  ;;  %1623 = vrcp.f32 %v2116_v26  ;;  %v1299_v12 = vand.u32 2147483647, %v2116_v26 }
 0x1c0   : > { %v1349_v25 = vmul.f32 %v1329_v18, %v1258_v53  ;;  %v1261_v52 = vmul.f32 %v1620_v35, %v1166_v49  ;;  %1625 = vrcp.f32 %v2118_v27  ;;  %vm1266_vm7 = vweird.f32 %v1620_v35 }
 0x1c1   : > { %v1622_v29 = vpop.eup %1621  ;;  %vm2131_vm11 = vmor %vm1265_vm6, %vm1266_vm7  ;;  %v1301_v13 = vand.u32 2147483648, %v2116_v26  ;;  %v1316_v11 = vand.u32 2147483648, %v2118_v27  ;;  %v1314_v8 = vand.u32 2147483647, %v2118_v27  ;;  %vm1295_vm0 = vweird.f32 %v2116_v26 }
 0x1c2   : > { %v1366_v24 = vrot.slane %v1349_v25, 4  ;;  %v1276_v33 = vmul.f32 %v1622_v29, %v1167_v19  ;;  %v1262_v38 = vsub.f32 1.0, %v1261_v52  ;;  %vm1281_vm9 = vweird.f32 %v1622_v29 }
 0x1c3   : > { %vm1282_vm13 = vmor %vm1280_vm8, %vm1281_vm9  ;;  %v1333_v39 = vperm.slane %v1321_v34, 1  ;;  %vm1310_vm3 = vweird.f32 %v2118_v27  ;;  %v1302_v44 = vor.u32 1.1754944e-38, %v1301_v13  ;;  %v1332_v49 = vperm.slane %v1321_v34, 0 }
 0x1c4   : > { %v1371_v30 = vsel %vm264_vm2, %v1348_v56, %v1366_v24  ;;  %v1277_v2 = vsub.f32 1.0, %v1276_v33  ;;  %v1263_v54 = vmul.f32 %v1620_v35, %v1262_v38  ;;  %v1317_v17 = vor.u32 1.1754944e-38, %v1316_v11 }
 0x1c5   : > { %1381 = vst [vmem:[%s2070_s11 + $0x10] sm:$0x77] %v1371_v30  ;;  %v1624_v43 = vpop.eup %1623  ;;  %vm1300_vm5 = vcmp.eq.f32.partialorder %v1299_v12, 8.507059e+37  ;;  %vm1315_vm6 = vcmp.eq.f32.partialorder %v1314_v8, 8.507059e+37 }
 0x1c6   : > { %v1278_v45 = vmul.f32 %v1622_v29, %v1277_v2  ;;  %v1626_v50 = vpop.eup %1625  ;;  %v1264_v51 = vadd.f32 %v1620_v35, %v1263_v54  ;;  %v1291_v58 = vmul.f32 %v1624_v43, %v2116_v26  ;;  %vm1296_vm14 = vweird.f32 %v1624_v43 }
 0x1c7   : > { %v1306_v0 = vmul.f32 %v1626_v50, %v2118_v27  ;;  %vm1311_vm15 = vweird.f32 %v1626_v50  ;;  %vm1297_vm1 = vmor %vm1295_vm0, %vm1296_vm14 }
 0x1c8   : > { %v1279_v15 = vadd.f32 %v1622_v29, %v1278_v45  ;;  %v1268_v47 = vsel %vm2131_vm11, %v1620_v35, %v1264_v51  ;;  %v1292_v1 = vsub.f32 1.0, %v1291_v58  ;;  %vm1312_vm4 = vmor %vm1310_vm3, %vm1311_vm15 }
 0x1c9   : > { %v1307_v3 = vsub.f32 1.0, %v1306_v0  ;;  %v1273_v5 = vsel %vm2125_vm10, %v1272_v59, %v1268_v47 }
 0x1ca   : > { %v1283_v31 = vsel %vm1282_vm13, %v1622_v29, %v1279_v15  ;;  %v1293_v6 = vmul.f32 %v1624_v43, %v1292_v1  ;;  %v1350_v9 = vmul.f32 %v1330_v61, %v1273_v5 }
 0x1cb   : > { %v1288_v55 = vsel %vm1285_vm12, %v1287_v62, %v1283_v31  ;;  %v1308_v60 = vmul.f32 %v1626_v50, %v1307_v3 }
 0x1cc   : > { %v1351_v7 = vmul.f32 %v1331_v57, %v1288_v55  ;;  %v1294_v28 = vadd.f32 %v1624_v43, %v1293_v6 }
 0x1cd   : > { %v1309_v10 = vadd.f32 %v1626_v50, %v1308_v60 }
 0x1ce   : > { %v1367_v16 = vrot.slane %v1351_v7, 4  ;;  %v1298_v14 = vsel %vm1297_vm1, %v1624_v43, %v1294_v28 }
 0x1cf   : > { %v1313_v18 = vsel %vm1312_vm4, %v1626_v50, %v1309_v10  ;;  %v1303_v19 = vsel %vm1300_vm5, %v1302_v44, %v1298_v14 }
 0x1d0   : > { %v1372_v4 = vsel %vm264_vm2, %v1350_v9, %v1367_v16  ;;  %v1318_v20 = vsel %vm1315_vm6, %v1317_v17, %v1313_v18  ;;  %v1352_v32 = vmul.f32 %v1332_v49, %v1303_v19 }
 0x1d1   : > { %1382 = vst [vmem:[%s2070_s11 + $0x18] sm:$0x77] %v1372_v4  ;;  %v1353_v21 = vmul.f32 %v1333_v39, %v1318_v20 }
 0x1d3   : > { %v1368_v22 = vrot.slane %v1353_v21, 4 }
 0x1d5   : > { %v1373_v37 = vsel %vm264_vm2, %v1352_v32, %v1368_v22 }
 0x1d6   : > { %1383 = vst [vmem:[%s2070_s11 + $0x20] sm:$0x77] %v1373_v37 }
 0x1d7 PF: > { %s14_s15 = sadd.s32 1, %s1633_s15  }
 0x1d8   : > { %p11_p4 = scmp.ge.s32.totalorder %s14_s15, 4  }
 0x1da   :  { %13 = sbr.rel (!%p11_p4) target bundleno = 1 (0x1), region = 91 }

// kernel: _lambda_.6
= control target key start
LH: loop header
LB: loop body
LE: loop exit
PB: predicated region body
PF: predicated region fallthrough
CT: control target
= control target key end

     0   :  { %s2966_s24 = smov 0   ;;  %s3872_s0 = inlined_call_operand.vmem [shape: f32[2,8,1280], index: 0, kind: input, shape index: {}]   ;;  %s3873_s1 = inlined_call_operand.vmem [shape: f32[1,1280], index: 1, kind: input, shape index: {}]   ;;  %s3874_s2 = inlined_call_operand.vmem [shape: f32[8,2], index: 2, kind: input, shape index: {}]   ;;  %s3875_s3 = inlined_call_operand.vmem [shape: f32[4,2], index: 3, kind: input, shape index: {}]   ;;  %s3876_s4 = inlined_call_operand.vmem [shape: f32[4,2], index: 4, kind: input, shape index: {}]   ;;  %s3877_s5 = inlined_call_operand.vmem [shape: bf16[4,72], index: 5, kind: input, shape index: {}]   ;;  %s3878_s6 = inlined_call_operand.vmem [shape: bf16[4,44], index: 6, kind: input, shape index: {}]   ;;  %s3879_s7 = inlined_call_operand.vmem [shape: f32[2,4,1280], index: 7, kind: output, shape index: {}]  }
   0x1 LB: > { %s2500_s25 = sadd.s32 4294967295, %s2914_s24   ;;  %p2504_p0 = scmp.ge.s32.totalorder %s2914_s24, 1  ;;  %s2914_s24 = sphi %s2966_s24, %s17_s24  }
   0x2   : > { %p237_p1 = scmp.lt.s32.totalorder %s2914_s24, 3 }
   0x4   : > { %p238_p2 = pnand %p2504_p0, %p237_p1 }
   0x5   : > { %p269_p3 = scmp.lt.s32.totalorder (!%p238_p2), %s2500_s25, 1  ;;  %s2918_s13 = smov (!%p238_p2), 94  }
   0x6   : > { %241 = sbr.rel (%p238_p2) target bundleno = 1664 (0x680), region = 48  ;;  %s2919_s14 = smov (!%p238_p2), 93  }
   0x7   : > { %s2920_s15 = smov (!%p238_p2), 95   ;;  %s2921_s16 = smov (!%p238_p2), 33  }
   0x8   : > { %s2922_s17 = smov (!%p238_p2), 127   ;;  %s2923_s18 = smov (!%p238_p2), 35  }
   0x9   : > { %s2924_s19 = smov (!%p238_p2), 1   ;;  %s2925_s20 = smov (!%p238_p2), 34  }
   0xb   : > { %s3881_s25 = smov (!%p269_p3, %s2500_s25), 1  ;;  %v280_v19 = vld [vmem:[%s3873_s1] sm:$0xff]  ;;  %v281_v41 = vld [vmem:[%s3873_s1 + $0x8] sm:$0x3]  ;;  %vm473_vm3 = vcmask 1043456   ;;  %vm842_vm4 = vcmask 760832  }
   0xc   : > { %s2879_s26 = smul.u32 80, %s3881_s25  ;;  %v2995_v22 = vperm.slane %v280_v19, 0  ;;  %v2997_v23 = vperm.slane %v280_v19, 1  ;;  %v2999_v24 = vperm.slane %v280_v19, 2  ;;  %v3001_v29 = vperm.slane %v280_v19, 3 }
   0xd   : > { %v3009_v33 = vperm.slane %v280_v19, 4  ;;  %v3014_v35 = vperm.slane %v280_v19, 5  ;;  %v3023_v40 = vperm.slane %v280_v19, 6  ;;  %v3033_v46 = vperm.slane %v280_v19, 7  ;;  %s2880_s10 = smul.u32 40, %s3881_s25 }
   0xe   : > { %s2980_s29 = scalar_lea.vmem %s3872_s0, %s2879_s26  ;;  %v3040_v51 = vperm.slane %v281_v41, 0  ;;  %v3047_v56 = vperm.slane %v281_v41, 1  ;;  %vm740_vm5 = vcmask 777216   ;;  %vm791_vm6 = vcmask 769024  }
   0xf   : > { %v282_v0 = vld [vmem:[%s2980_s29] sm:$0xff]  ;;  %v283_v1 = vld [vmem:[%s2980_s29 + $0x8] sm:$0xff]  ;;  %v284_v2 = vld [vmem:[%s2980_s29 + $0x10] sm:$0xff]  ;;  %vm577_vm7 = vcmask 269312   ;;  %vm689_vm8 = vcmask 1039360   ;;  %vm475_vm9 = vcmask 285696  }
  0x10   : > { %v292_v3 = vadd.f32 %v283_v1, %v282_v0  ;;  %v285_v4 = vld [vmem:[%s2980_s29 + $0x18] sm:$0xff]  ;;  %v286_v6 = vld [vmem:[%s2980_s29 + $0x20] sm:$0xff]  ;;  %v287_v8 = vld [vmem:[%s2980_s29 + $0x28] sm:$0xff]  ;;  %vm628_vm10 = vcmask 7168   ;;  %vm526_vm11 = vcmask 277504   ;;  %vm1139_vm12 = vcmask 588800  }
  0x11   : > { %v288_v10 = vld [vmem:[%s2980_s29 + $0x30] sm:$0xff]  ;;  %v289_v12 = vld [vmem:[%s2980_s29 + $0x38] sm:$0xff]  ;;  %v290_v14 = vld [vmem:[%s2980_s29 + $0x40] sm:$0xff] }
  0x12   : > { %v293_v5 = vadd.f32 %v292_v3, %v284_v2  ;;  %v291_v16 = vld [vmem:[%s2980_s29 + $0x48] sm:$0xff] }
  0x14   : > { %v294_v7 = vadd.f32 %v293_v5, %v285_v4 }
  0x16   : > { %v295_v9 = vadd.f32 %v294_v7, %v286_v6 }
  0x18   : > { %v296_v11 = vadd.f32 %v295_v9, %v287_v8  ;;  %v379_v9 = vld [vmem:[%s3874_s2] sm:$0xff] }
  0x1a   : > { %v297_v13 = vadd.f32 %v296_v11, %v288_v10 }
  0x1c   : > { %v298_v15 = vadd.f32 %v297_v13, %v289_v12 }
  0x1e   : > { %v299_v17 = vadd.f32 %v298_v15, %v290_v14 }
  0x20   : > { %v300_v18 = vadd.f32 %v299_v17, %v291_v16 }
  0x22   : > { %301 = vadd.xlane.f32.xlu0 %v300_v18 }
  0x95   : > { %v302_v20 = vpop.xlane.xlu0 %301 }
  0x96   : > { %v303_v21 = vmul.f32 0.0009765625, %v302_v20 }
  0x98   : > { %v304_v25 = vsub.f32 %v282_v0, %v303_v21  ;;  %v305_v26 = vsub.f32 %v283_v1, %v303_v21  ;;  %v306_v27 = vsub.f32 %v284_v2, %v303_v21  ;;  %v307_v28 = vsub.f32 %v285_v4, %v303_v21 }
  0x99   : > { %v308_v32 = vsub.f32 %v286_v6, %v303_v21  ;;  %v309_v36 = vsub.f32 %v287_v8, %v303_v21  ;;  %v310_v42 = vsub.f32 %v288_v10, %v303_v21  ;;  %v311_v47 = vsub.f32 %v289_v12, %v303_v21 }
  0x9a   : > { %v3004_v30 = vmul.f32 %v2995_v22, %v304_v25  ;;  %v3007_v31 = vmul.f32 %v2997_v23, %v305_v26  ;;  %v3012_v34 = vmul.f32 %v2999_v24, %v306_v27  ;;  %v3017_v37 = vmul.f32 %v3001_v29, %v307_v28 }
  0x9b   : > { %v3029_v43 = vmul.f32 %v3009_v33, %v308_v32  ;;  %v3036_v48 = vmul.f32 %v3014_v35, %v309_v36  ;;  %v312_v52 = vsub.f32 %v290_v14, %v303_v21  ;;  %v3043_v53 = vmul.f32 %v3023_v40, %v310_v42 }
  0x9c   : > { %v346_v38 = vmul.f32 %v3004_v30, %v3004_v30  ;;  %v347_v39 = vmul.f32 %v3007_v31, %v3007_v31  ;;  %v348_v44 = vmul.f32 %v3012_v34, %v3012_v34  ;;  %v349_v49 = vmul.f32 %v3017_v37, %v3017_v37 }
  0x9d   : > { %v350_v54 = vmul.f32 %v3029_v43, %v3029_v43  ;;  %v313_v57 = vsub.f32 %v291_v16, %v303_v21  ;;  %v343_v58 = vmul.f32 %v3033_v46, %v311_v47  ;;  %v351_v59 = vmul.f32 %v3036_v48, %v3036_v48 }
  0x9e   : > { %v356_v45 = vadd.f32 %v347_v39, %v346_v38  ;;  %v344_v61 = vmul.f32 %v3040_v51, %v312_v52  ;;  %v352_v62 = vmul.f32 %v3043_v53, %v3043_v53  ;;  %v2916_v8 = vmov 1  }
  0x9f   : > { %v345_v0 = vmul.f32 %v3047_v56, %v313_v57  ;;  %v353_v1 = vmul.f32 %v343_v58, %v343_v58  ;;  %2899 = vset.pattern.permute.xlu1 %v2916_v8  ;;  %2903 = vset.pattern.permute.xlu2 %v2916_v8  ;;  %v2917_v10 = vmov 0  }
  0xa0   : > { %v357_v50 = vadd.f32 %v356_v45, %v348_v44  ;;  %v354_v3 = vmul.f32 %v344_v61, %v344_v61  ;;  %398 = vperm.xlu1 %2899, %v379_v9   ;;  %432 = vst [vmem:[#allocation2 + $0x2c] sm:$0xf] %v2917_v10  ;;  %2901 = vset.pattern.permute.xlu0 %v2917_v10 }
  0xa1   : > { %v355_v5 = vmul.f32 %v345_v0, %v345_v0  ;;  %1451 = vst [vmem:[#allocation4] sm:$0x3] %v2917_v10 }
  0xa2   : > { %v358_v55 = vadd.f32 %v357_v50, %v349_v49  ;;  %1452 = vst [vmem:[#allocation4 + $0x16] sm:$0x3] %v2917_v10 }
  0xa3   : > { %431 = vst [vmem:[#allocation2] sm:$0xf] %v2917_v10 }
  0xa4   : > { %v359_v60 = vadd.f32 %v358_v55, %v350_v54 }
  0xa6   : > { %v360_v63 = vadd.f32 %v359_v60, %v351_v59 }
  0xa7   : > { %v765_v11 = vld [vmem:[#allocation2 + $0x2c] sm:$0xf] }
  0xa8   : > { %v361_v2 = vadd.f32 %v360_v63, %v352_v62  ;;  %782 = vrot.lane.b32.xlu1 %v765_v11, %s2918_s13  ;;  %v816_v26 = vld [vmem:[#allocation2 + $0x2c] sm:$0xf] }
  0xa9   : > { %2900 = vset.pattern.permute.xlu1 %v2917_v10  ;;  %v714_v27 = vld [vmem:[#allocation2 + $0x2c] sm:$0xf] }
  0xaa   : > { %v362_v4 = vadd.f32 %v361_v2, %v353_v1 }
  0xac   : > { %v363_v6 = vadd.f32 %v362_v4, %v354_v3 }
  0xae   : > { %v364_v7 = vadd.f32 %v363_v6, %v355_v5 }
  0xb0   : > { %365 = vadd.xlane.f32.xlu0 %v364_v7 }
  0xc4   : > { %833 = vrot.lane.b32.xlu0 %v816_v26, %s2919_s14 }
  0xcc   : > { %731 = vrot.lane.b32.xlu0 %v714_v27, %s2920_s15 }
 0x112   : > { %v399_v28 = vpop.permute.xlu1 %398 }
 0x11a   : > { %v3064_v32 = vpop.permute.xlu1 %782 }
 0x123   : > { %v366_v12 = vpop.xlane.xlu0 %365 }
 0x124   : > { %v367_v13 = vmul.f32 0.0009765625, %v366_v12 }
 0x126   : > { %v368_v14 = vadd.f32 1e-05, %v367_v13 }
 0x128   : > { %2904 = vrsqrt.f32 %v368_v14  ;;  %vm375_vm1 = vweird.f32 %v368_v14 }
 0x12e   : > { %v2905_v15 = vpop.eup %2904 }
 0x12f   : > { %v370_v16 = vmul.f32 %v2905_v15, %v368_v14  ;;  %vm376_vm0 = vweird.f32 %v2905_v15 }
 0x130   : > { %vm377_vm2 = vmor %vm375_vm1, %vm376_vm0  ;;  %vm1470_vm0 = vcmask 1041408   ;;  %vm1474_vm1 = vcmask 1045508  }
 0x131   : > { %v371_v17 = vmul.f32 %v2905_v15, %v370_v16 }
 0x133   : > { %v372_v18 = vmul.f32 0.5, %v371_v17 }
 0x135   : > { %v373_v19 = vsub.f32 1.5, %v372_v18 }
 0x137   : > { %v374_v20 = vmul.f32 %v2905_v15, %v373_v19 }
 0x139   : > { %v378_v21 = vsel %vm377_vm2, %v2905_v15, %v374_v20  ;;  %vm2244_vm2 = vcmask 1045504  }
 0x13a   : > { %v380_v25 = vmul.f32 %v379_v9, %v378_v21 }
 0x13c   : > { %383 = vperm.xlu1 %2900, %v380_v25  }
 0x1ae   : > { %v384_v36 = vpop.permute.xlu1 %383 }
 0x1af   : > { %v386_v38 = vmul.f32 %v384_v36, %v3004_v30  ;;  %v387_v39 = vmul.f32 %v384_v36, %v3007_v31  ;;  %v388_v41 = vmul.f32 %v384_v36, %v3012_v34  ;;  %v389_v42 = vmul.f32 %v384_v36, %v3017_v37 }
 0x1b0   : > { %v390_v44 = vmul.f32 %v384_v36, %v3029_v43  ;;  %v391_v45 = vmul.f32 %v384_v36, %v3036_v48  ;;  %v392_v47 = vmul.f32 %v384_v36, %v3043_v53  ;;  %v393_v49 = vmul.f32 %v384_v36, %v343_v58 }
 0x1b1   : > { %v394_v50 = vmul.f32 %v384_v36, %v344_v61  ;;  %v395_v52 = vmul.f32 %v384_v36, %v345_v0  ;;  %v401_v54 = vadd.f32 %v399_v28, %v386_v38  ;;  %v402_v55 = vadd.f32 %v399_v28, %v387_v39  ;;  %v3119_v38 = vpop.permute.xlu0 %833 }
 0x1b2   : > { %v403_v57 = vadd.f32 %v399_v28, %v388_v41  ;;  %v404_v59 = vadd.f32 %v399_v28, %v389_v42  ;;  %v405_v30 = vadd.f32 %v399_v28, %v390_v44  ;;  %v406_v60 = vadd.f32 %v399_v28, %v391_v45 }
 0x1b3   : > { %v407_v31 = vadd.f32 %v399_v28, %v392_v47  ;;  %v408_v62 = vadd.f32 %v399_v28, %v393_v49  ;;  %v409_v34 = vadd.f32 %v399_v28, %v394_v50  ;;  %v410_v63 = vadd.f32 %v399_v28, %v395_v52  ;;  %v663_v47 = vld [vmem:[#allocation2 + $0x2c] sm:$0xf] }
 0x1b4   : > { %v411_v37 = vmax.f32 %v401_v54, 0.0  ;;  %v412_v1 = vmax.f32 %v402_v55, 0.0  ;;  %v413_v43 = vmax.f32 %v403_v57, 0.0  ;;  %v414_v2 = vmax.f32 %v404_v59, 0.0 }
 0x1b5   : > { %v415_v48 = vmax.f32 %v405_v30, 0.0  ;;  %v416_v3 = vmax.f32 %v406_v60, 0.0  ;;  %v417_v53 = vmax.f32 %v407_v31, 0.0  ;;  %v418_v58 = vmax.f32 %v408_v62, 0.0 }
 0x1b6   : > { %v419_v61 = vmax.f32 %v409_v34, 0.0  ;;  %v420_v0 = vmax.f32 %v410_v63, 0.0  ;;  %v421_v4 = vmul.f32 %v411_v37, %v2995_v22  ;;  %v422_v5 = vmul.f32 %v412_v1, %v2997_v23 }
 0x1b7   : > { %v423_v6 = vmul.f32 %v413_v43, %v2999_v24  ;;  %v424_v7 = vmul.f32 %v414_v2, %v3001_v29  ;;  %v425_v9 = vmul.f32 %v415_v48, %v3009_v33  ;;  %v426_v10 = vmul.f32 %v416_v3, %v3014_v35 }
 0x1b8   : > { %v427_v11 = vmul.f32 %v417_v53, %v3023_v40  ;;  %v428_v12 = vmul.f32 %v418_v58, %v3033_v46  ;;  %v429_v13 = vmul.f32 %v419_v61, %v3040_v51  ;;  %v430_v14 = vmul.f32 %v420_v0, %v3047_v56 }
 0x1b9   : > { %v435_v15 = vpack.c.bf16 %v426_v10, %v425_v9  ;;  %v433_v16 = vpack.c.bf16 %v422_v5, %v421_v4  ;;  %v434_v17 = vpack.c.bf16 %v424_v7, %v423_v6  ;;  %v3126_v52 = vpop.permute.xlu0 %731 }
 0x1ba   : > { %v436_v18 = vpack.c.bf16 %v428_v12, %v427_v11  ;;  %v437_v19 = vpack.c.bf16 %v430_v14, %v429_v13 }
 0x1bb   : > { %440 = vst [vmem:[#allocation2 + $0x14] sm:$0xff] %v435_v15  ;;  %827 = vrot.lane.b32.xlu0 %v435_v15, %s2919_s14  ;;  %823 = vrot.lane.b32.xlu2 %v433_v16, %s2919_s14 }
 0x1bc   : > { %438 = vst [vmem:[#allocation2 + $0x4] sm:$0xff] %v433_v16  ;;  %721 = vrot.lane.b32.xlu1 %v433_v16, %s2920_s15 }
 0x1bd   : > { %439 = vst [vmem:[#allocation2 + $0xc] sm:$0xff] %v434_v17 }
 0x1be   : > { %441 = vst [vmem:[#allocation2 + $0x1c] sm:$0xff] %v436_v18 }
 0x1bf   : > { %442 = vst [vmem:[#allocation2 + $0x24] sm:$0xff] %v437_v19 }
 0x1c0   : > { %653 = vst [vmem:[#allocation3 + $0xa0] sm:$0xff] %v433_v16 }
 0x1c1   : > { %654 = vst [vmem:[#allocation3 + $0xa8] sm:$0xff] %v434_v17 }
 0x1c2   : > { %655 = vst [vmem:[#allocation3 + $0xb0] sm:$0xff] %v435_v15 }
 0x1c3   : > { %725 = vrot.lane.b32.xlu0 %v435_v15, %s2920_s15  ;;  %825 = vrot.lane.b32.xlu2 %v434_v17, %s2919_s14  ;;  %656 = vst [vmem:[#allocation3 + $0xb8] sm:$0xff] %v436_v18  ;;  %v597_v21 = vld [vmem:[#allocation2] sm:$0xff] }
 0x1c4   : > { %772 = vrot.lane.b32.xlu1 %v433_v16, %s2918_s13  ;;  %657 = vst [vmem:[#allocation3 + $0xc0] sm:$0xff] %v437_v19  ;;  %v547_v20 = vld [vmem:[#allocation2 + $0x8] sm:$0xff]  ;;  %v548_v25 = vld [vmem:[#allocation2 + $0x10] sm:$0xff] }
 0x1c5   : > { %v498_v26 = vld [vmem:[#allocation2 + $0x18] sm:$0xff] }
 0x1c6   : > { %v499_v27 = vld [vmem:[#allocation2 + $0x20] sm:$0xff]  ;;  %v602_v28 = vld [vmem:[#allocation2 + $0x28] sm:$0xf] }
 0x1c7   : > { %v448_v60 = vld [vmem:[#allocation2 + $0x28] sm:$0xf] }
 0x1cb   : > { %723 = vrot.lane.b32.xlu2 %v434_v17, %s2920_s15  ;;  %560 = vrot.lane.b32.xlu0 %v547_v20, %s2921_s16 }
 0x1cc   : > { %670 = vrot.lane.b32.xlu1 %v433_v16, %s2922_s17 }
 0x1d3   : > { %774 = vrot.lane.b32.xlu2 %v434_v17, %s2918_s13  ;;  %829 = vrot.lane.b32.xlu0 %v436_v18, %s2919_s14 }
 0x1d4   : > { %776 = vrot.lane.b32.xlu1 %v435_v15, %s2918_s13 }
 0x1db   : > { %672 = vrot.lane.b32.xlu2 %v434_v17, %s2922_s17  ;;  %457 = vrot.lane.b32.xlu0 %v547_v20, %s2923_s18  ;;  %v551_v17 = vld [vmem:[#allocation2 + $0x28] sm:$0xf] }
 0x1dc   : > { %609 = vrot.lane.b32.xlu1 %v597_v21, %s2924_s19 }
 0x1e3   : > { %558 = vrot.lane.b32.xlu2 %v597_v21, %s2921_s16  ;;  %562 = vrot.lane.b32.xlu0 %v548_v25, %s2921_s16 }
 0x1e4   : > { %674 = vrot.lane.b32.xlu1 %v435_v15, %s2922_s17 }
 0x1eb   : > { %611 = vrot.lane.b32.xlu2 %v547_v20, %s2924_s19  ;;  %727 = vrot.lane.b32.xlu0 %v436_v18, %s2920_s15 }
 0x1ec   : > { %507 = vrot.lane.b32.xlu1 %v597_v21, %s2925_s20 }
 0x1f3   : > { %511 = vrot.lane.b32.xlu0 %v548_v25, %s2925_s20  ;;  %455 = vrot.lane.b32.xlu2 %v597_v21, %s2923_s18 }
 0x1f4   : > { %613 = vrot.lane.b32.xlu1 %v548_v25, %s2924_s19 }
 0x1fb   : > { %780 = vrot.lane.b32.xlu0 %v437_v19, %s2918_s13  ;;  %509 = vrot.lane.b32.xlu2 %v547_v20, %s2925_s20 }
 0x1fc   : > { %778 = vrot.lane.b32.xlu1 %v436_v18, %s2918_s13 }
 0x203   : > { %513 = vrot.lane.b32.xlu0 %v498_v26, %s2925_s20  ;;  %831 = vrot.lane.b32.xlu2 %v437_v19, %s2919_s14 }
 0x204   : > { %676 = vrot.lane.b32.xlu1 %v436_v18, %s2922_s17 }
 0x20b   : > { %515 = vrot.lane.b32.xlu0 %v499_v27, %s2925_s20  ;;  %459 = vrot.lane.b32.xlu2 %v548_v25, %s2923_s18 }
 0x20c   : > { %564 = vrot.lane.b32.xlu1 %v498_v26, %s2921_s16 }
 0x213   : > { %619 = vrot.lane.b32.xlu0 %v602_v28, %s2924_s19  ;;  %729 = vrot.lane.b32.xlu2 %v437_v19, %s2920_s15 }
 0x214   : > { %678 = vrot.lane.b32.xlu1 %v437_v19, %s2922_s17 }
 0x215   : > { %v824_v36 = vpop.permute.xlu2 %823 }
 0x216   : > { %v835_v41 = vrot.slane %v824_v36, 4 }
 0x21b   : > { %615 = vrot.lane.b32.xlu2 %v498_v26, %s2924_s19 }
 0x21c   : > { %566 = vrot.lane.b32.xlu1 %v499_v27, %s2921_s16 }
 0x21d   : > { %v826_v39 = vpop.permute.xlu2 %825 }
 0x21e   : > { %v836_v42 = vrot.slane %v826_v39, 4 }
 0x220   : > { %v841_v44 = vsel %vm473_vm3, %v835_v41, %v836_v42  ;;  %v500_v41 = vld [vmem:[#allocation2 + $0x28] sm:$0xf] }
 0x221   : > { %v843_v45 = vsel %vm842_vm4, %v824_v36, %v841_v44 }
 0x222   : > { %v1039_v49 = vunpack.c.l.b16 %v843_v45  ;;  %v1040_v50 = vunpack.c.h.b16 %v843_v45 }
 0x223   : > { %461 = vrot.lane.b32.xlu2 %v498_v26, %s2923_s18 }
 0x224   : > { %680 = vrot.lane.b32.xlu1 %v663_v47, %s2922_s17  ;;  %v1089_v54 = vpack.c.b16 %v1039_v49, %v1039_v49  ;;  %v1090_v55 = vpack.c.b16 %v1040_v50, %v1040_v50 }
 0x225   : > { %v724_v57 = vpop.permute.xlu2 %723 }
 0x226   : > { %v1145_v59 = vsel %vm473_vm3, %v1089_v54, 0  ;;  %v1148_v30 = vsel %vm473_vm3, %v1090_v55, 0  ;;  %v734_v37 = vrot.slane %v724_v57, 4 }
 0x227   : > { %1177 = vmatpush.bf16.msra.mxu0 %v1145_v59  ;;  %1190 = vmatpush.bf16.msra.mxu1 %v1148_v30 }
 0x22b   : > { %617 = vrot.lane.b32.xlu2 %v499_v27, %s2924_s19 }
 0x22c   : > { %465 = vrot.lane.b32.xlu1 %v448_v60, %s2923_s18 }
 0x22d   : > { %v3133_v31 = vpop.permute.xlu2 %774  ;;  %v3135_v62 = vpop.permute.xlu0 %827 }
 0x22e   : > { %v722_v34 = vpop.permute.xlu1 %721  ;;  %v837_v63 = vrot.slane %v3135_v62, 4  ;;  %v785_v11 = vrot.slane %v3133_v31, 4 }
 0x22f   : > { %v733_v1 = vrot.slane %v722_v34, 4 }
 0x230   : > { %v844_v43 = vsel %vm473_vm3, %v836_v42, %v837_v63 }
 0x231   : > { %v739_v2 = vsel %vm473_vm3, %v733_v1, %v734_v37  ;;  %v845_v48 = vsel %vm842_vm4, %v826_v39, %v844_v43  ;;  %v2589_v43 = vld [vmem:[#allocation3 + $0xa0] sm:$0xf] }
 0x232   : > { %v741_v3 = vsel %vm740_vm5, %v722_v34, %v739_v2  ;;  %v1041_v53 = vunpack.c.l.b16 %v845_v48  ;;  %v1042_v58 = vunpack.c.h.b16 %v845_v48  ;;  %v2829_v2 = vld [vmem:[#allocation3 + $0xa4] sm:$0xf] }
 0x233   : > { %755 = vst [vmem:[#allocation3 + $0xf0] sm:$0xff] %v741_v3  ;;  %463 = vrot.lane.b32.xlu2 %v499_v27, %s2923_s18 }
 0x234   : > { %v1091_v61 = vpack.c.b16 %v1041_v53, %v1041_v53  ;;  %v1092_v0 = vpack.c.b16 %v1042_v58, %v1042_v58 }
 0x235   : > { %v3145_v4 = vpop.permute.xlu2 %672  ;;  %v3147_v5 = vpop.permute.xlu0 %725 }
 0x236   : > { %v773_v6 = vpop.permute.xlu1 %772  ;;  %v735_v7 = vrot.slane %v3147_v5, 4  ;;  %v1151_v9 = vsel %vm473_vm3, %v1091_v61, 0  ;;  %v1154_v10 = vsel %vm473_vm3, %v1092_v0, 0  ;;  %v683_v26 = vrot.slane %v3145_v4, 4 }
 0x237   : > { %v784_v12 = vrot.slane %v773_v6, 4  ;;  %1203 = vmatpush.bf16.msra.mxu2 %v1151_v9  ;;  %1216 = vmatpush.bf16.msra.mxu3 %v1154_v10 }
 0x238   : > { %v742_v13 = vsel %vm473_vm3, %v734_v37, %v735_v7 }
 0x239   : > { %v790_v14 = vsel %vm473_vm3, %v784_v12, %v785_v11  ;;  %v743_v15 = vsel %vm740_vm5, %v724_v57, %v742_v13 }
 0x23a   : > { %v792_v16 = vsel %vm791_vm6, %v773_v6, %v790_v14  ;;  %756 = vst [vmem:[#allocation3 + $0xf8] sm:$0xff] %v743_v15  ;;  %v2629_v42 = vld [vmem:[#allocation3 + $0xf0] sm:$0xf]  ;;  %v2839_v44 = vld [vmem:[#allocation3 + $0xf4] sm:$0xf] }
 0x23b   : > { %806 = vst [vmem:[#allocation3 + $0x118] sm:$0xff] %v792_v16  ;;  %568 = vrot.lane.b32.xlu2 %v551_v17, %s2921_s16 }
 0x23d   : > { %v559_v18 = vpop.permute.xlu2 %558  ;;  %v3160_v19 = vpop.permute.xlu0 %560 }
 0x23e   : > { %v671_v20 = vpop.permute.xlu1 %670  ;;  %v570_v21 = vrot.slane %v559_v18, 4  ;;  %v571_v25 = vrot.slane %v3160_v19, 4 }
 0x23f   : > { %v682_v27 = vrot.slane %v671_v20, 4 }
 0x240   : > { %v576_v28 = vsel %vm473_vm3, %v570_v21, %v571_v25 }
 0x241   : > { %v688_v36 = vsel %vm473_vm3, %v682_v27, %v683_v26  ;;  %v578_v39 = vsel %vm577_vm7, %v559_v18, %v576_v28  ;;  %v2637_v14 = vld [vmem:[#allocation3 + $0xf8] sm:$0xf]  ;;  %v2840_v15 = vld [vmem:[#allocation3 + $0xfc] sm:$0xf] }
 0x242   : > { %v690_v45 = vsel %vm689_vm8, %v671_v20, %v688_v36  ;;  %592 = vst [vmem:[#allocation3 + $0x50] sm:$0xff] %v578_v39  ;;  %v2844_v47 = vld [vmem:[#allocation3 + $0x114] sm:$0xf0]  ;;  %v2631_v49 = vld [vmem:[#allocation3 + $0x118] sm:$0xf0] }
 0x243   : > { %704 = vst [vmem:[#allocation3 + $0xc8] sm:$0xff] %v690_v45  ;;  %517 = vrot.lane.b32.xlu2 %v500_v41, %s2925_s20  ;;  %v2630_v50 = vor.u32 %v2844_v47, %v2629_v42  ;;  %v2634_v54 = vor.u32 %v2839_v44, %v2631_v49 }
 0x245   : > { %1178 = vmatpush.bf16.msra.mxu0 %v2630_v50  ;;  %1191 = vmatpush.bf16.msra.mxu1 %v2634_v54  ;;  %v3173_v55 = vpop.permute.xlu2 %611  ;;  %v3175_v57 = vpop.permute.xlu0 %829 }
 0x246   : > { %v3177_v59 = vpop.permute.xlu1 %776  ;;  %v838_v30 = vrot.slane %v3175_v57, 4  ;;  %v622_v10 = vrot.slane %v3173_v55, 4 }
 0x247   : > { %v786_v60 = vrot.slane %v3177_v59, 4 }
 0x248   : > { %v846_v34 = vsel %vm473_vm3, %v837_v63, %v838_v30 }
 0x249   : > { %v793_v37 = vsel %vm473_vm3, %v785_v11, %v786_v60  ;;  %v3191_v1 = vsel %vm842_vm4, %v3135_v62, %v846_v34  ;;  %v2549_v47 = vld [vmem:[#allocation3 + $0x50] sm:$0xf]  ;;  %v2819_v49 = vld [vmem:[#allocation3 + $0x54] sm:$0xf] }
 0x24a   : > { %v794_v48 = vsel %vm791_vm6, %v3133_v31, %v793_v37  ;;  %v2834_v3 = vld [vmem:[#allocation3 + $0xc4] sm:$0xf0]  ;;  %v2591_v53 = vld [vmem:[#allocation3 + $0xc8] sm:$0xf0] }
 0x24b   : > { %807 = vst [vmem:[#allocation3 + $0x120] sm:$0xff] %v794_v48  ;;  %v2590_v58 = vor.u32 %v2834_v3, %v2589_v43  ;;  %v2594_v61 = vor.u32 %v2829_v2, %v2591_v53 }
 0x24d   : > { %1179 = vmatpush.bf16.msra.mxu0 %v2590_v58  ;;  %1192 = vmatpush.bf16.msra.mxu1 %v2594_v61  ;;  %v456_v63 = vpop.permute.xlu2 %455  ;;  %v3195_v0 = vpop.permute.xlu0 %457 }
 0x24e   : > { %v610_v6 = vpop.permute.xlu1 %609  ;;  %v467_v9 = vrot.slane %v456_v63, 4  ;;  %v468_v62 = vrot.slane %v3195_v0, 4 }
 0x24f   : > { %v621_v11 = vrot.slane %v610_v6, 4 }
 0x250   : > { %v474_v31 = vsel %vm473_vm3, %v467_v9, %v468_v62 }
 0x251   : > { %v627_v12 = vsel %vm473_vm3, %v621_v11, %v622_v10  ;;  %v476_v13 = vsel %vm475_vm9, %v456_v63, %v474_v31  ;;  %v2597_v11 = vld [vmem:[#allocation3 + $0xa8] sm:$0xf]  ;;  %v2830_v31 = vld [vmem:[#allocation3 + $0xac] sm:$0xf] }
 0x252   : > { %v629_v16 = vsel %vm628_vm10, %v610_v6, %v627_v12  ;;  %490 = vst [vmem:[#allocation3] sm:$0xff] %v476_v13  ;;  %v2845_v17 = vld [vmem:[#allocation3 + $0x11c] sm:$0xf0]  ;;  %v2639_v18 = vld [vmem:[#allocation3 + $0x120] sm:$0xf0] }
 0x253   : > { %643 = vst [vmem:[#allocation3 + $0x78] sm:$0xff] %v629_v16  ;;  %v2638_v20 = vor.u32 %v2845_v17, %v2637_v14  ;;  %v2642_v21 = vor.u32 %v2840_v15, %v2639_v18  ;;  %v1043_v16 = vunpack.c.l.b16 %v3191_v1  ;;  %v1044_v18 = vunpack.c.h.b16 %v3191_v1 }
 0x255   : > { %1204 = vmatpush.bf16.msra.mxu2 %v2638_v20  ;;  %1217 = vmatpush.bf16.msra.mxu3 %v2642_v21  ;;  %v510_v27 = vpop.permute.xlu2 %509  ;;  %v3207_v28 = vpop.permute.xlu0 %562 }
 0x256   : > { %v3209_v36 = vpop.permute.xlu1 %674  ;;  %v572_v39 = vrot.slane %v3207_v28, 4  ;;  %v520_v53 = vrot.slane %v510_v27, 4 }
 0x257   : > { %v684_v41 = vrot.slane %v3209_v36, 4 }
 0x258   : > { %v579_v42 = vsel %vm473_vm3, %v571_v25, %v572_v39 }
 0x259   : > { %v691_v44 = vsel %vm473_vm3, %v683_v26, %v684_v41  ;;  %v580_v45 = vsel %vm577_vm7, %v3160_v19, %v579_v42  ;;  %v840_v26 = vrot.slane %v3119_v38, 4 }
 0x25a   : > { %v692_v50 = vsel %vm689_vm8, %v3145_v4, %v691_v44  ;;  %593 = vst [vmem:[#allocation3 + $0x58] sm:$0xff] %v580_v45  ;;  %v2824_v54 = vld [vmem:[#allocation3 + $0x74] sm:$0xf0]  ;;  %v2551_v34 = vld [vmem:[#allocation3 + $0x78] sm:$0xf0] }
 0x25b   : > { %705 = vst [vmem:[#allocation3 + $0xd0] sm:$0xff] %v692_v50  ;;  %v2550_v37 = vor.u32 %v2824_v54, %v2549_v47  ;;  %v2554_v25 = vor.u32 %v2819_v49, %v2551_v34  ;;  %v1093_v47 = vpack.c.b16 %v1043_v16, %v1043_v16  ;;  %v2509_v54 = vld [vmem:[#allocation3] sm:$0xf]  ;;  %v2809_v34 = vld [vmem:[#allocation3 + $0x4] sm:$0xf] }
 0x25d   : > { %1180 = vmatpush.bf16.msra.mxu0 %v2550_v37  ;;  %1193 = vmatpush.bf16.msra.mxu1 %v2554_v25  ;;  %v832_v43 = vpop.permute.xlu2 %831  ;;  %v3227_v2 = vpop.permute.xlu0 %727  ;;  %v1094_v37 = vpack.c.b16 %v1044_v18, %v1044_v18 }
 0x25e   : > { %v508_v48 = vpop.permute.xlu1 %507  ;;  %v839_v19 = vrot.slane %v832_v43, 4  ;;  %v736_v3 = vrot.slane %v3227_v2, 4 }
 0x25f   : > { %v519_v4 = vrot.slane %v508_v48, 4 }
 0x260   : > { %v848_v58 = vsel %vm473_vm3, %v838_v30, %v839_v19  ;;  %v850_v61 = vsel %vm473_vm3, %v839_v19, %v840_v26  ;;  %v744_v63 = vsel %vm473_vm3, %v735_v7, %v736_v3 }
 0x261   : > { %v525_v38 = vsel %vm473_vm3, %v519_v4, %v520_v53  ;;  %v3243_v6 = vsel %vm842_vm4, %v3175_v57, %v848_v58  ;;  %v3246_v9 = vsel %vm842_vm4, %v832_v43, %v850_v61  ;;  %v745_v12 = vsel %vm740_vm5, %v3147_v5, %v744_v63 }
 0x262   : > { %v527_v30 = vsel %vm526_vm11, %v508_v48, %v525_v38  ;;  %v2835_v13 = vld [vmem:[#allocation3 + $0xcc] sm:$0xf0]  ;;  %v2599_v14 = vld [vmem:[#allocation3 + $0xd0] sm:$0xf0]  ;;  %757 = vst [vmem:[#allocation3 + $0x100] sm:$0xff] %v745_v12  ;;  %v738_v4 = vrot.slane %v3126_v52, 4 }
 0x263   : > { %541 = vst [vmem:[#allocation3 + $0x28] sm:$0xff] %v527_v30  ;;  %v2598_v7 = vor.u32 %v2835_v13, %v2597_v11  ;;  %v2602_v15 = vor.u32 %v2830_v31, %v2599_v14  ;;  %v1045_v11 = vunpack.c.l.b16 %v3243_v6 }
 0x265   : > { %1205 = vmatpush.bf16.msra.mxu2 %v2598_v7  ;;  %1218 = vmatpush.bf16.msra.mxu3 %v2602_v15  ;;  %v3252_v57 = vpop.permute.xlu2 %459  ;;  %v3254_v17 = vpop.permute.xlu0 %511  ;;  %v2557_v7 = vld [vmem:[#allocation3 + $0x58] sm:$0xf]  ;;  %v2820_v15 = vld [vmem:[#allocation3 + $0x5c] sm:$0xf] }
 0x266   : > { %v3257_v20 = vpop.permute.xlu1 %613  ;;  %v469_v5 = vrot.slane %v3252_v57, 4  ;;  %v521_v21 = vrot.slane %v3254_v17, 4 }
 0x267   : > { %v623_v42 = vrot.slane %v3257_v20, 4 }
 0x268   : > { %v477_v44 = vsel %vm473_vm3, %v468_v62, %v469_v5  ;;  %v528_v45 = vsel %vm473_vm3, %v520_v53, %v521_v21  ;;  %v3285_v53 = vld [vmem:[%s3877_s5] sm:$0x3] }
 0x269   : > { %v630_v1 = vsel %vm473_vm3, %v622_v10, %v623_v42  ;;  %v478_v49 = vsel %vm475_vm9, %v3195_v0, %v477_v44  ;;  %v529_v50 = vsel %vm526_vm11, %v510_v27, %v528_v45  ;;  %v1157_v0 = vsel %vm473_vm3, %v1093_v47, 0 }
 0x26a   : > { %v631_v62 = vsel %vm628_vm10, %v3173_v55, %v630_v1  ;;  %491 = vst [vmem:[#allocation3 + $0x8] sm:$0xff] %v478_v49  ;;  %v2814_v25 = vld [vmem:[#allocation3 + $0x24] sm:$0xf0]  ;;  %v2511_v43 = vld [vmem:[#allocation3 + $0x28] sm:$0xf0]  ;;  %v1160_v27 = vsel %vm473_vm3, %v1094_v37, 0 }
 0x26b   : > { %644 = vst [vmem:[#allocation3 + $0x80] sm:$0xff] %v631_v62  ;;  %v2510_v26 = vor.u32 %v2814_v25, %v2509_v54  ;;  %v2514_v48 = vor.u32 %v2809_v34, %v2511_v43  ;;  %v789_v55 = vrot.slane %v3064_v32, 4  ;;  %v1046_v32 = vunpack.c.h.b16 %v3243_v6 }
 0x26c   : > { %542 = vst [vmem:[#allocation3 + $0x30] sm:$0xff] %v529_v50  ;;  %v1095_v54 = vpack.c.b16 %v1045_v11, %v1045_v11 }
 0x26d   : > { %1181 = vmatpush.bf16.msra.mxu0 %v2510_v26  ;;  %1194 = vmatpush.bf16.msra.mxu1 %v2514_v48  ;;  %v730_v10 = vpop.permute.xlu2 %729  ;;  %v781_v19 = vpop.permute.xlu0 %780  ;;  %v1096_v34 = vpack.c.b16 %v1046_v32, %v1046_v32 }
 0x26e   : > { %v779_v58 = vpop.permute.xlu1 %778  ;;  %v737_v61 = vrot.slane %v730_v10, 4  ;;  %v788_v63 = vrot.slane %v781_v19, 4 }
 0x26f   : > { %v787_v38 = vrot.slane %v779_v58, 4 }
 0x270   : > { %v746_v31 = vsel %vm473_vm3, %v736_v3, %v737_v61  ;;  %v748_v30 = vsel %vm473_vm3, %v737_v61, %v738_v4  ;;  %v799_v12 = vsel %vm473_vm3, %v788_v63, %v789_v55  ;;  %2667 = vmatmul.msk.bf16.vlgmr.msra.gmra.mxu0 %vm1139_vm12, %v3285_v53  ;;  %2668 = vmatmul.msk.bf16.vlgmr.msra.gmra.mxu1 %vm1139_vm12, %v3285_v53  ;;  %v1166_v55 = vsel %vm473_vm3, %v1096_v34, 0  ;;  %v2645_v4 = vld [vmem:[#allocation3 + $0x100] sm:$0xf] }
 0x271   : > { %1229 = vmatpush.bf16.msrb.mxu0 %v1157_v0  ;;  %1242 = vmatpush.bf16.msrb.mxu1 %v1160_v27  ;;  %v795_v52 = vsel %vm473_vm3, %v786_v60, %v787_v38  ;;  %v747_v13 = vsel %vm740_vm5, %v3227_v2, %v746_v31  ;;  %v749_v3 = vsel %vm740_vm5, %v730_v10, %v748_v30  ;;  %v2517_v2 = vld [vmem:[#allocation3 + $0x8] sm:$0xf]  ;;  %v2810_v1 = vld [vmem:[#allocation3 + $0xc] sm:$0xf] }
 0x272   : > { %v797_v14 = vsel %vm473_vm3, %v787_v38, %v788_v63  ;;  %v796_v6 = vsel %vm791_vm6, %v3177_v59, %v795_v52  ;;  %758 = vst [vmem:[#allocation3 + $0x108] sm:$0xff] %v747_v13  ;;  %v2825_v18 = vld [vmem:[#allocation3 + $0x7c] sm:$0xf0]  ;;  %v2559_v44 = vld [vmem:[#allocation3 + $0x80] sm:$0xf0]  ;;  %v800_v60 = vsel %vm791_vm6, %v781_v19, %v799_v12  ;;  %v1163_v19 = vsel %vm473_vm3, %v1095_v54, 0 }
 0x273   : > { %v798_v16 = vsel %vm791_vm6, %v779_v58, %v797_v14  ;;  %808 = vst [vmem:[#allocation3 + $0x128] sm:$0xff] %v796_v6  ;;  %v2558_v45 = vor.u32 %v2825_v18, %v2557_v7  ;;  %v2562_v47 = vor.u32 %v2820_v15, %v2559_v44  ;;  %v2815_v49 = vld [vmem:[#allocation3 + $0x2c] sm:$0xf0]  ;;  %v2519_v50 = vld [vmem:[#allocation3 + $0x30] sm:$0xf0] }
 0x274   : > { %759 = vst [vmem:[#allocation3 + $0x110] sm:$0xff] %v749_v3  ;;  %v2518_v48 = vor.u32 %v2815_v49, %v2517_v2  ;;  %v2522_v10 = vor.u32 %v2810_v1, %v2519_v50  ;;  %v908_v3 = vld [vmem:[%s3876_s4] sm:$0xf]  ;;  %v2831_v2 = vld [vmem:[#allocation3 + $0xb4] sm:$0xf] }
 0x275   : > { %809 = vst [vmem:[#allocation3 + $0x130] sm:$0xff] %v798_v16  ;;  %1206 = vmatpush.bf16.msra.mxu2 %v2558_v45  ;;  %1219 = vmatpush.bf16.msra.mxu3 %v2562_v47  ;;  %v3311_v59 = vpop.permute.xlu2 %615  ;;  %v514_v37 = vpop.permute.xlu0 %513  ;;  %v2605_v47 = vld [vmem:[#allocation3 + $0xb0] sm:$0xf] }
 0x276   : > { %810 = vst [vmem:[#allocation3 + $0x138] sm:$0xff] %v800_v60  ;;  %v3313_v62 = vpop.permute.xlu1 %676  ;;  %v624_v25 = vrot.slane %v3311_v59, 4  ;;  %v522_v43 = vrot.slane %v514_v37, 4  ;;  %911 = vperm.xlu0 %2901, %v908_v3  }
 0x277   : > { %v685_v26 = vrot.slane %v3313_v62, 4 }
 0x278   : > { %v632_v0 = vsel %vm473_vm3, %v623_v42, %v624_v25  ;;  %v530_v27 = vsel %vm473_vm3, %v521_v21, %v522_v43  ;;  %v2841_v21 = vld [vmem:[#allocation3 + $0x104] sm:$0xf] }
 0x279   : > { %v693_v58 = vsel %vm473_vm3, %v684_v41, %v685_v26  ;;  %v633_v61 = vsel %vm628_vm10, %v3257_v20, %v632_v0  ;;  %v531_v42 = vsel %vm526_vm11, %v3254_v17, %v530_v27  ;;  %1207 = vmatpush.bf16.msra.mxu2 %v2518_v48  ;;  %1220 = vmatpush.bf16.msra.mxu3 %v2522_v10  ;;  %v2653_v63 = vld [vmem:[#allocation3 + $0x108] sm:$0xf]  ;;  %v2842_v38 = vld [vmem:[#allocation3 + $0x10c] sm:$0xf]  ;;  %v1047_v0 = vunpack.c.l.b16 %v3246_v9 }
 0x27a   : > { %v694_v11 = vsel %vm689_vm8, %v3209_v36, %v693_v58  ;;  %645 = vst [vmem:[#allocation3 + $0x88] sm:$0xff] %v633_v61  ;;  %v2846_v31 = vld [vmem:[#allocation3 + $0x124] sm:$0xf0]  ;;  %v2647_v30 = vld [vmem:[#allocation3 + $0x128] sm:$0xf0]  ;;  %v1048_v27 = vunpack.c.h.b16 %v3246_v9 }
 0x27b   : > { %706 = vst [vmem:[#allocation3 + $0xd8] sm:$0xff] %v694_v11  ;;  %v2646_v41 = vor.u32 %v2846_v31, %v2645_v4  ;;  %v2650_v12 = vor.u32 %v2841_v21, %v2647_v30 }
 0x27c   : > { %543 = vst [vmem:[#allocation3 + $0x38] sm:$0xff] %v531_v42  ;;  %v2847_v20 = vld [vmem:[#allocation3 + $0x12c] sm:$0xf0]  ;;  %v2655_v32 = vld [vmem:[#allocation3 + $0x130] sm:$0xf0]  ;;  %2669 = vmatmul.msk.bf16.vlgmr.msra.gmra.mxu2 %vm1139_vm12, %v3285_v53  ;;  %2670 = vmatmul.msk.bf16.vlgmr.msra.gmra.mxu3 %vm1139_vm12, %v3285_v53  ;;  %v1098_v31 = vpack.c.b16 %v1048_v27, %v1048_v27 }
 0x27d   : > { %1255 = vmatpush.bf16.msrb.mxu2 %v1163_v19  ;;  %1268 = vmatpush.bf16.msrb.mxu3 %v1166_v55  ;;  %v3342_v36 = vpop.permute.xlu2 %461  ;;  %v2654_v17 = vor.u32 %v2847_v20, %v2653_v63  ;;  %v2658_v52 = vor.u32 %v2842_v38, %v2655_v32  ;;  %v3344_v13 = vpop.permute.xlu0 %515 }
 0x27e   : > { %1230 = vmatpush.bf16.msrb.mxu0 %v2646_v41  ;;  %1243 = vmatpush.bf16.msrb.mxu1 %v2650_v12  ;;  %v3349_v14 = vpop.permute.xlu1 %564  ;;  %v470_v7 = vrot.slane %v3342_v36, 4  ;;  %v523_v15 = vrot.slane %v3344_v13, 4 }
 0x27f   : > { %v573_v6 = vrot.slane %v3349_v14, 4 }
 0x280   : > { %v479_v16 = vsel %vm473_vm3, %v469_v5, %v470_v7  ;;  %v532_v18 = vsel %vm473_vm3, %v522_v43, %v523_v15 }
 0x281   : > { %1256 = vmatpush.bf16.msrb.mxu2 %v2654_v17  ;;  %1269 = vmatpush.bf16.msrb.mxu3 %v2658_v52  ;;  %v581_v44 = vsel %vm473_vm3, %v572_v39, %v573_v6  ;;  %v480_v60 = vsel %vm475_vm9, %v3252_v57, %v479_v16  ;;  %v533_v45 = vsel %vm526_vm11, %v514_v37, %v532_v18  ;;  %v2826_v58 = vld [vmem:[#allocation3 + $0x84] sm:$0xf0]  ;;  %v2567_v61 = vld [vmem:[#allocation3 + $0x88] sm:$0xf0]  ;;  %v1172_v16 = vsel %vm473_vm3, %v1098_v31, 0 }
 0x282   : > { %v582_v5 = vsel %vm577_vm7, %v3207_v28, %v581_v44  ;;  %492 = vst [vmem:[#allocation3 + $0x10] sm:$0xff] %v480_v60  ;;  %v2836_v1 = vld [vmem:[#allocation3 + $0xd4] sm:$0xf0]  ;;  %v2607_v49 = vld [vmem:[#allocation3 + $0xd8] sm:$0xf0] }
 0x283   : > { %594 = vst [vmem:[#allocation3 + $0x60] sm:$0xff] %v582_v5  ;;  %v2606_v50 = vor.u32 %v2836_v1, %v2605_v47  ;;  %v2610_v54 = vor.u32 %v2831_v2, %v2607_v49  ;;  %v2816_v12 = vld [vmem:[#allocation3 + $0x34] sm:$0xf0]  ;;  %v2832_v44 = vld [vmem:[#allocation3 + $0xbc] sm:$0xf] }
 0x284   : > { %544 = vst [vmem:[#allocation3 + $0x40] sm:$0xff] %v533_v45  ;;  %v2613_v18 = vld [vmem:[#allocation3 + $0xb8] sm:$0xf]  ;;  %v2661_v60 = vld [vmem:[#allocation3 + $0x110] sm:$0xf] }
 0x285   : > { %1231 = vmatpush.bf16.msrb.mxu0 %v2606_v50  ;;  %1244 = vmatpush.bf16.msrb.mxu1 %v2610_v54  ;;  %v618_v39 = vpop.permute.xlu2 %617  ;;  %v620_v34 = vpop.permute.xlu0 %619  ;;  %v2848_v2 = vld [vmem:[#allocation3 + $0x134] sm:$0xf0]  ;;  %v2843_v5 = vld [vmem:[#allocation3 + $0x114] sm:$0xf]  ;;  %v2663_v1 = vld [vmem:[#allocation3 + $0x138] sm:$0xf0] }
 0x286   : > { %v3370_v43 = vpop.permute.xlu1 %678  ;;  %v625_v57 = vrot.slane %v618_v39, 4  ;;  %v626_v37 = vrot.slane %v620_v34, 4 }
 0x287   : > { %v686_v48 = vrot.slane %v3370_v43, 4 }
 0x288   : > { %v634_v28 = vsel %vm473_vm3, %v624_v25, %v625_v57  ;;  %v636_v10 = vsel %vm473_vm3, %v625_v57, %v626_v37 }
 0x289   : > { %v695_v19 = vsel %vm473_vm3, %v685_v26, %v686_v48  ;;  %v635_v55 = vsel %vm628_vm10, %v3311_v59, %v634_v28  ;;  %v637_v4 = vsel %vm628_vm10, %v618_v39, %v636_v10  ;;  %v2525_v38 = vld [vmem:[#allocation3 + $0x10] sm:$0xf]  ;;  %v2811_v11 = vld [vmem:[#allocation3 + $0x14] sm:$0xf]  ;;  %v1097_v26 = vpack.c.b16 %v1047_v0, %v1047_v0 }
 0x28a   : > { %v696_v25 = vsel %vm689_vm8, %v3313_v62, %v695_v19  ;;  %646 = vst [vmem:[#allocation3 + $0x90] sm:$0xff] %v635_v55  ;;  %v2565_v42 = vld [vmem:[#allocation3 + $0x60] sm:$0xf]  ;;  %v2821_v21 = vld [vmem:[#allocation3 + $0x64] sm:$0xf]  ;;  %v2526_v32 = vor.u32 %v2816_v12, %v2525_v38 }
 0x28b   : > { %707 = vst [vmem:[#allocation3 + $0xe0] sm:$0xff] %v696_v25  ;;  %v2566_v9 = vor.u32 %v2826_v58, %v2565_v42  ;;  %v2570_v63 = vor.u32 %v2821_v21, %v2567_v61  ;;  %v2527_v62 = vld [vmem:[#allocation3 + $0x38] sm:$0xf0]  ;;  %v1169_v3 = vsel %vm473_vm3, %v1097_v26, 0  ;;  %v2817_v38 = vld [vmem:[#allocation3 + $0x3c] sm:$0xf0] }
 0x28c   : > { %647 = vst [vmem:[#allocation3 + $0x98] sm:$0xff] %v637_v4  ;;  %v2530_v17 = vor.u32 %v2811_v11, %v2527_v62  ;;  %v2535_v11 = vld [vmem:[#allocation3 + $0x40] sm:$0xf0] }
 0x28d   : > { %1232 = vmatpush.bf16.msrb.mxu0 %v2566_v9  ;;  %1245 = vmatpush.bf16.msrb.mxu1 %v2570_v63  ;;  %v3389_v59 = vpop.permute.xlu2 %463 }
 0x28e   : > { %v567_v30 = vpop.permute.xlu1 %566  ;;  %v471_v41 = vrot.slane %v3389_v59, 4 }
 0x28f   : > { %v574_v20 = vrot.slane %v567_v30, 4 }
 0x290   : > { %v481_v52 = vsel %vm473_vm3, %v470_v7, %v471_v41 }
 0x291   : > { %v583_v45 = vsel %vm473_vm3, %v573_v6, %v574_v20  ;;  %v482_v47 = vsel %vm475_vm9, %v3342_v36, %v481_v52  ;;  %1233 = vmatpush.bf16.msrb.mxu0 %v2526_v32  ;;  %1246 = vmatpush.bf16.msrb.mxu1 %v2530_v17  ;;  %v2662_v36 = vor.u32 %v2848_v2, %v2661_v60  ;;  %v2827_v27 = vld [vmem:[#allocation3 + $0x8c] sm:$0xf0]  ;;  %v2575_v19 = vld [vmem:[#allocation3 + $0x90] sm:$0xf0]  ;;  %v2833_v32 = vld [vmem:[#allocation3 + $0xc4] sm:$0xf] }
 0x292   : > { %v584_v7 = vsel %vm577_vm7, %v3349_v14, %v583_v45  ;;  %493 = vst [vmem:[#allocation3 + $0x18] sm:$0xff] %v482_v47  ;;  %v2837_v49 = vld [vmem:[#allocation3 + $0xdc] sm:$0xf0]  ;;  %v2615_v50 = vld [vmem:[#allocation3 + $0xe0] sm:$0xf0]  ;;  %v2666_v6 = vor.u32 %v2843_v5, %v2663_v1 }
 0x293   : > { %595 = vst [vmem:[#allocation3 + $0x68] sm:$0xff] %v584_v7  ;;  %v2614_v54 = vor.u32 %v2837_v49, %v2613_v18  ;;  %v2618_v39 = vor.u32 %v2832_v44, %v2615_v50  ;;  %v2828_v18 = vld [vmem:[#allocation3 + $0x94] sm:$0xf0]  ;;  %v2583_v44 = vld [vmem:[#allocation3 + $0x98] sm:$0xf0] }
 0x294   : > { %2671 = vmatmul.msk.bf16.vlgmr.msrb.gmra.mxu0 %vm1139_vm12, %v3285_v53  ;;  %2672 = vmatmul.msk.bf16.vlgmr.msrb.gmra.mxu1 %vm1139_vm12, %v3285_v53 }
 0x295   : > { %1281 = vmatpush.bf16.msra.mxu0 %v1169_v3  ;;  %1294 = vmatpush.bf16.msra.mxu1 %v1172_v16  ;;  %v569_v34 = vpop.permute.xlu2 %568 }
 0x296   : > { %1257 = vmatpush.bf16.msrb.mxu2 %v2614_v54  ;;  %1270 = vmatpush.bf16.msrb.mxu3 %v2618_v39  ;;  %v681_v14 = vpop.permute.xlu1 %680  ;;  %v575_v57 = vrot.slane %v569_v34, 4 }
 0x297   : > { %v687_v37 = vrot.slane %v681_v14, 4 }
 0x298   : > { %v585_v28 = vsel %vm473_vm3, %v574_v20, %v575_v57  ;;  %v2621_v20 = vld [vmem:[#allocation3 + $0xc0] sm:$0xf] }
 0x299   : > { %1282 = vmatpush.bf16.msra.mxu0 %v2662_v36  ;;  %1295 = vmatpush.bf16.msra.mxu1 %v2666_v6  ;;  %v697_v10 = vsel %vm473_vm3, %v686_v48, %v687_v37  ;;  %v586_v0 = vsel %vm577_vm7, %v567_v30, %v585_v28  ;;  %v2533_v42 = vld [vmem:[#allocation3 + $0x18] sm:$0xf]  ;;  %v2812_v21 = vld [vmem:[#allocation3 + $0x1c] sm:$0xf] }
 0x29a   : > { %v698_v55 = vsel %vm689_vm8, %v3370_v43, %v697_v10  ;;  %596 = vst [vmem:[#allocation3 + $0x70] sm:$0xff] %v586_v0  ;;  %v2573_v4 = vld [vmem:[#allocation3 + $0x68] sm:$0xf]  ;;  %v2822_v58 = vld [vmem:[#allocation3 + $0x6c] sm:$0xf]  ;;  %v2534_v31 = vor.u32 %v2817_v38, %v2533_v42  ;;  %v2538_v30 = vor.u32 %v2812_v21, %v2535_v11 }
 0x29b   : > { %708 = vst [vmem:[#allocation3 + $0xe8] sm:$0xff] %v698_v55  ;;  %v2574_v61 = vor.u32 %v2827_v27, %v2573_v4  ;;  %v2578_v25 = vor.u32 %v2822_v58, %v2575_v19 }
 0x29d   : > { %1258 = vmatpush.bf16.msrb.mxu2 %v2574_v61  ;;  %1271 = vmatpush.bf16.msrb.mxu3 %v2578_v25  ;;  %v518_v9 = vpop.permute.xlu2 %517 }
 0x29e   : > { %v466_v63 = vpop.permute.xlu1 %465  ;;  %v524_v48 = vrot.slane %v518_v9, 4 }
 0x29f   : > { %v472_v26 = vrot.slane %v466_v63, 4 }
 0x2a0   : > { %v534_v43 = vsel %vm473_vm3, %v523_v15, %v524_v48 }
 0x2a1   : > { %v483_v12 = vsel %vm473_vm3, %v471_v41, %v472_v26  ;;  %v535_v62 = vsel %vm526_vm11, %v3344_v13, %v534_v43  ;;  %1259 = vmatpush.bf16.msrb.mxu2 %v2534_v31  ;;  %1272 = vmatpush.bf16.msrb.mxu3 %v2538_v30  ;;  %v2581_v13 = vld [vmem:[#allocation3 + $0x70] sm:$0xf]  ;;  %v2823_v41 = vld [vmem:[#allocation3 + $0x74] sm:$0xf] }
 0x2a2   : > { %v484_v17 = vsel %vm475_vm9, %v3389_v59, %v483_v12  ;;  %545 = vst [vmem:[#allocation3 + $0x48] sm:$0xff] %v535_v62  ;;  %v2838_v52 = vld [vmem:[#allocation3 + $0xe4] sm:$0xf0]  ;;  %v2623_v3 = vld [vmem:[#allocation3 + $0xe8] sm:$0xf0]  ;;  %v2582_v60 = vor.u32 %v2828_v18, %v2581_v13  ;;  %v2586_v59 = vor.u32 %v2823_v41, %v2583_v44 }
 0x2a3   : > { %494 = vst [vmem:[#allocation3 + $0x20] sm:$0xff] %v484_v17  ;;  %v2622_v16 = vor.u32 %v2838_v52, %v2621_v20  ;;  %v2626_v15 = vor.u32 %v2833_v32, %v2623_v3 }
 0x2a4   : > { %2673 = vmatmul.msk.bf16.vlgmr.msrb.gmra.mxu2 %vm1139_vm12, %v3285_v53  ;;  %2674 = vmatmul.msk.bf16.vlgmr.msrb.gmra.mxu3 %vm1139_vm12, %v3285_v53 }
 0x2a5   : > { %1283 = vmatpush.bf16.msra.mxu0 %v2622_v16  ;;  %1296 = vmatpush.bf16.msra.mxu1 %v2626_v15 }
 0x2a9   : > { %1284 = vmatpush.bf16.msra.mxu0 %v2582_v60  ;;  %1297 = vmatpush.bf16.msra.mxu1 %v2586_v59  ;;  %v2818_v45 = vld [vmem:[#allocation3 + $0x44] sm:$0xf0]  ;;  %v2543_v47 = vld [vmem:[#allocation3 + $0x48] sm:$0xf0] }
 0x2aa   : > { %v2541_v2 = vld [vmem:[#allocation3 + $0x20] sm:$0xf]  ;;  %v2813_v5 = vld [vmem:[#allocation3 + $0x24] sm:$0xf] }
 0x2ab   : > { %v2542_v1 = vor.u32 %v2818_v45, %v2541_v2  ;;  %v2546_v7 = vor.u32 %v2813_v5, %v2543_v47 }
 0x2ad   : > { %1285 = vmatpush.bf16.msra.mxu0 %v2542_v1  ;;  %1298 = vmatpush.bf16.msra.mxu1 %v2546_v7 }
 0x2b0   : > { %2675 = vmatmul.msk.bf16.vlgmr.msra.gmra.mxu0 %vm1139_vm12, %v3285_v53  ;;  %2676 = vmatmul.msk.bf16.vlgmr.msra.gmra.mxu1 %vm1139_vm12, %v3285_v53 }
 0x2e8   : > { %v912_v57 = vpop.permute.xlu0 %911 }
 0x2ed   : > { %v1183_v49 = vpop.f32.mrf.mxu0  ;;  %v1196_v50 = vpop.f32.mrf.mxu1 }
 0x2ee   : > { %v1184_v37 = vadd.f32 %v1183_v49, %v912_v57  ;;  %v1197_v28 = vadd.f32 %v1196_v50, %v912_v57 }
 0x2f0   : > { %v1304_v19 = vmul.f32 %v1184_v37, %v2995_v22  ;;  %v1305_v55 = vmul.f32 %v1197_v28, %v2997_v23 }
 0x2f2   : > { %v1314_v4 = vsel %vm473_vm3, %v1304_v19, 0.0  ;;  %v1315_v58 = vsel %vm473_vm3, %v1305_v55, 0.0 }
 0x2f3   : > { %v1316_v21 = vadd.f32 %v1315_v58, %v1314_v4 }
 0x2f5   : > { %v1185_v54 = vpop.f32.mrf.mxu0  ;;  %v1198_v39 = vpop.f32.mrf.mxu1 }
 0x2ff   : > { %v1209_v36 = vpop.f32.mrf.mxu2  ;;  %v1222_v6 = vpop.f32.mrf.mxu3 }
 0x300   : > { %v1210_v27 = vadd.f32 %v1209_v36, %v912_v57  ;;  %v1223_v61 = vadd.f32 %v1222_v6, %v912_v57 }
 0x302   : > { %v1306_v53 = vmul.f32 %v1210_v27, %v2999_v24  ;;  %v1307_v63 = vmul.f32 %v1223_v61, %v3001_v29 }
 0x304   : > { %v1317_v9 = vsel %vm473_vm3, %v1306_v53, 0.0  ;;  %v1319_v11 = vsel %vm473_vm3, %v1307_v63, 0.0 }
 0x305   : > { %v1318_v38 = vadd.f32 %v1317_v9, %v1316_v21 }
 0x307   : > { %v1211_v34 = vpop.f32.mrf.mxu2  ;;  %v1224_v14 = vpop.f32.mrf.mxu3  ;;  %v1320_v30 = vadd.f32 %v1319_v11, %v1318_v38 }
 0x311   : > { %v1235_v10 = vpop.f32.mrf.mxu0  ;;  %v1248_v0 = vpop.f32.mrf.mxu1 }
 0x312   : > { %v1236_v48 = vadd.f32 %v1235_v10, %v912_v57  ;;  %v1249_v31 = vadd.f32 %v1248_v0, %v912_v57 }
 0x314   : > { %v1308_v26 = vmul.f32 %v1236_v48, %v3009_v33  ;;  %v1309_v12 = vmul.f32 %v1249_v31, %v3014_v35 }
 0x316   : > { %v1321_v43 = vsel %vm473_vm3, %v1308_v26, 0.0  ;;  %v1323_v17 = vsel %vm473_vm3, %v1309_v12, 0.0 }
 0x317   : > { %v1322_v62 = vadd.f32 %v1321_v43, %v1320_v30 }
 0x319   : > { %v1237_v25 = vpop.f32.mrf.mxu0  ;;  %v1250_v42 = vpop.f32.mrf.mxu1  ;;  %v1324_v15 = vadd.f32 %v1323_v17, %v1322_v62 }
 0x327   : > { %v1261_v20 = vpop.f32.mrf.mxu2  ;;  %v1274_v32 = vpop.f32.mrf.mxu3 }
 0x328   : > { %v1262_v52 = vadd.f32 %v1261_v20, %v912_v57  ;;  %v1275_v3 = vadd.f32 %v1274_v32, %v912_v57 }
 0x32a   : > { %v1310_v16 = vmul.f32 %v1262_v52, %v3023_v40  ;;  %v1311_v41 = vmul.f32 %v1275_v3, %v3033_v46 }
 0x32c   : > { %v1325_v13 = vsel %vm473_vm3, %v1310_v16, 0.0  ;;  %v1327_v5 = vsel %vm473_vm3, %v1311_v41, 0.0 }
 0x32d   : > { %v1326_v18 = vadd.f32 %v1325_v13, %v1324_v15  ;;  %v1287_v44 = vpop.f32.mrf.mxu0  ;;  %v1300_v60 = vpop.f32.mrf.mxu1 }
 0x32e   : > { %v1288_v59 = vadd.f32 %v1287_v44, %v912_v57  ;;  %v1301_v45 = vadd.f32 %v1300_v60, %v912_v57 }
 0x32f   : > { %v1263_v47 = vpop.f32.mrf.mxu2  ;;  %v1276_v2 = vpop.f32.mrf.mxu3  ;;  %v1328_v49 = vadd.f32 %v1327_v5, %v1326_v18 }
 0x330   : > { %v1312_v1 = vmul.f32 %v1288_v59, %v3040_v51  ;;  %v1313_v7 = vmul.f32 %v1301_v45, %v3047_v56 }
 0x332   : > { %v1329_v50 = vsel %vm473_vm3, %v1312_v1, 0.0  ;;  %v1331_v39 = vsel %vm473_vm3, %v1313_v7, 0.0 }
 0x333   : > { %v1330_v54 = vadd.f32 %v1329_v50, %v1328_v49 }
 0x335   : > { %v1289_v36 = vpop.f32.mrf.mxu0  ;;  %v1302_v6 = vpop.f32.mrf.mxu1  ;;  %v1332_v34 = vadd.f32 %v1331_v39, %v1330_v54 }
 0x337   : > { %1333 = vadd.xlane.f32.xlu1 %v1332_v34 }
 0x3aa   : > { %v1334_v14 = vpop.xlane.xlu1 %1333 }
 0x3ab   : > { %v1335_v57 = vmul.f32 0.0009765625, %v1334_v14 }
 0x3ad   : > { %v1336_v37 = vsub.f32 %v1304_v19, %v1335_v57  ;;  %v1337_v28 = vsub.f32 %v1305_v55, %v1335_v57  ;;  %v1338_v10 = vsub.f32 %v1306_v53, %v1335_v57  ;;  %v1339_v0 = vsub.f32 %v1307_v63, %v1335_v57 }
 0x3ae   : > { %v1340_v27 = vsub.f32 %v1308_v26, %v1335_v57  ;;  %v1341_v61 = vsub.f32 %v1309_v12, %v1335_v57  ;;  %v1342_v21 = vsub.f32 %v1310_v16, %v1335_v57  ;;  %v1343_v63 = vsub.f32 %v1311_v41, %v1335_v57 }
 0x3af   : > { %v3454_v4 = vmul.f32 %v1336_v37, %v2995_v22  ;;  %v3457_v58 = vmul.f32 %v1337_v28, %v2997_v23  ;;  %v3460_v25 = vmul.f32 %v1338_v10, %v2999_v24  ;;  %v3463_v42 = vmul.f32 %v1339_v0, %v3001_v29 }
 0x3b0   : > { %v3466_v19 = vmul.f32 %v1340_v27, %v3009_v33  ;;  %v1351_v48 = vmul.f32 %v1341_v61, %v3014_v35  ;;  %v1344_v30 = vsub.f32 %v1312_v1, %v1335_v57  ;;  %v1352_v43 = vmul.f32 %v1342_v21, %v3023_v40  ;;  %v1399_v61 = vld [vmem:[%s3875_s3] sm:$0xf] }
 0x3b1   : > { %v1356_v55 = vmul.f32 %v3454_v4, %v3454_v4  ;;  %v1357_v53 = vmul.f32 %v3457_v58, %v3457_v58  ;;  %v1358_v9 = vmul.f32 %v3460_v25, %v3460_v25  ;;  %v1359_v38 = vmul.f32 %v3463_v42, %v3463_v42 }
 0x3b2   : > { %v1360_v12 = vmul.f32 %v3466_v19, %v3466_v19  ;;  %v1345_v32 = vsub.f32 %v1313_v7, %v1335_v57  ;;  %v1353_v17 = vmul.f32 %v1343_v63, %v3033_v46  ;;  %v1361_v52 = vmul.f32 %v1351_v48, %v1351_v48 }
 0x3b3   : > { %v1366_v11 = vsel %vm473_vm3, %v1356_v55, 0.0  ;;  %v1367_v26 = vsel %vm473_vm3, %v1357_v53, 0.0  ;;  %v1369_v62 = vsel %vm473_vm3, %v1358_v9, 0.0  ;;  %v1371_v3 = vsel %vm473_vm3, %v1359_v38, 0.0 }
 0x3b4   : > { %v1368_v31 = vadd.f32 %v1367_v26, %v1366_v11  ;;  %v1354_v15 = vmul.f32 %v1344_v30, %v3040_v51  ;;  %v1362_v13 = vmul.f32 %v1352_v43, %v1352_v43  ;;  %v1373_v41 = vsel %vm473_vm3, %v1360_v12, 0.0 }
 0x3b5   : > { %v1355_v44 = vmul.f32 %v1345_v32, %v3047_v56  ;;  %v1363_v60 = vmul.f32 %v1353_v17, %v1353_v17  ;;  %v1375_v59 = vsel %vm473_vm3, %v1361_v52, 0.0 }
 0x3b6   : > { %v1370_v20 = vadd.f32 %v1369_v62, %v1368_v31  ;;  %v1364_v47 = vmul.f32 %v1354_v15, %v1354_v15  ;;  %v1377_v2 = vsel %vm473_vm3, %v1362_v13, 0.0 }
 0x3b7   : > { %v1365_v1 = vmul.f32 %v1355_v44, %v1355_v44  ;;  %v1379_v7 = vsel %vm473_vm3, %v1363_v60, 0.0 }
 0x3b8   : > { %v1372_v16 = vadd.f32 %v1371_v3, %v1370_v20  ;;  %v1381_v50 = vsel %vm473_vm3, %v1364_v47, 0.0 }
 0x3b9   : > { %v1383_v39 = vsel %vm473_vm3, %v1365_v1, 0.0 }
 0x3ba   : > { %v1374_v18 = vadd.f32 %v1373_v41, %v1372_v16 }
 0x3bc   : > { %v1376_v45 = vadd.f32 %v1375_v59, %v1374_v18 }
 0x3be   : > { %v1378_v5 = vadd.f32 %v1377_v2, %v1376_v45 }
 0x3c0   : > { %v1380_v49 = vadd.f32 %v1379_v7, %v1378_v5 }
 0x3c2   : > { %v1382_v54 = vadd.f32 %v1381_v50, %v1380_v49 }
 0x3c4   : > { %v1384_v36 = vadd.f32 %v1383_v39, %v1382_v54 }
 0x3c6   : > { %1385 = vadd.xlane.f32.xlu2 %v1384_v36 }
 0x439   : > { %v1386_v6 = vpop.xlane.xlu2 %1385 }
 0x43a   : > { %v1387_v34 = vmul.f32 0.0009765625, %v1386_v6 }
 0x43c   : > { %v1388_v14 = vadd.f32 1e-05, %v1387_v34 }
 0x43e   : > { %2906 = vrsqrt.f32 %v1388_v14  ;;  %vm1395_vm14 = vweird.f32 %v1388_v14 }
 0x444   : > { %v2907_v57 = vpop.eup %2906 }
 0x445   : > { %v1390_v37 = vmul.f32 %v2907_v57, %v1388_v14  ;;  %vm1396_vm13 = vweird.f32 %v2907_v57 }
 0x446   : > { %vm1397_vm15 = vmor %vm1395_vm14, %vm1396_vm13 }
 0x447   : > { %v1391_v28 = vmul.f32 %v2907_v57, %v1390_v37 }
 0x449   : > { %v1392_v10 = vmul.f32 0.5, %v1391_v28 }
 0x44b   : > { %v1393_v0 = vsub.f32 1.5, %v1392_v10 }
 0x44d   : > { %v1394_v27 = vmul.f32 %v2907_v57, %v1393_v0 }
 0x44f   : > { %v1398_v21 = vsel %vm1397_vm15, %v2907_v57, %v1394_v27 }
 0x450   : > { %v1400_v55 = vmul.f32 %v1399_v61, %v1398_v21 }
 0x452   : > { %1403 = vperm.xlu0 %2901, %v1400_v55  }
 0x45a   : > { %2902 = vset.pattern.permute.xlu0 %v2916_v8 }
 0x45b   : > { %1418 = vperm.xlu0 %2902, %v1399_v61  }
 0x4c4   : > { %v1404_v53 = vpop.permute.xlu0 %1403 }
 0x4c5   : > { %v1406_v9 = vmul.f32 %v1404_v53, %v3454_v4  ;;  %v1407_v63 = vmul.f32 %v1404_v53, %v3457_v58  ;;  %v1408_v38 = vmul.f32 %v1404_v53, %v3460_v25  ;;  %v1409_v11 = vmul.f32 %v1404_v53, %v3463_v42 }
 0x4c6   : > { %v1410_v26 = vmul.f32 %v1404_v53, %v3466_v19  ;;  %v1411_v31 = vmul.f32 %v1404_v53, %v1351_v48  ;;  %v1412_v30 = vmul.f32 %v1404_v53, %v1352_v43  ;;  %v1413_v12 = vmul.f32 %v1404_v53, %v1353_v17 }
 0x4c7   : > { %v1414_v62 = vmul.f32 %v1404_v53, %v1354_v15  ;;  %v1415_v20 = vmul.f32 %v1404_v53, %v1355_v44 }
 0x4cd   : > { %v1419_v32 = vpop.permute.xlu0 %1418 }
 0x4ce   : > { %v1421_v52 = vadd.f32 %v1419_v32, %v1406_v9  ;;  %v1422_v8 = vadd.f32 %v1419_v32, %v1407_v63  ;;  %v1423_v3 = vadd.f32 %v1419_v32, %v1408_v38  ;;  %v1424_v16 = vadd.f32 %v1419_v32, %v1409_v11 }
 0x4cf   : > { %v1425_v13 = vadd.f32 %v1419_v32, %v1410_v26  ;;  %v1426_v4 = vadd.f32 %v1419_v32, %v1411_v31  ;;  %v1427_v41 = vadd.f32 %v1419_v32, %v1412_v30  ;;  %v1428_v58 = vadd.f32 %v1419_v32, %v1413_v12 }
 0x4d0   : > { %v1429_v18 = vadd.f32 %v1419_v32, %v1414_v62  ;;  %v1430_v25 = vadd.f32 %v1419_v32, %v1415_v20  ;;  %v1431_v60 = vmax.f32 %v1421_v52, 0.0  ;;  %v1432_v42 = vmax.f32 %v1422_v8, 0.0 }
 0x4d1   : > { %v1433_v59 = vmax.f32 %v1423_v3, 0.0  ;;  %v1434_v19 = vmax.f32 %v1424_v16, 0.0  ;;  %v1435_v48 = vmax.f32 %v1425_v13, 0.0  ;;  %v1436_v43 = vmax.f32 %v1426_v4, 0.0 }
 0x4d2   : > { %v1437_v17 = vmax.f32 %v1427_v41, 0.0  ;;  %v1438_v15 = vmax.f32 %v1428_v58, 0.0  ;;  %v1439_v44 = vmax.f32 %v1429_v18, 0.0  ;;  %v1440_v45 = vmax.f32 %v1430_v25, 0.0 }
 0x4d3   : > { %v1441_v47 = vmul.f32 %v1431_v60, %v2995_v22  ;;  %v1442_v2 = vmul.f32 %v1432_v42, %v2997_v23  ;;  %v1443_v5 = vmul.f32 %v1433_v59, %v2999_v24  ;;  %v1444_v1 = vmul.f32 %v1434_v19, %v3001_v29 }
 0x4d4   : > { %v1445_v7 = vmul.f32 %v1435_v48, %v3009_v33  ;;  %v1446_v49 = vmul.f32 %v1436_v43, %v3014_v35  ;;  %v1447_v50 = vmul.f32 %v1437_v17, %v3023_v40  ;;  %v1448_v54 = vmul.f32 %v1438_v15, %v3033_v46 }
 0x4d5   : > { %v1449_v39 = vmul.f32 %v1439_v44, %v3040_v51  ;;  %v1450_v36 = vmul.f32 %v1440_v45, %v3047_v56  ;;  %v1453_v6 = vpack.c.bf16 %v1442_v2, %v1441_v47  ;;  %v1454_v34 = vpack.c.bf16 %v1444_v1, %v1443_v5 }
 0x4d6   : > { %v1455_v14 = vpack.c.bf16 %v1446_v49, %v1445_v7  ;;  %v1456_v57 = vpack.c.bf16 %v1448_v54, %v1447_v50 }
 0x4d7   : > { %v1457_v37 = vpack.c.bf16 %v1450_v36, %v1449_v39  ;;  %v1463_v28 = vrot.slane %v1453_v6, 2  ;;  %v1464_v10 = vrot.slane %v1454_v34, 4  ;;  %v1465_v0 = vrot.slane %v1454_v34, 6 }
 0x4d8   : > { %v1466_v27 = vrot.slane %v1455_v14, 2  ;;  %v1467_v61 = vrot.slane %v1456_v57, 4  ;;  %v1468_v21 = vrot.slane %v1456_v57, 6 }
 0x4d9   : > { %v1469_v55 = vrot.slane %v1457_v37, 2  ;;  %v1473_v53 = vsel %vm1470_vm0, %v1453_v6, %v1463_v28  ;;  %v1477_v9 = vsel %vm1474_vm1, %v1464_v10, %v1465_v0 }
 0x4da   : > { %v3514_v63 = vsel %vm473_vm3, %v1473_v53, %v1477_v9  ;;  %v1481_v38 = vsel %vm1470_vm0, %v1455_v14, %v1466_v27  ;;  %v1484_v11 = vsel %vm1474_vm1, %v1467_v61, %v1468_v21 }
 0x4db   : > { %v3518_v26 = vsel %vm473_vm3, %v1481_v38, %v1484_v11  ;;  %v1488_v31 = vsel %vm1470_vm0, %v1457_v37, %v1469_v55  ;;  %1492 = vst [vmem:[#allocation4 + $0x2] sm:$0xff] %v3514_v63 }
 0x4dc   : > { %1493 = vst [vmem:[#allocation4 + $0xa] sm:$0xff] %v3518_v26 }
 0x4dd   : > { %1494 = vst [vmem:[#allocation4 + $0x12] sm:$0xf] %v1488_v31 }
 0x4e2   : > { %v1495_v30 = vld [vmem:[#allocation4] sm:$0xff] }
 0x4e3   : > { %1499 = vst [vmem:[#allocation1] ss:$2 sm:$0xff] %v1495_v30  ;;  %v1496_v62 = vld [vmem:[#allocation4 + $0x8] sm:$0xff] }
 0x4e4   : > { %v1497_v12 = vld [vmem:[#allocation4 + $0x10] sm:$0x3f]  ;;  %1502 = vst [vmem:[#allocation1 + $0x10] ss:$2 sm:$0xff] %v1496_v62 }
 0x4e5   : > { %1505 = vst [vmem:[#allocation1 + $0x20] ss:$2 sm:$0xff] %v1497_v12  ;;  %v1558_v52 = vld [vmem:[#allocation4 + $0x10] sm:$0x3f] }
 0x4e6   : > { %v1620_v58 = vld [vmem:[#allocation4 + $0x10] sm:$0x3f] }
 0x4e7   : > { %v1681_v48 = vld [vmem:[#allocation4 + $0x10] sm:$0x3f] }
 0x4e8   : > { %v1743_v2 = vld [vmem:[#allocation4 + $0x12] sm:$0xf] }
 0x4e9   : > { %v1769_v34 = vld [vmem:[#allocation4 + $0x12] sm:$0x3f] }
 0x4ea   : > { %v1508_v20 = vld.sshfl [vmem:[#allocation1 + $0x8] sm:$0xff pattern:$0x75643120]  ;;  %v1506_v32 = vld.sshfl [vmem:[#allocation1] sm:$0xff pattern:$0x75643120] }
 0x4eb   : > { %1520 = vrot.lane.b32.xlu2 %v1508_v20, %s2923_s18  ;;  %1518 = vrot.lane.b32.xlu0 %v1506_v32, %s2923_s18  ;;  %1561 = vst [vmem:[#allocation1 + $0x1] ss:$2 sm:$0xff] %v1495_v30  ;;  %v1512_v16 = vld.sshfl [vmem:[#allocation1 + $0x18] sm:$0xff pattern:$0x75643120] }
 0x4ec   : > { %v3525_v8 = vld.sshfl [vmem:[#allocation1 + $0x20] sm:$0xff pattern:$0x75643120]  ;;  %v3527_v3 = vld.sshfl [vmem:[#allocation1 + $0x28] sm:$0xff pattern:$0x75643120]  ;;  %1524 = vrot.lane.b32.xlu1 %v1512_v16, %s2923_s18 }
 0x4ed   : > { %1567 = vst [vmem:[#allocation1 + $0x21] ss:$2 sm:$0xff] %v1558_v52  ;;  %v1510_v13 = vld.sshfl [vmem:[#allocation1 + $0x10] sm:$0xff pattern:$0x75643120] }
 0x4ee   : > { %1564 = vst [vmem:[#allocation1 + $0x11] ss:$2 sm:$0xff] %v1496_v62  ;;  %v1831_v0 = vld [vmem:[#allocation4 + $0x12] sm:$0x3f] }
 0x4ef   : > { %v1892_v9 = vld [vmem:[#allocation4 + $0x12] sm:$0x3f] }
 0x4f0   : > { %v1954_v20 = vld [vmem:[#allocation4 + $0x12] sm:$0x3f] }
 0x4f2   : > { %v1570_v4 = vld.sshfl [vmem:[#allocation1 + $0x8] sm:$0xff pattern:$0x75643120]  ;;  %v1568_v41 = vld.sshfl [vmem:[#allocation1] sm:$0xff pattern:$0x75643120] }
 0x4f3   : > { %1522 = vrot.lane.b32.xlu2 %v1510_v13, %s2923_s18  ;;  %1582 = vrot.lane.b32.xlu0 %v1570_v4, %s2925_s20  ;;  %1622 = vst [vmem:[#allocation1] ss:$2 sm:$0xff] %v1495_v30 }
 0x4f4   : > { %v3532_v18 = vld.sshfl [vmem:[#allocation1 + $0x20] sm:$0xff pattern:$0x75643120]  ;;  %v3534_v25 = vld.sshfl [vmem:[#allocation1 + $0x28] sm:$0xff pattern:$0x75643120]  ;;  %1580 = vrot.lane.b32.xlu1 %v1568_v41, %s2925_s20 }
 0x4f5   : > { %1628 = vst [vmem:[#allocation1 + $0x20] ss:$2 sm:$0xff] %v1620_v58  ;;  %v1574_v60 = vld.sshfl [vmem:[#allocation1 + $0x18] sm:$0xff pattern:$0x75643120] }
 0x4f6   : > { %v1572_v42 = vld.sshfl [vmem:[#allocation1 + $0x10] sm:$0xff pattern:$0x75643120] }
 0x4f7   : > { %1625 = vst [vmem:[#allocation1 + $0x10] ss:$2 sm:$0xff] %v1496_v62 }
 0x4fa   : > { %v1629_v59 = vld.sshfl [vmem:[#allocation1] sm:$0xff pattern:$0x75643120]  ;;  %v1631_v19 = vld.sshfl [vmem:[#allocation1 + $0x8] sm:$0xff pattern:$0x75643120] }
 0x4fb   : > { %1586 = vrot.lane.b32.xlu0 %v1574_v60, %s2925_s20  ;;  %1641 = vrot.lane.b32.xlu2 %v1629_v59, %s2921_s16  ;;  %1684 = vst [vmem:[#allocation1 + $0x1] ss:$2 sm:$0xff] %v1495_v30 }
 0x4fc   : > { %v3539_v43 = vld.sshfl [vmem:[#allocation1 + $0x20] sm:$0xff pattern:$0x75643120]  ;;  %v3541_v17 = vld.sshfl [vmem:[#allocation1 + $0x28] sm:$0xff pattern:$0x75643120]  ;;  %1584 = vrot.lane.b32.xlu1 %v1572_v42, %s2925_s20 }
 0x4fd   : > { %1690 = vst [vmem:[#allocation1 + $0x21] ss:$2 sm:$0xff] %v1681_v48 }
 0x4fe   : > { %v1633_v15 = vld.sshfl [vmem:[#allocation1 + $0x10] sm:$0xff pattern:$0x75643120]  ;;  %v3543_v44 = vld.sshfl [vmem:[#allocation1 + $0x18] sm:$0xff pattern:$0x75643120] }
 0x4ff   : > { %1687 = vst [vmem:[#allocation1 + $0x11] ss:$2 sm:$0xff] %v1496_v62 }
 0x502   : > { %v1693_v45 = vld.sshfl [vmem:[#allocation1 + $0x8] sm:$0xff pattern:$0x75643120]  ;;  %v1691_v47 = vld.sshfl [vmem:[#allocation1] sm:$0xff pattern:$0x75643120] }
 0x503   : > { %1645 = vrot.lane.b32.xlu0 %v1633_v15, %s2921_s16  ;;  %1705 = vrot.lane.b32.xlu2 %v1693_v45, %s2924_s19  ;;  %1745 = vst [vmem:[#allocation1] ss:$2 sm:$0xff] %v3514_v63 }
 0x504   : > { %v3549_v5 = vld.sshfl [vmem:[#allocation1 + $0x20] sm:$0xff pattern:$0x75643120]  ;;  %v3551_v1 = vld.sshfl [vmem:[#allocation1 + $0x28] sm:$0xff pattern:$0x75643120]  ;;  %1643 = vrot.lane.b32.xlu1 %v1631_v19, %s2921_s16 }
 0x505   : > { %1751 = vst [vmem:[#allocation1 + $0x20] ss:$2 sm:$0xff] %v1743_v2 }
 0x506   : > { %v1695_v7 = vld.sshfl [vmem:[#allocation1 + $0x10] sm:$0xff pattern:$0x75643120]  ;;  %v1697_v49 = vld.sshfl [vmem:[#allocation1 + $0x18] sm:$0xff pattern:$0x75643120] }
 0x507   : > { %1748 = vst [vmem:[#allocation1 + $0x10] ss:$2 sm:$0xff] %v3518_v26 }
 0x50a   : > { %v1752_v50 = vld.sshfl [vmem:[#allocation1] sm:$0xff pattern:$0x75643120]  ;;  %v1753_v54 = vld.sshfl [vmem:[#allocation1 + $0x8] sm:$0xff pattern:$0x75643120] }
 0x50b   : > { %1707 = vrot.lane.b32.xlu2 %v1695_v7, %s2924_s19  ;;  %1703 = vrot.lane.b32.xlu0 %v1691_v47, %s2924_s19  ;;  %1762 = vst [vmem:[#allocation5 + $0x50] sm:$0x33] %v1752_v50 }
 0x50c   : > { %1763 = vst [vmem:[#allocation5 + $0x58] sm:$0x33] %v1753_v54  ;;  %v1756_v6 = vld.sshfl [vmem:[#allocation1 + $0x20] sm:$0xff pattern:$0x75643120] }
 0x50d   : > { %1772 = vst [vmem:[#allocation1 + $0x1] ss:$2 sm:$0xff] %v3514_v63 }
 0x50e   : > { %v1754_v39 = vld.sshfl [vmem:[#allocation1 + $0x10] sm:$0xff pattern:$0x75643120]  ;;  %v1755_v36 = vld.sshfl [vmem:[#allocation1 + $0x18] sm:$0xff pattern:$0x75643120] }
 0x50f   : > { %1764 = vst [vmem:[#allocation5 + $0x60] sm:$0x33] %v1754_v39 }
 0x510   : > { %1765 = vst [vmem:[#allocation5 + $0x68] sm:$0x33] %v1755_v36 }
 0x511   : > { %1775 = vst [vmem:[#allocation1 + $0x11] ss:$2 sm:$0xff] %v3518_v26 }
 0x512   : > { %1778 = vst [vmem:[#allocation1 + $0x21] ss:$2 sm:$0xff] %v1769_v34 }
 0x513   : > { %1766 = vst [vmem:[#allocation5 + $0x70] sm:$0x33] %v1756_v6 }
 0x514   : > { %v1781_v14 = vld.sshfl [vmem:[#allocation1 + $0x8] sm:$0xff pattern:$0x75643120]  ;;  %v1779_v57 = vld.sshfl [vmem:[#allocation1] sm:$0xff pattern:$0x75643120] }
 0x515   : > { %1793 = vrot.lane.b32.xlu0 %v1781_v14, %s2922_s17  ;;  %1791 = vrot.lane.b32.xlu1 %v1779_v57, %s2922_s17  ;;  %1833 = vst [vmem:[#allocation1] ss:$2 sm:$0xff] %v3514_v63 }
 0x518   : > { %v1783_v37 = vld.sshfl [vmem:[#allocation1 + $0x10] sm:$0xff pattern:$0x75643120]  ;;  %v1785_v28 = vld.sshfl [vmem:[#allocation1 + $0x18] sm:$0xff pattern:$0x75643120] }
 0x519   : > { %1836 = vst [vmem:[#allocation1 + $0x10] ss:$2 sm:$0xff] %v3518_v26  ;;  %v1787_v10 = vld.sshfl [vmem:[#allocation1 + $0x20] sm:$0xff pattern:$0x75643120] }
 0x51a   : > { %v1789_v27 = vld.sshfl [vmem:[#allocation1 + $0x28] sm:$0xff pattern:$0x75643120] }
 0x51b   : > { %1839 = vst [vmem:[#allocation1 + $0x20] ss:$2 sm:$0xff] %v1831_v0 }
 0x51c   : > { %v1842_v61 = vld.sshfl [vmem:[#allocation1 + $0x8] sm:$0xff pattern:$0x75643120]  ;;  %v1840_v21 = vld.sshfl [vmem:[#allocation1] sm:$0xff pattern:$0x75643120] }
 0x51d   : > { %1795 = vrot.lane.b32.xlu0 %v1783_v37, %s2922_s17  ;;  %1797 = vrot.lane.b32.xlu1 %v1785_v28, %s2922_s17  ;;  %1895 = vst [vmem:[#allocation1 + $0x1] ss:$2 sm:$0xff] %v3514_v63 }
 0x520   : > { %v1844_v55 = vld.sshfl [vmem:[#allocation1 + $0x10] sm:$0xff pattern:$0x75643120]  ;;  %v1846_v53 = vld.sshfl [vmem:[#allocation1 + $0x18] sm:$0xff pattern:$0x75643120] }
 0x521   : > { %1856 = vrot.lane.b32.xlu2 %v1844_v55, %s2920_s15  ;;  %1898 = vst [vmem:[#allocation1 + $0x11] ss:$2 sm:$0xff] %v3518_v26 }
 0x522   : > { %v1848_v38 = vld.sshfl [vmem:[#allocation1 + $0x20] sm:$0xff pattern:$0x75643120]  ;;  %v1850_v11 = vld.sshfl [vmem:[#allocation1 + $0x28] sm:$0xff pattern:$0x75643120] }
 0x523   : > { %1901 = vst [vmem:[#allocation1 + $0x21] ss:$2 sm:$0xff] %v1892_v9 }
 0x524   : > { %v1904_v31 = vld.sshfl [vmem:[#allocation1 + $0x8] sm:$0xff pattern:$0x75643120]  ;;  %v1902_v30 = vld.sshfl [vmem:[#allocation1] sm:$0xff pattern:$0x75643120] }
 0x525   : > { %1852 = vrot.lane.b32.xlu0 %v1840_v21, %s2920_s15  ;;  %1916 = vrot.lane.b32.xlu1 %v1904_v31, %s2918_s13  ;;  %1956 = vst [vmem:[#allocation1] ss:$2 sm:$0xff] %v3514_v63 }
 0x528   : > { %v1906_v12 = vld.sshfl [vmem:[#allocation1 + $0x10] sm:$0xff pattern:$0x75643120]  ;;  %v1908_v62 = vld.sshfl [vmem:[#allocation1 + $0x18] sm:$0xff pattern:$0x75643120] }
 0x529   : > { %1914 = vrot.lane.b32.xlu2 %v1902_v30, %s2918_s13  ;;  %1959 = vst [vmem:[#allocation1 + $0x10] ss:$2 sm:$0xff] %v3518_v26 }
 0x52a   : > { %v1910_v32 = vld.sshfl [vmem:[#allocation1 + $0x20] sm:$0xff pattern:$0x75643120]  ;;  %v1912_v52 = vld.sshfl [vmem:[#allocation1 + $0x28] sm:$0xff pattern:$0x75643120] }
 0x52b   : > { %1962 = vst [vmem:[#allocation1 + $0x20] ss:$2 sm:$0xff] %v1954_v20 }
 0x52c   : > { %v1965_v63 = vld.sshfl [vmem:[#allocation1 + $0x8] sm:$0xff pattern:$0x75643120]  ;;  %v1963_v16 = vld.sshfl [vmem:[#allocation1] sm:$0xff pattern:$0x75643120] }
 0x52d   : > { %1854 = vrot.lane.b32.xlu0 %v1842_v61, %s2920_s15  ;;  %1918 = vrot.lane.b32.xlu1 %v1906_v12, %s2918_s13 }
 0x530   : > { %v1967_v26 = vld.sshfl [vmem:[#allocation1 + $0x10] sm:$0xff pattern:$0x75643120]  ;;  %v1969_v59 = vld.sshfl [vmem:[#allocation1 + $0x18] sm:$0xff pattern:$0x75643120] }
 0x531   : > { %1920 = vrot.lane.b32.xlu2 %v1908_v62, %s2918_s13 }
 0x532   : > { %v1973_v19 = vld.sshfl [vmem:[#allocation1 + $0x28] sm:$0xff pattern:$0x75643120] }
 0x535   : > { %1858 = vrot.lane.b32.xlu0 %v1846_v53, %s2920_s15  ;;  %1709 = vrot.lane.b32.xlu1 %v1697_v49, %s2924_s19 }
 0x539   : > { %1977 = vrot.lane.b32.xlu2 %v1965_v63, %s2919_s14 }
 0x53d   : > { %1860 = vrot.lane.b32.xlu1 %v1848_v38, %s2920_s15  ;;  %1975 = vrot.lane.b32.xlu0 %v1963_v16, %s2919_s14 }
 0x541   : > { %1647 = vrot.lane.b32.xlu2 %v3543_v44, %s2921_s16 }
 0x545   : > { %1979 = vrot.lane.b32.xlu1 %v1967_v26, %s2919_s14  ;;  %1922 = vrot.lane.b32.xlu0 %v1910_v32, %s2918_s13  ;;  %v1521_v13 = vpop.permute.xlu2 %1520 }
 0x546   : > { %v1531_v41 = vrot.slane %v1521_v13, 4 }
 0x549   : > { %1799 = vrot.lane.b32.xlu2 %v1787_v10, %s2922_s17 }
 0x54d   : > { %1526 = vrot.lane.b32.xlu1 %v3525_v8, %s2923_s18  ;;  %1588 = vrot.lane.b32.xlu0 %v3532_v18, %s2925_s20  ;;  %v1523_v4 = vpop.permute.xlu2 %1522 }
 0x54e   : > { %v1532_v58 = vrot.slane %v1523_v4, 4 }
 0x550   : > { %v1538_v60 = vsel %vm473_vm3, %v1531_v41, %v1532_v58 }
 0x551   : > { %1649 = vrot.lane.b32.xlu2 %v3539_v43, %s2921_s16  ;;  %v1539_v42 = vsel %vm475_vm9, %v1521_v13, %v1538_v60 }
 0x552   : > { %1552 = vst [vmem:[#allocation5 + $0x8] sm:$0x33] %v1539_v42 }
 0x555   : > { %1711 = vrot.lane.b32.xlu1 %v3549_v5, %s2924_s19  ;;  %1981 = vrot.lane.b32.xlu0 %v1969_v59, %s2919_s14  ;;  %v1642_v8 = vpop.permute.xlu2 %1641  ;;  %v1971_v5 = vld.sshfl [vmem:[#allocation1 + $0x20] sm:$0xff pattern:$0x75643120] }
 0x556   : > { %v1653_v38 = vrot.slane %v1642_v8, 4 }
 0x559   : > { %1985 = vrot.lane.b32.xlu2 %v1973_v19, %s2919_s14 }
 0x55d   : > { %1924 = vrot.lane.b32.xlu1 %v1912_v52, %s2918_s13  ;;  %1801 = vrot.lane.b32.xlu0 %v1789_v27, %s2922_s17  ;;  %v1519_v18 = vpop.permute.xlu0 %1518  ;;  %v1706_v48 = vpop.permute.xlu2 %1705  ;;  %s3849_s13 = scalar_lea.vmem %s3879_s7, %s2880_s10 }
 0x55e   : > { %v1530_v43 = vrot.slane %v1519_v18, 4  ;;  %v3602_v44 = vpop.permute.xlu1 %1524  ;;  %v1716_v54 = vrot.slane %v1706_v48, 4 }
 0x55f   : > { %v1533_v47 = vrot.slane %v3602_v44, 4 }
 0x560   : > { %v1536_v15 = vsel %vm473_vm3, %v1530_v43, %v1531_v41 }
 0x561   : > { %1862 = vrot.lane.b32.xlu2 %v1850_v11, %s2920_s15  ;;  %v1537_v45 = vsel %vm475_vm9, %v1519_v18, %v1536_v15  ;;  %v1540_v2 = vsel %vm473_vm3, %v1532_v58, %v1533_v47 }
 0x562   : > { %1551 = vst [vmem:[#allocation5] sm:$0x33] %v1537_v45  ;;  %v1541_v7 = vsel %vm475_vm9, %v1523_v4, %v1540_v2 }
 0x563   : > { %1553 = vst [vmem:[#allocation5 + $0x10] sm:$0x33] %v1541_v7  ;;  %v2014_v7 = vld [vmem:[%s2980_s29 + $0x8] sm:$0xff] }
 0x565   : > { %1651 = vrot.lane.b32.xlu1 %v3541_v17, %s2921_s16  ;;  %1983 = vrot.lane.b32.xlu0 %v1971_v5, %s2919_s14  ;;  %v1583_v49 = vpop.permute.xlu0 %1582  ;;  %v3613_v50 = vpop.permute.xlu2 %1707  ;;  %v2013_v5 = vld [vmem:[%s2980_s29] sm:$0xff] }
 0x566   : > { %v1717_v39 = vrot.slane %v3613_v50, 4  ;;  %v1593_v36 = vrot.slane %v1583_v49, 4  ;;  %v1581_v34 = vpop.permute.xlu1 %1580 }
 0x567   : > { %v1592_v14 = vrot.slane %v1581_v34, 4 }
 0x568   : > { %v1723_v6 = vsel %vm473_vm3, %v1716_v54, %v1717_v39 }
 0x569   : > { %1590 = vrot.lane.b32.xlu2 %v3534_v25, %s2925_s20  ;;  %v1724_v17 = vsel %vm628_vm10, %v1706_v48, %v1723_v6  ;;  %v1598_v57 = vsel %vm473_vm3, %v1592_v14, %v1593_v36 }
 0x56a   : > { %1737 = vst [vmem:[#allocation5 + $0x30] sm:$0xcc] %v1724_v17  ;;  %v1599_v37 = vsel %vm526_vm11, %v1581_v34, %v1598_v57 }
 0x56b   : > { %1613 = vst [vmem:[#allocation5] sm:$0xcc] %v1599_v37 }
 0x56d   : > { %1528 = vrot.lane.b32.xlu0 %v3527_v3, %s2923_s18  ;;  %v3626_v28 = vpop.permute.xlu0 %1586 }
 0x56e   : > { %v1595_v10 = vrot.slane %v3626_v28, 4  ;;  %v1585_v0 = vpop.permute.xlu1 %1584 }
 0x56f   : > { %v1594_v27 = vrot.slane %v1585_v0, 4 }
 0x571   : > { %v1600_v25 = vsel %vm473_vm3, %v1593_v36, %v1594_v27  ;;  %v1602_v61 = vsel %vm473_vm3, %v1594_v27, %v1595_v10  ;;  %v2015_v27 = vld [vmem:[%s2980_s29 + $0x10] sm:$0xff] }
 0x572   : > { %v1601_v21 = vsel %vm526_vm11, %v1583_v49, %v1600_v25  ;;  %v1603_v55 = vsel %vm526_vm11, %v1585_v0, %v1602_v61  ;;  %v2023_v49 = vpack.c.bf16 %v2014_v7, %v2013_v5  ;;  %v2016_v25 = vld [vmem:[%s2980_s29 + $0x18] sm:$0xff] }
 0x573   : > { %1614 = vst [vmem:[#allocation5 + $0x8] sm:$0xcc] %v1601_v21  ;;  %v2024_v21 = vpack.c.bf16 %v2016_v25, %v2015_v27 }
 0x574   : > { %1615 = vst [vmem:[#allocation5 + $0x10] sm:$0xcc] %v1603_v55 }
 0x575   : > { %1713 = vrot.lane.b32.xlu0 %v3551_v1, %s2924_s19  ;;  %v3637_v3 = vpop.permute.xlu0 %1645 }
 0x576   : > { %v1655_v53 = vrot.slane %v3637_v3, 4  ;;  %v1644_v9 = vpop.permute.xlu1 %1643 }
 0x577   : > { %v1654_v11 = vrot.slane %v1644_v9, 4 }
 0x579   : > { %v1659_v30 = vsel %vm473_vm3, %v1653_v38, %v1654_v11  ;;  %v1661_v12 = vsel %vm473_vm3, %v1654_v11, %v1655_v53 }
 0x57a   : > { %v1660_v62 = vsel %vm577_vm7, %v1642_v8, %v1659_v30  ;;  %v1662_v20 = vsel %vm577_vm7, %v1644_v9, %v1661_v12  ;;  %v2034_v9 = vrot.slane %v2024_v21, 6 }
 0x57b   : > { %v3640_v31 = vpop.permute.xlu2 %1856  ;;  %1674 = vst [vmem:[#allocation5 + $0x28] sm:$0x33] %v1660_v62 }
 0x57c   : > { %1675 = vst [vmem:[#allocation5 + $0x30] sm:$0x33] %v1662_v20  ;;  %v1866_v38 = vrot.slane %v3640_v31, 4 }
 0x57d   : > { %v1704_v1 = vpop.permute.xlu0 %1703  ;;  %2054 = vst [vmem:[#allocation5 + $0xa8] sm:$0xcc] %v2034_v9 }
 0x57e   : > { %v1715_v32 = vrot.slane %v1704_v1, 4 }
 0x580   : > { %v1721_v52 = vsel %vm473_vm3, %v1715_v32, %v1716_v54  ;;  %v2033_v54 = vrot.slane %v2023_v49, 6 }
 0x581   : > { %v1722_v63 = vsel %vm628_vm10, %v1704_v1, %v1721_v52  ;;  %v2039_v52 = vrot.slane %v2034_v9, 4 }
 0x582   : > { %1736 = vst [vmem:[#allocation5 + $0x28] sm:$0xcc] %v1722_v63  ;;  %v2038_v14 = vrot.slane %v2033_v54, 4 }
 0x583   : > { %v1915_v16 = vpop.permute.xlu2 %1914  ;;  %2053 = vst [vmem:[#allocation5 + $0xa0] sm:$0xcc] %v2033_v54  ;;  %v2017_v54 = vld [vmem:[%s2980_s29 + $0x20] sm:$0xff] }
 0x584   : > { %v1926_v34 = vrot.slane %v1915_v16, 4  ;;  %2058 = vst [vmem:[#allocation5 + $0xc8] sm:$0x33] %v2038_v14 }
 0x585   : > { %2059 = vst [vmem:[#allocation5 + $0xd0] sm:$0x33] %v2039_v52 }
 0x587   : > { %v1794_v26 = vpop.permute.xlu0 %1793  ;;  %v1792_v13 = vpop.permute.xlu1 %1791 }
 0x588   : > { %v1804_v4 = vrot.slane %v1794_v26, 4  ;;  %v1803_v41 = vrot.slane %v1792_v13, 4 }
 0x58a   : > { %v1809_v58 = vsel %vm473_vm3, %v1803_v41, %v1804_v4 }
 0x58b   : > { %v1810_v60 = vsel %vm689_vm8, %v1792_v13, %v1809_v58  ;;  %v3650_v42 = vpop.permute.xlu2 %1920  ;;  %v2761_v52 = vld [vmem:[#allocation5 + $0xc8] sm:$0x30] }
 0x58c   : > { %1824 = vst [vmem:[#allocation5 + $0x50] sm:$0xcc] %v1810_v60  ;;  %v1929_v11 = vrot.slane %v3650_v42, 4 }
 0x58f   : > { %v1796_v59 = vpop.permute.xlu0 %1795  ;;  %v1798_v8 = vpop.permute.xlu1 %1797 }
 0x590   : > { %v1805_v19 = vrot.slane %v1796_v59, 4  ;;  %v1806_v18 = vrot.slane %v1798_v8, 4 }
 0x592   : > { %v1811_v48 = vsel %vm473_vm3, %v1804_v4, %v1805_v19  ;;  %v1813_v43 = vsel %vm473_vm3, %v1805_v19, %v1806_v18 }
 0x593   : > { %v1812_v15 = vsel %vm689_vm8, %v1794_v26, %v1811_v48  ;;  %v1814_v45 = vsel %vm689_vm8, %v1796_v59, %v1813_v43  ;;  %v3656_v2 = vpop.permute.xlu2 %1977 }
 0x594   : > { %1825 = vst [vmem:[#allocation5 + $0x58] sm:$0xcc] %v1812_v15 }
 0x595   : > { %1826 = vst [vmem:[#allocation5 + $0x60] sm:$0xcc] %v1814_v45 }
 0x597   : > { %v1853_v36 = vpop.permute.xlu0 %1852  ;;  %v1917_v6 = vpop.permute.xlu1 %1916 }
 0x598   : > { %v1927_v17 = vrot.slane %v1917_v6, 4  ;;  %v1864_v20 = vrot.slane %v1853_v36, 4 }
 0x59a   : > { %v1932_v57 = vsel %vm473_vm3, %v1926_v34, %v1927_v17 }
 0x59b   : > { %v1933_v37 = vsel %vm791_vm6, %v1915_v16, %v1932_v57  ;;  %v1648_v0 = vpop.permute.xlu2 %1647 }
 0x59c   : > { %1947 = vst [vmem:[#allocation5 + $0x78] sm:$0xcc] %v1933_v37  ;;  %v1656_v61 = vrot.slane %v1648_v0, 4 }
 0x59e   : > { %v1663_v55 = vsel %vm473_vm3, %v1655_v53, %v1656_v61 }
 0x59f   : > { %v1664_v30 = vsel %vm577_vm7, %v3637_v3, %v1663_v55  ;;  %v1855_v12 = vpop.permute.xlu0 %1854  ;;  %v1919_v62 = vpop.permute.xlu1 %1918 }
 0x5a0   : > { %1676 = vst [vmem:[#allocation5 + $0x38] sm:$0x33] %v1664_v30  ;;  %v1865_v1 = vrot.slane %v1855_v12, 4  ;;  %v1928_v32 = vrot.slane %v1919_v62, 4 }
 0x5a2   : > { %v1870_v63 = vsel %vm473_vm3, %v1864_v20, %v1865_v1  ;;  %v1872_v53 = vsel %vm473_vm3, %v1865_v1, %v1866_v38  ;;  %v1934_v16 = vsel %vm473_vm3, %v1927_v17, %v1928_v32  ;;  %v1936_v26 = vsel %vm473_vm3, %v1928_v32, %v1929_v11  ;;  %v2874_v32 = vld [vmem:[#allocation5 + $0xc4] sm:$0x30] }
 0x5a3   : > { %v1871_v3 = vsel %vm740_vm5, %v1853_v36, %v1870_v63  ;;  %v1873_v13 = vsel %vm740_vm5, %v1855_v12, %v1872_v53  ;;  %v1935_v4 = vsel %vm791_vm6, %v1917_v6, %v1934_v16  ;;  %v3678_v41 = vpop.permute.xlu2 %1799  ;;  %v1937_v58 = vsel %vm791_vm6, %v1919_v62, %v1936_v26  ;;  %v2018_v6 = vld [vmem:[%s2980_s29 + $0x28] sm:$0xff]  ;;  %v2021_v26 = vld [vmem:[%s2980_s29 + $0x40] sm:$0xff] }
 0x5a4   : > { %1885 = vst [vmem:[#allocation5 + $0x78] sm:$0x33] %v1871_v3  ;;  %v1807_v60 = vrot.slane %v3678_v41, 4  ;;  %v2025_v34 = vpack.c.bf16 %v2018_v6, %v2017_v54  ;;  %v2022_v3 = vld [vmem:[%s2980_s29 + $0x48] sm:$0xff] }
 0x5a5   : > { %1886 = vst [vmem:[#allocation5 + $0x80] sm:$0x33] %v1873_v13  ;;  %v2019_v13 = vld [vmem:[%s2980_s29 + $0x30] sm:$0xff]  ;;  %v2719_v6 = vld [vmem:[#allocation5 + $0x50] sm:$0xf] }
 0x5a6   : > { %1948 = vst [vmem:[#allocation5 + $0x80] sm:$0xcc] %v1935_v4  ;;  %v1815_v59 = vsel %vm473_vm3, %v1806_v18, %v1807_v60  ;;  %v2035_v57 = vrot.slane %v2025_v34, 6 }
 0x5a7   : > { %1949 = vst [vmem:[#allocation5 + $0x88] sm:$0xcc] %v1937_v58  ;;  %v1816_v19 = vsel %vm689_vm8, %v1798_v8, %v1815_v59  ;;  %v1859_v48 = vpop.permute.xlu0 %1858  ;;  %v3686_v43 = vpop.permute.xlu1 %1709  ;;  %v2027_v59 = vpack.c.bf16 %v2022_v3, %v2021_v26  ;;  %v2681_v26 = vld [vmem:[#allocation5 + $0x28] sm:$0xf0] }
 0x5a8   : > { %1827 = vst [vmem:[#allocation5 + $0x68] sm:$0xcc] %v1816_v19  ;;  %v1867_v15 = vrot.slane %v1859_v48, 4  ;;  %v1718_v45 = vrot.slane %v3686_v43, 4  ;;  %v2040_v25 = vrot.slane %v2035_v57, 4  ;;  %v2020_v19 = vld [vmem:[%s2980_s29 + $0x38] sm:$0xff] }
 0x5a9   : > { %2055 = vst [vmem:[#allocation5 + $0xb0] sm:$0xcc] %v2035_v57 }
 0x5aa   : > { %v1874_v5 = vsel %vm473_vm3, %v1866_v38, %v1867_v15  ;;  %v1725_v7 = vsel %vm473_vm3, %v1717_v39, %v1718_v45  ;;  %2060 = vst [vmem:[#allocation5 + $0xd8] sm:$0x33] %v2040_v25  ;;  %v2769_v25 = vld [vmem:[#allocation5 + $0xd0] sm:$0x30] }
 0x5ab   : > { %v1875_v18 = vsel %vm740_vm5, %v3640_v31, %v1874_v5  ;;  %v1726_v8 = vsel %vm628_vm10, %v3613_v50, %v1725_v7  ;;  %v3699_v49 = vpop.permute.xlu2 %1649  ;;  %v1988_v50 = vrot.slane %v3656_v2, 4  ;;  %v2037_v7 = vrot.slane %v2027_v59, 6  ;;  %v2864_v34 = vld [vmem:[#allocation5 + $0x74] sm:$0xf0] }
 0x5ac   : > { %1887 = vst [vmem:[#allocation5 + $0x88] sm:$0x33] %v1875_v18  ;;  %v1657_v36 = vrot.slane %v3699_v49, 4 }
 0x5ad   : > { %1738 = vst [vmem:[#allocation5 + $0x38] sm:$0xcc] %v1726_v8 }
 0x5ae   : > { %v1665_v17 = vsel %vm473_vm3, %v1656_v61, %v1657_v36  ;;  %2057 = vst [vmem:[#allocation5 + $0xc0] sm:$0xcc] %v2037_v7 }
 0x5af   : > { %v1666_v39 = vsel %vm577_vm7, %v1648_v0, %v1665_v17  ;;  %v1861_v14 = vpop.permute.xlu1 %1860  ;;  %v1976_v31 = vpop.permute.xlu0 %1975  ;;  %v2721_v17 = vld [vmem:[#allocation5 + $0x78] sm:$0xf0] }
 0x5b0   : > { %1677 = vst [vmem:[#allocation5 + $0x40] sm:$0x33] %v1666_v39  ;;  %v1868_v37 = vrot.slane %v1861_v14, 4  ;;  %v1987_v27 = vrot.slane %v1976_v31, 4 }
 0x5b2   : > { %v1876_v21 = vsel %vm473_vm3, %v1867_v15, %v1868_v37  ;;  %v1993_v55 = vsel %vm473_vm3, %v1987_v27, %v1988_v50  ;;  %v2026_v15 = vpack.c.bf16 %v2020_v19, %v2019_v13  ;;  %v2854_v27 = vld [vmem:[#allocation5 + $0x24] sm:$0xf0]  ;;  %v2679_v13 = vld [vmem:[#allocation5] sm:$0xf] }
 0x5b3   : > { %v1877_v9 = vsel %vm740_vm5, %v1859_v48, %v1876_v21  ;;  %v3712_v38 = vpop.permute.xlu2 %1985  ;;  %v1994_v0 = vsel %vm842_vm4, %v1976_v31, %v1993_v55 }
 0x5b4   : > { %1888 = vst [vmem:[#allocation5 + $0x90] sm:$0x33] %v1877_v9  ;;  %v2036_v39 = vrot.slane %v2026_v15, 6  ;;  %v2720_v9 = vor.u32 %v2864_v34, %v2719_v6  ;;  %v2727_v34 = vld [vmem:[#allocation5 + $0x58] sm:$0xf] }
 0x5b5   : > { %2008 = vst [vmem:[#allocation5 + $0xa0] sm:$0x33] %v1994_v0  ;;  %v2859_v0 = vld [vmem:[#allocation5 + $0x54] sm:$0xf] }
 0x5b6   : > { %2056 = vst [vmem:[#allocation5 + $0xb8] sm:$0xcc] %v2036_v39 }
 0x5b7   : > { %v3715_v61 = vpop.permute.xlu1 %1979  ;;  %v3717_v30 = vpop.permute.xlu0 %1922 }
 0x5b8   : > { %v1989_v12 = vrot.slane %v3715_v61, 4  ;;  %v1930_v62 = vrot.slane %v3717_v30, 4 }
 0x5ba   : > { %v1995_v20 = vsel %vm473_vm3, %v1988_v50, %v1989_v12  ;;  %v1938_v1 = vsel %vm473_vm3, %v1929_v11, %v1930_v62 }
 0x5bb   : > { %v1996_v63 = vsel %vm842_vm4, %v3656_v2, %v1995_v20  ;;  %v1863_v53 = vpop.permute.xlu2 %1862  ;;  %v1939_v16 = vsel %vm791_vm6, %v3650_v42, %v1938_v1  ;;  %v2041_v20 = vrot.slane %v2036_v39, 4 }
 0x5bc   : > { %2009 = vst [vmem:[#allocation5 + $0xa8] sm:$0x33] %v1996_v63  ;;  %v1869_v4 = vrot.slane %v1863_v53, 4  ;;  %v2759_v58 = vld [vmem:[#allocation5 + $0xa0] sm:$0xf]  ;;  %v2724_v63 = vor.u32 %v2859_v0, %v2721_v17 }
 0x5bd   : > { %1950 = vst [vmem:[#allocation5 + $0x90] sm:$0xcc] %v1939_v16  ;;  %v2760_v11 = vor.u32 %v2874_v32, %v2759_v58  ;;  %v2869_v48 = vld [vmem:[#allocation5 + $0xa4] sm:$0xf] }
 0x5be   : > { %v1878_v5 = vsel %vm473_vm3, %v1868_v37, %v1869_v4  ;;  %v2764_v2 = vor.u32 %v2869_v48, %v2761_v52  ;;  %v2042_v37 = vrot.slane %v2037_v7, 4  ;;  %v2849_v58 = vld [vmem:[#allocation5 + $0x4] sm:$0xf]  ;;  %2061 = vst [vmem:[#allocation5 + $0xe0] sm:$0x33] %v2041_v20 }
 0x5bf   : > { %v1879_v18 = vsel %vm740_vm5, %v1861_v14, %v1878_v5  ;;  %v3739_v42 = vpop.permute.xlu1 %1526  ;;  %v2246_v8 = vsel %vm2244_vm2, %v2760_v11, 0  ;;  %v1589_v54 = vpop.permute.xlu0 %1588  ;;  %v2875_v14 = vld [vmem:[#allocation5 + $0xcc] sm:$0x30]  ;;  %v2684_v48 = vor.u32 %v2849_v58, %v2681_v26  ;;  %v2865_v5 = vld [vmem:[#allocation5 + $0x7c] sm:$0xf0]  ;;  %vm2240_vm5 = vcmask 359424  }
 0x5c0   : > { %1889 = vst [vmem:[#allocation5 + $0x98] sm:$0x33] %v1879_v18  ;;  %v1534_v31 = vrot.slane %v3739_v42, 4  ;;  %2280 = vmatpush.bf16.msra.mxu2 %v2246_v8  ;;  %v2249_v57 = vsel %vm2244_vm2, %v2764_v2, 0  ;;  %v1596_v50 = vrot.slane %v1589_v54, 4 }
 0x5c1   : > { %2293 = vmatpush.bf16.msra.mxu3 %v2249_v57  ;;  %2062 = vst [vmem:[#allocation5 + $0xe8] sm:$0x33] %v2042_v37  ;;  %v3767_v2 = vld [vmem:[%s3878_s6] sm:$0x3]  ;;  %v2729_v8 = vld [vmem:[#allocation5 + $0x80] sm:$0xf0]  ;;  %v2728_v57 = vor.u32 %v2865_v5, %v2727_v34 }
 0x5c2   : > { %v1542_v21 = vsel %vm473_vm3, %v1533_v47, %v1534_v31  ;;  %v1604_v55 = vsel %vm473_vm3, %v1595_v10, %v1596_v50  ;;  %v2735_v58 = vld [vmem:[#allocation5 + $0x60] sm:$0xf] }
 0x5c3   : > { %v1543_v1 = vsel %vm475_vm9, %v3602_v44, %v1542_v21  ;;  %v1591_v32 = vpop.permute.xlu2 %1590  ;;  %v1605_v52 = vsel %vm526_vm11, %v3626_v28, %v1604_v55  ;;  %v2767_v53 = vld [vmem:[#allocation5 + $0xa8] sm:$0xf]  ;;  %v2870_v16 = vld [vmem:[#allocation5 + $0xac] sm:$0xf]  ;;  %v2680_v44 = vor.u32 %v2854_v27, %v2679_v13 }
 0x5c4   : > { %1554 = vst [vmem:[#allocation5 + $0x18] sm:$0x33] %v1543_v1  ;;  %v1597_v47 = vrot.slane %v1591_v32, 4  ;;  %2281 = vmatpush.bf16.msra.mxu2 %v2720_v9  ;;  %v2768_v10 = vor.u32 %v2875_v14, %v2767_v53  ;;  %v2772_v3 = vor.u32 %v2870_v16, %v2769_v25  ;;  %v2687_v27 = vld [vmem:[#allocation5 + $0x8] sm:$0xf] }
 0x5c5   : > { %1616 = vst [vmem:[#allocation5 + $0x18] sm:$0xcc] %v1605_v52  ;;  %2294 = vmatpush.bf16.msra.mxu3 %v2724_v63  ;;  %v2876_v1 = vld [vmem:[#allocation5 + $0xd4] sm:$0x30]  ;;  %v2777_v32 = vld [vmem:[#allocation5 + $0xd8] sm:$0x30] }
 0x5c6   : > { %v1606_v4 = vsel %vm473_vm3, %v1596_v50, %v1597_v47  ;;  %v2252_v59 = vsel %vm2244_vm2, %v2768_v10, 0  ;;  %v2255_v15 = vsel %vm2244_vm2, %v2772_v3, 0  ;;  %v2860_v50 = vld [vmem:[#allocation5 + $0x5c] sm:$0xf] }
 0x5c7   : > { %v1607_v28 = vsel %vm526_vm11, %v1589_v54, %v1606_v4  ;;  %v3759_v19 = vpop.permute.xlu1 %1711  ;;  %v3761_v11 = vpop.permute.xlu0 %1981  ;;  %v2732_v37 = vor.u32 %v2860_v50, %v2729_v8  ;;  %v2737_v4 = vld [vmem:[#allocation5 + $0x88] sm:$0xf0] }
 0x5c8   : > { %1617 = vst [vmem:[#allocation5 + $0x20] sm:$0xcc] %v1607_v28  ;;  %v1719_v7 = vrot.slane %v3759_v19, 4  ;;  %v1990_v18 = vrot.slane %v3761_v11, 4  ;;  %2282 = vmatpush.bf16.msra.mxu2 %v2680_v44  ;;  %v1992_v44 = vrot.slane %v3712_v38, 4 }
 0x5c9   : > { %2295 = vmatpush.bf16.msra.mxu3 %v2684_v48  ;;  %v2861_v28 = vld [vmem:[#allocation5 + $0x64] sm:$0xf]  ;;  %v2094_v48 = vld [vmem:[%s3876_s4] sm:$0xf] }
 0x5ca   : > { %v1727_v54 = vsel %vm473_vm3, %v1718_v45, %v1719_v7  ;;  %v1997_v6 = vsel %vm473_vm3, %v1989_v12, %v1990_v18  ;;  %v2855_v45 = vld [vmem:[#allocation5 + $0x2c] sm:$0xf0]  ;;  %v2689_v12 = vld [vmem:[#allocation5 + $0x30] sm:$0xf0]  ;;  %v2740_v38 = vor.u32 %v2861_v28, %v2737_v4  ;;  %2097 = vperm.xlu2 %2903, %v2094_v48  }
 0x5cb   : > { %v1728_v17 = vsel %vm628_vm10, %v3686_v43, %v1727_v54  ;;  %v1998_v39 = vsel %vm842_vm4, %v3715_v61, %v1997_v6  ;;  %2797 = vmatmul.msk.bf16.vlgmr.msra.gmra.mxu2 %vm2240_vm5, %v3767_v2  ;;  %v2688_v25 = vor.u32 %v2855_v45, %v2687_v27  ;;  %v2850_v61 = vld [vmem:[#allocation5 + $0xc] sm:$0xf]  ;;  %v2877_v45 = vld [vmem:[#allocation5 + $0xdc] sm:$0x30] }
 0x5cc   : > { %2306 = vmatpush.bf16.msrb.mxu2 %v2252_v59  ;;  %1739 = vst [vmem:[#allocation5 + $0x40] sm:$0xcc] %v1728_v17  ;;  %2798 = vmatmul.msk.bf16.vlgmr.msra.gmra.mxu3 %vm2240_vm5, %v3767_v2  ;;  %v2692_v9 = vor.u32 %v2850_v61, %v2689_v12  ;;  %v2856_v17 = vld [vmem:[#allocation5 + $0x34] sm:$0xf0]  ;;  %v2785_v12 = vld [vmem:[#allocation5 + $0xe0] sm:$0x30] }
 0x5cd   : > { %2319 = vmatpush.bf16.msrb.mxu3 %v2255_v15  ;;  %2010 = vst [vmem:[#allocation5 + $0xb0] sm:$0x33] %v1998_v39  ;;  %v2697_v39 = vld [vmem:[#allocation5 + $0x38] sm:$0xf0] }
 0x5cf   : > { %v1925_v43 = vpop.permute.xlu1 %1924  ;;  %v1802_v14 = vpop.permute.xlu0 %1801 }
 0x5d0   : > { %2307 = vmatpush.bf16.msrb.mxu2 %v2728_v57  ;;  %v1931_v21 = vrot.slane %v1925_v43, 4  ;;  %v1808_v55 = vrot.slane %v1802_v14, 4  ;;  %v2878_v43 = vld [vmem:[#allocation5 + $0xe4] sm:$0x30]  ;;  %v2793_v14 = vld [vmem:[#allocation5 + $0xe8] sm:$0x30] }
 0x5d1   : > { %2320 = vmatpush.bf16.msrb.mxu3 %v2732_v37 }
 0x5d2   : > { %v1940_v0 = vsel %vm473_vm3, %v1930_v62, %v1931_v21  ;;  %v1817_v20 = vsel %vm473_vm3, %v1807_v60, %v1808_v55  ;;  %v2866_v62 = vld [vmem:[#allocation5 + $0x84] sm:$0xf0] }
 0x5d3   : > { %v1941_v52 = vsel %vm791_vm6, %v3717_v30, %v1940_v0  ;;  %v1818_v63 = vsel %vm689_vm8, %v3678_v41, %v1817_v20  ;;  %v2736_v59 = vor.u32 %v2866_v62, %v2735_v58  ;;  %v2857_v28 = vld [vmem:[#allocation5 + $0x3c] sm:$0xf0]  ;;  %v2705_v48 = vld [vmem:[#allocation5 + $0x40] sm:$0xf0] }
 0x5d4   : > { %2308 = vmatpush.bf16.msrb.mxu2 %v2688_v25  ;;  %1951 = vst [vmem:[#allocation5 + $0x98] sm:$0xcc] %v1941_v52  ;;  %v2775_v53 = vld [vmem:[#allocation5 + $0xb0] sm:$0xf]  ;;  %v2871_v16 = vld [vmem:[#allocation5 + $0xb4] sm:$0xf] }
 0x5d5   : > { %2321 = vmatpush.bf16.msrb.mxu3 %v2692_v9  ;;  %1828 = vst [vmem:[#allocation5 + $0x70] sm:$0xcc] %v1818_v63  ;;  %v2776_v47 = vor.u32 %v2876_v1, %v2775_v53  ;;  %v2780_v26 = vor.u32 %v2871_v16, %v2777_v32  ;;  %v2867_v1 = vld [vmem:[#allocation5 + $0x8c] sm:$0xf0]  ;;  %v2745_v32 = vld [vmem:[#allocation5 + $0x90] sm:$0xf0] }
 0x5d7   : > { %v1652_v10 = vpop.permute.xlu1 %1651  ;;  %v2258_v3 = vsel %vm2244_vm2, %v2776_v47, 0  ;;  %v2261_v60 = vsel %vm2244_vm2, %v2780_v26, 0  ;;  %v1984_v13 = vpop.permute.xlu0 %1983 }
 0x5d8   : > { %v1658_v30 = vrot.slane %v1652_v10, 4  ;;  %2332 = vmatpush.bf16.msrb.mxu0 %v2258_v3  ;;  %2345 = vmatpush.bf16.msrb.mxu1 %v2261_v60  ;;  %v1991_v41 = vrot.slane %v1984_v13, 4  ;;  %v2743_v60 = vld [vmem:[#allocation5 + $0x68] sm:$0xf] }
 0x5da   : > { %v1667_v15 = vsel %vm473_vm3, %v1657_v36, %v1658_v30  ;;  %v1999_v5 = vsel %vm473_vm3, %v1990_v18, %v1991_v41  ;;  %v2001_v8 = vsel %vm473_vm3, %v1991_v41, %v1992_v44  ;;  %v2695_v36 = vld [vmem:[#allocation5 + $0x10] sm:$0xf]  ;;  %v2851_v18 = vld [vmem:[#allocation5 + $0x14] sm:$0xf]  ;;  %v2744_v44 = vor.u32 %v2867_v1, %v2743_v60 }
 0x5db   : > { %v1668_v54 = vsel %vm577_vm7, %v3699_v49, %v1667_v15  ;;  %v2000_v6 = vsel %vm842_vm4, %v3761_v11, %v1999_v5  ;;  %v2002_v34 = vsel %vm842_vm4, %v1984_v13, %v2001_v8  ;;  %2799 = vmatmul.msk.bf16.vlgmr.msrb.gmra.mxu2 %vm2240_vm5, %v3767_v2  ;;  %v2696_v49 = vor.u32 %v2856_v17, %v2695_v36  ;;  %v2753_v47 = vld [vmem:[#allocation5 + $0x98] sm:$0xf0]  ;;  %v2862_v13 = vld [vmem:[#allocation5 + $0x6c] sm:$0xf]  ;;  %v2703_v15 = vld [vmem:[#allocation5 + $0x18] sm:$0xf] }
 0x5dc   : > { %1678 = vst [vmem:[#allocation5 + $0x48] sm:$0x33] %v1668_v54  ;;  %2333 = vmatpush.bf16.msrb.mxu0 %v2736_v59  ;;  %2346 = vmatpush.bf16.msrb.mxu1 %v2740_v38  ;;  %v2700_v57 = vor.u32 %v2851_v18, %v2697_v39  ;;  %v2751_v16 = vld [vmem:[#allocation5 + $0x70] sm:$0xf]  ;;  %v2863_v3 = vld [vmem:[#allocation5 + $0x74] sm:$0xf]  ;;  %v2748_v30 = vor.u32 %v2862_v13, %v2745_v32 }
 0x5dd   : > { %2011 = vst [vmem:[#allocation5 + $0xb8] sm:$0x33] %v2000_v6  ;;  %2800 = vmatmul.msk.bf16.vlgmr.msrb.gmra.mxu3 %vm2240_vm5, %v3767_v2  ;;  %v2756_v59 = vor.u32 %v2863_v3, %v2753_v47  ;;  %v2852_v5 = vld [vmem:[#allocation5 + $0x1c] sm:$0xf]  ;;  %v2704_v8 = vor.u32 %v2857_v28, %v2703_v15 }
 0x5de   : > { %2012 = vst [vmem:[#allocation5 + $0xc0] sm:$0x33] %v2002_v34  ;;  %v2708_v38 = vor.u32 %v2852_v5, %v2705_v48 }
 0x5df   : > { %v1529_v11 = vpop.permute.xlu0 %1528 }
 0x5e0   : > { %2334 = vmatpush.bf16.msrb.mxu0 %v2696_v49  ;;  %2347 = vmatpush.bf16.msrb.mxu1 %v2700_v57  ;;  %v1535_v50 = vrot.slane %v1529_v11, 4 }
 0x5e2   : > { %v1544_v37 = vsel %vm473_vm3, %v1534_v31, %v1535_v50 }
 0x5e3   : > { %v1545_v27 = vsel %vm475_vm9, %v3739_v42, %v1544_v37  ;;  %2801 = vmatmul.msk.bf16.vlgmr.msrb.gmra.mxu0 %vm2240_vm5, %v3767_v2  ;;  %2802 = vmatmul.msk.bf16.vlgmr.msrb.gmra.mxu1 %vm2240_vm5, %v3767_v2  ;;  %v2868_v42 = vld [vmem:[#allocation5 + $0x94] sm:$0xf0] }
 0x5e4   : > { %1555 = vst [vmem:[#allocation5 + $0x20] sm:$0x33] %v1545_v27  ;;  %v2783_v25 = vld [vmem:[#allocation5 + $0xb8] sm:$0xf]  ;;  %v2872_v61 = vld [vmem:[#allocation5 + $0xbc] sm:$0xf]  ;;  %v2752_v58 = vor.u32 %v2868_v42, %v2751_v16 }
 0x5e5   : > { %v2791_v21 = vld [vmem:[#allocation5 + $0xc0] sm:$0xf]  ;;  %v2873_v55 = vld [vmem:[#allocation5 + $0xc4] sm:$0xf]  ;;  %v2784_v9 = vor.u32 %v2877_v45, %v2783_v25  ;;  %v2788_v31 = vor.u32 %v2872_v61, %v2785_v12 }
 0x5e6   : > { %v2792_v0 = vor.u32 %v2878_v43, %v2791_v21  ;;  %v2796_v20 = vor.u32 %v2873_v55, %v2793_v14 }
 0x5e7   : > { %v1714_v52 = vpop.permute.xlu0 %1713  ;;  %v2264_v63 = vsel %vm2244_vm2, %v2784_v9, 0  ;;  %v2267_v53 = vsel %vm2244_vm2, %v2788_v31, 0 }
 0x5e8   : > { %v2270_v26 = vsel %vm2244_vm2, %v2792_v0, 0  ;;  %v2273_v62 = vsel %vm2244_vm2, %v2796_v20, 0  ;;  %v1720_v10 = vrot.slane %v1714_v52, 4  ;;  %2358 = vmatpush.bf16.msra.mxu2 %v2264_v63  ;;  %2371 = vmatpush.bf16.msra.mxu3 %v2267_v53 }
 0x5e9   : > { %2384 = vmatpush.bf16.msra.mxu0 %v2270_v26  ;;  %2397 = vmatpush.bf16.msra.mxu1 %v2273_v62 }
 0x5ea   : > { %v1729_v4 = vsel %vm473_vm3, %v1719_v7, %v1720_v10 }
 0x5eb   : > { %v1730_v41 = vsel %vm628_vm10, %v3759_v19, %v1729_v4  ;;  %v2711_v7 = vld [vmem:[#allocation5 + $0x20] sm:$0xf]  ;;  %v2853_v54 = vld [vmem:[#allocation5 + $0x24] sm:$0xf] }
 0x5ec   : > { %1740 = vst [vmem:[#allocation5 + $0x48] sm:$0xcc] %v1730_v41  ;;  %2359 = vmatpush.bf16.msra.mxu2 %v2744_v44  ;;  %2372 = vmatpush.bf16.msra.mxu3 %v2748_v30 }
 0x5ed   : > { %2385 = vmatpush.bf16.msra.mxu0 %v2752_v58  ;;  %2398 = vmatpush.bf16.msra.mxu1 %v2756_v59 }
 0x5f0   : > { %2360 = vmatpush.bf16.msra.mxu2 %v2704_v8  ;;  %2373 = vmatpush.bf16.msra.mxu3 %v2708_v38 }
 0x5f3   : > { %2803 = vmatmul.msk.bf16.vlgmr.msra.gmra.mxu2 %vm2240_vm5, %v3767_v2  ;;  %2804 = vmatmul.msk.bf16.vlgmr.msra.gmra.mxu3 %vm2240_vm5, %v3767_v2  ;;  %v2858_v19 = vld [vmem:[#allocation5 + $0x44] sm:$0xf0]  ;;  %v2713_v6 = vld [vmem:[#allocation5 + $0x48] sm:$0xf0] }
 0x5f4   : > { %v2712_v34 = vor.u32 %v2858_v19, %v2711_v7  ;;  %v2716_v17 = vor.u32 %v2853_v54, %v2713_v6 }
 0x5f6   : > { %2386 = vmatpush.bf16.msra.mxu0 %v2712_v34  ;;  %2399 = vmatpush.bf16.msra.mxu1 %v2716_v17 }
 0x5f9   : > { %2805 = vmatmul.msk.bf16.vlgmr.msra.gmra.mxu0 %vm2240_vm5, %v3767_v2  ;;  %2806 = vmatmul.msk.bf16.vlgmr.msra.gmra.mxu1 %vm2240_vm5, %v3767_v2 }
 0x624   : > { %v2098_v39 = vpop.permute.xlu2 %2097 }
 0x64e   : > { %v2284_v36 = vpop.f32.mrf.mxu2 }
 0x64f   : > { %v2297_v18 = vpop.f32.mrf.mxu3  ;;  %v2285_v49 = vadd.f32 %v2284_v36, %v2098_v39 }
 0x650   : > { %v2298_v57 = vadd.f32 %v2297_v18, %v2098_v39 }
 0x651   : > { %v2405_v50 = vmul.f32 %v2285_v49, %v2995_v22 }
 0x652   : > { %v2406_v11 = vmul.f32 %v2298_v57, %v2997_v23 }
 0x654   : > { %v2425_v37 = vrot.slane %v2406_v11, 4 }
 0x656   : > { %v2286_v45 = vpop.f32.mrf.mxu2  ;;  %v2430_v2 = vsel %vm473_vm3, %v2405_v50, %v2425_v37 }
 0x657   : > { %v2299_v12 = vpop.f32.mrf.mxu3  ;;  %2440 = vst [vmem:[%s3849_s13] sm:$0xff] %v2430_v2 }
 0x65e   : > { %v2310_v27 = vpop.f32.mrf.mxu2 }
 0x65f   : > { %v2311_v43 = vadd.f32 %v2310_v27, %v2098_v39 }
 0x660   : > { %v2323_v14 = vpop.f32.mrf.mxu3  ;;  %v2336_v25 = vpop.f32.mrf.mxu0 }
 0x661   : > { %v2324_v23 = vadd.f32 %v2323_v14, %v2098_v39  ;;  %v2337_v22 = vadd.f32 %v2336_v25, %v2098_v39  ;;  %v2349_v61 = vpop.f32.mrf.mxu1  ;;  %v2407_v55 = vmul.f32 %v2311_v43, %v2999_v24 }
 0x662   : > { %v2350_v21 = vadd.f32 %v2349_v61, %v2098_v39 }
 0x663   : > { %v2408_v9 = vmul.f32 %v2324_v23, %v3001_v29  ;;  %v2409_v31 = vmul.f32 %v2337_v22, %v3009_v33 }
 0x664   : > { %v2410_v0 = vmul.f32 %v2350_v21, %v3014_v35 }
 0x665   : > { %v2426_v20 = vrot.slane %v2408_v9, 4 }
 0x666   : > { %v2427_v1 = vrot.slane %v2410_v0, 4  ;;  %v2312_v32 = vpop.f32.mrf.mxu2 }
 0x667   : > { %v2431_v42 = vsel %vm473_vm3, %v2407_v55, %v2426_v20 }
 0x668   : > { %2441 = vst [vmem:[%s3849_s13 + $0x8] sm:$0xff] %v2431_v42  ;;  %v2432_v52 = vsel %vm473_vm3, %v2409_v31, %v2427_v1  ;;  %v2325_v63 = vpop.f32.mrf.mxu3  ;;  %v2338_v53 = vpop.f32.mrf.mxu0 }
 0x669   : > { %2442 = vst [vmem:[%s3849_s13 + $0x10] sm:$0xff] %v2432_v52  ;;  %v2351_v16 = vpop.f32.mrf.mxu1 }
 0x676   : > { %v2362_v24 = vpop.f32.mrf.mxu2  ;;  %v2375_v47 = vpop.f32.mrf.mxu3 }
 0x677   : > { %v2363_v29 = vadd.f32 %v2362_v24, %v2098_v39  ;;  %v2376_v26 = vadd.f32 %v2375_v47, %v2098_v39  ;;  %v2388_v33 = vpop.f32.mrf.mxu0  ;;  %v2401_v35 = vpop.f32.mrf.mxu1 }
 0x678   : > { %v2389_v62 = vadd.f32 %v2388_v33, %v2098_v39  ;;  %v2402_v10 = vadd.f32 %v2401_v35, %v2098_v39 }
 0x679   : > { %v2411_v3 = vmul.f32 %v2363_v29, %v3023_v40  ;;  %v2412_v60 = vmul.f32 %v2376_v26, %v3033_v46 }
 0x67a   : > { %v2414_v13 = vmul.f32 %v2402_v10, %v3047_v56  ;;  %v2413_v44 = vmul.f32 %v2389_v62, %v3040_v51 }
 0x67b   : > { %v2428_v4 = vrot.slane %v2412_v60, 4 }
 0x67c   : > { %v2429_v30 = vrot.slane %v2414_v13, 4 }
 0x67d   : > { %v2433_v41 = vsel %vm473_vm3, %v2411_v3, %v2428_v4 }
 0x67e   : > { %2443 = vst [vmem:[%s3849_s13 + $0x18] sm:$0xff] %v2433_v41  ;;  %v2434_v58 = vsel %vm473_vm3, %v2413_v44, %v2429_v30  ;;  %v2364_v59 = vpop.f32.mrf.mxu2  ;;  %v2377_v28 = vpop.f32.mrf.mxu3 }
 0x67f   : > { %2444 = vst [vmem:[%s3849_s13 + $0x20] sm:$0xff] %v2434_v58  ;;  %v2390_v48 = vpop.f32.mrf.mxu0  ;;  %v2403_v15 = vpop.f32.mrf.mxu1 }
 0x680 PF: > { %s17_s24 = sadd.s32 1, %s2914_s24  }
 0x681   : > { %p14_p4 = scmp.ge.s32.totalorder %s17_s24, 4  }
 0x683   :  { %16 = sbr.rel (!%p14_p4) target bundleno = 1 (0x1), region = 100 }

</bundles_post_ra>
